<compile_context>
chip_gen: v7x
topology: tpu7x:2x2x1
jax: 0.10.0
libtpu: 0.0.40
codegen_flags: <defaults>
</compile_context>

<pallas_src>
import math
import numpy as np
import jax
import jax.numpy as jnp
from jax import lax
from jax.experimental import pallas as pl
from jax.experimental.pallas import tpu as pltpu

# ----------------------------- config (small demo sizes) ---------------------
HIDDEN_S = 32        # hidden_features (scalar channels)
HIDDEN_V = 8         # hidden_features_v (multivector channels)
NUM_LAYERS = 2
K_NN = 4             # num_nearest_neighbors
NUM_TOKENS = 20
IN_FEATURES = 1
OUT_FEATURES = 1

ROW_TILE = 512       # rows per grid step (feedback: 512+ reaches ~85% of HBM roofline)
LN_EPS = 1e-5        # torch nn.LayerNorm default eps
MV_EPS = 1e-6        # MVLayerNorm EPS
GELU_C = math.sqrt(2.0 / math.pi)
BF16 = jnp.bfloat16

# ------------------- Cl(3,0,0) geometric-product blade table -----------------
_BLADES = [(), (1,), (2,), (3,), (1, 2), (1, 3), (2, 3), (1, 2, 3)]
_BLADE_IDX = {b: i for i, b in enumerate(_BLADES)}


def _blade_mul(a, b):
    lst = list(a) + list(b)
    sign = 1
    changed = True
    while changed:                      # bubble sort, counting swaps
        changed = False
        for t in range(len(lst) - 1):
            if lst[t] > lst[t + 1]:
                lst[t], lst[t + 1] = lst[t + 1], lst[t]
                sign = -sign
                changed = True
    out = []
    t = 0
    while t < len(lst):                 # e_i^2 = +1 for metric (1, 1, 1)
        if t + 1 < len(lst) and lst[t] == lst[t + 1]:
            t += 2
        else:
            out.append(lst[t])
            t += 1
    return _BLADE_IDX[tuple(out)], sign


GP_TABLE = {(i, k): _blade_mul(_BLADES[i], _BLADES[k])
            for i in range(8) for k in range(8)}


# ----------------------- constant matrices (host precomputed) ----------------
def _pool8_np(c):                 # (c*8, c): sum over the 8 blades of a channel
    m = np.zeros((c * 8, c), np.float32)
    for i in range(c):
        m[i * 8:(i + 1) * 8, i] = 1.0
    return m


def _rep8_np(c):                  # (c, c*8): broadcast a per-channel scalar to all blades
    return _pool8_np(c).T.copy()


def _sel0_np(c):                  # (c*8, c): extract blade 0 of each channel
    m = np.zeros((c * 8, c), np.float32)
    for i in range(c):
        m[i * 8, i] = 1.0
    return m


def _exp0_np(c):                  # (c, c*8): scatter a per-channel scalar into blade 0
    return _sel0_np(c).T.copy()


def _mask0_np(c):                 # (1, c*8): zero on blade-0 lanes, one elsewhere
    m = np.ones((1, c * 8), np.float32)
    for i in range(c):
        m[0, i * 8] = 0.0
    return m


def _gp_mats_np(c):
    """Matrix form of the Cl(3,0,0) geometric product for c channels:
       gp(left, right) = ((left @ B) * (right @ P)) @ G, all lane-dense matmuls."""
    c8 = c * 8
    B = np.zeros((c8, 8 * c8), np.float32)
    P = np.zeros((c8, 8 * c8), np.float32)
    G = np.zeros((8 * c8, c8), np.float32)
    for i in range(8):
        base = i * c8
        for ch in range(c):
            for j in range(8):
                B[ch * 8 + i, base + ch * 8 + j] = 1.0
            for k in range(8):
                j, sgn = GP_TABLE[(i, k)]
                P[ch * 8 + k, base + ch * 8 + j] = float(sgn)
        for m in range(c8):
            G[base + m, m] = 1.0
    return B, P, G


_EYE8 = np.eye(8, dtype=np.float32)


def _kron8(w):
    """MVLinear (subspaces=False) channel-mix as a flat matmul: (out,in) -> (in*8, out*8)."""
    return jnp.kron(w.T, jnp.asarray(_EYE8))


def _blade0_bias(b):
    """MVLinear bias lands on the grade-0 blade: (out,) -> (1, out*8)."""
    out = b.shape[0]
    z = jnp.zeros((out, 8), jnp.float32).at[:, 0].set(b)
    return z.reshape(1, out * 8)


# ------------------------------- kernel helpers -------------------------------
def _mm(x, w):
    """MXU matmul with bf16 operands and f32 accumulation."""
    return jnp.dot(x.astype(BF16), w.astype(BF16), preferred_element_type=jnp.float32)


def _row_tiling(n, tile=ROW_TILE):
    r8 = max(8, ((n + 7) // 8) * 8)
    if r8 <= tile:
        return r8, r8                     # single grid step
    rp = ((n + tile - 1) // tile) * tile
    return rp, tile


def _pad_rows(x, rows_p):
    pad = rows_p - x.shape[0]
    if pad == 0:
        return x
    return jnp.concatenate([x, jnp.zeros((pad, x.shape[1]), x.dtype)], axis=0)


# ------------------------ in-kernel (traced) CVP blocks ------------------------
def _cvp_linear_values(s, v, w, *, h, vector_gate, relu_act):
    """CVPLinear: dot-product invariants + channel mixes. Pure function of VMEM values."""
    if vector_gate:
        (W_vstack, b_vstack, W_dotf, W_ws_s, W_ws_v, b_ws, W_wv, b_wv,
         W_wsv, b_wsv, rep8) = w
    else:
        (W_vstack, b_vstack, W_dotf, W_ws_s, W_ws_v, b_ws, W_wv, b_wv) = w
    h8 = h * 8
    # dot_left / dot_right / wh stacked into a single matmul (shared input v)
    vproj = _mm(v, W_vstack) + b_vstack
    left = vproj[:, :h8]
    right = vproj[:, h8:2 * h8]
    vh = vproj[:, 2 * h8:3 * h8]
    # extended bilinear form (all +1 for metric (1,1,1)) folded with linear_out
    vn = _mm(left * right, W_dotf)
    s_pre = _mm(s, W_ws_s) + _mm(vn, W_ws_v) + b_ws
    v_out = _mm(vh, W_wv) + b_wv
    if vector_gate:
        gate = _mm(jax.nn.sigmoid(s_pre), W_wsv) + b_wsv          # vector_act = sigmoid
        v_out = v_out * _mm(jax.nn.sigmoid(gate), rep8)           # per-channel gate -> all blades
    s_out = jax.nn.relu(s_pre) if relu_act else s_pre
    return s_out, v_out


def _cvp_gp_values(s, v, w, *, h):
    """CVPGeometricProductLayer (incl. its internal MVLayerNorm and MVGELU)."""
    (W_gpstack, b_gpstack, B_all, P_all, G_sum, W_gpout, b_gpout, a_gp,
     pool8, sel0, rep8, W_wv2, b_wv2, W_s2v_v, W_s2v_s, b_s2v, mask0, exp0) = w
    h8 = h * 8
    proj = _mm(v, W_gpstack) + b_gpstack                          # gp_left | gp_right stacked
    left = proj[:, :h8]
    right = proj[:, h8:]
    # geometric product in matrix form: fully lane-dense, no per-blade slices
    v_gp = _mm(_mm(left, B_all) * _mm(right, P_all), G_sum)
    v_gp = _mm(v_gp, W_gpout) + b_gpout
    # MVLayerNorm (gp_prod.vec_norm)
    q = _mm(v_gp * v_gp, pool8)
    norm = jnp.sqrt(jnp.sqrt(q * q + 1e-16))
    mean_norm = jnp.mean(norm, axis=-1, keepdims=True) + MV_EPS
    v_gp = v_gp * (a_gp / mean_norm)
    v2 = v_gp + v                                                 # residual
    # MVGELU gate from blade-0 per channel
    s0 = _mm(v2, sel0)
    gate = jax.nn.sigmoid(GELU_C * (2.0 * (s0 + 0.044715 * s0 * s0 * s0)))
    v2 = v2 * _mm(gate, rep8)
    v3 = _mm(v2, W_wv2) + b_wv2
    # scalar = s2v(cat([v3[...,0], s])), written back into blade 0
    scalar = _mm(v3, W_s2v_v) + _mm(s, W_s2v_s) + b_s2v
    v_out = v3 * mask0 + _mm(scalar, exp0)
    return s, v_out


def _cvp_ln_values(s, v, w):
    """CVPLayerNorm: scalar LayerNorm + MVLayerNorm (per-row only -> padding safe)."""
    gamma, beta, a_ln, pool8 = w
    mu = jnp.mean(s, axis=-1, keepdims=True)
    var = jnp.mean((s - mu) ** 2, axis=-1, keepdims=True)
    s_out = (s - mu) * lax.rsqrt(var + LN_EPS) * gamma + beta
    q = _mm(v * v, pool8)
    norm = jnp.sqrt(jnp.sqrt(q * q + 1e-16))
    mean_norm = jnp.mean(norm, axis=-1, keepdims=True) + MV_EPS
    v_out = v * (a_ln / mean_norm)
    return s_out, v_out


# --------------------------- fused block pallas wrapper ------------------------
def apply_cvp_block(block, s, v):
    """One pallas_call running CVPLinear [-> CVPGeometricProduct -> CVPLayerNorm]."""
    cfg = block['cfg']
    weights = list(block['lin'])
    n_lin = len(weights)
    n_gp = 0
    if block['gp'] is not None:
        weights += list(block['gp'])
        n_gp = len(block['gp'])
        weights += list(block['ln'])
    n_w = len(weights)
    so, vo = cfg['so'], cfg['vo']

    n_rows = s.shape[0]
    rows_p, tile = _row_tiling(n_rows)
    s_p = _pad_rows(s, rows_p)
    v_p = _pad_rows(v, rows_p)

    def kernel(*refs):
        s_ref, v_ref = refs[0], refs[1]
        w = [r[...] for r in refs[2:2 + n_w]]
        s_out_ref, v_out_ref = refs[2 + n_w], refs[3 + n_w]
        ss, vv = _cvp_linear_values(s_ref[...], v_ref[...], w[:n_lin],
                                    h=cfg['h_lin'],
                                    vector_gate=cfg['vector_gate'],
                                    relu_act=cfg['relu'])
        if n_gp:
            ss, vv = _cvp_gp_values(ss, vv, w[n_lin:n_lin + n_gp], h=cfg['h_gp'])
            ss, vv = _cvp_ln_values(ss, vv, w[n_lin + n_gp:])
        s_out_ref[...] = ss
        v_out_ref[...] = vv

    grid = (rows_p // tile,)
    in_specs = [pl.BlockSpec((tile, s_p.shape[1]), lambda i: (i, 0)),
                pl.BlockSpec((tile, v_p.shape[1]), lambda i: (i, 0))]
    in_specs += [pl.BlockSpec(w.shape, lambda i: (0, 0)) for w in weights]
    out_specs = (pl.BlockSpec((tile, so), lambda i: (i, 0)),
                 pl.BlockSpec((tile, vo * 8), lambda i: (i, 0)))
    out_shape = (jax.ShapeDtypeStruct((rows_p, so), jnp.float32),
                 jax.ShapeDtypeStruct((rows_p, vo * 8), jnp.float32))

    s_out, v_out = pl.pallas_call(
        kernel,
        grid=grid,
        in_specs=in_specs,
        out_specs=out_specs,
        out_shape=out_shape,
        compiler_params=pltpu.CompilerParams(dimension_semantics=("parallel",)),
    )(s_p, v_p, *weights)
    return s_out[:n_rows], v_out[:n_rows]


def _linear_kernel(x_ref, w_ref, b_ref, o_ref):
    o_ref[...] = _mm(x_ref[...], w_ref[...]) + b_ref[...]


def pallas_linear(x, w, b):
    """y = x @ w + b  (w already (K, O), e.g. a kron-expanded MVLinear weight)."""
    n, k = x.shape
    o = w.shape[1]
    rows_p, tile = _row_tiling(n)
    xp = _pad_rows(x, rows_p)
    y = pl.pallas_call(
        _linear_kernel,
        grid=(rows_p // tile,),
        in_specs=[pl.BlockSpec((tile, k), lambda i: (i, 0)),
                  pl.BlockSpec((k, o), lambda i: (0, 0)),
                  pl.BlockSpec((1, o), lambda i: (0, 0))],
        out_specs=pl.BlockSpec((tile, o), lambda i: (i, 0)),
        out_shape=jax.ShapeDtypeStruct((rows_p, o), jnp.float32),
        compiler_params=pltpu.CompilerParams(dimension_semantics=("parallel",)),
    )(xp, w, b)
    return y[:n]


# -------------------------- parameters (init + packing) -----------------------
class ParamRNG:
    def __init__(self, key):
        self._key = key

    def next(self):
        self._key, sub = jax.random.split(self._key)
        return sub


def init_linear(rng, in_f, out_f, bias=True):
    w = jax.random.normal(rng.next(), (out_f, in_f), jnp.float32) / math.sqrt(in_f)
    b = (jax.random.normal(rng.next(), (out_f,), jnp.float32) * 0.01) if bias else None
    return {'w': w, 'b': b}


def init_mvlinear(rng, in_f, out_f):
    w = jax.random.normal(rng.next(), (out_f, in_f), jnp.float32) / math.sqrt(in_f)
    b = jax.random.normal(rng.next(), (out_f,), jnp.float32) * 0.01
    return {'w': w, 'b': b}


def init_cvp_linear_block(rng, in_dims, out_dims, vector_gate, relu_act):
    si, vi = in_dims
    so, vo = out_dims
    h = max(vi, vo)
    dl = init_mvlinear(rng, vi, h)          # dot_prod.linear_left
    dr = init_mvlinear(rng, vi, h)          # dot_prod.linear_right
    do = init_linear(rng, h, h, bias=False)  # dot_prod.linear_out
    wh = init_mvlinear(rng, vi, h)
    ws = init_linear(rng, h + si, so)
    wv = init_mvlinear(rng, h, vo)
    lin = [
        jnp.concatenate([_kron8(dl['w']), _kron8(dr['w']), _kron8(wh['w'])],
                        axis=1).astype(BF16),                         # W_vstack (vi*8, 3h*8)
        jnp.concatenate([_blade0_bias(dl['b']), _blade0_bias(dr['b']),
                         _blade0_bias(wh['b'])], axis=1),             # b_vstack
        (jnp.asarray(_pool8_np(h)) @ do['w'].T).astype(BF16),         # pool-over-blades folded w/ dot_out
        ws['w'].T[:si].astype(BF16),                                  # W_ws (s part)
        ws['w'].T[si:].astype(BF16),                                  # W_ws (vn part)
        ws['b'].reshape(1, so),
        _kron8(wv['w']).astype(BF16),                                 # W_wv (h*8, vo*8)
        _blade0_bias(wv['b']),
    ]
    if vector_gate:
        wsv = init_linear(rng, so, vo)
        lin += [wsv['w'].T.astype(BF16), wsv['b'].reshape(1, vo),
                jnp.asarray(_rep8_np(vo)).astype(BF16)]
    cfg = dict(so=so, vo=vo, h_lin=h, vector_gate=vector_gate, relu=relu_act)
    return lin, cfg


def init_cvp_gp_block(rng, in_dims, out_dims):
    si, vi = in_dims
    so, vo = out_dims
    h = max(vi, vo)
    assert vi == vo == h, "CVPGeometricProductLayer here assumes vi == vo == h_dim"
    gl = init_mvlinear(rng, vi, h)          # gp_prod.linear_left
    gr = init_mvlinear(rng, vi, h)          # gp_prod.linear_right
    go = init_mvlinear(rng, h, vo)          # gp_prod.linear_out
    wv = init_mvlinear(rng, h, vo)
    s2v = init_linear(rng, si + h, vo)
    B, P, G = _gp_mats_np(h)
    sel0 = jnp.asarray(_sel0_np(vo))
    gp = [
        jnp.concatenate([_kron8(gl['w']), _kron8(gr['w'])], axis=1).astype(BF16),
        jnp.concatenate([_blade0_bias(gl['b']), _blade0_bias(gr['b'])], axis=1),
        jnp.asarray(B).astype(BF16), jnp.asarray(P).astype(BF16), jnp.asarray(G).astype(BF16),
        _kron8(go['w']).astype(BF16), _blade0_bias(go['b']),
        jnp.ones((1, vo * 8), jnp.float32),                           # gp vec_norm weight (per-blade)
        jnp.asarray(_pool8_np(vo)).astype(BF16),
        sel0.astype(BF16),
        jnp.asarray(_rep8_np(vo)).astype(BF16),
        _kron8(wv['w']).astype(BF16), _blade0_bias(wv['b']),
        (sel0 @ s2v['w'].T[:vo]).astype(BF16),                        # blade0-extract folded with s2v
        s2v['w'].T[vo:].astype(BF16),
        s2v['b'].reshape(1, vo),
        jnp.asarray(_mask0_np(vo)),
        jnp.asarray(_exp0_np(vo)).astype(BF16),
    ]
    return gp, dict(h_gp=h)


def init_cvp_ln_block(dims):
    so, vo = dims
    return [jnp.ones((1, so), jnp.float32), jnp.zeros((1, so), jnp.float32),
            jnp.ones((1, vo * 8), jnp.float32),
            jnp.asarray(_pool8_np(vo)).astype(BF16)]


def init_mpnn(rng, hv, hs):
    e_lin, e_cfg = init_cvp_linear_block(rng, (2 * hs + 1, 2 * hv), (hs, hv),
                                         vector_gate=True, relu_act=True)
    e_gp, e_gcfg = init_cvp_gp_block(rng, (hs, hv), (hs, hv))
    e_ln = init_cvp_ln_block((hs, hv))
    n_lin, n_cfg = init_cvp_linear_block(rng, (2 * hs, 2 * hv), (hs, hv),
                                         vector_gate=True, relu_act=True)
    n_gp, n_gcfg = init_cvp_gp_block(rng, (hs, hv), (hs, hv))
    n_ln = init_cvp_ln_block((hs, hv))
    return {'edge': {'lin': e_lin, 'gp': e_gp, 'ln': e_ln, 'cfg': {**e_cfg, **e_gcfg}},
            'node': {'lin': n_lin, 'gp': n_gp, 'ln': n_ln, 'cfg': {**n_cfg, **n_gcfg}}}


def init_cvp(rng, in_features=IN_FEATURES, hidden_features=HIDDEN_S,
             hidden_features_v=HIDDEN_V, out_features=OUT_FEATURES,
             num_layers=NUM_LAYERS, num_tokens=NUM_TOKENS):
    p = {}
    fe = init_mvlinear(rng, in_features, hidden_features_v)
    p['feature_embedding'] = {'w': _kron8(fe['w']).astype(BF16), 'b': _blade0_bias(fe['b'])}
    p['aa_embedding'] = jax.random.normal(
        rng.next(), (num_tokens, hidden_features), jnp.float32) * 0.02
    # NOTE: inv_feature_embedding exists in the torch module but is unused in forward.
    p['layers'] = [init_mpnn(rng, hidden_features_v, hidden_features)
                   for _ in range(num_layers)]
    proj_lin, proj_cfg = init_cvp_linear_block(
        rng, (hidden_features, hidden_features_v), (out_features, out_features),
        vector_gate=False, relu_act=False)
    p['projection'] = {'lin': proj_lin, 'gp': None, 'ln': None, 'cfg': proj_cfg}
    return p


# ---------------------------------- graph glue ---------------------------------
def knn_graph(x, k, batch):
    """Per-batch kNN with self-loops; edges: [0]=source neighbor, [1]=target."""
    # TODO(synk): for large N, tile the O(N^2) distance/top-k over rows in a Pallas kernel.
    n = x.shape[0]
    d2 = jnp.sum((x[:, None, :] - x[None, :, :]) ** 2, axis=-1)
    same = batch[:, None] == batch[None, :]
    d2 = jnp.where(same, d2, jnp.inf)
    _, nbr = lax.top_k(-d2, k)
    src = nbr.reshape(-1)
    dst = jnp.repeat(jnp.arange(n), k)
    return jnp.stack([src, dst], axis=0)


def featurization(p, seqs, coords, batch_idx, num_graphs):
    s = p['aa_embedding'][seqs]
    n = coords.shape[0]
    cnt = jax.ops.segment_sum(jnp.ones((n,), jnp.float32), batch_idx,
                              num_segments=num_graphs)
    coords_mean = (jax.ops.segment_sum(coords, batch_idx, num_segments=num_graphs)
                   / cnt[:, None])[batch_idx]
    ci = coords - coords_mean
    mv = jnp.zeros((n, 8), jnp.float32).at[:, 1:4].set(ci)        # grade-1 embedding, 1 channel
    v = pallas_linear(mv, p['feature_embedding']['w'], p['feature_embedding']['b'])
    return s, v, coords_mean


def apply_mpnn(layer, s, v, positions, edge_index):
    src, dst = edge_index[0], edge_index[1]
    s_in = jnp.concatenate([s[dst], s[src], (positions[src] - positions[dst])[:, None]],
                           axis=-1)
    v_in = jnp.concatenate([v[dst], v[src]], axis=-1)             # channel concat (flat layout)
    ms, mv = apply_cvp_block(layer['edge'], s_in, v_in)
    # aggregate: global_add_pool over target node / sqrt(num_messages)
    n = s.shape[0]
    num_msgs = jax.ops.segment_sum(jnp.ones((dst.shape[0],), jnp.float32), dst,
                                   num_segments=n)
    inv = 1.0 / jnp.sqrt(jnp.maximum(num_msgs, 1.0))
    s_agg = jax.ops.segment_sum(ms, dst, num_segments=n) * inv[:, None]
    v_agg = jax.ops.segment_sum(mv, dst, num_segments=n) * inv[:, None]
    us, uv = apply_cvp_block(layer['node'],
                             jnp.concatenate([s, s_agg], axis=-1),
                             jnp.concatenate([v, v_agg], axis=-1))
    return s + us, v + uv


def cvp_inner(p, seqs, coords, positions, edge_index, batch_idx, num_graphs):
    s, v, coords_mean = featurization(p, seqs, coords, batch_idx, num_graphs)
    for layer in p['layers']:
        s, v = apply_mpnn(layer, s, v, positions, edge_index)
    s, v = apply_cvp_block(p['projection'], s, v)
    pred = v[:, 1:4] + coords_mean                                 # blades e1..e3 of channel 0
    return s, pred


def cvp_forward(p, coords, positions, seqs, masks, noise_key):
    # TODO(synk): dynamic boolean masking (coords[masks]) requires dynamic shapes;
    # this implementation assumes all-True masks so shapes stay static on TPU.
    B, L = masks.shape
    batch_idx = jnp.repeat(jnp.arange(B), 3 * L)
    coords_flat = coords.reshape(-1, 3)                            # (B*L*3, 3)
    positions_flat = jnp.repeat(positions.reshape(-1), 3)
    seqs_flat = jnp.repeat(seqs.reshape(-1), 3)
    noise = jax.random.normal(noise_key, coords_flat.shape, jnp.float32)
    noised = coords_flat + noise
    edge_index = knn_graph(noised, K_NN, batch_idx)
    feats, denoised = cvp_inner(p, seqs_flat, noised, positions_flat,
                                edge_index, batch_idx, B)
    loss = jnp.mean((denoised - coords_flat) ** 2, axis=1)
    return jnp.mean(loss), {'loss': loss}


# ------------------------------------ main --------------------------------------
if __name__ == "__main__":
    key = jax.random.PRNGKey(0)
    k_param, k_coords, k_seq, k_noise = jax.random.split(key, 4)

    B, L = 2, 4
    coords = jax.random.normal(k_coords, (B, L, 3, 3), jnp.float32)
    positions = jnp.tile(jnp.arange(L, dtype=jnp.float32)[None, :], (B, 1))
    seqs = jax.random.randint(k_seq, (B, L), 0, NUM_TOKENS, dtype=jnp.int32)
    masks = jnp.ones((B, L), dtype=bool)

    rng = ParamRNG(k_param)
    params = init_cvp(rng)

    # jit the whole forward; params (including static block configs) are closed over.
    fwd = jax.jit(lambda c, pos, sq, m, k: cvp_forward(params, c, pos, sq, m, k))

    loss, aux = fwd(coords, positions, seqs, masks, k_noise)
    loss = jax.block_until_ready(loss)
    per_node = jax.block_until_ready(aux['loss'])

    assert per_node.shape == (B * L * 3,)
    assert bool(jnp.isfinite(loss))
    print("KERNEL_OK")
</pallas_src>

<mosaic_0001>
module attributes {stable_mosaic.version = 11 : i64} {
  func.func private @main(%arg0: i32) attributes {dimension_semantics = [#tpu.dimension_semantics<core_parallel>], iteration_bounds = array<i64: 2>, tpu.core_type = #tpu.core_type<sc_scalar_subcore>, window_params = []} {
    return
  }
}

module attributes {stable_mosaic.version = 11 : i64} {
  func.func private @main(%arg0: i32) attributes {dimension_semantics = [#tpu.dimension_semantics<core_parallel>], iteration_bounds = array<i64: 2>, tpu.core_type = #tpu.core_type<sc_scalar_subcore>, window_params = []} {
    return
  }
}

module attributes {stable_mosaic.version = 11 : i64} {
  func.func @_linear_kernel(%arg0: i32, %arg1: memref<24x8xf32, #tpu.memory_space<vmem>>, %arg2: memref<8x64xbf16, #tpu.memory_space<vmem>>, %arg3: memref<1x64xf32, #tpu.memory_space<vmem>>, %arg4: memref<24x64xf32, #tpu.memory_space<vmem>>) attributes {dimension_semantics = [#tpu.dimension_semantics<parallel>], iteration_bounds = array<i64: 1>, scalar_prefetch = 0 : i64, scratch_operands = 0 : i64, tpu.core_type = #tpu.core_type<tc>, window_params = [{transform_indices = @transform_0, window_bounds = array<i64: 24, 8>}, {pipeline_mode = #tpu.pipeline_mode<synchronous>, transform_indices = @transform_1, window_bounds = array<i64: 8, 64>}, {pipeline_mode = #tpu.pipeline_mode<synchronous>, transform_indices = @transform_2, window_bounds = array<i64: 1, 64>}, {transform_indices = @transform_3, window_bounds = array<i64: 24, 64>}]} {
    %c0 = arith.constant 0 : index
    %c0_0 = arith.constant 0 : index
    %0 = vector.load %arg1[%c0, %c0_0] : memref<24x8xf32, #tpu.memory_space<vmem>>, vector<24x8xf32>
    %c0_1 = arith.constant 0 : index
    %c0_2 = arith.constant 0 : index
    %1 = vector.load %arg2[%c0_1, %c0_2] : memref<8x64xbf16, #tpu.memory_space<vmem>>, vector<8x64xbf16>
    %2 = arith.truncf %0 : vector<24x8xf32> to vector<24x8xbf16>
    %cst = arith.constant dense<0.000000e+00> : vector<24x64xf32>
    %3 = tpu.matmul %2, %1, %cst {dimension_numbers = #tpu.dot_dimension_numbers<[1], [0], [0], [1], [0, 0, 1, 1], [], []>} : vector<24x8xbf16>, vector<8x64xbf16>, vector<24x64xf32> -> vector<24x64xf32>
    %c0_3 = arith.constant 0 : index
    %c0_4 = arith.constant 0 : index
    %4 = vector.load %arg3[%c0_3, %c0_4] : memref<1x64xf32, #tpu.memory_space<vmem>>, vector<1x64xf32>
    %5 = vector.broadcast %4 : vector<1x64xf32> to vector<24x64xf32>
    %6 = arith.addf %3, %5 : vector<24x64xf32>
    %c0_5 = arith.constant 0 : index
    %c0_6 = arith.constant 0 : index
    %7 = vector.load %arg4[%c0_5, %c0_6] : memref<24x64xf32, #tpu.memory_space<vmem>>, vector<24x64xf32>
    tpu.vector_store %arg4[%c0_5, %c0_6], %6 {strides = array<i32>} : memref<24x64xf32, #tpu.memory_space<vmem>>, vector<24x64xf32>,
    return
  }
  func.func @transform_0(%arg0: i32) -> (i32, i32) {
    %c0_i32 = arith.constant 0 : i32
    %c0_i32_0 = arith.constant 0 : i32
    return %arg0, %c0_i32 : i32, i32
  }
  func.func @transform_1(%arg0: i32) -> (i32, i32) {
    %c0_i32 = arith.constant 0 : i32
    %c0_i32_0 = arith.constant 0 : i32
    %c0_i32_1 = arith.constant 0 : i32
    return %c0_i32, %c0_i32_0 : i32, i32
  }
  func.func @transform_2(%arg0: i32) -> (i32, i32) {
    %c0_i32 = arith.constant 0 : i32
    %c0_i32_0 = arith.constant 0 : i32
    %c0_i32_1 = arith.constant 0 : i32
    return %c0_i32, %c0_i32_0 : i32, i32
  }
  func.func @transform_3(%arg0: i32) -> (i32, i32) {
    %c0_i32 = arith.constant 0 : i32
    %c0_i32_0 = arith.constant 0 : i32
    return %arg0, %c0_i32 : i32, i32
  }
}

module attributes {stable_mosaic.version = 11 : i64} {
  func.func @kernel(%arg0: i32, %arg1: memref<96x65xf32, #tpu.memory_space<vmem>>, %arg2: memref<96x128xf32, #tpu.memory_space<vmem>>, %arg3: memref<128x384xbf16, #tpu.memory_space<vmem>>, %arg4: memref<1x384xf32, #tpu.memory_space<vmem>>, %arg5: memref<128x16xbf16, #tpu.memory_space<vmem>>, %arg6: memref<65x32xbf16, #tpu.memory_space<vmem>>, %arg7: memref<16x32xbf16, #tpu.memory_space<vmem>>, %arg8: memref<1x32xf32, #tpu.memory_space<vmem>>, %arg9: memref<128x64xbf16, #tpu.memory_space<vmem>>, %arg10: memref<1x64xf32, #tpu.memory_space<vmem>>, %arg11: memref<32x8xbf16, #tpu.memory_space<vmem>>, %arg12: memref<1x8xf32, #tpu.memory_space<vmem>>, %arg13: memref<8x64xbf16, #tpu.memory_space<vmem>>, %arg14: memref<64x128xbf16, #tpu.memory_space<vmem>>, %arg15: memref<1x128xf32, #tpu.memory_space<vmem>>, %arg16: memref<64x512xbf16, #tpu.memory_space<vmem>>, %arg17: memref<64x512xbf16, #tpu.memory_space<vmem>>, %arg18: memref<512x64xbf16, #tpu.memory_space<vmem>>, %arg19: memref<64x64xbf16, #tpu.memory_space<vmem>>, %arg20: memref<1x64xf32, #tpu.memory_space<vmem>>, %arg21: memref<1x64xf32, #tpu.memory_space<vmem>>, %arg22: memref<64x8xbf16, #tpu.memory_space<vmem>>, %arg23: memref<64x8xbf16, #tpu.memory_space<vmem>>, %arg24: memref<8x64xbf16, #tpu.memory_space<vmem>>, %arg25: memref<64x64xbf16, #tpu.memory_space<vmem>>, %arg26: memref<1x64xf32, #tpu.memory_space<vmem>>, %arg27: memref<64x8xbf16, #tpu.memory_space<vmem>>, %arg28: memref<32x8xbf16, #tpu.memory_space<vmem>>, %arg29: memref<1x8xf32, #tpu.memory_space<vmem>>, %arg30: memref<1x64xf32, #tpu.memory_space<vmem>>, %arg31: memref<8x64xbf16, #tpu.memory_space<vmem>>, %arg32: memref<1x32xf32, #tpu.memory_space<vmem>>, %arg33: memref<1x32xf32, #tpu.memory_space<vmem>>, %arg34: memref<1x64xf32, #tpu.memory_space<vmem>>, %arg35: memref<64x8xbf16, #tpu.memory_space<vmem>>, %arg36: memref<96x32xf32, #tpu.memory_space<vmem>>, %arg37: memref<96x64xf32, #tpu.memory_space<vmem>>) attributes {dimension_semantics = [#tpu.dimension_semantics<parallel>], iteration_bounds = array<i64: 1>, scalar_prefetch = 0 : i64, scratch_operands = 0 : i64, tpu.core_type = #tpu.core_type<tc>, window_params = [{transform_indices = @transform_0, window_bounds = array<i64: 96, 65>}, {transform_indices = @transform_1, window_bounds = array<i64: 96, 128>}, {pipeline_mode = #tpu.pipeline_mode<synchronous>, transform_indices = @transform_2, window_bounds = array<i64: 128, 384>}, {pipeline_mode = #tpu.pipeline_mode<synchronous>, transform_indices = @transform_3, window_bounds = array<i64: 1, 384>}, {pipeline_mode = #tpu.pipeline_mode<synchronous>, transform_indices = @transform_4, window_bounds = array<i64: 128, 16>}, {pipeline_mode = #tpu.pipeline_mode<synchronous>, transform_indices = @transform_5, window_bounds = array<i64: 65, 32>}, {pipeline_mode = #tpu.pipeline_mode<synchronous>, transform_indices = @transform_6, window_bounds = array<i64: 16, 32>}, {pipeline_mode = #tpu.pipeline_mode<synchronous>, transform_indices = @transform_7, window_bounds = array<i64: 1, 32>}, {pipeline_mode = #tpu.pipeline_mode<synchronous>, transform_indices = @transform_8, window_bounds = array<i64: 128, 64>}, {pipeline_mode = #tpu.pipeline_mode<synchronous>, transform_indices = @transform_9, window_bounds = array<i64: 1, 64>}, {pipeline_mode = #tpu.pipeline_mode<synchronous>, transform_indices = @transform_10, window_bounds = array<i64: 32, 8>}, {pipeline_mode = #tpu.pipeline_mode<synchronous>, transform_indices = @transform_11, window_bounds = array<i64: 1, 8>}, {pipeline_mode = #tpu.pipeline_mode<synchronous>, transform_indices = @transform_12, window_bounds = array<i64: 8, 64>}, {pipeline_mode = #tpu.pipeline_mode<synchronous>, transform_indices = @transform_13, window_bounds = array<i64: 64, 128>}, {pipeline_mode = #tpu.pipeline_mode<synchronous>, transform_indices = @transform_14, window_bounds = array<i64: 1, 128>}, {pipeline_mode = #tpu.pipeline_mode<synchronous>, transform_indices = @transform_15, window_bounds = array<i64: 64, 512>}, {pipeline_mode = #tpu.pipeline_mode<synchronous>, transform_indices = @transform_16, window_bounds = array<i64: 64, 512>}, {pipeline_mode = #tpu.pipeline_mode<synchronous>, transform_indices = @transform_17, window_bounds = array<i64: 512, 64>}, {pipeline_mode = #tpu.pipeline_mode<synchronous>, transform_indices = @transform_18, window_bounds = array<i64: 64, 64>}, {pipeline_mode = #tpu.pipeline_mode<synchronous>, transform_indices = @transform_19, window_bounds = array<i64: 1, 64>}, {pipeline_mode = #tpu.pipeline_mode<synchronous>, transform_indices = @transform_20, window_bounds = array<i64: 1, 64>}, {pipeline_mode = #tpu.pipeline_mode<synchronous>, transform_indices = @transform_21, window_bounds = array<i64: 64, 8>}, {pipeline_mode = #tpu.pipeline_mode<synchronous>, transform_indices = @transform_22, window_bounds = array<i64: 64, 8>}, {pipeline_mode = #tpu.pipeline_mode<synchronous>, transform_indices = @transform_23, window_bounds = array<i64: 8, 64>}, {pipeline_mode = #tpu.pipeline_mode<synchronous>, transform_indices = @transform_24, window_bounds = array<i64: 64, 64>}, {pipeline_mode = #tpu.pipeline_mode<synchronous>, transform_indices = @transform_25, window_bounds = array<i64: 1, 64>}, {pipeline_mode = #tpu.pipeline_mode<synchronous>, transform_indices = @transform_26, window_bounds = array<i64: 64, 8>}, {pipeline_mode = #tpu.pipeline_mode<synchronous>, transform_indices = @transform_27, window_bounds = array<i64: 32, 8>}, {pipeline_mode = #tpu.pipeline_mode<synchronous>, transform_indices = @transform_28, window_bounds = array<i64: 1, 8>}, {pipeline_mode = #tpu.pipeline_mode<synchronous>, transform_indices = @transform_29, window_bounds = array<i64: 1, 64>}, {pipeline_mode = #tpu.pipeline_mode<synchronous>, transform_indices = @transform_30, window_bounds = array<i64: 8, 64>}, {pipeline_mode = #tpu.pipeline_mode<synchronous>, transform_indices = @transform_31, window_bounds = array<i64: 1, 32>}, {pipeline_mode = #tpu.pipeline_mode<synchronous>, transform_indices = @transform_32, window_bounds = array<i64: 1, 32>}, {pipeline_mode = #tpu.pipeline_mode<synchronous>, transform_indices = @transform_33, window_bounds = array<i64: 1, 64>}, {pipeline_mode = #tpu.pipeline_mode<synchronous>, transform_indices = @transform_34, window_bounds = array<i64: 64, 8>}, {transform_indices = @transform_35, window_bounds = array<i64: 96, 32>}, {transform_indices = @transform_36, window_bounds = array<i64: 96, 64>}]} {
    %c0 = arith.constant 0 : index
    %c0_0 = arith.constant 0 : index
    %0 = vector.load %arg3[%c0, %c0_0] : memref<128x384xbf16, #tpu.memory_space<vmem>>, vector<128x384xbf16>
    %c0_1 = arith.constant 0 : index
    %c0_2 = arith.constant 0 : index
    %1 = vector.load %arg4[%c0_1, %c0_2] : memref<1x384xf32, #tpu.memory_space<vmem>>, vector<1x384xf32>
    %c0_3 = arith.constant 0 : index
    %c0_4 = arith.constant 0 : index
    %2 = vector.load %arg5[%c0_3, %c0_4] : memref<128x16xbf16, #tpu.memory_space<vmem>>, vector<128x16xbf16>
    %c0_5 = arith.constant 0 : index
    %c0_6 = arith.constant 0 : index
    %3 = vector.load %arg6[%c0_5, %c0_6] : memref<65x32xbf16, #tpu.memory_space<vmem>>, vector<65x32xbf16>
    %c0_7 = arith.constant 0 : index
    %c0_8 = arith.constant 0 : index
    %4 = vector.load %arg7[%c0_7, %c0_8] : memref<16x32xbf16, #tpu.memory_space<vmem>>, vector<16x32xbf16>
    %c0_9 = arith.constant 0 : index
    %c0_10 = arith.constant 0 : index
    %5 = vector.load %arg8[%c0_9, %c0_10] : memref<1x32xf32, #tpu.memory_space<vmem>>, vector<1x32xf32>
    %c0_11 = arith.constant 0 : index
    %c0_12 = arith.constant 0 : index
    %6 = vector.load %arg9[%c0_11, %c0_12] : memref<128x64xbf16, #tpu.memory_space<vmem>>, vector<128x64xbf16>
    %c0_13 = arith.constant 0 : index
    %c0_14 = arith.constant 0 : index
    %7 = vector.load %arg10[%c0_13, %c0_14] : memref<1x64xf32, #tpu.memory_space<vmem>>, vector<1x64xf32>
    %c0_15 = arith.constant 0 : index
    %c0_16 = arith.constant 0 : index
    %8 = vector.load %arg11[%c0_15, %c0_16] : memref<32x8xbf16, #tpu.memory_space<vmem>>, vector<32x8xbf16>
    %c0_17 = arith.constant 0 : index
    %c0_18 = arith.constant 0 : index
    %9 = vector.load %arg12[%c0_17, %c0_18] : memref<1x8xf32, #tpu.memory_space<vmem>>, vector<1x8xf32>
    %c0_19 = arith.constant 0 : index
    %c0_20 = arith.constant 0 : index
    %10 = vector.load %arg13[%c0_19, %c0_20] : memref<8x64xbf16, #tpu.memory_space<vmem>>, vector<8x64xbf16>
    %c0_21 = arith.constant 0 : index
    %c0_22 = arith.constant 0 : index
    %11 = vector.load %arg14[%c0_21, %c0_22] : memref<64x128xbf16, #tpu.memory_space<vmem>>, vector<64x128xbf16>
    %c0_23 = arith.constant 0 : index
    %c0_24 = arith.constant 0 : index
    %12 = vector.load %arg15[%c0_23, %c0_24] : memref<1x128xf32, #tpu.memory_space<vmem>>, vector<1x128xf32>
    %c0_25 = arith.constant 0 : index
    %c0_26 = arith.constant 0 : index
    %13 = vector.load %arg16[%c0_25, %c0_26] : memref<64x512xbf16, #tpu.memory_space<vmem>>, vector<64x512xbf16>
    %c0_27 = arith.constant 0 : index
    %c0_28 = arith.constant 0 : index
    %14 = vector.load %arg17[%c0_27, %c0_28] : memref<64x512xbf16, #tpu.memory_space<vmem>>, vector<64x512xbf16>
    %c0_29 = arith.constant 0 : index
    %c0_30 = arith.constant 0 : index
    %15 = vector.load %arg18[%c0_29, %c0_30] : memref<512x64xbf16, #tpu.memory_space<vmem>>, vector<512x64xbf16>
    %c0_31 = arith.constant 0 : index
    %c0_32 = arith.constant 0 : index
    %16 = vector.load %arg19[%c0_31, %c0_32] : memref<64x64xbf16, #tpu.memory_space<vmem>>, vector<64x64xbf16>
    %c0_33 = arith.constant 0 : index
    %c0_34 = arith.constant 0 : index
    %17 = vector.load %arg20[%c0_33, %c0_34] : memref<1x64xf32, #tpu.memory_space<vmem>>, vector<1x64xf32>
    %c0_35 = arith.constant 0 : index
    %c0_36 = arith.constant 0 : index
    %18 = vector.load %arg21[%c0_35, %c0_36] : memref<1x64xf32, #tpu.memory_space<vmem>>, vector<1x64xf32>
    %c0_37 = arith.constant 0 : index
    %c0_38 = arith.constant 0 : index
    %19 = vector.load %arg22[%c0_37, %c0_38] : memref<64x8xbf16, #tpu.memory_space<vmem>>, vector<64x8xbf16>
    %c0_39 = arith.constant 0 : index
    %c0_40 = arith.constant 0 : index
    %20 = vector.load %arg23[%c0_39, %c0_40] : memref<64x8xbf16, #tpu.memory_space<vmem>>, vector<64x8xbf16>
    %c0_41 = arith.constant 0 : index
    %c0_42 = arith.constant 0 : index
    %21 = vector.load %arg24[%c0_41, %c0_42] : memref<8x64xbf16, #tpu.memory_space<vmem>>, vector<8x64xbf16>
    %c0_43 = arith.constant 0 : index
    %c0_44 = arith.constant 0 : index
    %22 = vector.load %arg25[%c0_43, %c0_44] : memref<64x64xbf16, #tpu.memory_space<vmem>>, vector<64x64xbf16>
    %c0_45 = arith.constant 0 : index
    %c0_46 = arith.constant 0 : index
    %23 = vector.load %arg26[%c0_45, %c0_46] : memref<1x64xf32, #tpu.memory_space<vmem>>, vector<1x64xf32>
    %c0_47 = arith.constant 0 : index
    %c0_48 = arith.constant 0 : index
    %24 = vector.load %arg27[%c0_47, %c0_48] : memref<64x8xbf16, #tpu.memory_space<vmem>>, vector<64x8xbf16>
    %c0_49 = arith.constant 0 : index
    %c0_50 = arith.constant 0 : index
    %25 = vector.load %arg28[%c0_49, %c0_50] : memref<32x8xbf16, #tpu.memory_space<vmem>>, vector<32x8xbf16>
    %c0_51 = arith.constant 0 : index
    %c0_52 = arith.constant 0 : index
    %26 = vector.load %arg29[%c0_51, %c0_52] : memref<1x8xf32, #tpu.memory_space<vmem>>, vector<1x8xf32>
    %c0_53 = arith.constant 0 : index
    %c0_54 = arith.constant 0 : index
    %27 = vector.load %arg30[%c0_53, %c0_54] : memref<1x64xf32, #tpu.memory_space<vmem>>, vector<1x64xf32>
    %c0_55 = arith.constant 0 : index
    %c0_56 = arith.constant 0 : index
    %28 = vector.load %arg31[%c0_55, %c0_56] : memref<8x64xbf16, #tpu.memory_space<vmem>>, vector<8x64xbf16>
    %c0_57 = arith.constant 0 : index
    %c0_58 = arith.constant 0 : index
    %29 = vector.load %arg32[%c0_57, %c0_58] : memref<1x32xf32, #tpu.memory_space<vmem>>, vector<1x32xf32>
    %c0_59 = arith.constant 0 : index
    %c0_60 = arith.constant 0 : index
    %30 = vector.load %arg33[%c0_59, %c0_60] : memref<1x32xf32, #tpu.memory_space<vmem>>, vector<1x32xf32>
    %c0_61 = arith.constant 0 : index
    %c0_62 = arith.constant 0 : index
    %31 = vector.load %arg34[%c0_61, %c0_62] : memref<1x64xf32, #tpu.memory_space<vmem>>, vector<1x64xf32>
    %c0_63 = arith.constant 0 : index
    %c0_64 = arith.constant 0 : index
    %32 = vector.load %arg35[%c0_63, %c0_64] : memref<64x8xbf16, #tpu.memory_space<vmem>>, vector<64x8xbf16>
    %c0_65 = arith.constant 0 : index
    %c0_66 = arith.constant 0 : index
    %33 = vector.load %arg1[%c0_65, %c0_66] : memref<96x65xf32, #tpu.memory_space<vmem>>, vector<96x65xf32>
    %c0_67 = arith.constant 0 : index
    %c0_68 = arith.constant 0 : index
    %34 = vector.load %arg2[%c0_67, %c0_68] : memref<96x128xf32, #tpu.memory_space<vmem>>, vector<96x128xf32>
    %35 = arith.truncf %34 : vector<96x128xf32> to vector<96x128xbf16>
    %cst = arith.constant dense<0.000000e+00> : vector<96x384xf32>
    %36 = tpu.matmul %35, %0, %cst {dimension_numbers = #tpu.dot_dimension_numbers<[1], [0], [0], [1], [0, 0, 1, 1], [], []>} : vector<96x128xbf16>, vector<128x384xbf16>, vector<96x384xf32> -> vector<96x384xf32>
    %37 = vector.broadcast %1 : vector<1x384xf32> to vector<96x384xf32>
    %38 = arith.addf %36, %37 : vector<96x384xf32>
    %39 = vector.extract_strided_slice %38 {offsets = [0, 0], sizes = [96, 128], strides = [1, 1]} : vector<96x384xf32> to vector<96x128xf32>
    %40 = vector.extract_strided_slice %38 {offsets = [0, 128], sizes = [96, 128], strides = [1, 1]} : vector<96x384xf32> to vector<96x128xf32>
    %41 = vector.extract_strided_slice %38 {offsets = [0, 256], sizes = [96, 128], strides = [1, 1]} : vector<96x384xf32> to vector<96x128xf32>
    %42 = arith.mulf %39, %40 : vector<96x128xf32>
    %43 = arith.truncf %42 : vector<96x128xf32> to vector<96x128xbf16>
    %cst_69 = arith.constant dense<0.000000e+00> : vector<96x16xf32>
    %44 = tpu.matmul %43, %2, %cst_69 {dimension_numbers = #tpu.dot_dimension_numbers<[1], [0], [0], [1], [0, 0, 1, 1], [], []>} : vector<96x128xbf16>, vector<128x16xbf16>, vector<96x16xf32> -> vector<96x16xf32>
    %45 = arith.truncf %33 : vector<96x65xf32> to vector<96x65xbf16>
    %cst_70 = arith.constant dense<0.000000e+00> : vector<96x32xf32>
    %46 = tpu.matmul %45, %3, %cst_70 {dimension_numbers = #tpu.dot_dimension_numbers<[1], [0], [0], [1], [0, 0, 1, 1], [], []>} : vector<96x65xbf16>, vector<65x32xbf16>, vector<96x32xf32> -> vector<96x32xf32>
    %47 = arith.truncf %44 : vector<96x16xf32> to vector<96x16xbf16>
    %cst_71 = arith.constant dense<0.000000e+00> : vector<96x32xf32>
    %48 = tpu.matmul %47, %4, %cst_71 {dimension_numbers = #tpu.dot_dimension_numbers<[1], [0], [0], [1], [0, 0, 1, 1], [], []>} : vector<96x16xbf16>, vector<16x32xbf16>, vector<96x32xf32> -> vector<96x32xf32>
    %49 = arith.addf %46, %48 : vector<96x32xf32>
    %50 = vector.broadcast %5 : vector<1x32xf32> to vector<96x32xf32>
    %51 = arith.addf %49, %50 : vector<96x32xf32>
    %52 = arith.truncf %41 : vector<96x128xf32> to vector<96x128xbf16>
    %cst_72 = arith.constant dense<0.000000e+00> : vector<96x64xf32>
    %53 = tpu.matmul %52, %6, %cst_72 {dimension_numbers = #tpu.dot_dimension_numbers<[1], [0], [0], [1], [0, 0, 1, 1], [], []>} : vector<96x128xbf16>, vector<128x64xbf16>, vector<96x64xf32> -> vector<96x64xf32>
    %54 = vector.broadcast %7 : vector<1x64xf32> to vector<96x64xf32>
    %55 = arith.addf %53, %54 : vector<96x64xf32>
    %56 = arith.negf %51 : vector<96x32xf32>
    %57 = math.exp %56 : vector<96x32xf32>
    %cst_73 = arith.constant 1.000000e+00 : f32
    %58 = vector.broadcast %cst_73 : f32 to vector<96x32xf32>
    %59 = arith.addf %58, %57 : vector<96x32xf32>
    %60 = arith.divf %58, %59 : vector<96x32xf32>
    %61 = arith.truncf %60 : vector<96x32xf32> to vector<96x32xbf16>
    %cst_74 = arith.constant dense<0.000000e+00> : vector<96x8xf32>
    %62 = tpu.matmul %61, %8, %cst_74 {dimension_numbers = #tpu.dot_dimension_numbers<[1], [0], [0], [1], [0, 0, 1, 1], [], []>} : vector<96x32xbf16>, vector<32x8xbf16>, vector<96x8xf32> -> vector<96x8xf32>
    %63 = vector.broadcast %9 : vector<1x8xf32> to vector<96x8xf32>
    %64 = arith.addf %62, %63 : vector<96x8xf32>
    %65 = arith.negf %64 : vector<96x8xf32>
    %66 = math.exp %65 : vector<96x8xf32>
    %cst_75 = arith.constant 1.000000e+00 : f32
    %67 = vector.broadcast %cst_75 : f32 to vector<96x8xf32>
    %68 = arith.addf %67, %66 : vector<96x8xf32>
    %69 = arith.divf %67, %68 : vector<96x8xf32>
    %70 = arith.truncf %69 : vector<96x8xf32> to vector<96x8xbf16>
    %cst_76 = arith.constant dense<0.000000e+00> : vector<96x64xf32>
    %71 = tpu.matmul %70, %10, %cst_76 {dimension_numbers = #tpu.dot_dimension_numbers<[1], [0], [0], [1], [0, 0, 1, 1], [], []>} : vector<96x8xbf16>, vector<8x64xbf16>, vector<96x64xf32> -> vector<96x64xf32>
    %72 = arith.mulf %55, %71 : vector<96x64xf32>
    %cst_77 = arith.constant 0.000000e+00 : f32
    %73 = vector.broadcast %cst_77 : f32 to vector<96x32xf32>
    %74 = arith.maximumf %51, %73 : vector<96x32xf32>
    %75 = arith.truncf %72 : vector<96x64xf32> to vector<96x64xbf16>
    %cst_78 = arith.constant dense<0.000000e+00> : vector<96x128xf32>
    %76 = tpu.matmul %75, %11, %cst_78 {dimension_numbers = #tpu.dot_dimension_numbers<[1], [0], [0], [1], [0, 0, 1, 1], [], []>} : vector<96x64xbf16>, vector<64x128xbf16>, vector<96x128xf32> -> vector<96x128xf32>
    %77 = vector.broadcast %12 : vector<1x128xf32> to vector<96x128xf32>
    %78 = arith.addf %76, %77 : vector<96x128xf32>
    %79 = vector.extract_strided_slice %78 {offsets = [0, 0], sizes = [96, 64], strides = [1, 1]} : vector<96x128xf32> to vector<96x64xf32>
    %80 = vector.extract_strided_slice %78 {offsets = [0, 64], sizes = [96, 64], strides = [1, 1]} : vector<96x128xf32> to vector<96x64xf32>
    %81 = arith.truncf %79 : vector<96x64xf32> to vector<96x64xbf16>
    %cst_79 = arith.constant dense<0.000000e+00> : vector<96x512xf32>
    %82 = tpu.matmul %81, %13, %cst_79 {dimension_numbers = #tpu.dot_dimension_numbers<[1], [0], [0], [1], [0, 0, 1, 1], [], []>} : vector<96x64xbf16>, vector<64x512xbf16>, vector<96x512xf32> -> vector<96x512xf32>
    %83 = arith.truncf %80 : vector<96x64xf32> to vector<96x64xbf16>
    %cst_80 = arith.constant dense<0.000000e+00> : vector<96x512xf32>
    %84 = tpu.matmul %83, %14, %cst_80 {dimension_numbers = #tpu.dot_dimension_numbers<[1], [0], [0], [1], [0, 0, 1, 1], [], []>} : vector<96x64xbf16>, vector<64x512xbf16>, vector<96x512xf32> -> vector<96x512xf32>
    %85 = arith.mulf %82, %84 : vector<96x512xf32>
    %86 = arith.truncf %85 : vector<96x512xf32> to vector<96x512xbf16>
    %cst_81 = arith.constant dense<0.000000e+00> : vector<96x64xf32>
    %87 = tpu.matmul %86, %15, %cst_81 {dimension_numbers = #tpu.dot_dimension_numbers<[1], [0], [0], [1], [0, 0, 1, 1], [], []>} : vector<96x512xbf16>, vector<512x64xbf16>, vector<96x64xf32> -> vector<96x64xf32>
    %88 = arith.truncf %87 : vector<96x64xf32> to vector<96x64xbf16>
    %cst_82 = arith.constant dense<0.000000e+00> : vector<96x64xf32>
    %89 = tpu.matmul %88, %16, %cst_82 {dimension_numbers = #tpu.dot_dimension_numbers<[1], [0], [0], [1], [0, 0, 1, 1], [], []>} : vector<96x64xbf16>, vector<64x64xbf16>, vector<96x64xf32> -> vector<96x64xf32>
    %90 = vector.broadcast %17 : vector<1x64xf32> to vector<96x64xf32>
    %91 = arith.addf %89, %90 : vector<96x64xf32>
    %92 = arith.mulf %91, %91 : vector<96x64xf32>
    %93 = arith.truncf %92 : vector<96x64xf32> to vector<96x64xbf16>
    %cst_83 = arith.constant dense<0.000000e+00> : vector<96x8xf32>
    %94 = tpu.matmul %93, %19, %cst_83 {dimension_numbers = #tpu.dot_dimension_numbers<[1], [0], [0], [1], [0, 0, 1, 1], [], []>} : vector<96x64xbf16>, vector<64x8xbf16>, vector<96x8xf32> -> vector<96x8xf32>
    %95 = arith.mulf %94, %94 : vector<96x8xf32>
    %cst_84 = arith.constant 1.000000e-16 : f32
    %96 = vector.broadcast %cst_84 : f32 to vector<96x8xf32>
    %97 = arith.addf %95, %96 : vector<96x8xf32>
    %98 = math.sqrt %97 : vector<96x8xf32>
    %99 = math.sqrt %98 : vector<96x8xf32>
    %cst_85 = arith.constant dense<0.000000e+00> : vector<96xf32>
    %100 = vector.multi_reduction <add>, %99, %cst_85 [1] : vector<96x8xf32> to vector<96xf32>
    %101 = vector.shape_cast %100 : vector<96xf32> to vector<96x1xf32>
    %cst_86 = arith.constant 8.000000e+00 : f32
    %102 = vector.broadcast %cst_86 : f32 to vector<96x1xf32>
    %103 = arith.divf %101, %102 : vector<96x1xf32>
    %cst_87 = arith.constant 9.99999997E-7 : f32
    %104 = vector.broadcast %cst_87 : f32 to vector<96x1xf32>
    %105 = arith.addf %103, %104 : vector<96x1xf32>
    %106 = vector.broadcast %18 : vector<1x64xf32> to vector<96x64xf32>
    %107 = vector.broadcast %105 : vector<96x1xf32> to vector<96x64xf32>
    %108 = arith.divf %106, %107 : vector<96x64xf32>
    %109 = arith.mulf %91, %108 : vector<96x64xf32>
    %110 = arith.addf %109, %72 : vector<96x64xf32>
    %111 = arith.truncf %110 : vector<96x64xf32> to vector<96x64xbf16>
    %cst_88 = arith.constant dense<0.000000e+00> : vector<96x8xf32>
    %112 = tpu.matmul %111, %20, %cst_88 {dimension_numbers = #tpu.dot_dimension_numbers<[1], [0], [0], [1], [0, 0, 1, 1], [], []>} : vector<96x64xbf16>, vector<64x8xbf16>, vector<96x8xf32> -> vector<96x8xf32>
    %cst_89 = arith.constant 4.471500e-02 : f32
    %113 = vector.broadcast %cst_89 : f32 to vector<96x8xf32>
    %114 = arith.mulf %113, %112 : vector<96x8xf32>
    %115 = arith.mulf %114, %112 : vector<96x8xf32>
    %116 = arith.mulf %115, %112 : vector<96x8xf32>
    %117 = arith.addf %112, %116 : vector<96x8xf32>
    %cst_90 = arith.constant 2.000000e+00 : f32
    %118 = vector.broadcast %cst_90 : f32 to vector<96x8xf32>
    %119 = arith.mulf %118, %117 : vector<96x8xf32>
    %cst_91 = arith.constant 0.797884583 : f32
    %120 = vector.broadcast %cst_91 : f32 to vector<96x8xf32>
    %121 = arith.mulf %120, %119 : vector<96x8xf32>
    %122 = arith.negf %121 : vector<96x8xf32>
    %123 = math.exp %122 : vector<96x8xf32>
    %cst_92 = arith.constant 1.000000e+00 : f32
    %124 = vector.broadcast %cst_92 : f32 to vector<96x8xf32>
    %125 = arith.addf %124, %123 : vector<96x8xf32>
    %126 = arith.divf %124, %125 : vector<96x8xf32>
    %127 = arith.truncf %126 : vector<96x8xf32> to vector<96x8xbf16>
    %cst_93 = arith.constant dense<0.000000e+00> : vector<96x64xf32>
    %128 = tpu.matmul %127, %21, %cst_93 {dimension_numbers = #tpu.dot_dimension_numbers<[1], [0], [0], [1], [0, 0, 1, 1], [], []>} : vector<96x8xbf16>, vector<8x64xbf16>, vector<96x64xf32> -> vector<96x64xf32>
    %129 = arith.mulf %110, %128 : vector<96x64xf32>
    %130 = arith.truncf %129 : vector<96x64xf32> to vector<96x64xbf16>
    %cst_94 = arith.constant dense<0.000000e+00> : vector<96x64xf32>
    %131 = tpu.matmul %130, %22, %cst_94 {dimension_numbers = #tpu.dot_dimension_numbers<[1], [0], [0], [1], [0, 0, 1, 1], [], []>} : vector<96x64xbf16>, vector<64x64xbf16>, vector<96x64xf32> -> vector<96x64xf32>
    %132 = vector.broadcast %23 : vector<1x64xf32> to vector<96x64xf32>
    %133 = arith.addf %131, %132 : vector<96x64xf32>
    %134 = arith.truncf %133 : vector<96x64xf32> to vector<96x64xbf16>
    %cst_95 = arith.constant dense<0.000000e+00> : vector<96x8xf32>
    %135 = tpu.matmul %134, %24, %cst_95 {dimension_numbers = #tpu.dot_dimension_numbers<[1], [0], [0], [1], [0, 0, 1, 1], [], []>} : vector<96x64xbf16>, vector<64x8xbf16>, vector<96x8xf32> -> vector<96x8xf32>
    %136 = arith.truncf %74 : vector<96x32xf32> to vector<96x32xbf16>
    %cst_96 = arith.constant dense<0.000000e+00> : vector<96x8xf32>
    %137 = tpu.matmul %136, %25, %cst_96 {dimension_numbers = #tpu.dot_dimension_numbers<[1], [0], [0], [1], [0, 0, 1, 1], [], []>} : vector<96x32xbf16>, vector<32x8xbf16>, vector<96x8xf32> -> vector<96x8xf32>
    %138 = arith.addf %135, %137 : vector<96x8xf32>
    %139 = vector.broadcast %26 : vector<1x8xf32> to vector<96x8xf32>
    %140 = arith.addf %138, %139 : vector<96x8xf32>
    %141 = vector.broadcast %27 : vector<1x64xf32> to vector<96x64xf32>
    %142 = arith.mulf %133, %141 : vector<96x64xf32>
    %143 = arith.truncf %140 : vector<96x8xf32> to vector<96x8xbf16>
    %cst_97 = arith.constant dense<0.000000e+00> : vector<96x64xf32>
    %144 = tpu.matmul %143, %28, %cst_97 {dimension_numbers = #tpu.dot_dimension_numbers<[1], [0], [0], [1], [0, 0, 1, 1], [], []>} : vector<96x8xbf16>, vector<8x64xbf16>, vector<96x64xf32> -> vector<96x64xf32>
    %145 = arith.addf %142, %144 : vector<96x64xf32>
    %cst_98 = arith.constant dense<0.000000e+00> : vector<96xf32>
    %146 = vector.multi_reduction <add>, %74, %cst_98 [1] : vector<96x32xf32> to vector<96xf32>
    %147 = vector.shape_cast %146 : vector<96xf32> to vector<96x1xf32>
    %cst_99 = arith.constant 3.200000e+01 : f32
    %148 = vector.broadcast %cst_99 : f32 to vector<96x1xf32>
    %149 = arith.divf %147, %148 : vector<96x1xf32>
    %150 = vector.broadcast %149 : vector<96x1xf32> to vector<96x32xf32>
    %151 = arith.subf %74, %150 : vector<96x32xf32>
    %152 = arith.mulf %151, %151 : vector<96x32xf32>
    %cst_100 = arith.constant dense<0.000000e+00> : vector<96xf32>
    %153 = vector.multi_reduction <add>, %152, %cst_100 [1] : vector<96x32xf32> to vector<96xf32>
    %154 = vector.shape_cast %153 : vector<96xf32> to vector<96x1xf32>
    %cst_101 = arith.constant 3.200000e+01 : f32
    %155 = vector.broadcast %cst_101 : f32 to vector<96x1xf32>
    %156 = arith.divf %154, %155 : vector<96x1xf32>
    %157 = vector.broadcast %149 : vector<96x1xf32> to vector<96x32xf32>
    %158 = arith.subf %74, %157 : vector<96x32xf32>
    %cst_102 = arith.constant 9.99999974E-6 : f32
    %159 = vector.broadcast %cst_102 : f32 to vector<96x1xf32>
    %160 = arith.addf %156, %159 : vector<96x1xf32>
    %161 = math.rsqrt %160 : vector<96x1xf32>
    %162 = vector.broadcast %161 : vector<96x1xf32> to vector<96x32xf32>
    %163 = arith.mulf %158, %162 : vector<96x32xf32>
    %164 = vector.broadcast %29 : vector<1x32xf32> to vector<96x32xf32>
    %165 = arith.mulf %163, %164 : vector<96x32xf32>
    %166 = vector.broadcast %30 : vector<1x32xf32> to vector<96x32xf32>
    %167 = arith.addf %165, %166 : vector<96x32xf32>
    %168 = arith.mulf %145, %145 : vector<96x64xf32>
    %169 = arith.truncf %168 : vector<96x64xf32> to vector<96x64xbf16>
    %cst_103 = arith.constant dense<0.000000e+00> : vector<96x8xf32>
    %170 = tpu.matmul %169, %32, %cst_103 {dimension_numbers = #tpu.dot_dimension_numbers<[1], [0], [0], [1], [0, 0, 1, 1], [], []>} : vector<96x64xbf16>, vector<64x8xbf16>, vector<96x8xf32> -> vector<96x8xf32>
    %171 = arith.mulf %170, %170 : vector<96x8xf32>
    %cst_104 = arith.constant 1.000000e-16 : f32
    %172 = vector.broadcast %cst_104 : f32 to vector<96x8xf32>
    %173 = arith.addf %171, %172 : vector<96x8xf32>
    %174 = math.sqrt %173 : vector<96x8xf32>
    %175 = math.sqrt %174 : vector<96x8xf32>
    %cst_105 = arith.constant dense<0.000000e+00> : vector<96xf32>
    %176 = vector.multi_reduction <add>, %175, %cst_105 [1] : vector<96x8xf32> to vector<96xf32>
    %177 = vector.shape_cast %176 : vector<96xf32> to vector<96x1xf32>
    %cst_106 = arith.constant 8.000000e+00 : f32
    %178 = vector.broadcast %cst_106 : f32 to vector<96x1xf32>
    %179 = arith.divf %177, %178 : vector<96x1xf32>
    %cst_107 = arith.constant 9.99999997E-7 : f32
    %180 = vector.broadcast %cst_107 : f32 to vector<96x1xf32>
    %181 = arith.addf %179, %180 : vector<96x1xf32>
    %182 = vector.broadcast %31 : vector<1x64xf32> to vector<96x64xf32>
    %183 = vector.broadcast %181 : vector<96x1xf32> to vector<96x64xf32>
    %184 = arith.divf %182, %183 : vector<96x64xf32>
    %185 = arith.mulf %145, %184 : vector<96x64xf32>
    %c0_108 = arith.constant 0 : index
    %c0_109 = arith.constant 0 : index
    %186 = vector.load %arg36[%c0_108, %c0_109] : memref<96x32xf32, #tpu.memory_space<vmem>>, vector<96x32xf32>
    tpu.vector_store %arg36[%c0_108, %c0_109], %167 {strides = array<i32>} : memref<96x32xf32, #tpu.memory_space<vmem>>, vector<96x32xf32>,
    %c0_110 = arith.constant 0 : index
    %c0_111 = arith.constant 0 : index
    %187 = vector.load %arg37[%c0_110, %c0_111] : memref<96x64xf32, #tpu.memory_space<vmem>>, vector<96x64xf32>
    tpu.vector_store %arg37[%c0_110, %c0_111], %185 {strides = array<i32>} : memref<96x64xf32, #tpu.memory_space<vmem>>, vector<96x64xf32>,
    return
  }
  func.func @transform_0(%arg0: i32) -> (i32, i32) {
    %c0_i32 = arith.constant 0 : i32
    %c0_i32_0 = arith.constant 0 : i32
    return %arg0, %c0_i32 : i32, i32
  }
  func.func @transform_1(%arg0: i32) -> (i32, i32) {
    %c0_i32 = arith.constant 0 : i32
    %c0_i32_0 = arith.constant 0 : i32
    return %arg0, %c0_i32 : i32, i32
  }
  func.func @transform_2(%arg0: i32) -> (i32, i32) {
    %c0_i32 = arith.constant 0 : i32
    %c0_i32_0 = arith.constant 0 : i32
    %c0_i32_1 = arith.constant 0 : i32
    return %c0_i32, %c0_i32_0 : i32, i32
  }
  func.func @transform_3(%arg0: i32) -> (i32, i32) {
    %c0_i32 = arith.constant 0 : i32
    %c0_i32_0 = arith.constant 0 : i32
    %c0_i32_1 = arith.constant 0 : i32
    return %c0_i32, %c0_i32_0 : i32, i32
  }
  func.func @transform_4(%arg0: i32) -> (i32, i32) {
    %c0_i32 = arith.constant 0 : i32
    %c0_i32_0 = arith.constant 0 : i32
    %c0_i32_1 = arith.constant 0 : i32
    return %c0_i32, %c0_i32_0 : i32, i32
  }
  func.func @transform_5(%arg0: i32) -> (i32, i32) {
    %c0_i32 = arith.constant 0 : i32
    %c0_i32_0 = arith.constant 0 : i32
    %c0_i32_1 = arith.constant 0 : i32
    return %c0_i32, %c0_i32_0 : i32, i32
  }
  func.func @transform_6(%arg0: i32) -> (i32, i32) {
    %c0_i32 = arith.constant 0 : i32
    %c0_i32_0 = arith.constant 0 : i32
    %c0_i32_1 = arith.constant 0 : i32
    return %c0_i32, %c0_i32_0 : i32, i32
  }
  func.func @transform_7(%arg0: i32) -> (i32, i32) {
    %c0_i32 = arith.constant 0 : i32
    %c0_i32_0 = arith.constant 0 : i32
    %c0_i32_1 = arith.constant 0 : i32
    return %c0_i32, %c0_i32_0 : i32, i32
  }
  func.func @transform_8(%arg0: i32) -> (i32, i32) {
    %c0_i32 = arith.constant 0 : i32
    %c0_i32_0 = arith.constant 0 : i32
    %c0_i32_1 = arith.constant 0 : i32
    return %c0_i32, %c0_i32_0 : i32, i32
  }
  func.func @transform_9(%arg0: i32) -> (i32, i32) {
    %c0_i32 = arith.constant 0 : i32
    %c0_i32_0 = arith.constant 0 : i32
    %c0_i32_1 = arith.constant 0 : i32
    return %c0_i32, %c0_i32_0 : i32, i32
  }
  func.func @transform_10(%arg0: i32) -> (i32, i32) {
    %c0_i32 = arith.constant 0 : i32
    %c0_i32_0 = arith.constant 0 : i32
    %c0_i32_1 = arith.constant 0 : i32
    return %c0_i32, %c0_i32_0 : i32, i32
  }
  func.func @transform_11(%arg0: i32) -> (i32, i32) {
    %c0_i32 = arith.constant 0 : i32
    %c0_i32_0 = arith.constant 0 : i32
    %c0_i32_1 = arith.constant 0 : i32
    return %c0_i32, %c0_i32_0 : i32, i32
  }
  func.func @transform_12(%arg0: i32) -> (i32, i32) {
    %c0_i32 = arith.constant 0 : i32
    %c0_i32_0 = arith.constant 0 : i32
    %c0_i32_1 = arith.constant 0 : i32
    return %c0_i32, %c0_i32_0 : i32, i32
  }
  func.func @transform_13(%arg0: i32) -> (i32, i32) {
    %c0_i32 = arith.constant 0 : i32
    %c0_i32_0 = arith.constant 0 : i32
    %c0_i32_1 = arith.constant 0 : i32
    return %c0_i32, %c0_i32_0 : i32, i32
  }
  func.func @transform_14(%arg0: i32) -> (i32, i32) {
    %c0_i32 = arith.constant 0 : i32
    %c0_i32_0 = arith.constant 0 : i32
    %c0_i32_1 = arith.constant 0 : i32
    return %c0_i32, %c0_i32_0 : i32, i32
  }
  func.func @transform_15(%arg0: i32) -> (i32, i32) {
    %c0_i32 = arith.constant 0 : i32
    %c0_i32_0 = arith.constant 0 : i32
    %c0_i32_1 = arith.constant 0 : i32
    return %c0_i32, %c0_i32_0 : i32, i32
  }
  func.func @transform_16(%arg0: i32) -> (i32, i32) {
    %c0_i32 = arith.constant 0 : i32
    %c0_i32_0 = arith.constant 0 : i32
    %c0_i32_1 = arith.constant 0 : i32
    return %c0_i32, %c0_i32_0 : i32, i32
  }
  func.func @transform_17(%arg0: i32) -> (i32, i32) {
    %c0_i32 = arith.constant 0 : i32
    %c0_i32_0 = arith.constant 0 : i32
    %c0_i32_1 = arith.constant 0 : i32
    return %c0_i32, %c0_i32_0 : i32, i32
  }
  func.func @transform_18(%arg0: i32) -> (i32, i32) {
    %c0_i32 = arith.constant 0 : i32
    %c0_i32_0 = arith.constant 0 : i32
    %c0_i32_1 = arith.constant 0 : i32
    return %c0_i32, %c0_i32_0 : i32, i32
  }
  func.func @transform_19(%arg0: i32) -> (i32, i32) {
    %c0_i32 = arith.constant 0 : i32
    %c0_i32_0 = arith.constant 0 : i32
    %c0_i32_1 = arith.constant 0 : i32
    return %c0_i32, %c0_i32_0 : i32, i32
  }
  func.func @transform_20(%arg0: i32) -> (i32, i32) {
    %c0_i32 = arith.constant 0 : i32
    %c0_i32_0 = arith.constant 0 : i32
    %c0_i32_1 = arith.constant 0 : i32
    return %c0_i32, %c0_i32_0 : i32, i32
  }
  func.func @transform_21(%arg0: i32) -> (i32, i32) {
    %c0_i32 = arith.constant 0 : i32
    %c0_i32_0 = arith.constant 0 : i32
    %c0_i32_1 = arith.constant 0 : i32
    return %c0_i32, %c0_i32_0 : i32, i32
  }
  func.func @transform_22(%arg0: i32) -> (i32, i32) {
    %c0_i32 = arith.constant 0 : i32
    %c0_i32_0 = arith.constant 0 : i32
    %c0_i32_1 = arith.constant 0 : i32
    return %c0_i32, %c0_i32_0 : i32, i32
  }
  func.func @transform_23(%arg0: i32) -> (i32, i32) {
    %c0_i32 = arith.constant 0 : i32
    %c0_i32_0 = arith.constant 0 : i32
    %c0_i32_1 = arith.constant 0 : i32
    return %c0_i32, %c0_i32_0 : i32, i32
  }
  func.func @transform_24(%arg0: i32) -> (i32, i32) {
    %c0_i32 = arith.constant 0 : i32
    %c0_i32_0 = arith.constant 0 : i32
    %c0_i32_1 = arith.constant 0 : i32
    return %c0_i32, %c0_i32_0 : i32, i32
  }
  func.func @transform_25(%arg0: i32) -> (i32, i32) {
    %c0_i32 = arith.constant 0 : i32
    %c0_i32_0 = arith.constant 0 : i32
    %c0_i32_1 = arith.constant 0 : i32
    return %c0_i32, %c0_i32_0 : i32, i32
  }
  func.func @transform_26(%arg0: i32) -> (i32, i32) {
    %c0_i32 = arith.constant 0 : i32
    %c0_i32_0 = arith.constant 0 : i32
    %c0_i32_1 = arith.constant 0 : i32
    return %c0_i32, %c0_i32_0 : i32, i32
  }
  func.func @transform_27(%arg0: i32) -> (i32, i32) {
    %c0_i32 = arith.constant 0 : i32
    %c0_i32_0 = arith.constant 0 : i32
    %c0_i32_1 = arith.constant 0 : i32
    return %c0_i32, %c0_i32_0 : i32, i32
  }
  func.func @transform_28(%arg0: i32) -> (i32, i32) {
    %c0_i32 = arith.constant 0 : i32
    %c0_i32_0 = arith.constant 0 : i32
    %c0_i32_1 = arith.constant 0 : i32
    return %c0_i32, %c0_i32_0 : i32, i32
  }
  func.func @transform_29(%arg0: i32) -> (i32, i32) {
    %c0_i32 = arith.constant 0 : i32
    %c0_i32_0 = arith.constant 0 : i32
    %c0_i32_1 = arith.constant 0 : i32
    return %c0_i32, %c0_i32_0 : i32, i32
  }
  func.func @transform_30(%arg0: i32) -> (i32, i32) {
    %c0_i32 = arith.constant 0 : i32
    %c0_i32_0 = arith.constant 0 : i32
    %c0_i32_1 = arith.constant 0 : i32
    return %c0_i32, %c0_i32_0 : i32, i32
  }
  func.func @transform_31(%arg0: i32) -> (i32, i32) {
    %c0_i32 = arith.constant 0 : i32
    %c0_i32_0 = arith.constant 0 : i32
    %c0_i32_1 = arith.constant 0 : i32
    return %c0_i32, %c0_i32_0 : i32, i32
  }
  func.func @transform_32(%arg0: i32) -> (i32, i32) {
    %c0_i32 = arith.constant 0 : i32
    %c0_i32_0 = arith.constant 0 : i32
    %c0_i32_1 = arith.constant 0 : i32
    return %c0_i32, %c0_i32_0 : i32, i32
  }
  func.func @transform_33(%arg0: i32) -> (i32, i32) {
    %c0_i32 = arith.constant 0 : i32
    %c0_i32_0 = arith.constant 0 : i32
    %c0_i32_1 = arith.constant 0 : i32
    return %c0_i32, %c0_i32_0 : i32, i32
  }
  func.func @transform_34(%arg0: i32) -> (i32, i32) {
    %c0_i32 = arith.constant 0 : i32
    %c0_i32_0 = arith.constant 0 : i32
    %c0_i32_1 = arith.constant 0 : i32
    return %c0_i32, %c0_i32_0 : i32, i32
  }
  func.func @transform_35(%arg0: i32) -> (i32, i32) {
    %c0_i32 = arith.constant 0 : i32
    %c0_i32_0 = arith.constant 0 : i32
    return %arg0, %c0_i32 : i32, i32
  }
  func.func @transform_36(%arg0: i32) -> (i32, i32) {
    %c0_i32 = arith.constant 0 : i32
    %c0_i32_0 = arith.constant 0 : i32
    return %arg0, %c0_i32 : i32, i32
  }
}

module attributes {stable_mosaic.version = 11 : i64} {
  func.func @kernel(%arg0: i32, %arg1: memref<24x32xf32, #tpu.memory_space<vmem>>, %arg2: memref<24x64xf32, #tpu.memory_space<vmem>>, %arg3: memref<64x192xbf16, #tpu.memory_space<vmem>>, %arg4: memref<1x192xf32, #tpu.memory_space<vmem>>, %arg5: memref<64x8xbf16, #tpu.memory_space<vmem>>, %arg6: memref<32x1xbf16, #tpu.memory_space<vmem>>, %arg7: memref<8x1xbf16, #tpu.memory_space<vmem>>, %arg8: memref<1x1xf32, #tpu.memory_space<vmem>>, %arg9: memref<64x8xbf16, #tpu.memory_space<vmem>>, %arg10: memref<1x8xf32, #tpu.memory_space<vmem>>, %arg11: memref<24x1xf32, #tpu.memory_space<vmem>>, %arg12: memref<24x8xf32, #tpu.memory_space<vmem>>) attributes {dimension_semantics = [#tpu.dimension_semantics<parallel>], iteration_bounds = array<i64: 1>, scalar_prefetch = 0 : i64, scratch_operands = 0 : i64, tpu.core_type = #tpu.core_type<tc>, window_params = [{transform_indices = @transform_0, window_bounds = array<i64: 24, 32>}, {transform_indices = @transform_1, window_bounds = array<i64: 24, 64>}, {pipeline_mode = #tpu.pipeline_mode<synchronous>, transform_indices = @transform_2, window_bounds = array<i64: 64, 192>}, {pipeline_mode = #tpu.pipeline_mode<synchronous>, transform_indices = @transform_3, window_bounds = array<i64: 1, 192>}, {pipeline_mode = #tpu.pipeline_mode<synchronous>, transform_indices = @transform_4, window_bounds = array<i64: 64, 8>}, {pipeline_mode = #tpu.pipeline_mode<synchronous>, transform_indices = @transform_5, window_bounds = array<i64: 32, 1>}, {pipeline_mode = #tpu.pipeline_mode<synchronous>, transform_indices = @transform_6, window_bounds = array<i64: 8, 1>}, {pipeline_mode = #tpu.pipeline_mode<synchronous>, transform_indices = @transform_7, window_bounds = array<i64: 1, 1>}, {pipeline_mode = #tpu.pipeline_mode<synchronous>, transform_indices = @transform_8, window_bounds = array<i64: 64, 8>}, {pipeline_mode = #tpu.pipeline_mode<synchronous>, transform_indices = @transform_9, window_bounds = array<i64: 1, 8>}, {transform_indices = @transform_10, window_bounds = array<i64: 24, 1>}, {transform_indices = @transform_11, window_bounds = array<i64: 24, 8>}]} {
    %c0 = arith.constant 0 : index
    %c0_0 = arith.constant 0 : index
    %0 = vector.load %arg3[%c0, %c0_0] : memref<64x192xbf16, #tpu.memory_space<vmem>>, vector<64x192xbf16>
    %c0_1 = arith.constant 0 : index
    %c0_2 = arith.constant 0 : index
    %1 = vector.load %arg4[%c0_1, %c0_2] : memref<1x192xf32, #tpu.memory_space<vmem>>, vector<1x192xf32>
    %c0_3 = arith.constant 0 : index
    %c0_4 = arith.constant 0 : index
    %2 = vector.load %arg5[%c0_3, %c0_4] : memref<64x8xbf16, #tpu.memory_space<vmem>>, vector<64x8xbf16>
    %c0_5 = arith.constant 0 : index
    %c0_6 = arith.constant 0 : index
    %3 = vector.load %arg6[%c0_5, %c0_6] : memref<32x1xbf16, #tpu.memory_space<vmem>>, vector<32x1xbf16>
    %c0_7 = arith.constant 0 : index
    %c0_8 = arith.constant 0 : index
    %4 = vector.load %arg7[%c0_7, %c0_8] : memref<8x1xbf16, #tpu.memory_space<vmem>>, vector<8x1xbf16>
    %c0_9 = arith.constant 0 : index
    %c0_10 = arith.constant 0 : index
    %5 = vector.load %arg8[%c0_9, %c0_10] : memref<1x1xf32, #tpu.memory_space<vmem>>, vector<1x1xf32>
    %c0_11 = arith.constant 0 : index
    %c0_12 = arith.constant 0 : index
    %6 = vector.load %arg9[%c0_11, %c0_12] : memref<64x8xbf16, #tpu.memory_space<vmem>>, vector<64x8xbf16>
    %c0_13 = arith.constant 0 : index
    %c0_14 = arith.constant 0 : index
    %7 = vector.load %arg10[%c0_13, %c0_14] : memref<1x8xf32, #tpu.memory_space<vmem>>, vector<1x8xf32>
    %c0_15 = arith.constant 0 : index
    %c0_16 = arith.constant 0 : index
    %8 = vector.load %arg1[%c0_15, %c0_16] : memref<24x32xf32, #tpu.memory_space<vmem>>, vector<24x32xf32>
    %c0_17 = arith.constant 0 : index
    %c0_18 = arith.constant 0 : index
    %9 = vector.load %arg2[%c0_17, %c0_18] : memref<24x64xf32, #tpu.memory_space<vmem>>, vector<24x64xf32>
    %10 = arith.truncf %9 : vector<24x64xf32> to vector<24x64xbf16>
    %cst = arith.constant dense<0.000000e+00> : vector<24x192xf32>
    %11 = tpu.matmul %10, %0, %cst {dimension_numbers = #tpu.dot_dimension_numbers<[1], [0], [0], [1], [0, 0, 1, 1], [], []>} : vector<24x64xbf16>, vector<64x192xbf16>, vector<24x192xf32> -> vector<24x192xf32>
    %12 = vector.broadcast %1 : vector<1x192xf32> to vector<24x192xf32>
    %13 = arith.addf %11, %12 : vector<24x192xf32>
    %14 = vector.extract_strided_slice %13 {offsets = [0, 0], sizes = [24, 64], strides = [1, 1]} : vector<24x192xf32> to vector<24x64xf32>
    %15 = vector.extract_strided_slice %13 {offsets = [0, 64], sizes = [24, 64], strides = [1, 1]} : vector<24x192xf32> to vector<24x64xf32>
    %16 = vector.extract_strided_slice %13 {offsets = [0, 128], sizes = [24, 64], strides = [1, 1]} : vector<24x192xf32> to vector<24x64xf32>
    %17 = arith.mulf %14, %15 : vector<24x64xf32>
    %18 = arith.truncf %17 : vector<24x64xf32> to vector<24x64xbf16>
    %cst_19 = arith.constant dense<0.000000e+00> : vector<24x8xf32>
    %19 = tpu.matmul %18, %2, %cst_19 {dimension_numbers = #tpu.dot_dimension_numbers<[1], [0], [0], [1], [0, 0, 1, 1], [], []>} : vector<24x64xbf16>, vector<64x8xbf16>, vector<24x8xf32> -> vector<24x8xf32>
    %20 = arith.truncf %8 : vector<24x32xf32> to vector<24x32xbf16>
    %cst_20 = arith.constant dense<0.000000e+00> : vector<24x1xf32>
    %21 = tpu.matmul %20, %3, %cst_20 {dimension_numbers = #tpu.dot_dimension_numbers<[1], [0], [0], [1], [0, 0, 1, 1], [], []>} : vector<24x32xbf16>, vector<32x1xbf16>, vector<24x1xf32> -> vector<24x1xf32>
    %22 = arith.truncf %19 : vector<24x8xf32> to vector<24x8xbf16>
    %cst_21 = arith.constant dense<0.000000e+00> : vector<24x1xf32>
    %23 = tpu.matmul %22, %4, %cst_21 {dimension_numbers = #tpu.dot_dimension_numbers<[1], [0], [0], [1], [0, 0, 1, 1], [], []>} : vector<24x8xbf16>, vector<8x1xbf16>, vector<24x1xf32> -> vector<24x1xf32>
    %24 = arith.addf %21, %23 : vector<24x1xf32>
    %25 = vector.broadcast %5 : vector<1x1xf32> to vector<24x1xf32>
    %26 = arith.addf %24, %25 : vector<24x1xf32>
    %27 = arith.truncf %16 : vector<24x64xf32> to vector<24x64xbf16>
    %cst_22 = arith.constant dense<0.000000e+00> : vector<24x8xf32>
    %28 = tpu.matmul %27, %6, %cst_22 {dimension_numbers = #tpu.dot_dimension_numbers<[1], [0], [0], [1], [0, 0, 1, 1], [], []>} : vector<24x64xbf16>, vector<64x8xbf16>, vector<24x8xf32> -> vector<24x8xf32>
    %29 = vector.broadcast %7 : vector<1x8xf32> to vector<24x8xf32>
    %30 = arith.addf %28, %29 : vector<24x8xf32>
    %c0_23 = arith.constant 0 : index
    %c0_24 = arith.constant 0 : index
    %31 = vector.load %arg11[%c0_23, %c0_24] : memref<24x1xf32, #tpu.memory_space<vmem>>, vector<24x1xf32>
    tpu.vector_store %arg11[%c0_23, %c0_24], %26 {strides = array<i32>} : memref<24x1xf32, #tpu.memory_space<vmem>>, vector<24x1xf32>,
    %c0_25 = arith.constant 0 : index
    %c0_26 = arith.constant 0 : index
    %32 = vector.load %arg12[%c0_25, %c0_26] : memref<24x8xf32, #tpu.memory_space<vmem>>, vector<24x8xf32>
    tpu.vector_store %arg12[%c0_25, %c0_26], %30 {strides = array<i32>} : memref<24x8xf32, #tpu.memory_space<vmem>>, vector<24x8xf32>,
    return
  }
  func.func @transform_0(%arg0: i32) -> (i32, i32) {
    %c0_i32 = arith.constant 0 : i32
    %c0_i32_0 = arith.constant 0 : i32
    return %arg0, %c0_i32 : i32, i32
  }
  func.func @transform_1(%arg0: i32) -> (i32, i32) {
    %c0_i32 = arith.constant 0 : i32
    %c0_i32_0 = arith.constant 0 : i32
    return %arg0, %c0_i32 : i32, i32
  }
  func.func @transform_2(%arg0: i32) -> (i32, i32) {
    %c0_i32 = arith.constant 0 : i32
    %c0_i32_0 = arith.constant 0 : i32
    %c0_i32_1 = arith.constant 0 : i32
    return %c0_i32, %c0_i32_0 : i32, i32
  }
  func.func @transform_3(%arg0: i32) -> (i32, i32) {
    %c0_i32 = arith.constant 0 : i32
    %c0_i32_0 = arith.constant 0 : i32
    %c0_i32_1 = arith.constant 0 : i32
    return %c0_i32, %c0_i32_0 : i32, i32
  }
  func.func @transform_4(%arg0: i32) -> (i32, i32) {
    %c0_i32 = arith.constant 0 : i32
    %c0_i32_0 = arith.constant 0 : i32
    %c0_i32_1 = arith.constant 0 : i32
    return %c0_i32, %c0_i32_0 : i32, i32
  }
  func.func @transform_5(%arg0: i32) -> (i32, i32) {
    %c0_i32 = arith.constant 0 : i32
    %c0_i32_0 = arith.constant 0 : i32
    %c0_i32_1 = arith.constant 0 : i32
    return %c0_i32, %c0_i32_0 : i32, i32
  }
  func.func @transform_6(%arg0: i32) -> (i32, i32) {
    %c0_i32 = arith.constant 0 : i32
    %c0_i32_0 = arith.constant 0 : i32
    %c0_i32_1 = arith.constant 0 : i32
    return %c0_i32, %c0_i32_0 : i32, i32
  }
  func.func @transform_7(%arg0: i32) -> (i32, i32) {
    %c0_i32 = arith.constant 0 : i32
    %c0_i32_0 = arith.constant 0 : i32
    %c0_i32_1 = arith.constant 0 : i32
    return %c0_i32, %c0_i32_0 : i32, i32
  }
  func.func @transform_8(%arg0: i32) -> (i32, i32) {
    %c0_i32 = arith.constant 0 : i32
    %c0_i32_0 = arith.constant 0 : i32
    %c0_i32_1 = arith.constant 0 : i32
    return %c0_i32, %c0_i32_0 : i32, i32
  }
  func.func @transform_9(%arg0: i32) -> (i32, i32) {
    %c0_i32 = arith.constant 0 : i32
    %c0_i32_0 = arith.constant 0 : i32
    %c0_i32_1 = arith.constant 0 : i32
    return %c0_i32, %c0_i32_0 : i32, i32
  }
  func.func @transform_10(%arg0: i32) -> (i32, i32) {
    %c0_i32 = arith.constant 0 : i32
    %c0_i32_0 = arith.constant 0 : i32
    return %arg0, %c0_i32 : i32, i32
  }
  func.func @transform_11(%arg0: i32) -> (i32, i32) {
    %c0_i32 = arith.constant 0 : i32
    %c0_i32_0 = arith.constant 0 : i32
    return %arg0, %c0_i32 : i32, i32
  }
}

module attributes {stable_mosaic.version = 11 : i64} {
  func.func @kernel(%arg0: i32, %arg1: memref<24x64xf32, #tpu.memory_space<vmem>>, %arg2: memref<24x128xf32, #tpu.memory_space<vmem>>, %arg3: memref<128x384xbf16, #tpu.memory_space<vmem>>, %arg4: memref<1x384xf32, #tpu.memory_space<vmem>>, %arg5: memref<128x16xbf16, #tpu.memory_space<vmem>>, %arg6: memref<64x32xbf16, #tpu.memory_space<vmem>>, %arg7: memref<16x32xbf16, #tpu.memory_space<vmem>>, %arg8: memref<1x32xf32, #tpu.memory_space<vmem>>, %arg9: memref<128x64xbf16, #tpu.memory_space<vmem>>, %arg10: memref<1x64xf32, #tpu.memory_space<vmem>>, %arg11: memref<32x8xbf16, #tpu.memory_space<vmem>>, %arg12: memref<1x8xf32, #tpu.memory_space<vmem>>, %arg13: memref<8x64xbf16, #tpu.memory_space<vmem>>, %arg14: memref<64x128xbf16, #tpu.memory_space<vmem>>, %arg15: memref<1x128xf32, #tpu.memory_space<vmem>>, %arg16: memref<64x512xbf16, #tpu.memory_space<vmem>>, %arg17: memref<64x512xbf16, #tpu.memory_space<vmem>>, %arg18: memref<512x64xbf16, #tpu.memory_space<vmem>>, %arg19: memref<64x64xbf16, #tpu.memory_space<vmem>>, %arg20: memref<1x64xf32, #tpu.memory_space<vmem>>, %arg21: memref<1x64xf32, #tpu.memory_space<vmem>>, %arg22: memref<64x8xbf16, #tpu.memory_space<vmem>>, %arg23: memref<64x8xbf16, #tpu.memory_space<vmem>>, %arg24: memref<8x64xbf16, #tpu.memory_space<vmem>>, %arg25: memref<64x64xbf16, #tpu.memory_space<vmem>>, %arg26: memref<1x64xf32, #tpu.memory_space<vmem>>, %arg27: memref<64x8xbf16, #tpu.memory_space<vmem>>, %arg28: memref<32x8xbf16, #tpu.memory_space<vmem>>, %arg29: memref<1x8xf32, #tpu.memory_space<vmem>>, %arg30: memref<1x64xf32, #tpu.memory_space<vmem>>, %arg31: memref<8x64xbf16, #tpu.memory_space<vmem>>, %arg32: memref<1x32xf32, #tpu.memory_space<vmem>>, %arg33: memref<1x32xf32, #tpu.memory_space<vmem>>, %arg34: memref<1x64xf32, #tpu.memory_space<vmem>>, %arg35: memref<64x8xbf16, #tpu.memory_space<vmem>>, %arg36: memref<24x32xf32, #tpu.memory_space<vmem>>, %arg37: memref<24x64xf32, #tpu.memory_space<vmem>>) attributes {dimension_semantics = [#tpu.dimension_semantics<parallel>], iteration_bounds = array<i64: 1>, scalar_prefetch = 0 : i64, scratch_operands = 0 : i64, tpu.core_type = #tpu.core_type<tc>, window_params = [{transform_indices = @transform_0, window_bounds = array<i64: 24, 64>}, {transform_indices = @transform_1, window_bounds = array<i64: 24, 128>}, {pipeline_mode = #tpu.pipeline_mode<synchronous>, transform_indices = @transform_2, window_bounds = array<i64: 128, 384>}, {pipeline_mode = #tpu.pipeline_mode<synchronous>, transform_indices = @transform_3, window_bounds = array<i64: 1, 384>}, {pipeline_mode = #tpu.pipeline_mode<synchronous>, transform_indices = @transform_4, window_bounds = array<i64: 128, 16>}, {pipeline_mode = #tpu.pipeline_mode<synchronous>, transform_indices = @transform_5, window_bounds = array<i64: 64, 32>}, {pipeline_mode = #tpu.pipeline_mode<synchronous>, transform_indices = @transform_6, window_bounds = array<i64: 16, 32>}, {pipeline_mode = #tpu.pipeline_mode<synchronous>, transform_indices = @transform_7, window_bounds = array<i64: 1, 32>}, {pipeline_mode = #tpu.pipeline_mode<synchronous>, transform_indices = @transform_8, window_bounds = array<i64: 128, 64>}, {pipeline_mode = #tpu.pipeline_mode<synchronous>, transform_indices = @transform_9, window_bounds = array<i64: 1, 64>}, {pipeline_mode = #tpu.pipeline_mode<synchronous>, transform_indices = @transform_10, window_bounds = array<i64: 32, 8>}, {pipeline_mode = #tpu.pipeline_mode<synchronous>, transform_indices = @transform_11, window_bounds = array<i64: 1, 8>}, {pipeline_mode = #tpu.pipeline_mode<synchronous>, transform_indices = @transform_12, window_bounds = array<i64: 8, 64>}, {pipeline_mode = #tpu.pipeline_mode<synchronous>, transform_indices = @transform_13, window_bounds = array<i64: 64, 128>}, {pipeline_mode = #tpu.pipeline_mode<synchronous>, transform_indices = @transform_14, window_bounds = array<i64: 1, 128>}, {pipeline_mode = #tpu.pipeline_mode<synchronous>, transform_indices = @transform_15, window_bounds = array<i64: 64, 512>}, {pipeline_mode = #tpu.pipeline_mode<synchronous>, transform_indices = @transform_16, window_bounds = array<i64: 64, 512>}, {pipeline_mode = #tpu.pipeline_mode<synchronous>, transform_indices = @transform_17, window_bounds = array<i64: 512, 64>}, {pipeline_mode = #tpu.pipeline_mode<synchronous>, transform_indices = @transform_18, window_bounds = array<i64: 64, 64>}, {pipeline_mode = #tpu.pipeline_mode<synchronous>, transform_indices = @transform_19, window_bounds = array<i64: 1, 64>}, {pipeline_mode = #tpu.pipeline_mode<synchronous>, transform_indices = @transform_20, window_bounds = array<i64: 1, 64>}, {pipeline_mode = #tpu.pipeline_mode<synchronous>, transform_indices = @transform_21, window_bounds = array<i64: 64, 8>}, {pipeline_mode = #tpu.pipeline_mode<synchronous>, transform_indices = @transform_22, window_bounds = array<i64: 64, 8>}, {pipeline_mode = #tpu.pipeline_mode<synchronous>, transform_indices = @transform_23, window_bounds = array<i64: 8, 64>}, {pipeline_mode = #tpu.pipeline_mode<synchronous>, transform_indices = @transform_24, window_bounds = array<i64: 64, 64>}, {pipeline_mode = #tpu.pipeline_mode<synchronous>, transform_indices = @transform_25, window_bounds = array<i64: 1, 64>}, {pipeline_mode = #tpu.pipeline_mode<synchronous>, transform_indices = @transform_26, window_bounds = array<i64: 64, 8>}, {pipeline_mode = #tpu.pipeline_mode<synchronous>, transform_indices = @transform_27, window_bounds = array<i64: 32, 8>}, {pipeline_mode = #tpu.pipeline_mode<synchronous>, transform_indices = @transform_28, window_bounds = array<i64: 1, 8>}, {pipeline_mode = #tpu.pipeline_mode<synchronous>, transform_indices = @transform_29, window_bounds = array<i64: 1, 64>}, {pipeline_mode = #tpu.pipeline_mode<synchronous>, transform_indices = @transform_30, window_bounds = array<i64: 8, 64>}, {pipeline_mode = #tpu.pipeline_mode<synchronous>, transform_indices = @transform_31, window_bounds = array<i64: 1, 32>}, {pipeline_mode = #tpu.pipeline_mode<synchronous>, transform_indices = @transform_32, window_bounds = array<i64: 1, 32>}, {pipeline_mode = #tpu.pipeline_mode<synchronous>, transform_indices = @transform_33, window_bounds = array<i64: 1, 64>}, {pipeline_mode = #tpu.pipeline_mode<synchronous>, transform_indices = @transform_34, window_bounds = array<i64: 64, 8>}, {transform_indices = @transform_35, window_bounds = array<i64: 24, 32>}, {transform_indices = @transform_36, window_bounds = array<i64: 24, 64>}]} {
    %c0 = arith.constant 0 : index
    %c0_0 = arith.constant 0 : index
    %0 = vector.load %arg3[%c0, %c0_0] : memref<128x384xbf16, #tpu.memory_space<vmem>>, vector<128x384xbf16>
    %c0_1 = arith.constant 0 : index
    %c0_2 = arith.constant 0 : index
    %1 = vector.load %arg4[%c0_1, %c0_2] : memref<1x384xf32, #tpu.memory_space<vmem>>, vector<1x384xf32>
    %c0_3 = arith.constant 0 : index
    %c0_4 = arith.constant 0 : index
    %2 = vector.load %arg5[%c0_3, %c0_4] : memref<128x16xbf16, #tpu.memory_space<vmem>>, vector<128x16xbf16>
    %c0_5 = arith.constant 0 : index
    %c0_6 = arith.constant 0 : index
    %3 = vector.load %arg6[%c0_5, %c0_6] : memref<64x32xbf16, #tpu.memory_space<vmem>>, vector<64x32xbf16>
    %c0_7 = arith.constant 0 : index
    %c0_8 = arith.constant 0 : index
    %4 = vector.load %arg7[%c0_7, %c0_8] : memref<16x32xbf16, #tpu.memory_space<vmem>>, vector<16x32xbf16>
    %c0_9 = arith.constant 0 : index
    %c0_10 = arith.constant 0 : index
    %5 = vector.load %arg8[%c0_9, %c0_10] : memref<1x32xf32, #tpu.memory_space<vmem>>, vector<1x32xf32>
    %c0_11 = arith.constant 0 : index
    %c0_12 = arith.constant 0 : index
    %6 = vector.load %arg9[%c0_11, %c0_12] : memref<128x64xbf16, #tpu.memory_space<vmem>>, vector<128x64xbf16>
    %c0_13 = arith.constant 0 : index
    %c0_14 = arith.constant 0 : index
    %7 = vector.load %arg10[%c0_13, %c0_14] : memref<1x64xf32, #tpu.memory_space<vmem>>, vector<1x64xf32>
    %c0_15 = arith.constant 0 : index
    %c0_16 = arith.constant 0 : index
    %8 = vector.load %arg11[%c0_15, %c0_16] : memref<32x8xbf16, #tpu.memory_space<vmem>>, vector<32x8xbf16>
    %c0_17 = arith.constant 0 : index
    %c0_18 = arith.constant 0 : index
    %9 = vector.load %arg12[%c0_17, %c0_18] : memref<1x8xf32, #tpu.memory_space<vmem>>, vector<1x8xf32>
    %c0_19 = arith.constant 0 : index
    %c0_20 = arith.constant 0 : index
    %10 = vector.load %arg13[%c0_19, %c0_20] : memref<8x64xbf16, #tpu.memory_space<vmem>>, vector<8x64xbf16>
    %c0_21 = arith.constant 0 : index
    %c0_22 = arith.constant 0 : index
    %11 = vector.load %arg14[%c0_21, %c0_22] : memref<64x128xbf16, #tpu.memory_space<vmem>>, vector<64x128xbf16>
    %c0_23 = arith.constant 0 : index
    %c0_24 = arith.constant 0 : index
    %12 = vector.load %arg15[%c0_23, %c0_24] : memref<1x128xf32, #tpu.memory_space<vmem>>, vector<1x128xf32>
    %c0_25 = arith.constant 0 : index
    %c0_26 = arith.constant 0 : index
    %13 = vector.load %arg16[%c0_25, %c0_26] : memref<64x512xbf16, #tpu.memory_space<vmem>>, vector<64x512xbf16>
    %c0_27 = arith.constant 0 : index
    %c0_28 = arith.constant 0 : index
    %14 = vector.load %arg17[%c0_27, %c0_28] : memref<64x512xbf16, #tpu.memory_space<vmem>>, vector<64x512xbf16>
    %c0_29 = arith.constant 0 : index
    %c0_30 = arith.constant 0 : index
    %15 = vector.load %arg18[%c0_29, %c0_30] : memref<512x64xbf16, #tpu.memory_space<vmem>>, vector<512x64xbf16>
    %c0_31 = arith.constant 0 : index
    %c0_32 = arith.constant 0 : index
    %16 = vector.load %arg19[%c0_31, %c0_32] : memref<64x64xbf16, #tpu.memory_space<vmem>>, vector<64x64xbf16>
    %c0_33 = arith.constant 0 : index
    %c0_34 = arith.constant 0 : index
    %17 = vector.load %arg20[%c0_33, %c0_34] : memref<1x64xf32, #tpu.memory_space<vmem>>, vector<1x64xf32>
    %c0_35 = arith.constant 0 : index
    %c0_36 = arith.constant 0 : index
    %18 = vector.load %arg21[%c0_35, %c0_36] : memref<1x64xf32, #tpu.memory_space<vmem>>, vector<1x64xf32>
    %c0_37 = arith.constant 0 : index
    %c0_38 = arith.constant 0 : index
    %19 = vector.load %arg22[%c0_37, %c0_38] : memref<64x8xbf16, #tpu.memory_space<vmem>>, vector<64x8xbf16>
    %c0_39 = arith.constant 0 : index
    %c0_40 = arith.constant 0 : index
    %20 = vector.load %arg23[%c0_39, %c0_40] : memref<64x8xbf16, #tpu.memory_space<vmem>>, vector<64x8xbf16>
    %c0_41 = arith.constant 0 : index
    %c0_42 = arith.constant 0 : index
    %21 = vector.load %arg24[%c0_41, %c0_42] : memref<8x64xbf16, #tpu.memory_space<vmem>>, vector<8x64xbf16>
    %c0_43 = arith.constant 0 : index
    %c0_44 = arith.constant 0 : index
    %22 = vector.load %arg25[%c0_43, %c0_44] : memref<64x64xbf16, #tpu.memory_space<vmem>>, vector<64x64xbf16>
    %c0_45 = arith.constant 0 : index
    %c0_46 = arith.constant 0 : index
    %23 = vector.load %arg26[%c0_45, %c0_46] : memref<1x64xf32, #tpu.memory_space<vmem>>, vector<1x64xf32>
    %c0_47 = arith.constant 0 : index
    %c0_48 = arith.constant 0 : index
    %24 = vector.load %arg27[%c0_47, %c0_48] : memref<64x8xbf16, #tpu.memory_space<vmem>>, vector<64x8xbf16>
    %c0_49 = arith.constant 0 : index
    %c0_50 = arith.constant 0 : index
    %25 = vector.load %arg28[%c0_49, %c0_50] : memref<32x8xbf16, #tpu.memory_space<vmem>>, vector<32x8xbf16>
    %c0_51 = arith.constant 0 : index
    %c0_52 = arith.constant 0 : index
    %26 = vector.load %arg29[%c0_51, %c0_52] : memref<1x8xf32, #tpu.memory_space<vmem>>, vector<1x8xf32>
    %c0_53 = arith.constant 0 : index
    %c0_54 = arith.constant 0 : index
    %27 = vector.load %arg30[%c0_53, %c0_54] : memref<1x64xf32, #tpu.memory_space<vmem>>, vector<1x64xf32>
    %c0_55 = arith.constant 0 : index
    %c0_56 = arith.constant 0 : index
    %28 = vector.load %arg31[%c0_55, %c0_56] : memref<8x64xbf16, #tpu.memory_space<vmem>>, vector<8x64xbf16>
    %c0_57 = arith.constant 0 : index
    %c0_58 = arith.constant 0 : index
    %29 = vector.load %arg32[%c0_57, %c0_58] : memref<1x32xf32, #tpu.memory_space<vmem>>, vector<1x32xf32>
    %c0_59 = arith.constant 0 : index
    %c0_60 = arith.constant 0 : index
    %30 = vector.load %arg33[%c0_59, %c0_60] : memref<1x32xf32, #tpu.memory_space<vmem>>, vector<1x32xf32>
    %c0_61 = arith.constant 0 : index
    %c0_62 = arith.constant 0 : index
    %31 = vector.load %arg34[%c0_61, %c0_62] : memref<1x64xf32, #tpu.memory_space<vmem>>, vector<1x64xf32>
    %c0_63 = arith.constant 0 : index
    %c0_64 = arith.constant 0 : index
    %32 = vector.load %arg35[%c0_63, %c0_64] : memref<64x8xbf16, #tpu.memory_space<vmem>>, vector<64x8xbf16>
    %c0_65 = arith.constant 0 : index
    %c0_66 = arith.constant 0 : index
    %33 = vector.load %arg1[%c0_65, %c0_66] : memref<24x64xf32, #tpu.memory_space<vmem>>, vector<24x64xf32>
    %c0_67 = arith.constant 0 : index
    %c0_68 = arith.constant 0 : index
    %34 = vector.load %arg2[%c0_67, %c0_68] : memref<24x128xf32, #tpu.memory_space<vmem>>, vector<24x128xf32>
    %35 = arith.truncf %34 : vector<24x128xf32> to vector<24x128xbf16>
    %cst = arith.constant dense<0.000000e+00> : vector<24x384xf32>
    %36 = tpu.matmul %35, %0, %cst {dimension_numbers = #tpu.dot_dimension_numbers<[1], [0], [0], [1], [0, 0, 1, 1], [], []>} : vector<24x128xbf16>, vector<128x384xbf16>, vector<24x384xf32> -> vector<24x384xf32>
    %37 = vector.broadcast %1 : vector<1x384xf32> to vector<24x384xf32>
    %38 = arith.addf %36, %37 : vector<24x384xf32>
    %39 = vector.extract_strided_slice %38 {offsets = [0, 0], sizes = [24, 128], strides = [1, 1]} : vector<24x384xf32> to vector<24x128xf32>
    %40 = vector.extract_strided_slice %38 {offsets = [0, 128], sizes = [24, 128], strides = [1, 1]} : vector<24x384xf32> to vector<24x128xf32>
    %41 = vector.extract_strided_slice %38 {offsets = [0, 256], sizes = [24, 128], strides = [1, 1]} : vector<24x384xf32> to vector<24x128xf32>
    %42 = arith.mulf %39, %40 : vector<24x128xf32>
    %43 = arith.truncf %42 : vector<24x128xf32> to vector<24x128xbf16>
    %cst_69 = arith.constant dense<0.000000e+00> : vector<24x16xf32>
    %44 = tpu.matmul %43, %2, %cst_69 {dimension_numbers = #tpu.dot_dimension_numbers<[1], [0], [0], [1], [0, 0, 1, 1], [], []>} : vector<24x128xbf16>, vector<128x16xbf16>, vector<24x16xf32> -> vector<24x16xf32>
    %45 = arith.truncf %33 : vector<24x64xf32> to vector<24x64xbf16>
    %cst_70 = arith.constant dense<0.000000e+00> : vector<24x32xf32>
    %46 = tpu.matmul %45, %3, %cst_70 {dimension_numbers = #tpu.dot_dimension_numbers<[1], [0], [0], [1], [0, 0, 1, 1], [], []>} : vector<24x64xbf16>, vector<64x32xbf16>, vector<24x32xf32> -> vector<24x32xf32>
    %47 = arith.truncf %44 : vector<24x16xf32> to vector<24x16xbf16>
    %cst_71 = arith.constant dense<0.000000e+00> : vector<24x32xf32>
    %48 = tpu.matmul %47, %4, %cst_71 {dimension_numbers = #tpu.dot_dimension_numbers<[1], [0], [0], [1], [0, 0, 1, 1], [], []>} : vector<24x16xbf16>, vector<16x32xbf16>, vector<24x32xf32> -> vector<24x32xf32>
    %49 = arith.addf %46, %48 : vector<24x32xf32>
    %50 = vector.broadcast %5 : vector<1x32xf32> to vector<24x32xf32>
    %51 = arith.addf %49, %50 : vector<24x32xf32>
    %52 = arith.truncf %41 : vector<24x128xf32> to vector<24x128xbf16>
    %cst_72 = arith.constant dense<0.000000e+00> : vector<24x64xf32>
    %53 = tpu.matmul %52, %6, %cst_72 {dimension_numbers = #tpu.dot_dimension_numbers<[1], [0], [0], [1], [0, 0, 1, 1], [], []>} : vector<24x128xbf16>, vector<128x64xbf16>, vector<24x64xf32> -> vector<24x64xf32>
    %54 = vector.broadcast %7 : vector<1x64xf32> to vector<24x64xf32>
    %55 = arith.addf %53, %54 : vector<24x64xf32>
    %56 = arith.negf %51 : vector<24x32xf32>
    %57 = math.exp %56 : vector<24x32xf32>
    %cst_73 = arith.constant 1.000000e+00 : f32
    %58 = vector.broadcast %cst_73 : f32 to vector<24x32xf32>
    %59 = arith.addf %58, %57 : vector<24x32xf32>
    %60 = arith.divf %58, %59 : vector<24x32xf32>
    %61 = arith.truncf %60 : vector<24x32xf32> to vector<24x32xbf16>
    %cst_74 = arith.constant dense<0.000000e+00> : vector<24x8xf32>
    %62 = tpu.matmul %61, %8, %cst_74 {dimension_numbers = #tpu.dot_dimension_numbers<[1], [0], [0], [1], [0, 0, 1, 1], [], []>} : vector<24x32xbf16>, vector<32x8xbf16>, vector<24x8xf32> -> vector<24x8xf32>
    %63 = vector.broadcast %9 : vector<1x8xf32> to vector<24x8xf32>
    %64 = arith.addf %62, %63 : vector<24x8xf32>
    %65 = arith.negf %64 : vector<24x8xf32>
    %66 = math.exp %65 : vector<24x8xf32>
    %cst_75 = arith.constant 1.000000e+00 : f32
    %67 = vector.broadcast %cst_75 : f32 to vector<24x8xf32>
    %68 = arith.addf %67, %66 : vector<24x8xf32>
    %69 = arith.divf %67, %68 : vector<24x8xf32>
    %70 = arith.truncf %69 : vector<24x8xf32> to vector<24x8xbf16>
    %cst_76 = arith.constant dense<0.000000e+00> : vector<24x64xf32>
    %71 = tpu.matmul %70, %10, %cst_76 {dimension_numbers = #tpu.dot_dimension_numbers<[1], [0], [0], [1], [0, 0, 1, 1], [], []>} : vector<24x8xbf16>, vector<8x64xbf16>, vector<24x64xf32> -> vector<24x64xf32>
    %72 = arith.mulf %55, %71 : vector<24x64xf32>
    %cst_77 = arith.constant 0.000000e+00 : f32
    %73 = vector.broadcast %cst_77 : f32 to vector<24x32xf32>
    %74 = arith.maximumf %51, %73 : vector<24x32xf32>
    %75 = arith.truncf %72 : vector<24x64xf32> to vector<24x64xbf16>
    %cst_78 = arith.constant dense<0.000000e+00> : vector<24x128xf32>
    %76 = tpu.matmul %75, %11, %cst_78 {dimension_numbers = #tpu.dot_dimension_numbers<[1], [0], [0], [1], [0, 0, 1, 1], [], []>} : vector<24x64xbf16>, vector<64x128xbf16>, vector<24x128xf32> -> vector<24x128xf32>
    %77 = vector.broadcast %12 : vector<1x128xf32> to vector<24x128xf32>
    %78 = arith.addf %76, %77 : vector<24x128xf32>
    %79 = vector.extract_strided_slice %78 {offsets = [0, 0], sizes = [24, 64], strides = [1, 1]} : vector<24x128xf32> to vector<24x64xf32>
    %80 = vector.extract_strided_slice %78 {offsets = [0, 64], sizes = [24, 64], strides = [1, 1]} : vector<24x128xf32> to vector<24x64xf32>
    %81 = arith.truncf %79 : vector<24x64xf32> to vector<24x64xbf16>
    %cst_79 = arith.constant dense<0.000000e+00> : vector<24x512xf32>
    %82 = tpu.matmul %81, %13, %cst_79 {dimension_numbers = #tpu.dot_dimension_numbers<[1], [0], [0], [1], [0, 0, 1, 1], [], []>} : vector<24x64xbf16>, vector<64x512xbf16>, vector<24x512xf32> -> vector<24x512xf32>
    %83 = arith.truncf %80 : vector<24x64xf32> to vector<24x64xbf16>
    %cst_80 = arith.constant dense<0.000000e+00> : vector<24x512xf32>
    %84 = tpu.matmul %83, %14, %cst_80 {dimension_numbers = #tpu.dot_dimension_numbers<[1], [0], [0], [1], [0, 0, 1, 1], [], []>} : vector<24x64xbf16>, vector<64x512xbf16>, vector<24x512xf32> -> vector<24x512xf32>
    %85 = arith.mulf %82, %84 : vector<24x512xf32>
    %86 = arith.truncf %85 : vector<24x512xf32> to vector<24x512xbf16>
    %cst_81 = arith.constant dense<0.000000e+00> : vector<24x64xf32>
    %87 = tpu.matmul %86, %15, %cst_81 {dimension_numbers = #tpu.dot_dimension_numbers<[1], [0], [0], [1], [0, 0, 1, 1], [], []>} : vector<24x512xbf16>, vector<512x64xbf16>, vector<24x64xf32> -> vector<24x64xf32>
    %88 = arith.truncf %87 : vector<24x64xf32> to vector<24x64xbf16>
    %cst_82 = arith.constant dense<0.000000e+00> : vector<24x64xf32>
    %89 = tpu.matmul %88, %16, %cst_82 {dimension_numbers = #tpu.dot_dimension_numbers<[1], [0], [0], [1], [0, 0, 1, 1], [], []>} : vector<24x64xbf16>, vector<64x64xbf16>, vector<24x64xf32> -> vector<24x64xf32>
    %90 = vector.broadcast %17 : vector<1x64xf32> to vector<24x64xf32>
    %91 = arith.addf %89, %90 : vector<24x64xf32>
    %92 = arith.mulf %91, %91 : vector<24x64xf32>
    %93 = arith.truncf %92 : vector<24x64xf32> to vector<24x64xbf16>
    %cst_83 = arith.constant dense<0.000000e+00> : vector<24x8xf32>
    %94 = tpu.matmul %93, %19, %cst_83 {dimension_numbers = #tpu.dot_dimension_numbers<[1], [0], [0], [1], [0, 0, 1, 1], [], []>} : vector<24x64xbf16>, vector<64x8xbf16>, vector<24x8xf32> -> vector<24x8xf32>
    %95 = arith.mulf %94, %94 : vector<24x8xf32>
    %cst_84 = arith.constant 1.000000e-16 : f32
    %96 = vector.broadcast %cst_84 : f32 to vector<24x8xf32>
    %97 = arith.addf %95, %96 : vector<24x8xf32>
    %98 = math.sqrt %97 : vector<24x8xf32>
    %99 = math.sqrt %98 : vector<24x8xf32>
    %cst_85 = arith.constant dense<0.000000e+00> : vector<24xf32>
    %100 = vector.multi_reduction <add>, %99, %cst_85 [1] : vector<24x8xf32> to vector<24xf32>
    %101 = vector.shape_cast %100 : vector<24xf32> to vector<24x1xf32>
    %cst_86 = arith.constant 8.000000e+00 : f32
    %102 = vector.broadcast %cst_86 : f32 to vector<24x1xf32>
    %103 = arith.divf %101, %102 : vector<24x1xf32>
    %cst_87 = arith.constant 9.99999997E-7 : f32
    %104 = vector.broadcast %cst_87 : f32 to vector<24x1xf32>
    %105 = arith.addf %103, %104 : vector<24x1xf32>
    %106 = vector.broadcast %18 : vector<1x64xf32> to vector<24x64xf32>
    %107 = vector.broadcast %105 : vector<24x1xf32> to vector<24x64xf32>
    %108 = arith.divf %106, %107 : vector<24x64xf32>
    %109 = arith.mulf %91, %108 : vector<24x64xf32>
    %110 = arith.addf %109, %72 : vector<24x64xf32>
    %111 = arith.truncf %110 : vector<24x64xf32> to vector<24x64xbf16>
    %cst_88 = arith.constant dense<0.000000e+00> : vector<24x8xf32>
    %112 = tpu.matmul %111, %20, %cst_88 {dimension_numbers = #tpu.dot_dimension_numbers<[1], [0], [0], [1], [0, 0, 1, 1], [], []>} : vector<24x64xbf16>, vector<64x8xbf16>, vector<24x8xf32> -> vector<24x8xf32>
    %cst_89 = arith.constant 4.471500e-02 : f32
    %113 = vector.broadcast %cst_89 : f32 to vector<24x8xf32>
    %114 = arith.mulf %113, %112 : vector<24x8xf32>
    %115 = arith.mulf %114, %112 : vector<24x8xf32>
    %116 = arith.mulf %115, %112 : vector<24x8xf32>
    %117 = arith.addf %112, %116 : vector<24x8xf32>
    %cst_90 = arith.constant 2.000000e+00 : f32
    %118 = vector.broadcast %cst_90 : f32 to vector<24x8xf32>
    %119 = arith.mulf %118, %117 : vector<24x8xf32>
    %cst_91 = arith.constant 0.797884583 : f32
    %120 = vector.broadcast %cst_91 : f32 to vector<24x8xf32>
    %121 = arith.mulf %120, %119 : vector<24x8xf32>
    %122 = arith.negf %121 : vector<24x8xf32>
    %123 = math.exp %122 : vector<24x8xf32>
    %cst_92 = arith.constant 1.000000e+00 : f32
    %124 = vector.broadcast %cst_92 : f32 to vector<24x8xf32>
    %125 = arith.addf %124, %123 : vector<24x8xf32>
    %126 = arith.divf %124, %125 : vector<24x8xf32>
    %127 = arith.truncf %126 : vector<24x8xf32> to vector<24x8xbf16>
    %cst_93 = arith.constant dense<0.000000e+00> : vector<24x64xf32>
    %128 = tpu.matmul %127, %21, %cst_93 {dimension_numbers = #tpu.dot_dimension_numbers<[1], [0], [0], [1], [0, 0, 1, 1], [], []>} : vector<24x8xbf16>, vector<8x64xbf16>, vector<24x64xf32> -> vector<24x64xf32>
    %129 = arith.mulf %110, %128 : vector<24x64xf32>
    %130 = arith.truncf %129 : vector<24x64xf32> to vector<24x64xbf16>
    %cst_94 = arith.constant dense<0.000000e+00> : vector<24x64xf32>
    %131 = tpu.matmul %130, %22, %cst_94 {dimension_numbers = #tpu.dot_dimension_numbers<[1], [0], [0], [1], [0, 0, 1, 1], [], []>} : vector<24x64xbf16>, vector<64x64xbf16>, vector<24x64xf32> -> vector<24x64xf32>
    %132 = vector.broadcast %23 : vector<1x64xf32> to vector<24x64xf32>
    %133 = arith.addf %131, %132 : vector<24x64xf32>
    %134 = arith.truncf %133 : vector<24x64xf32> to vector<24x64xbf16>
    %cst_95 = arith.constant dense<0.000000e+00> : vector<24x8xf32>
    %135 = tpu.matmul %134, %24, %cst_95 {dimension_numbers = #tpu.dot_dimension_numbers<[1], [0], [0], [1], [0, 0, 1, 1], [], []>} : vector<24x64xbf16>, vector<64x8xbf16>, vector<24x8xf32> -> vector<24x8xf32>
    %136 = arith.truncf %74 : vector<24x32xf32> to vector<24x32xbf16>
    %cst_96 = arith.constant dense<0.000000e+00> : vector<24x8xf32>
    %137 = tpu.matmul %136, %25, %cst_96 {dimension_numbers = #tpu.dot_dimension_numbers<[1], [0], [0], [1], [0, 0, 1, 1], [], []>} : vector<24x32xbf16>, vector<32x8xbf16>, vector<24x8xf32> -> vector<24x8xf32>
    %138 = arith.addf %135, %137 : vector<24x8xf32>
    %139 = vector.broadcast %26 : vector<1x8xf32> to vector<24x8xf32>
    %140 = arith.addf %138, %139 : vector<24x8xf32>
    %141 = vector.broadcast %27 : vector<1x64xf32> to vector<24x64xf32>
    %142 = arith.mulf %133, %141 : vector<24x64xf32>
    %143 = arith.truncf %140 : vector<24x8xf32> to vector<24x8xbf16>
    %cst_97 = arith.constant dense<0.000000e+00> : vector<24x64xf32>
    %144 = tpu.matmul %143, %28, %cst_97 {dimension_numbers = #tpu.dot_dimension_numbers<[1], [0], [0], [1], [0, 0, 1, 1], [], []>} : vector<24x8xbf16>, vector<8x64xbf16>, vector<24x64xf32> -> vector<24x64xf32>
    %145 = arith.addf %142, %144 : vector<24x64xf32>
    %cst_98 = arith.constant dense<0.000000e+00> : vector<24xf32>
    %146 = vector.multi_reduction <add>, %74, %cst_98 [1] : vector<24x32xf32> to vector<24xf32>
    %147 = vector.shape_cast %146 : vector<24xf32> to vector<24x1xf32>
    %cst_99 = arith.constant 3.200000e+01 : f32
    %148 = vector.broadcast %cst_99 : f32 to vector<24x1xf32>
    %149 = arith.divf %147, %148 : vector<24x1xf32>
    %150 = vector.broadcast %149 : vector<24x1xf32> to vector<24x32xf32>
    %151 = arith.subf %74, %150 : vector<24x32xf32>
    %152 = arith.mulf %151, %151 : vector<24x32xf32>
    %cst_100 = arith.constant dense<0.000000e+00> : vector<24xf32>
    %153 = vector.multi_reduction <add>, %152, %cst_100 [1] : vector<24x32xf32> to vector<24xf32>
    %154 = vector.shape_cast %153 : vector<24xf32> to vector<24x1xf32>
    %cst_101 = arith.constant 3.200000e+01 : f32
    %155 = vector.broadcast %cst_101 : f32 to vector<24x1xf32>
    %156 = arith.divf %154, %155 : vector<24x1xf32>
    %157 = vector.broadcast %149 : vector<24x1xf32> to vector<24x32xf32>
    %158 = arith.subf %74, %157 : vector<24x32xf32>
    %cst_102 = arith.constant 9.99999974E-6 : f32
    %159 = vector.broadcast %cst_102 : f32 to vector<24x1xf32>
    %160 = arith.addf %156, %159 : vector<24x1xf32>
    %161 = math.rsqrt %160 : vector<24x1xf32>
    %162 = vector.broadcast %161 : vector<24x1xf32> to vector<24x32xf32>
    %163 = arith.mulf %158, %162 : vector<24x32xf32>
    %164 = vector.broadcast %29 : vector<1x32xf32> to vector<24x32xf32>
    %165 = arith.mulf %163, %164 : vector<24x32xf32>
    %166 = vector.broadcast %30 : vector<1x32xf32> to vector<24x32xf32>
    %167 = arith.addf %165, %166 : vector<24x32xf32>
    %168 = arith.mulf %145, %145 : vector<24x64xf32>
    %169 = arith.truncf %168 : vector<24x64xf32> to vector<24x64xbf16>
    %cst_103 = arith.constant dense<0.000000e+00> : vector<24x8xf32>
    %170 = tpu.matmul %169, %32, %cst_103 {dimension_numbers = #tpu.dot_dimension_numbers<[1], [0], [0], [1], [0, 0, 1, 1], [], []>} : vector<24x64xbf16>, vector<64x8xbf16>, vector<24x8xf32> -> vector<24x8xf32>
    %171 = arith.mulf %170, %170 : vector<24x8xf32>
    %cst_104 = arith.constant 1.000000e-16 : f32
    %172 = vector.broadcast %cst_104 : f32 to vector<24x8xf32>
    %173 = arith.addf %171, %172 : vector<24x8xf32>
    %174 = math.sqrt %173 : vector<24x8xf32>
    %175 = math.sqrt %174 : vector<24x8xf32>
    %cst_105 = arith.constant dense<0.000000e+00> : vector<24xf32>
    %176 = vector.multi_reduction <add>, %175, %cst_105 [1] : vector<24x8xf32> to vector<24xf32>
    %177 = vector.shape_cast %176 : vector<24xf32> to vector<24x1xf32>
    %cst_106 = arith.constant 8.000000e+00 : f32
    %178 = vector.broadcast %cst_106 : f32 to vector<24x1xf32>
    %179 = arith.divf %177, %178 : vector<24x1xf32>
    %cst_107 = arith.constant 9.99999997E-7 : f32
    %180 = vector.broadcast %cst_107 : f32 to vector<24x1xf32>
    %181 = arith.addf %179, %180 : vector<24x1xf32>
    %182 = vector.broadcast %31 : vector<1x64xf32> to vector<24x64xf32>
    %183 = vector.broadcast %181 : vector<24x1xf32> to vector<24x64xf32>
    %184 = arith.divf %182, %183 : vector<24x64xf32>
    %185 = arith.mulf %145, %184 : vector<24x64xf32>
    %c0_108 = arith.constant 0 : index
    %c0_109 = arith.constant 0 : index
    %186 = vector.load %arg36[%c0_108, %c0_109] : memref<24x32xf32, #tpu.memory_space<vmem>>, vector<24x32xf32>
    tpu.vector_store %arg36[%c0_108, %c0_109], %167 {strides = array<i32>} : memref<24x32xf32, #tpu.memory_space<vmem>>, vector<24x32xf32>,
    %c0_110 = arith.constant 0 : index
    %c0_111 = arith.constant 0 : index
    %187 = vector.load %arg37[%c0_110, %c0_111] : memref<24x64xf32, #tpu.memory_space<vmem>>, vector<24x64xf32>
    tpu.vector_store %arg37[%c0_110, %c0_111], %185 {strides = array<i32>} : memref<24x64xf32, #tpu.memory_space<vmem>>, vector<24x64xf32>,
    return
  }
  func.func @transform_0(%arg0: i32) -> (i32, i32) {
    %c0_i32 = arith.constant 0 : i32
    %c0_i32_0 = arith.constant 0 : i32
    return %arg0, %c0_i32 : i32, i32
  }
  func.func @transform_1(%arg0: i32) -> (i32, i32) {
    %c0_i32 = arith.constant 0 : i32
    %c0_i32_0 = arith.constant 0 : i32
    return %arg0, %c0_i32 : i32, i32
  }
  func.func @transform_2(%arg0: i32) -> (i32, i32) {
    %c0_i32 = arith.constant 0 : i32
    %c0_i32_0 = arith.constant 0 : i32
    %c0_i32_1 = arith.constant 0 : i32
    return %c0_i32, %c0_i32_0 : i32, i32
  }
  func.func @transform_3(%arg0: i32) -> (i32, i32) {
    %c0_i32 = arith.constant 0 : i32
    %c0_i32_0 = arith.constant 0 : i32
    %c0_i32_1 = arith.constant 0 : i32
    return %c0_i32, %c0_i32_0 : i32, i32
  }
  func.func @transform_4(%arg0: i32) -> (i32, i32) {
    %c0_i32 = arith.constant 0 : i32
    %c0_i32_0 = arith.constant 0 : i32
    %c0_i32_1 = arith.constant 0 : i32
    return %c0_i32, %c0_i32_0 : i32, i32
  }
  func.func @transform_5(%arg0: i32) -> (i32, i32) {
    %c0_i32 = arith.constant 0 : i32
    %c0_i32_0 = arith.constant 0 : i32
    %c0_i32_1 = arith.constant 0 : i32
    return %c0_i32, %c0_i32_0 : i32, i32
  }
  func.func @transform_6(%arg0: i32) -> (i32, i32) {
    %c0_i32 = arith.constant 0 : i32
    %c0_i32_0 = arith.constant 0 : i32
    %c0_i32_1 = arith.constant 0 : i32
    return %c0_i32, %c0_i32_0 : i32, i32
  }
  func.func @transform_7(%arg0: i32) -> (i32, i32) {
    %c0_i32 = arith.constant 0 : i32
    %c0_i32_0 = arith.constant 0 : i32
    %c0_i32_1 = arith.constant 0 : i32
    return %c0_i32, %c0_i32_0 : i32, i32
  }
  func.func @transform_8(%arg0: i32) -> (i32, i32) {
    %c0_i32 = arith.constant 0 : i32
    %c0_i32_0 = arith.constant 0 : i32
    %c0_i32_1 = arith.constant 0 : i32
    return %c0_i32, %c0_i32_0 : i32, i32
  }
  func.func @transform_9(%arg0: i32) -> (i32, i32) {
    %c0_i32 = arith.constant 0 : i32
    %c0_i32_0 = arith.constant 0 : i32
    %c0_i32_1 = arith.constant 0 : i32
    return %c0_i32, %c0_i32_0 : i32, i32
  }
  func.func @transform_10(%arg0: i32) -> (i32, i32) {
    %c0_i32 = arith.constant 0 : i32
    %c0_i32_0 = arith.constant 0 : i32
    %c0_i32_1 = arith.constant 0 : i32
    return %c0_i32, %c0_i32_0 : i32, i32
  }
  func.func @transform_11(%arg0: i32) -> (i32, i32) {
    %c0_i32 = arith.constant 0 : i32
    %c0_i32_0 = arith.constant 0 : i32
    %c0_i32_1 = arith.constant 0 : i32
    return %c0_i32, %c0_i32_0 : i32, i32
  }
  func.func @transform_12(%arg0: i32) -> (i32, i32) {
    %c0_i32 = arith.constant 0 : i32
    %c0_i32_0 = arith.constant 0 : i32
    %c0_i32_1 = arith.constant 0 : i32
    return %c0_i32, %c0_i32_0 : i32, i32
  }
  func.func @transform_13(%arg0: i32) -> (i32, i32) {
    %c0_i32 = arith.constant 0 : i32
    %c0_i32_0 = arith.constant 0 : i32
    %c0_i32_1 = arith.constant 0 : i32
    return %c0_i32, %c0_i32_0 : i32, i32
  }
  func.func @transform_14(%arg0: i32) -> (i32, i32) {
    %c0_i32 = arith.constant 0 : i32
    %c0_i32_0 = arith.constant 0 : i32
    %c0_i32_1 = arith.constant 0 : i32
    return %c0_i32, %c0_i32_0 : i32, i32
  }
  func.func @transform_15(%arg0: i32) -> (i32, i32) {
    %c0_i32 = arith.constant 0 : i32
    %c0_i32_0 = arith.constant 0 : i32
    %c0_i32_1 = arith.constant 0 : i32
    return %c0_i32, %c0_i32_0 : i32, i32
  }
  func.func @transform_16(%arg0: i32) -> (i32, i32) {
    %c0_i32 = arith.constant 0 : i32
    %c0_i32_0 = arith.constant 0 : i32
    %c0_i32_1 = arith.constant 0 : i32
    return %c0_i32, %c0_i32_0 : i32, i32
  }
  func.func @transform_17(%arg0: i32) -> (i32, i32) {
    %c0_i32 = arith.constant 0 : i32
    %c0_i32_0 = arith.constant 0 : i32
    %c0_i32_1 = arith.constant 0 : i32
    return %c0_i32, %c0_i32_0 : i32, i32
  }
  func.func @transform_18(%arg0: i32) -> (i32, i32) {
    %c0_i32 = arith.constant 0 : i32
    %c0_i32_0 = arith.constant 0 : i32
    %c0_i32_1 = arith.constant 0 : i32
    return %c0_i32, %c0_i32_0 : i32, i32
  }
  func.func @transform_19(%arg0: i32) -> (i32, i32) {
    %c0_i32 = arith.constant 0 : i32
    %c0_i32_0 = arith.constant 0 : i32
    %c0_i32_1 = arith.constant 0 : i32
    return %c0_i32, %c0_i32_0 : i32, i32
  }
  func.func @transform_20(%arg0: i32) -> (i32, i32) {
    %c0_i32 = arith.constant 0 : i32
    %c0_i32_0 = arith.constant 0 : i32
    %c0_i32_1 = arith.constant 0 : i32
    return %c0_i32, %c0_i32_0 : i32, i32
  }
  func.func @transform_21(%arg0: i32) -> (i32, i32) {
    %c0_i32 = arith.constant 0 : i32
    %c0_i32_0 = arith.constant 0 : i32
    %c0_i32_1 = arith.constant 0 : i32
    return %c0_i32, %c0_i32_0 : i32, i32
  }
  func.func @transform_22(%arg0: i32) -> (i32, i32) {
    %c0_i32 = arith.constant 0 : i32
    %c0_i32_0 = arith.constant 0 : i32
    %c0_i32_1 = arith.constant 0 : i32
    return %c0_i32, %c0_i32_0 : i32, i32
  }
  func.func @transform_23(%arg0: i32) -> (i32, i32) {
    %c0_i32 = arith.constant 0 : i32
    %c0_i32_0 = arith.constant 0 : i32
    %c0_i32_1 = arith.constant 0 : i32
    return %c0_i32, %c0_i32_0 : i32, i32
  }
  func.func @transform_24(%arg0: i32) -> (i32, i32) {
    %c0_i32 = arith.constant 0 : i32
    %c0_i32_0 = arith.constant 0 : i32
    %c0_i32_1 = arith.constant 0 : i32
    return %c0_i32, %c0_i32_0 : i32, i32
  }
  func.func @transform_25(%arg0: i32) -> (i32, i32) {
    %c0_i32 = arith.constant 0 : i32
    %c0_i32_0 = arith.constant 0 : i32
    %c0_i32_1 = arith.constant 0 : i32
    return %c0_i32, %c0_i32_0 : i32, i32
  }
  func.func @transform_26(%arg0: i32) -> (i32, i32) {
    %c0_i32 = arith.constant 0 : i32
    %c0_i32_0 = arith.constant 0 : i32
    %c0_i32_1 = arith.constant 0 : i32
    return %c0_i32, %c0_i32_0 : i32, i32
  }
  func.func @transform_27(%arg0: i32) -> (i32, i32) {
    %c0_i32 = arith.constant 0 : i32
    %c0_i32_0 = arith.constant 0 : i32
    %c0_i32_1 = arith.constant 0 : i32
    return %c0_i32, %c0_i32_0 : i32, i32
  }
  func.func @transform_28(%arg0: i32) -> (i32, i32) {
    %c0_i32 = arith.constant 0 : i32
    %c0_i32_0 = arith.constant 0 : i32
    %c0_i32_1 = arith.constant 0 : i32
    return %c0_i32, %c0_i32_0 : i32, i32
  }
  func.func @transform_29(%arg0: i32) -> (i32, i32) {
    %c0_i32 = arith.constant 0 : i32
    %c0_i32_0 = arith.constant 0 : i32
    %c0_i32_1 = arith.constant 0 : i32
    return %c0_i32, %c0_i32_0 : i32, i32
  }
  func.func @transform_30(%arg0: i32) -> (i32, i32) {
    %c0_i32 = arith.constant 0 : i32
    %c0_i32_0 = arith.constant 0 : i32
    %c0_i32_1 = arith.constant 0 : i32
    return %c0_i32, %c0_i32_0 : i32, i32
  }
  func.func @transform_31(%arg0: i32) -> (i32, i32) {
    %c0_i32 = arith.constant 0 : i32
    %c0_i32_0 = arith.constant 0 : i32
    %c0_i32_1 = arith.constant 0 : i32
    return %c0_i32, %c0_i32_0 : i32, i32
  }
  func.func @transform_32(%arg0: i32) -> (i32, i32) {
    %c0_i32 = arith.constant 0 : i32
    %c0_i32_0 = arith.constant 0 : i32
    %c0_i32_1 = arith.constant 0 : i32
    return %c0_i32, %c0_i32_0 : i32, i32
  }
  func.func @transform_33(%arg0: i32) -> (i32, i32) {
    %c0_i32 = arith.constant 0 : i32
    %c0_i32_0 = arith.constant 0 : i32
    %c0_i32_1 = arith.constant 0 : i32
    return %c0_i32, %c0_i32_0 : i32, i32
  }
  func.func @transform_34(%arg0: i32) -> (i32, i32) {
    %c0_i32 = arith.constant 0 : i32
    %c0_i32_0 = arith.constant 0 : i32
    %c0_i32_1 = arith.constant 0 : i32
    return %c0_i32, %c0_i32_0 : i32, i32
  }
  func.func @transform_35(%arg0: i32) -> (i32, i32) {
    %c0_i32 = arith.constant 0 : i32
    %c0_i32_0 = arith.constant 0 : i32
    return %arg0, %c0_i32 : i32, i32
  }
  func.func @transform_36(%arg0: i32) -> (i32, i32) {
    %c0_i32 = arith.constant 0 : i32
    %c0_i32_0 = arith.constant 0 : i32
    return %arg0, %c0_i32 : i32, i32
  }
}

</mosaic_0001>

<bundles_post_ra>
// kernel: eq.8
= control target key start
LH: loop header
LB: loop body
LE: loop exit
PB: predicated region body
PF: predicated region fallthrough
CT: control target
= control target key end

     0   :  { %vm7_vm0 = vcmask 97280   ;;  %vm13_vm1 = vcmask 195680   ;;  %s39_s0 = inlined_call_operand.vmem [shape: s32[2,12], index: 0, kind: input, shape index: {}]   ;;  %s40_s1 = inlined_call_operand.vmem [shape: s32[24], index: 1, kind: output, shape index: {}]  }
   0x1   :  { %v4_v0 = vld [vmem:[%s39_s0] sm:$0x3]  ;;  %s22_s0 = smov 12  }
   0x2   :  { %5 = vst [vmem:[#allocation1] sm:$0x3] %v4_v0 }
   0x9   :  { %v10_v1 = vld [vmem:[#allocation1 + $0x1] sm:$0x1]   ;;  %v6_v2 = vld [vmem:[#allocation1] sm:$0x1]  }
   0xa   :  { %11 = vrot.lane.b32.xlu0 %v10_v1, %s22_s0  ;;  %8 = vst.msk [vmem:[#allocation0] sm:$0x1] %vm7_vm0, %v6_v2  }
  0x7c   :  { %v12_v3 = vpop.permute.xlu0 %11  }
  0x7d   :  { %14 = vst.msk [vmem:[#allocation0] sm:$0x1] %vm13_vm1, %v12_v3  }
  0x84   :  { %v18_v4 = vld [vmem:[#allocation0] sm:$0x1] }
  0x85   :  { %20 = vst [vmem:[%s40_s1] sm:$0x1] %v18_v4 }

// kernel: _lambda_.6
= control target key start
LH: loop header
LB: loop body
LE: loop exit
PB: predicated region body
PF: predicated region fallthrough
CT: control target
= control target key end

     0   :  { %vm35_vm0 = vcmask 1043456   ;;  %vm28_vm1 = vcmask 64512   ;;  %vm87_vm2 = vcmask 523264   ;;  %s152_s1 = inlined_call_operand.vmem [shape: bf16[8,64], index: 1, kind: input, shape index: {}]   ;;  %s153_s0 = inlined_call_operand.vmem [shape: f32[24,8], index: 0, kind: input, shape index: {}]   ;;  %s154_s2 = inlined_call_operand.vmem [shape: f32[1,64], index: 2, kind: input, shape index: {}]   ;;  %s155_s3 = inlined_call_operand.vmem [shape: f32[24,64], index: 3, kind: output, shape index: {}]  }
   0x1   :  { %v18_v0 = vld [vmem:[%s152_s1] sm:$0xf]  ;;  %v16_v2 = vld [vmem:[%s153_s0 + $0x8] sm:$0xff]  ;;  %v17_v4 = vld [vmem:[%s153_s0 + $0x10] sm:$0xff] }
   0x2   :  { %v15_v1 = vld [vmem:[%s153_s0] sm:$0xff]  ;;  %107 = vmatprep.subr.msk.bf16.mxu0 %vm35_vm0, %v18_v0  ;;  %v37_v3 = vsel %vm35_vm0, %v18_v0, 0  ;;  %v20_v6 = vpack.c.bf16 %v17_v4, %v17_v4 }
   0x3   :  { %v19_v5 = vpack.c.bf16 %v16_v2, %v15_v1  ;;  %102 = vmatpush3.bf16.msra.mxu0 %v37_v3  ;;  %v95_v7 = vld [vmem:[%s154_s2] ss:$0 sm:$0xff] }
   0x5   :  { %103 = vmatprep.mubr.msk.bf16.mxu0 %vm28_vm1, %v19_v5 }
   0x6   :  { %104 = vmatmul.mubr.msk.bf16.vlgmr.msra.gmra.mrb[0].mxu0 %vm28_vm1, %v20_v6 }
  0xd9   :  { %v105_v8 = vpop.f32.mrb[0].mxu0 }
  0xda   :  { %v82_v9 = vadd.f32 %v105_v8, %v95_v7  ;;  %v73_v10 = vpop.f32.mrb[1].mxu0 }
  0xdb   :  { %v74_v11 = vadd.f32 %v95_v7, %v73_v10  ;;  %v106_v12 = vpop.f32.mrb[2].mxu0 }
  0xdc   :  { %90 = vst.msk [vmem:[%s155_s3 + $0x10] sm:$0xff] %vm87_vm2, %v82_v9  ;;  %v76_v13 = vpop.f32.mrb[3].mxu0 }
  0xdd   :  { %88 = vst.msk [vmem:[%s155_s3] sm:$0xff] %vm87_vm2, %v74_v11  ;;  %v77_v14 = vadd.f32 %v95_v7, %v76_v13 }
  0xdf   :  { %89 = vst.msk [vmem:[%s155_s3 + $0x8] sm:$0xff] %vm87_vm2, %v77_v14 }

// kernel: _lambda_.11
= control target key start
LH: loop header
LB: loop body
LE: loop exit
PB: predicated region body
PF: predicated region fallthrough
CT: control target
= control target key end

     0   :  { %s862_s0 = inlined_call_operand.vmem [shape: f32[24,32], index: 0, kind: input, shape index: {}]   ;;  %s863_s1 = inlined_call_operand.vmem [shape: f32[24,64], index: 1, kind: input, shape index: {}]   ;;  %s864_s2 = inlined_call_operand.vmem [shape: bf16[64,192], index: 2, kind: input, shape index: {}]   ;;  %s865_s3 = inlined_call_operand.vmem [shape: f32[1,192], index: 3, kind: input, shape index: {}]   ;;  %s866_s4 = inlined_call_operand.vmem [shape: bf16[64,8], index: 4, kind: input, shape index: {}]   ;;  %s867_s5 = inlined_call_operand.vmem [shape: bf16[32,1], index: 5, kind: input, shape index: {}]   ;;  %s868_s6 = inlined_call_operand.vmem [shape: bf16[8,1], index: 6, kind: input, shape index: {}]   ;;  %s869_s7 = inlined_call_operand.<no memory space> [shape: f32[1,1], index: 7, kind: input, shape index: {}]   ;;  %s870_s8 = inlined_call_operand.vmem [shape: bf16[64,8], index: 8, kind: input, shape index: {}]   ;;  %s871_s9 = inlined_call_operand.vmem [shape: f32[1,8], index: 9, kind: input, shape index: {}]   ;;  %s872_s10 = inlined_call_operand.hbm [shape: f32[24,1], index: 10, kind: output, shape index: {0}]   ;;  %s873_s11 = inlined_call_operand.vmem [shape: f32[24,8], index: 11, kind: output, shape index: {1}]  }
   0x1   :  { %v17_v0 = vstv %s869_s7 }
   0x2   :  { %18 = vst [vmem:[#allocation2] sm:$0x1] %v17_v0 }
   0x3   :  { %v630_v1 = vld [vmem:[%s864_s2 + $0x4] ss:$8 sps:$4 sm:$0xff]   ;;  %v632_v2 = vld [vmem:[%s864_s2] ss:$8 sps:$4 sm:$0xff]   ;;  %v676_v3 = vmov 0  }
   0x4   :  { %171 = vmatprep.mubr.bf16.mxu0 %v676_v3  ;;  %139 = vmatprep.subr.bf16.mxu0 %v630_v1  ;;  %v633_v4 = vld [vmem:[%s864_s2 + $0x14] ss:$8 sps:$4 sm:$0xff]   ;;  %v635_v5 = vld [vmem:[%s864_s2 + $0x10] ss:$8 sps:$4 sm:$0xff]   ;;  %v636_v6 = vld [vmem:[%s864_s2 + $0x24] ss:$8 sps:$4 sm:$0xff]  }
   0x5   :  { %140 = vmatpush1.bf16.msra.mxu0 %v632_v2  ;;  %v638_v7 = vld [vmem:[%s864_s2 + $0x20] ss:$8 sps:$4 sm:$0xff]   ;;  %v639_v8 = vld [vmem:[%s864_s2 + $0x34] ss:$8 sps:$4 sm:$0xff]   ;;  %v641_v9 = vld [vmem:[%s864_s2 + $0x30] ss:$8 sps:$4 sm:$0xff]  }
   0x6   :  { %141 = vmatprep.subr.bf16.mxu0 %v633_v4  ;;  %v76_v10 = vld [vmem:[%s863_s1] sm:$0xff]  ;;  %v77_v11 = vld [vmem:[%s863_s1 + $0x8] sm:$0xff] }
   0x9   :  { %142 = vmatpush1.bf16.msra.mxu0 %v635_v5 }
   0xa   :  { %143 = vmatprep.subr.bf16.mxu0 %v636_v6 }
   0xd   :  { %144 = vmatpush1.bf16.msra.mxu0 %v638_v7 }
   0xe   :  { %145 = vmatprep.subr.bf16.mxu0 %v639_v8 }
   0xf   :  { %19 = vsyncpa [#allocation4], 0  ;;  %v79_v12 = vpack.c.bf16 %v77_v11, %v76_v10  ;;  %vm132_vm0 = vcmask 523264   ;;  %v78_v13 = vld [vmem:[%s863_s1 + $0x10] sm:$0xff]  ;;  %v642_v15 = vld [vmem:[%s866_s4] sm:$0xff]   ;;  %v82_v16 = vlaneseq  ;;  %vm296_vm1 = vcmask 1043456  }
  0x10   :  { %v80_v14 = vpack.c.bf16 %v78_v13, %v78_v13  ;;  %586 = vmatprep.subr.bf16.mxu1 %v642_v15  ;;  %v643_v17 = vld [vmem:[%s866_s4 + $0x8] sm:$0xff]   ;;  %v644_v19 = vld [vmem:[%s866_s4 + $0x10] sm:$0xff]   ;;  %v49_v21 = vld [vmem:[%s865_s3] sm:$0x3]  ;;  %s677_s3 = smov 64   ;;  %vm360_vm2 = vcmask 261120  }
  0x11   :  { %146 = vmatpush1.bf16.msra.mxu0 %v641_v9  ;;  %587 = vmatpush3.bf16.msra.mxu1 %v642_v15  ;;  %v83_v18 = vshrl.u32 %v82_v16, 7  ;;  %v645_v23 = vld [vmem:[%s866_s4 + $0x18] sm:$0xff]   ;;  %v62_v30 = vld [vmem:[%s868_s6] sm:$0xf]  ;;  %v647_v51 = vld [vmem:[%s867_s5 + $0x8] sm:$0xff]   ;;  %vm289_vm3 = vcmask 64512  }
  0x12   :  { %588 = vmatprep.subr.bf16.mxu1 %v643_v17  ;;  %v298_v32 = vsel %vm296_vm1, %v62_v30, 0  ;;  %v646_v33 = vld [vmem:[%s867_s5] sm:$0xff]   ;;  %v74_v53 = vld [vmem:[%s862_s0 + $0x8] sm:$0xff]  ;;  %v75_v56 = vld [vmem:[%s862_s0 + $0x10] sm:$0xff]  ;;  %vm510_vm4 = vcmask 7168  }
  0x13   :  { %v84_v20 = vsub.s32 0, %v83_v18  ;;  %v88_v22 = vsub.s32 1, %v83_v18  ;;  %604 = vmatprep.subr.bf16.mxu0 %v646_v33  ;;  %v73_v52 = vld [vmem:[%s862_s0] sm:$0xff]  ;;  %v286_v57 = vpack.c.bf16 %v75_v56, %v75_v56  ;;  %v649_v0 = vld [vmem:[%s870_s8 + $0x8] sm:$0xff]   ;;  %v650_v1 = vld [vmem:[%s870_s8 + $0x10] sm:$0xff]  }
  0x14   :  { %545 = vmatmul.mubr.msk.bf16.vlgmr.msra.gmra.mrb[0].mxu0 %vm132_vm0, %v79_v12  ;;  %v285_v54 = vpack.c.bf16 %v74_v53, %v73_v52  ;;  %v648_v55 = vld [vmem:[%s870_s8] sm:$0xff]   ;;  %v651_v2 = vld [vmem:[%s870_s8 + $0x18] sm:$0xff]   ;;  %s678_s8 = smov [#allocation3]  }
  0x15   :  { %181 = vmatprep.mubr.bf16.mxu0 %v676_v3  ;;  %589 = vmatpush3.bf16.msra.mxu1 %v643_v17  ;;  %v85_v24 = vrot.slane %v49_v21, %v84_v20  ;;  %v794_v26 = vrot.slane %v49_v21, %v88_v22  ;;  %v559_v10 = vld [vmem:[#allocation2] ss:$0 sm:$0xff]  ;;  %s522_s24 = sshll.u32 %s678_s8, 4  ;;  %s523_s24 = int_to_ptr.vmem [resolvable:$true] %s522_s24 }
  0x16   :  { %590 = vmatprep.subr.bf16.mxu1 %v644_v19  ;;  %605 = vmatpush3.bf16.msra.mxu0 %v646_v33  ;;  %s652_s25 = scalar_lea.vmem %s523_s24, 384  ;;  %p657_p1 = scmp.lt.s32.totalorder %s523_s24, %s523_s24 }
  0x17   :  { %606 = vmatprep.subr.bf16.mxu0 %v647_v51  ;;  %p653_p0 = scmp.ne.s32.totalorder %s523_s24, %s652_s25  ;;  %p658_p2 = scmp.lt.s32.totalorder %s652_s25, %s652_s25 }
  0x19   :  { %591 = vmatpush3.bf16.msra.mxu1 %v644_v19  ;;  %p659_p3 = por %p658_p2, %p657_p1 }
  0x1a   :  { %592 = vmatprep.subr.bf16.mxu1 %v645_v23  ;;  %607 = vmatpush3.bf16.msra.mxu0 %v647_v51 }
  0x1b   :  { %p660_p4 = pnand %p659_p3, %p653_p0 }
  0x1c   :  { %546 = vmatmul.mubr.msk.bf16.gmra.mrb[4].mxu0 %vm132_vm0, %v80_v14 }
  0x1d   :  { %593 = vmatpush3.bf16.msra.mxu1 %v645_v23  ;;  %608 = vmatprep.mubr.msk.bf16.mxu0 %vm360_vm2, %v285_v54 }
  0x1e   :  { %624 = vmatprep.subr.msk.bf16.mxu1 %vm296_vm1, %v62_v30 }
  0x24   :  { %609 = vmatmul.mubr.msk.bf16.vlgmr.msra.gmra.mrb[8].mxu0 %vm360_vm2, %v286_v57 }
  0xe7   :  { %v173_v25 = vpop.f32.mrb[0].mxu0 }
  0xe8   :  { %v174_v27 = vadd.f32 %v173_v25, %v85_v24  ;;  %v175_v28 = vpop.f32.mrb[1].mxu0 }
  0xe9   :  { %v177_v29 = vpop.f32.mrb[2].mxu0  ;;  %v176_v34 = vadd.f32 %v175_v28, %v794_v26 }
  0xea   :  { %v179_v31 = vpop.f32.mrb[3].mxu0  ;;  %193 = vrot.lane.b32.xlu0 %v174_v27, %s677_s3  ;;  %v178_v36 = vadd.f32 %v177_v29, %v85_v24 }
  0xeb   :  { %v180_v35 = vadd.f32 %v179_v31, %v794_v26 }
  0xed   :  { %v424_v37 = vpack.c.bf16 %v180_v35, %v176_v34 }
  0xee   :  { %195 = vrot.lane.b32.xlu0 %v178_v36, %s677_s3 }
  0xef   :  { %v183_v38 = vpop.f32.mrb[4].mxu0 }
  0xf0   :  { %v184_v39 = vadd.f32 %v183_v38, %v85_v24  ;;  %v185_v40 = vpop.f32.mrb[5].mxu0 }
  0xf1   :  { %v187_v41 = vpop.f32.mrb[6].mxu0  ;;  %v186_v3 = vadd.f32 %v185_v40, %v794_v26 }
  0xf2   :  { %v188_v42 = vpop.f32.mrb[7].mxu0  ;;  %197 = vrot.lane.b32.xlu1 %v184_v39, %s677_s3 }
  0xf3   :  { %v425_v4 = vpack.c.bf16 %v186_v3, %v186_v3 }
  0xf7   :  { %v610_v5 = vpop.f32.mrb[8].mxu0 }
  0xf8   :  { %v401_v6 = vpop.f32.mrb[9].mxu0 }
  0xf9   :  { %v611_v7 = vpop.f32.mrb[10].mxu0 }
  0xfa   :  { %v404_v8 = vpop.f32.mrb[11].mxu0 }
 0x15c   :  { %v194_v43 = vpop.permute.xlu0 %193 }
 0x15d   :  { %v202_v45 = vmul.f32 %v194_v43, %v174_v27 }
 0x160   :  { %v196_v44 = vpop.permute.xlu0 %195 }
 0x161   :  { %v203_v46 = vmul.f32 %v196_v44, %v178_v36 }
 0x163   :  { %v205_v47 = vpack.c.bf16 %v203_v46, %v202_v45 }
 0x164   :  { %v198_v48 = vpop.permute.xlu1 %197 }
 0x165   :  { %v204_v49 = vmul.f32 %v198_v48, %v184_v39  ;;  %594 = vmatprep.mubr.msk.bf16.mxu1 %vm132_vm0, %v205_v47 }
 0x167   :  { %v206_v50 = vpack.c.bf16 %v204_v49, %v204_v49 }
 0x169   :  { %595 = vmatmul.mubr.msk.bf16.vlgmr.msra.gmra.mrb[0].mxu1 %vm132_vm0, %v206_v50 }
 0x16a   :  { %599 = vmatpush3.bf16.msra.mxu1 %v298_v32 }
 0x16b   :  { %612 = vmatprep.subr.bf16.mxu1 %v648_v55 }
 0x23c   :  { %v596_v58 = vpop.f32.mrb[0].mxu1 }
 0x23d   :  { %v271_v59 = vpop.f32.mrb[1].mxu1  ;;  %v288_v63 = vpack.c.bf16 %v596_v58, %v596_v58 }
 0x23e   :  { %v597_v60 = vpop.f32.mrb[2].mxu1 }
 0x23f   :  { %v274_v61 = vpop.f32.mrb[3].mxu1 }
 0x240   :  { %v287_v62 = vpack.c.bf16 %v274_v61, %v271_v59 }
 0x242   :  { %600 = vmatprep.mubr.msk.bf16.mxu1 %vm289_vm3, %v287_v62 }
 0x243   :  { %601 = vmatmul.mubr.msk.bf16.vlgmr.msra.gmra.mrb[4].mxu1 %vm289_vm3, %v288_v63 }
 0x244   :  { %613 = vmatpush3.bf16.msra.mxu1 %v648_v55  ;;  %620 = vmatprep.mubr.msk.bf16.mxu1 %vm132_vm0, %v424_v37 }
 0x245   :  { %614 = vmatprep.subr.bf16.mxu1 %v649_v0 }
 0x248   :  { %615 = vmatpush3.bf16.msra.mxu1 %v649_v0 }
 0x249   :  { %616 = vmatprep.subr.bf16.mxu1 %v650_v1 }
 0x24c   :  { %617 = vmatpush3.bf16.msra.mxu1 %v650_v1 }
 0x24d   :  { %618 = vmatprep.subr.bf16.mxu1 %v651_v2 }
 0x250   :  { %619 = vmatpush3.bf16.msra.mxu1 %v651_v2 }
 0x253   :  { %621 = vmatmul.mubr.msk.bf16.vlgmr.msra.gmra.mrb[8].mxu1 %vm132_vm0, %v425_v4 }
 0x316   :  { %v602_v9 = vpop.f32.mrb[4].mxu1 }
 0x317   :  { %v410_v11 = vadd.f32 %v610_v5, %v602_v9  ;;  %v334_v12 = vpop.f32.mrb[5].mxu1 }
 0x318   :  { %v402_v13 = vadd.f32 %v401_v6, %v334_v12  ;;  %v603_v14 = vpop.f32.mrb[6].mxu1 }
 0x319   :  { %v423_v15 = vadd.f32 %v559_v10, %v410_v11  ;;  %v337_v16 = vpop.f32.mrb[7].mxu1 }
 0x31a   :  { %v421_v17 = vadd.f32 %v559_v10, %v402_v13  ;;  %v405_v18 = vadd.f32 %v404_v8, %v337_v16 }
 0x31b   :  { %513 = vst.msk [vmem:[#allocation3 + $0x10] sm:$0xff] %vm510_vm4, %v423_v15 }
 0x31c   :  { %511 = vst.msk [vmem:[#allocation3] sm:$0xff] %vm510_vm4, %v421_v17  ;;  %v422_v19 = vadd.f32 %v559_v10, %v405_v18 }
 0x31e   :  { %512 = vst.msk [vmem:[#allocation3 + $0x8] sm:$0xff] %vm510_vm4, %v422_v19 }
 0x31f   :  { %663 = shalt.err (!%p660_p4)
}
 0x320   :  { %s664_s7 = scalar_lea.hbm %s872_s10, 384 }
 0x321   :  { %p665_p5 = scmp.ne.s32.totalorder %s872_s10, %s664_s7  ;;  %p668_p6 = scmp.lt.u32.totalorder %s664_s7, %s872_s10 }
 0x323   :  { %p670_p7 = pnand %p668_p6, %p665_p5 }
 0x325   :  { %673 = shalt.err (!%p670_p7)
}
 0x326   :  { %s679_s4 = smov 128   ;;  %s680_s30 = smov 8   ;;  %v560_v20 = vld [vmem:[%s871_s9] ss:$0 sm:$0xff]  ;;  %v622_v21 = vpop.f32.mrb[8].mxu1 }
 0x327   :  { %528 = dma.vmem_to_hbm [thread:$0]  %s523_s24, 384, %s872_s10, [#allocation4], %s679_s4, %s679_s4, %s680_s30   ;;  %v505_v22 = vadd.f32 %v622_v21, %v560_v20  ;;  %v496_v23 = vpop.f32.mrb[9].mxu1 }
 0x328   :  { %v497_v24 = vadd.f32 %v560_v20, %v496_v23  ;;  %v623_v25 = vpop.f32.mrb[10].mxu1 }
 0x329   :  { %516 = vst.msk [vmem:[%s873_s11 + $0x10] sm:$0xff] %vm289_vm3, %v505_v22  ;;  %v499_v26 = vpop.f32.mrb[11].mxu1 }
 0x32a   :  { %514 = vst.msk [vmem:[%s873_s11] sm:$0xff] %vm289_vm3, %v497_v24  ;;  %v500_v27 = vadd.f32 %v560_v20, %v499_v26 }
 0x32c   :  { %515 = vst.msk [vmem:[%s873_s11 + $0x8] sm:$0xff] %vm289_vm3, %v500_v27 }
 0x32d   :  { %674 = dma.done.wait [#allocation4], 384  }
 0x32e   :  { %675 = vsyncadd [#allocation4], 4294966912 }
 0x32f   :  { %536 = vsyncpa [#allocation4], 1 }

// kernel: _lambda_.7
= control target key start
LH: loop header
LB: loop body
LE: loop exit
PB: predicated region body
PF: predicated region fallthrough
CT: control target
= control target key end

     0   :  { %s6517_s3 = smov 2   ;;  %v6518_v0 = vmov 0   ;;  %s6519_s7 = smov 1   ;;  %v432_v53 = vlaneseq  ;;  %vm914_vm0 = vcmask 130048   ;;  %vm1060_vm1 = vcmask 1040384   ;;  %s8178_s0 = inlined_call_operand.smem [shape: u32[37], index: -1, kind: input, shape index: {}] }
   0x1   :  { %s6563_s6 = sld [smem:[%s8178_s0 + %s6517_s3]]   ;;  %607 = vmatprep.mubr.bf16.mxu0 %v6518_v0  ;;  %s6520_s11 = smov 4   ;;  %vm1041_vm2 = vcmask 531456   ;;  %vm1402_vm3 = vcmask 261120   ;;  %vm1599_vm4 = vcmask 1043456   ;;  %vm1580_vm5 = vcmask 64512  }
   0x2   :  { %s6572_s10 = sld [smem:[%s8178_s0 + %s6519_s7]]   ;;  %s6521_s15 = smov 8   ;;  %v433_v54 = vshrl.u32 %v432_v53, 7  ;;  %vm1744_vm6 = vcmask 523264  }
   0x3   :  { %s6589_s14 = sld [smem:[%s8178_s0 + %s6520_s11]]   ;;  %s6522_s19 = smov 6  }
   0x4   :  { %s6628_s18 = sld [smem:[%s8178_s0 + %s6521_s15]]   ;;  %s6523_s23 = smov 3   ;;  %v434_v55 = vsub.s32 0, %v433_v54  ;;  %v438_v57 = vsub.s32 1, %v433_v54 }
   0x5   :  { %s5040_s22 = sld [smem:[%s8178_s0 + %s6522_s19]]   ;;  %s6524_s27 = smov 5  }
   0x6   :  { %s5037_s26 = sld [smem:[%s8178_s0 + %s6523_s23]]   ;;  %s6525_s4 = smov 10  }
   0x7   :  { %v6039_v1 = vld [vmem:[%s6563_s6 + $0x4] ss:$12 sps:$4 sm:$0xff]   ;;  %v6041_v2 = vld [vmem:[%s6563_s6] ss:$12 sps:$4 sm:$0xff]   ;;  %v6042_v3 = vld [vmem:[%s6563_s6 + $0x1c] ss:$12 sps:$4 sm:$0xff]   ;;  %s5039_s30 = sld [smem:[%s8178_s0 + %s6524_s27]]  }
   0x8   :  { %575 = vmatprep.subr.bf16.mxu0 %v6039_v1  ;;  %v6044_v4 = vld [vmem:[%s6563_s6 + $0x18] ss:$12 sps:$4 sm:$0xff]   ;;  %v6045_v5 = vld [vmem:[%s6563_s6 + $0x34] ss:$12 sps:$4 sm:$0xff]   ;;  %v6047_v6 = vld [vmem:[%s6563_s6 + $0x30] ss:$12 sps:$4 sm:$0xff]   ;;  %s6724_s3 = sld [smem:[%s8178_s0]]  }
   0x9   :  { %576 = vmatpush1.bf16.msra.mxu0 %v6041_v2  ;;  %v6048_v7 = vld [vmem:[%s6563_s6 + $0x4c] ss:$12 sps:$4 sm:$0xff]   ;;  %v413_v8 = vld [vmem:[%s6572_s10] sm:$0xff]  ;;  %v6050_v9 = vld [vmem:[%s6563_s6 + $0x48] ss:$12 sps:$4 sm:$0xff]   ;;  %s5044_s7 = sld [smem:[%s8178_s0 + %s6525_s4]]   ;;  %s6526_s8 = smov 7  }
   0xa   :  { %577 = vmatprep.subr.bf16.mxu0 %v6042_v3  ;;  %v414_v10 = vld [vmem:[%s6572_s10 + $0x8] sm:$0xff]  ;;  %v6051_v11 = vld [vmem:[%s6563_s6 + $0x64] ss:$12 sps:$4 sm:$0xff]   ;;  %v6057_v19 = vld [vmem:[%s6563_s6 + $0x94] ss:$12 sps:$4 sm:$0xff]   ;;  %s5041_s11 = sld [smem:[%s8178_s0 + %s6526_s8]]   ;;  %s6527_s12 = smov 12  }
   0xb   :  { %v425_v12 = vpack.c.bf16 %v414_v10, %v413_v8  ;;  %v6053_v13 = vld [vmem:[%s6563_s6 + $0x60] ss:$12 sps:$4 sm:$0xff]   ;;  %v6054_v14 = vld [vmem:[%s6563_s6 + $0x7c] ss:$12 sps:$4 sm:$0xff]   ;;  %v6056_v17 = vld [vmem:[%s6563_s6 + $0x78] ss:$12 sps:$4 sm:$0xff]   ;;  %s5046_s15 = sld [smem:[%s8178_s0 + %s6527_s12]]  }
   0xc   :  { %v6063_v15 = vld [vmem:[%s6563_s6 + $0x8] ss:$12 sps:$4 sm:$0xff]   ;;  %v6064_v16 = vld [vmem:[%s6563_s6 + $0x20] ss:$12 sps:$4 sm:$0xff]   ;;  %v6065_v18 = vld [vmem:[%s6563_s6 + $0x38] ss:$12 sps:$4 sm:$0xff]  }
   0xd   :  { %578 = vmatpush1.bf16.msra.mxu0 %v6044_v4  ;;  %5656 = vmatprep.mubr.bf16.mxu1 %v425_v12  ;;  %v6059_v20 = vld [vmem:[%s6563_s6 + $0x90] ss:$12 sps:$4 sm:$0xff]   ;;  %v6060_v22 = vld [vmem:[%s6563_s6 + $0xac] ss:$12 sps:$4 sm:$0xff]   ;;  %v6062_v23 = vld [vmem:[%s6563_s6 + $0xa8] ss:$12 sps:$4 sm:$0xff]  }
   0xe   :  { %579 = vmatprep.subr.bf16.mxu0 %v6045_v5  ;;  %5640 = vmatprep.subr.bf16.mxu1 %v6063_v15  ;;  %v6066_v21 = vld [vmem:[%s6563_s6 + $0x50] ss:$12 sps:$4 sm:$0xff]   ;;  %v6067_v24 = vld [vmem:[%s6563_s6 + $0x68] ss:$12 sps:$4 sm:$0xff]   ;;  %v6068_v25 = vld [vmem:[%s6563_s6 + $0x80] ss:$12 sps:$4 sm:$0xff]  }
   0xf   :  { %5641 = vmatpush3.bf16.msra.mxu1 %v6063_v15  ;;  %v415_v26 = vld [vmem:[%s6572_s10 + $0x10] sm:$0xff]  ;;  %v416_v27 = vld [vmem:[%s6572_s10 + $0x18] sm:$0xff]  ;;  %v417_v31 = vld [vmem:[%s6572_s10 + $0x20] sm:$0xff]  ;;  %s6528_s16 = smov 13   ;;  %s6529_s20 = smov 11  }
  0x10   :  { %5642 = vmatprep.subr.bf16.mxu1 %v6064_v16  ;;  %v6069_v28 = vld [vmem:[%s6563_s6 + $0x98] ss:$12 sps:$4 sm:$0xff]   ;;  %v426_v29 = vpack.c.bf16 %v416_v27, %v415_v26  ;;  %v6070_v30 = vld [vmem:[%s6563_s6 + $0xb0] ss:$12 sps:$4 sm:$0xff]   ;;  %v418_v32 = vld [vmem:[%s6572_s10 + $0x28] sm:$0xff]  ;;  %s6826_s19 = sld [smem:[%s8178_s0 + %s6528_s16]]   ;;  %s6530_s24 = smov 15  }
  0x11   :  { %580 = vmatpush1.bf16.msra.mxu0 %v6047_v6  ;;  %v6071_v33 = vld [vmem:[%s6589_s14] sm:$0xff]   ;;  %v427_v34 = vpack.c.bf16 %v418_v32, %v417_v31  ;;  %v6072_v35 = vld [vmem:[%s6589_s14 + $0x8] sm:$0xff]   ;;  %v419_v36 = vld [vmem:[%s6572_s10 + $0x30] sm:$0xff]  ;;  %s5045_s23 = sld [smem:[%s8178_s0 + %s6529_s20]]   ;;  %s6531_s28 = smov 9  }
  0x12   :  { %581 = vmatprep.subr.bf16.mxu0 %v6048_v7  ;;  %v420_v37 = vld [vmem:[%s6572_s10 + $0x38] sm:$0xff]  ;;  %v6073_v38 = vld [vmem:[%s6589_s14 + $0x10] sm:$0xff]   ;;  %v421_v40 = vld [vmem:[%s6572_s10 + $0x40] sm:$0xff]  ;;  %s6845_s27 = sld [smem:[%s8178_s0 + %s6530_s24]]   ;;  %s6532_s2 = smov 16  }
  0x13   :  { %5643 = vmatpush3.bf16.msra.mxu1 %v6064_v16  ;;  %v428_v39 = vpack.c.bf16 %v420_v37, %v419_v36  ;;  %v422_v41 = vld [vmem:[%s6572_s10 + $0x48] sm:$0xff]  ;;  %v6074_v42 = vld [vmem:[%s6589_s14 + $0x18] sm:$0xff]   ;;  %v423_v44 = vld [vmem:[%s6572_s10 + $0x50] sm:$0xff]  ;;  %s5043_s1 = sld [smem:[%s8178_s0 + %s6531_s28]]   ;;  %s6533_s6 = smov 14  }
  0x14   :  { %5644 = vmatprep.subr.bf16.mxu1 %v6065_v18  ;;  %v429_v43 = vpack.c.bf16 %v422_v41, %v421_v40  ;;  %v424_v45 = vld [vmem:[%s6572_s10 + $0x58] sm:$0xff]  ;;  %v6075_v47 = vld [vmem:[%s6589_s14 + $0x20] sm:$0xff]   ;;  %v6076_v48 = vld [vmem:[%s6589_s14 + $0x28] sm:$0xff]   ;;  %s6924_s5 = sld [smem:[%s8178_s0 + %s6532_s2]]   ;;  %s6534_s10 = smov 64  }
  0x15   :  { %582 = vmatpush1.bf16.msra.mxu0 %v6050_v9  ;;  %v430_v46 = vpack.c.bf16 %v424_v45, %v423_v44  ;;  %v6077_v49 = vld [vmem:[%s6589_s14 + $0x30] sm:$0xff]   ;;  %v6078_v50 = vld [vmem:[%s6589_s14 + $0x38] sm:$0xff]   ;;  %v6079_v51 = vld [vmem:[%s6628_s18] sm:$0xff]   ;;  %v442_v9 = vsub.s32 2, %v433_v54  ;;  %s5048_s9 = sld [smem:[%s8178_s0 + %s6533_s6]]   ;;  %s6543_s13 = smov 31  }
  0x16   :  { %583 = vmatprep.subr.bf16.mxu0 %v6051_v11  ;;  %v6084_v52 = vld [vmem:[%s5040_s22] sm:$0xff]   ;;  %s5065_s16 = sld [smem:[%s8178_s0 + %s6543_s13]]   ;;  %s6544_s17 = smov 32  }
  0x17   :  { %5645 = vmatpush3.bf16.msra.mxu1 %v6065_v18  ;;  %v182_v56 = vld [vmem:[%s5037_s26] sm:$0x7]  ;;  %s5066_s20 = sld [smem:[%s8178_s0 + %s6544_s17]]   ;;  %s6545_s21 = smov 35  }
  0x18   :  { %5646 = vmatprep.subr.bf16.mxu1 %v6066_v21  ;;  %v6637_v58 = vrot.slane %v182_v56, %v434_v55  ;;  %v6639_v59 = vrot.slane %v182_v56, %v438_v57  ;;  %v6649_v18 = vrot.slane %v182_v56, %v442_v9  ;;  %s7679_s24 = sld [smem:[%s8178_s0 + %s6545_s21]]   ;;  %s6546_s25 = smov 24  }
  0x19   :  { %584 = vmatpush1.bf16.msra.mxu0 %v6053_v13  ;;  %s7725_s28 = sld [smem:[%s8178_s0 + %s6546_s25]]   ;;  %s6547_s29 = smov 26  }
  0x1a   :  { %585 = vmatprep.subr.bf16.mxu0 %v6054_v14  ;;  %s7784_s2 = sld [smem:[%s8178_s0 + %s6547_s29]]  }
  0x1b   :  { %5647 = vmatpush3.bf16.msra.mxu1 %v6066_v21 }
  0x1c   :  { %5648 = vmatprep.subr.bf16.mxu1 %v6067_v24 }
  0x1d   :  { %586 = vmatpush1.bf16.msra.mxu0 %v6056_v17 }
  0x1e   :  { %587 = vmatprep.subr.bf16.mxu0 %v6057_v19 }
  0x1f   :  { %5649 = vmatpush3.bf16.msra.mxu1 %v6067_v24 }
  0x20   :  { %5650 = vmatprep.subr.bf16.mxu1 %v6068_v25 }
  0x21   :  { %588 = vmatpush1.bf16.msra.mxu0 %v6059_v20 }
  0x22   :  { %589 = vmatprep.subr.bf16.mxu0 %v6060_v22 }
  0x23   :  { %5651 = vmatpush3.bf16.msra.mxu1 %v6068_v25 }
  0x24   :  { %5652 = vmatprep.subr.bf16.mxu1 %v6069_v28 }
  0x25   :  { %590 = vmatpush1.bf16.msra.mxu0 %v6062_v23  ;;  %v6080_v23 = vld [vmem:[%s6628_s18 + $0x8] sm:$0xff]  }
  0x26   :  { %5696 = vmatprep.subr.bf16.mxu0 %v6084_v52 }
  0x27   :  { %5653 = vmatpush3.bf16.msra.mxu1 %v6069_v28 }
  0x28   :  { %608 = vmatmul.mubr.bf16.vlgmr.msra.gmra.mrb[0].mxu0 %v425_v12  ;;  %5654 = vmatprep.subr.bf16.mxu1 %v6070_v30 }
  0x29   :  { %617 = vmatprep.mubr.bf16.mxu0 %v6518_v0  ;;  %5697 = vmatpush3.bf16.msra.mxu0 %v6084_v52 }
  0x2b   :  { %5655 = vmatpush3.bf16.msra.mxu1 %v6070_v30 }
  0x2c   :  { %5668 = vmatprep.subr.bf16.mxu1 %v6071_v33 }
  0x2e   :  { %5657 = vmatmul.mubr.bf16.vlgmr.msra.gmra.mrb[0].mxu1 %v426_v29 }
  0x2f   :  { %5669 = vmatpush3.bf16.msra.mxu1 %v6071_v33  ;;  %5660 = vmatprep.mubr.bf16.mxu1 %v427_v34 }
  0x30   :  { %618 = vmatmul.mubr.bf16.gmra.mrb[4].mxu0 %v426_v29  ;;  %5670 = vmatprep.subr.bf16.mxu1 %v6072_v35 }
  0x31   :  { %627 = vmatprep.mubr.bf16.mxu0 %v6518_v0 }
  0x33   :  { %5671 = vmatpush3.bf16.msra.mxu1 %v6072_v35 }
  0x34   :  { %5672 = vmatprep.subr.bf16.mxu1 %v6073_v38 }
  0x36   :  { %5661 = vmatmul.mubr.bf16.gmra.mrb[4].mxu1 %v428_v39 }
  0x37   :  { %5673 = vmatpush3.bf16.msra.mxu1 %v6073_v38  ;;  %5664 = vmatprep.mubr.bf16.mxu1 %v429_v43 }
  0x38   :  { %628 = vmatmul.mubr.bf16.gmra.mrb[8].mxu0 %v427_v34  ;;  %5674 = vmatprep.subr.bf16.mxu1 %v6074_v42 }
  0x39   :  { %637 = vmatprep.mubr.bf16.mxu0 %v6518_v0 }
  0x3b   :  { %5675 = vmatpush3.bf16.msra.mxu1 %v6074_v42 }
  0x3c   :  { %5676 = vmatprep.subr.bf16.mxu1 %v6075_v47 }
  0x3e   :  { %5665 = vmatmul.mubr.bf16.gmra.mrb[8].mxu1 %v430_v46 }
  0x3f   :  { %5677 = vmatpush3.bf16.msra.mxu1 %v6075_v47 }
  0x40   :  { %638 = vmatmul.mubr.bf16.gmra.mrb[12].mxu0 %v428_v39  ;;  %5678 = vmatprep.subr.bf16.mxu1 %v6076_v48  ;;  %v6081_v39 = vld [vmem:[%s6628_s18 + $0x10] sm:$0xff]  }
  0x41   :  { %647 = vmatprep.mubr.bf16.mxu0 %v6518_v0 }
  0x43   :  { %5679 = vmatpush3.bf16.msra.mxu1 %v6076_v48 }
  0x44   :  { %5680 = vmatprep.subr.bf16.mxu1 %v6077_v49 }
  0x47   :  { %5681 = vmatpush3.bf16.msra.mxu1 %v6077_v49 }
  0x48   :  { %648 = vmatmul.mubr.bf16.gmra.mrb[16].mxu0 %v429_v43  ;;  %5682 = vmatprep.subr.bf16.mxu1 %v6078_v50 }
  0x49   :  { %657 = vmatprep.mubr.bf16.mxu0 %v6518_v0 }
  0x4b   :  { %5683 = vmatpush3.bf16.msra.mxu1 %v6078_v50 }
  0x4c   :  { %5732 = vmatprep.subr.bf16.mxu1 %v6079_v51 }
  0x50   :  { %658 = vmatmul.mubr.bf16.gmra.mrb[20].mxu0 %v430_v46  ;;  %v6082_v46 = vld [vmem:[%s6628_s18 + $0x18] sm:$0xff]  }
  0xfb   :  { %v609_v60 = vpop.f32.mrb[0].mxu0 }
  0xfc   :  { %v610_v61 = vadd.f32 %v609_v60, %v6637_v58  ;;  %v611_v62 = vpop.f32.mrb[1].mxu0 }
  0xfd   :  { %v612_v63 = vadd.f32 %v611_v62, %v6639_v59  ;;  %v613_v1 = vpop.f32.mrb[2].mxu0 }
  0xfe   :  { %v614_v2 = vadd.f32 %v613_v1, %v6637_v58  ;;  %v615_v3 = vpop.f32.mrb[3].mxu0  ;;  %v6083_v1 = vld [vmem:[%s6628_s18 + $0x20] sm:$0xff]  }
  0xff   :  { %v749_v4 = vmul.f32 %v612_v63, %v610_v61  ;;  %v616_v5 = vadd.f32 %v615_v3, %v6639_v59 }
 0x101   :  { %v750_v6 = vmul.f32 %v616_v5, %v614_v2  ;;  %v5658_v20 = vpop.f32.mrb[0].mxu1 }
 0x102   :  { %v6653_v24 = vadd.f32 %v5658_v20, %v6649_v18  ;;  %v702_v25 = vpop.f32.mrb[1].mxu1 }
 0x103   :  { %v619_v7 = vpop.f32.mrb[4].mxu0  ;;  %v761_v8 = vpack.c.bf16 %v750_v6, %v749_v4  ;;  %v6657_v28 = vadd.f32 %v702_v25, %v6649_v18  ;;  %v5659_v29 = vpop.f32.mrb[2].mxu1 }
 0x104   :  { %v620_v10 = vadd.f32 %v619_v7, %v6637_v58  ;;  %v621_v11 = vpop.f32.mrb[5].mxu0  ;;  %v6661_v32 = vadd.f32 %v5659_v29, %v6649_v18  ;;  %v705_v33 = vpop.f32.mrb[3].mxu1 }
 0x105   :  { %v622_v12 = vadd.f32 %v621_v11, %v6639_v59  ;;  %v623_v13 = vpop.f32.mrb[6].mxu0  ;;  %5684 = vmatprep.mubr.bf16.mxu1 %v761_v8  ;;  %v6665_v36 = vadd.f32 %v705_v33, %v6649_v18  ;;  %v6085_v8 = vld [vmem:[%s6628_s18 + $0x28] sm:$0xff]  }
 0x106   :  { %v624_v14 = vadd.f32 %v623_v13, %v6637_v58  ;;  %v625_v15 = vpop.f32.mrb[7].mxu0  ;;  %v1166_v40 = vpack.c.bf16 %v6661_v32, %v6653_v24  ;;  %v6089_v24 = vld [vmem:[%s5039_s30 + $0x8] sm:$0xff]   ;;  %v6090_v32 = vld [vmem:[%s5039_s30 + $0x10] sm:$0xff]  }
 0x107   :  { %v751_v16 = vmul.f32 %v622_v12, %v620_v10  ;;  %v626_v17 = vadd.f32 %v625_v15, %v6639_v59  ;;  %v1165_v41 = vpack.c.bf16 %v6665_v36, %v6657_v28 }
 0x109   :  { %v752_v19 = vmul.f32 %v626_v17, %v624_v14  ;;  %v5662_v43 = vpop.f32.mrb[4].mxu1 }
 0x10a   :  { %v6675_v47 = vadd.f32 %v5662_v43, %v6649_v18  ;;  %v718_v48 = vpop.f32.mrb[5].mxu1 }
 0x10b   :  { %v762_v21 = vpack.c.bf16 %v752_v19, %v751_v16  ;;  %v629_v22 = vpop.f32.mrb[8].mxu0  ;;  %v5663_v52 = vpop.f32.mrb[6].mxu1 }
 0x10c   :  { %v630_v26 = vadd.f32 %v629_v22, %v6637_v58  ;;  %v631_v27 = vpop.f32.mrb[9].mxu0  ;;  %v6683_v55 = vadd.f32 %v5663_v52, %v6649_v18  ;;  %v721_v56 = vpop.f32.mrb[7].mxu1 }
 0x10d   :  { %v632_v30 = vadd.f32 %v631_v27, %v6639_v59  ;;  %v633_v31 = vpop.f32.mrb[10].mxu0  ;;  %5685 = vmatmul.mubr.bf16.vlgmr.msra.gmra.mrb[12].mxu1 %v762_v21  ;;  %v722_v61 = vadd.f32 %v721_v56, %v6649_v18 }
 0x10e   :  { %v634_v34 = vadd.f32 %v633_v31, %v6637_v58  ;;  %v635_v35 = vpop.f32.mrb[11].mxu0  ;;  %5733 = vmatpush3.bf16.msra.mxu1 %v6079_v51  ;;  %v6679_v51 = vadd.f32 %v718_v48, %v6649_v18  ;;  %v1168_v2 = vpack.c.bf16 %v6683_v55, %v6675_v47 }
 0x10f   :  { %v753_v37 = vmul.f32 %v632_v30, %v630_v26  ;;  %v636_v38 = vadd.f32 %v635_v35, %v6639_v59  ;;  %5734 = vmatprep.subr.bf16.mxu1 %v6080_v23  ;;  %v6086_v26 = vld [vmem:[%s6628_s18 + $0x30] sm:$0xff]  }
 0x110   :  { %v1167_v3 = vpack.c.bf16 %v722_v61, %v6679_v51 }
 0x111   :  { %v754_v42 = vmul.f32 %v636_v38, %v634_v34  ;;  %v5666_v5 = vpop.f32.mrb[8].mxu1  ;;  %v6087_v34 = vld [vmem:[%s6628_s18 + $0x38] sm:$0xff]  }
 0x112   :  { %5735 = vmatpush3.bf16.msra.mxu1 %v6080_v23  ;;  %v743_v9 = vadd.f32 %v5666_v5, %v6649_v18  ;;  %v734_v10 = vpop.f32.mrb[9].mxu1 }
 0x113   :  { %v639_v44 = vpop.f32.mrb[12].mxu0  ;;  %v763_v45 = vpack.c.bf16 %v754_v42, %v753_v37  ;;  %5736 = vmatprep.subr.bf16.mxu1 %v6081_v39  ;;  %v735_v13 = vadd.f32 %v734_v10, %v6649_v18  ;;  %v5667_v14 = vpop.f32.mrb[10].mxu1  ;;  %v406_v10 = vld [vmem:[%s6724_s3 + $0x28] sm:$0xff] }
 0x114   :  { %v640_v49 = vadd.f32 %v639_v44, %v6637_v58  ;;  %v641_v50 = vpop.f32.mrb[13].mxu0  ;;  %v746_v17 = vadd.f32 %v5667_v14, %v6649_v18  ;;  %v737_v19 = vpop.f32.mrb[11].mxu1 }
 0x115   :  { %v642_v53 = vadd.f32 %v641_v50, %v6639_v59  ;;  %v643_v54 = vpop.f32.mrb[14].mxu0  ;;  %5688 = vmatprep.mubr.bf16.mxu1 %v763_v45  ;;  %v738_v22 = vadd.f32 %v737_v19, %v6649_v18  ;;  %v1062_v50 = vsel %vm1060_vm1, 65535, %v6518_v0 }
 0x116   :  { %v644_v57 = vadd.f32 %v643_v54, %v6637_v58  ;;  %v645_v60 = vpop.f32.mrb[15].mxu0  ;;  %5737 = vmatpush3.bf16.msra.mxu1 %v6081_v39  ;;  %v1170_v27 = vpack.c.bf16 %v746_v17, %v743_v9  ;;  %v405_v9 = vld [vmem:[%s6724_s3 + $0x20] sm:$0xff]  ;;  %v408_v17 = vld [vmem:[%s6724_s3 + $0x38] sm:$0xff] }
 0x117   :  { %v755_v62 = vmul.f32 %v642_v53, %v640_v49  ;;  %v646_v63 = vadd.f32 %v645_v60, %v6639_v59  ;;  %5738 = vmatprep.subr.bf16.mxu1 %v6082_v46  ;;  %v1169_v29 = vpack.c.bf16 %v738_v22, %v735_v13  ;;  %v6092_v49 = vld [vmem:[%s5039_s30 + $0x20] ss:$0 sps:$4 sm:$0x11]  }
 0x118   :  { %v1064_v53 = vand.u32 %v6092_v49, %v1062_v50 }
 0x119   :  { %v756_v4 = vmul.f32 %v646_v63, %v644_v57  ;;  %v402_v63 = vld [vmem:[%s6724_s3 + $0x8] sm:$0xff] }
 0x11a   :  { %5739 = vmatpush3.bf16.msra.mxu1 %v6082_v46 }
 0x11b   :  { %v649_v6 = vpop.f32.mrb[16].mxu0  ;;  %v764_v7 = vpack.c.bf16 %v756_v4, %v755_v62  ;;  %5740 = vmatprep.subr.bf16.mxu1 %v6083_v1  ;;  %v401_v62 = vld [vmem:[%s6724_s3] sm:$0xff] }
 0x11c   :  { %v650_v11 = vadd.f32 %v649_v6, %v6637_v58  ;;  %v651_v12 = vpop.f32.mrb[17].mxu0  ;;  %v896_v5 = vpack.c.bf16 %v402_v63, %v401_v62  ;;  %v403_v6 = vld [vmem:[%s6724_s3 + $0x10] sm:$0xff] }
 0x11d   :  { %v652_v15 = vadd.f32 %v651_v12, %v6639_v59  ;;  %v653_v16 = vpop.f32.mrb[18].mxu0  ;;  %5689 = vmatmul.mubr.bf16.gmra.mrb[16].mxu1 %v764_v7  ;;  %v404_v7 = vld [vmem:[%s6724_s3 + $0x18] sm:$0xff] }
 0x11e   :  { %v654_v20 = vadd.f32 %v653_v16, %v6637_v58  ;;  %v655_v21 = vpop.f32.mrb[19].mxu0  ;;  %5741 = vmatpush3.bf16.msra.mxu1 %v6083_v1  ;;  %v897_v13 = vpack.c.bf16 %v404_v7, %v403_v6  ;;  %v407_v16 = vld [vmem:[%s6724_s3 + $0x30] sm:$0xff] }
 0x11f   :  { %v757_v23 = vmul.f32 %v652_v15, %v650_v11  ;;  %v656_v25 = vadd.f32 %v655_v21, %v6639_v59  ;;  %5742 = vmatprep.subr.bf16.mxu1 %v6085_v8  ;;  %v898_v15 = vpack.c.bf16 %v406_v10, %v405_v9  ;;  %v410_v21 = vld [vmem:[%s6724_s3 + $0x48] sm:$0xff] }
 0x121   :  { %v758_v30 = vmul.f32 %v656_v25, %v654_v20  ;;  %v409_v20 = vld [vmem:[%s6724_s3 + $0x40] sm:$0xff]  ;;  %v899_v25 = vpack.c.bf16 %v408_v17, %v407_v16 }
 0x122   :  { %5743 = vmatpush3.bf16.msra.mxu1 %v6085_v8 }
 0x123   :  { %v659_v31 = vpop.f32.mrb[20].mxu0  ;;  %v765_v33 = vpack.c.bf16 %v758_v30, %v757_v23  ;;  %5744 = vmatprep.subr.bf16.mxu1 %v6086_v26  ;;  %v412_v30 = vld [vmem:[%s6724_s3 + $0x58] sm:$0xff] }
 0x124   :  { %v660_v35 = vadd.f32 %v659_v31, %v6637_v58  ;;  %v661_v37 = vpop.f32.mrb[21].mxu0 }
 0x125   :  { %v662_v38 = vadd.f32 %v661_v37, %v6639_v59  ;;  %v663_v39 = vpop.f32.mrb[22].mxu0  ;;  %5692 = vmatprep.mubr.bf16.mxu1 %v765_v33 }
 0x126   :  { %v664_v18 = vadd.f32 %v663_v39, %v6637_v58  ;;  %v665_v42 = vpop.f32.mrb[23].mxu0  ;;  %5745 = vmatpush3.bf16.msra.mxu1 %v6086_v26  ;;  %v6088_v58 = vld [vmem:[%s5039_s30] sm:$0xff]   ;;  %v6094_v39 = vld [vmem:[%s5044_s7 + $0x8] sm:$0xff]  }
 0x127   :  { %v759_v43 = vmul.f32 %v662_v38, %v660_v35  ;;  %v666_v44 = vadd.f32 %v665_v42, %v6639_v59  ;;  %5746 = vmatprep.subr.bf16.mxu1 %v6087_v34  ;;  %5710 = vmatprep.subr.bf16.mxu0 %v6088_v58  ;;  %v6093_v38 = vld [vmem:[%s5044_s7] sm:$0xff]   ;;  %s6549_s7 = smov 25  }
 0x129   :  { %v760_v45 = vmul.f32 %v666_v44, %v664_v18  ;;  %v5121_v18 = vld [vmem:[%s5041_s11] ss:$0 sm:$0xff]  ;;  %s6535_s11 = smov 17  }
 0x12a   :  { %5747 = vmatpush3.bf16.msra.mxu1 %v6087_v34  ;;  %s7000_s14 = sld [smem:[%s8178_s0 + %s6535_s11]]   ;;  %s6550_s11 = smov 34  }
 0x12b   :  { %v766_v46 = vpack.c.bf16 %v760_v45, %v759_v43  ;;  %5760 = vmatprep.subr.bf16.mxu1 %v6093_v38 }
 0x12d   :  { %5693 = vmatmul.mubr.bf16.gmra.mrb[20].mxu1 %v766_v46 }
 0x12e   :  { %5748 = vmatprep.mubr.bf16.mxu1 %v1165_v41 }
 0x135   :  { %5749 = vmatmul.mubr.bf16.vlgmr.msra.gmra.mrb[24].mxu1 %v1166_v40  ;;  %v6091_v40 = vld [vmem:[%s5039_s30 + $0x18] sm:$0xff]  }
 0x136   :  { %5752 = vmatprep.mubr.bf16.mxu1 %v1167_v3  ;;  %5761 = vmatpush3.bf16.msra.mxu1 %v6093_v38 }
 0x137   :  { %5762 = vmatprep.subr.bf16.mxu1 %v6094_v39 }
 0x13a   :  { %5763 = vmatpush3.bf16.msra.mxu1 %v6094_v39 }
 0x13d   :  { %5753 = vmatmul.mubr.bf16.gmra.mrb[28].mxu1 %v1168_v2 }
 0x13e   :  { %5756 = vmatprep.mubr.bf16.mxu1 %v1169_v29  ;;  %v411_v29 = vld [vmem:[%s6724_s3 + $0x50] sm:$0xff]  ;;  %s6548_s3 = smov 30  }
 0x13f   :  { %v901_v35 = vpack.c.bf16 %v412_v30, %v411_v29  ;;  %s5064_s6 = sld [smem:[%s8178_s0 + %s6548_s3]]  }
 0x145   :  { %5757 = vmatmul.mubr.bf16.gmra.mrb[32].mxu1 %v1170_v27  ;;  %v900_v27 = vpack.c.bf16 %v410_v21, %v409_v20 }
 0x1e0   :  { %v5686_v59 = vpop.f32.mrb[12].mxu1 }
 0x1e1   :  { %v849_v47 = vpop.f32.mrb[13].mxu1 }
 0x1e2   :  { %v5687_v48 = vpop.f32.mrb[14].mxu1 }
 0x1e3   :  { %v903_v28 = vpack.c.bf16 %v5687_v48, %v5686_v59  ;;  %v852_v36 = vpop.f32.mrb[15].mxu1 }
 0x1e4   :  { %v902_v41 = vpack.c.bf16 %v852_v36, %v849_v47 }
 0x1e6   :  { %5698 = vmatprep.mubr.msk.bf16.mxu0 %vm914_vm0, %v902_v41 }
 0x1e7   :  { %5699 = vmatmul.mubr.msk.bf16.vlgmr.msra.gmra.mrb[24].mxu0 %vm914_vm0, %v903_v28 }
 0x1e8   :  { %5711 = vmatpush3.bf16.msra.mxu0 %v6088_v58 }
 0x1e9   :  { %5712 = vmatprep.subr.bf16.mxu0 %v6089_v24 }
 0x1ec   :  { %5713 = vmatpush3.bf16.msra.mxu0 %v6089_v24 }
 0x1ed   :  { %5714 = vmatprep.subr.bf16.mxu0 %v6090_v32 }
 0x1f0   :  { %v5690_v51 = vpop.f32.mrb[16].mxu1  ;;  %5715 = vmatpush3.bf16.msra.mxu0 %v6090_v32 }
 0x1f1   :  { %v865_v52 = vpop.f32.mrb[17].mxu1  ;;  %5716 = vmatprep.subr.bf16.mxu0 %v6091_v40 }
 0x1f2   :  { %v5691_v54 = vpop.f32.mrb[18].mxu1 }
 0x1f3   :  { %v905_v55 = vpack.c.bf16 %v5691_v54, %v5690_v51  ;;  %v868_v56 = vpop.f32.mrb[19].mxu1 }
 0x1f4   :  { %v904_v57 = vpack.c.bf16 %v868_v56, %v865_v52  ;;  %5717 = vmatpush3.bf16.msra.mxu0 %v6091_v40 }
 0x1f5   :  { %5718 = vmatprep.subr.bf16.mxu0 %v1064_v53 }
 0x1f6   :  { %5702 = vmatprep.mubr.msk.bf16.mxu0 %vm914_vm0, %v904_v57 }
 0x1f7   :  { %5703 = vmatmul.mubr.msk.bf16.gmra.mrb[28].mxu0 %vm914_vm0, %v905_v55 }
 0x1f8   :  { %5719 = vmatpush3.bf16.msra.mxu0 %v1064_v53 }
 0x200   :  { %v5694_v60 = vpop.f32.mrb[20].mxu1 }
 0x201   :  { %v881_v61 = vpop.f32.mrb[21].mxu1 }
 0x202   :  { %v5695_v1 = vpop.f32.mrb[22].mxu1 }
 0x203   :  { %v907_v2 = vpack.c.bf16 %v5695_v1, %v5694_v60  ;;  %v884_v3 = vpop.f32.mrb[23].mxu1 }
 0x204   :  { %v906_v4 = vpack.c.bf16 %v884_v3, %v881_v61 }
 0x206   :  { %5706 = vmatprep.mubr.msk.bf16.mxu0 %vm914_vm0, %v906_v4 }
 0x207   :  { %5707 = vmatmul.mubr.msk.bf16.gmra.mrb[32].mxu0 %vm914_vm0, %v907_v2 }
 0x208   :  { %5720 = vmatprep.mubr.msk.bf16.mxu0 %vm1041_vm2, %v896_v5  ;;  %v6733_v8 = vpop.f32.mrb[24].mxu1 }
 0x209   :  { %v6737_v11 = vpop.f32.mrb[25].mxu1 }
 0x20a   :  { %v6739_v12 = vpop.f32.mrb[26].mxu1 }
 0x20b   :  { %v6741_v14 = vpop.f32.mrb[27].mxu1 }
 0x20f   :  { %5721 = vmatmul.mubr.msk.bf16.vlgmr.msra.gmra.mrb[24].mxu0 %vm1041_vm2, %v897_v13 }
 0x210   :  { %5724 = vmatprep.mubr.msk.bf16.mxu0 %vm1041_vm2, %v898_v15  ;;  %v6747_v19 = vpop.f32.mrb[28].mxu1 }
 0x211   :  { %v6751_v22 = vpop.f32.mrb[29].mxu1 }
 0x212   :  { %v6753_v23 = vpop.f32.mrb[30].mxu1 }
 0x213   :  { %v6755_v26 = vpop.f32.mrb[31].mxu1 }
 0x217   :  { %5725 = vmatmul.mubr.msk.bf16.gmra.mrb[28].mxu0 %vm1041_vm2, %v899_v25 }
 0x218   :  { %5728 = vmatprep.mubr.msk.bf16.mxu0 %vm1041_vm2, %v900_v27  ;;  %v6761_v31 = vpop.f32.mrb[32].mxu1 }
 0x219   :  { %v6763_v33 = vpop.f32.mrb[33].mxu1 }
 0x21a   :  { %v6765_v34 = vpop.f32.mrb[34].mxu1 }
 0x21b   :  { %v6767_v37 = vpop.f32.mrb[35].mxu1 }
 0x21f   :  { %5729 = vmatmul.mubr.msk.bf16.gmra.mrb[32].mxu0 %vm1041_vm2, %v901_v35 }
 0x2e2   :  { %v5722_v42 = vpop.f32.mrb[24].mxu0 }
 0x2e3   :  { %v6776_v43 = vadd.f32 %v5722_v42, %v5121_v18  ;;  %v1100_v44 = vpop.f32.mrb[25].mxu0 }
 0x2e4   :  { %v6778_v45 = vadd.f32 %v5121_v18, %v1100_v44  ;;  %v5723_v46 = vpop.f32.mrb[26].mxu0 }
 0x2e5   :  { %8203 = vst [vmem:[#allocation2_spill] sm:$0xff] %v6776_v43  ;;  %v5133_v58 = vmul.f32 -1.442695, %v6776_v43  ;;  %v6781_v59 = vadd.f32 %v5723_v46, %v5121_v18  ;;  %v1103_v47 = vpop.f32.mrb[27].mxu0 }
 0x2e6   :  { %8204 = vst [vmem:[#allocation3_spill] sm:$0xff] %v6778_v45  ;;  %v5131_v48 = vmul.f32 -1.442695, %v6778_v45  ;;  %v6784_v28 = vadd.f32 %v5121_v18, %v1103_v47 }
 0x2e7   :  { %8205 = vst [vmem:[#allocation4_spill] sm:$0xff] %v6781_v59  ;;  %6205 = vpow2.f32 %v5133_v58  ;;  %v5134_v36 = vmul.f32 -1.442695, %v6781_v59 }
 0x2e8   :  { %8206 = vst [vmem:[#allocation5_spill] sm:$0xff] %v6784_v28  ;;  %6207 = vpow2.f32 %v5131_v48  ;;  %v5132_v41 = vmul.f32 -1.442695, %v6784_v28 }
 0x2e9   :  { %6209 = vpow2.f32 %v5134_v36 }
 0x2ea   :  { %6211 = vpow2.f32 %v5132_v41  ;;  %v5726_v24 = vpop.f32.mrb[28].mxu0 }
 0x2eb   :  { %v6788_v32 = vadd.f32 %v5726_v24, %v5121_v18  ;;  %v1116_v40 = vpop.f32.mrb[29].mxu0 }
 0x2ec   :  { %v6790_v49 = vadd.f32 %v5121_v18, %v1116_v40  ;;  %v5727_v50 = vpop.f32.mrb[30].mxu0 }
 0x2ed   :  { %8207 = vst [vmem:[#allocation6_spill] sm:$0xff] %v6788_v32  ;;  %v5137_v51 = vmul.f32 -1.442695, %v6788_v32  ;;  %v6793_v52 = vadd.f32 %v5727_v50, %v5121_v18  ;;  %v1119_v53 = vpop.f32.mrb[31].mxu0 }
 0x2ee   :  { %8208 = vst [vmem:[#allocation7_spill] sm:$0xff] %v6790_v49  ;;  %v5135_v54 = vmul.f32 -1.442695, %v6790_v49  ;;  %v6796_v55 = vadd.f32 %v5121_v18, %v1119_v53 }
 0x2ef   :  { %8209 = vst [vmem:[#allocation8_spill] sm:$0xff] %v6793_v52  ;;  %6213 = vpow2.f32 %v5137_v51  ;;  %v5138_v56 = vmul.f32 -1.442695, %v6793_v52 }
 0x2f0   :  { %8210 = vst [vmem:[#allocation9_spill] sm:$0xff] %v6796_v55  ;;  %6215 = vpow2.f32 %v5135_v54  ;;  %v5136_v57 = vmul.f32 -1.442695, %v6796_v55 }
 0x2f1   :  { %v6206_v60 = vpop.eup %6205  ;;  %6217 = vpow2.f32 %v5138_v56 }
 0x2f2   :  { %v6208_v61 = vpop.eup %6207  ;;  %v1344_v62 = vadd.f32 1.0, %v6206_v60  ;;  %6219 = vpow2.f32 %v5136_v57  ;;  %v5730_v63 = vpop.f32.mrb[32].mxu0 }
 0x2f3   :  { %v6210_v1 = vpop.eup %6209  ;;  %v1342_v2 = vadd.f32 1.0, %v6208_v61  ;;  %v6800_v3 = vadd.f32 %v5730_v63, %v5121_v18  ;;  %v1132_v4 = vpop.f32.mrb[33].mxu0 }
 0x2f4   :  { %v6212_v5 = vpop.eup %6211  ;;  %6221 = vrcp.f32 %v1344_v62  ;;  %v1345_v6 = vadd.f32 1.0, %v6210_v1  ;;  %v6802_v7 = vadd.f32 %v5121_v18, %v1132_v4  ;;  %v5731_v9 = vpop.f32.mrb[34].mxu0 }
 0x2f5   :  { %8211 = vst [vmem:[#allocation10_spill] sm:$0xff] %v6800_v3  ;;  %6223 = vrcp.f32 %v1342_v2  ;;  %v1343_v10 = vadd.f32 1.0, %v6212_v5  ;;  %v5141_v13 = vmul.f32 -1.442695, %v6800_v3  ;;  %v1135_v15 = vpop.f32.mrb[35].mxu0  ;;  %v6806_v17 = vadd.f32 %v5731_v9, %v5121_v18 }
 0x2f6   :  { %8212 = vst [vmem:[#allocation11_spill] sm:$0xff] %v6802_v7  ;;  %6225 = vrcp.f32 %v1345_v6  ;;  %v5139_v16 = vmul.f32 -1.442695, %v6802_v7  ;;  %v6808_v20 = vadd.f32 %v5121_v18, %v1135_v15 }
 0x2f7   :  { %8213 = vst [vmem:[#allocation12_spill] sm:$0xff] %v6806_v17  ;;  %6227 = vrcp.f32 %v1343_v10  ;;  %v5142_v21 = vmul.f32 -1.442695, %v6806_v17 }
 0x2f8   :  { %8214 = vst [vmem:[#allocation13_spill] sm:$0xff] %v6808_v20  ;;  %6229 = vpow2.f32 %v5141_v13  ;;  %v5140_v27 = vmul.f32 -1.442695, %v6808_v20  ;;  %v233_v13 = vld [vmem:[%s5046_s15] sm:$0xf]  ;;  %s6536_s15 = smov 18  }
 0x2f9   :  { %v6214_v25 = vpop.eup %6213  ;;  %6231 = vpow2.f32 %v5139_v16  ;;  %5998 = vmatprep.subr.msk.bf16.mxu0 %vm1599_vm4, %v233_v13  ;;  %v1601_v15 = vsel %vm1599_vm4, %v233_v13, 0  ;;  %v6095_v16 = vld [vmem:[%s6826_s19] sm:$0xff]   ;;  %s7115_s18 = sld [smem:[%s8178_s0 + %s6536_s15]]   ;;  %s6551_s15 = smov 28  }
 0x2fa   :  { %v6216_v29 = vpop.eup %6215  ;;  %v1348_v30 = vadd.f32 1.0, %v6214_v25  ;;  %6233 = vpow2.f32 %v5142_v21  ;;  %5777 = vmatpush3.bf16.msra.mxu0 %v1601_v15  ;;  %v6096_v21 = vld [vmem:[%s6826_s19 + $0x8] sm:$0xff]   ;;  %5790 = vmatprep.subr.bf16.mxu1 %v6095_v16  ;;  %v6097_v25 = vld [vmem:[%s6826_s19 + $0x10] sm:$0xff]  }
 0x2fb   :  { %v6218_v35 = vpop.eup %6217  ;;  %v1346_v38 = vadd.f32 1.0, %v6216_v29  ;;  %6235 = vpow2.f32 %v5140_v27  ;;  %v5143_v27 = vld [vmem:[%s5045_s23] ss:$0 sm:$0xff]  ;;  %s6538_s23 = smov 19  }
 0x2fc   :  { %v6220_v39 = vpop.eup %6219  ;;  %6237 = vrcp.f32 %v1348_v30  ;;  %v1349_v42 = vadd.f32 1.0, %v6218_v35  ;;  %s5053_s26 = sld [smem:[%s8178_s0 + %s6538_s23]]   ;;  %s6553_s23 = smov 33  }
 0x2fd   :  { %6239 = vrcp.f32 %v1346_v38  ;;  %v1347_v44 = vadd.f32 1.0, %v6220_v39 }
 0x2fe   :  { %v6222_v18 = vpop.eup %6221  ;;  %6241 = vrcp.f32 %v1349_v42 }
 0x2ff   :  { %v6224_v46 = vpop.eup %6223  ;;  %6243 = vrcp.f32 %v1347_v44 }
 0x300   :  { %v6226_v58 = vpop.eup %6225 }
 0x301   :  { %v6228_v47 = vpop.eup %6227  ;;  %v1379_v48 = vpack.c.bf16 %v6226_v58, %v6222_v18 }
 0x302   :  { %v6230_v36 = vpop.eup %6229  ;;  %v1378_v41 = vpack.c.bf16 %v6228_v47, %v6224_v46 }
 0x303   :  { %v6232_v24 = vpop.eup %6231  ;;  %v1352_v40 = vadd.f32 1.0, %v6230_v36 }
 0x304   :  { %v6234_v50 = vpop.eup %6233  ;;  %v1350_v51 = vadd.f32 1.0, %v6232_v24  ;;  %5764 = vmatprep.mubr.msk.bf16.mxu1 %vm1402_vm3, %v1378_v41 }
 0x305   :  { %v6236_v53 = vpop.eup %6235  ;;  %6245 = vrcp.f32 %v1352_v40  ;;  %v1353_v54 = vadd.f32 1.0, %v6234_v50  ;;  %5765 = vmatmul.mubr.msk.bf16.vlgmr.msra.gmra.mrb[36].mxu1 %vm1402_vm3, %v1379_v48 }
 0x306   :  { %v6238_v56 = vpop.eup %6237  ;;  %6247 = vrcp.f32 %v1350_v51  ;;  %v1351_v57 = vadd.f32 1.0, %v6236_v53  ;;  %5791 = vmatpush3.bf16.msra.mxu1 %v6095_v16 }
 0x307   :  { %v6240_v60 = vpop.eup %6239  ;;  %6249 = vrcp.f32 %v1353_v54  ;;  %5792 = vmatprep.subr.bf16.mxu1 %v6096_v21 }
 0x308   :  { %v6242_v61 = vpop.eup %6241  ;;  %6251 = vrcp.f32 %v1351_v57 }
 0x309   :  { %v6244_v62 = vpop.eup %6243  ;;  %v1381_v63 = vpack.c.bf16 %v6242_v61, %v6238_v56 }
 0x30a   :  { %v1380_v1 = vpack.c.bf16 %v6244_v62, %v6240_v60  ;;  %5793 = vmatpush3.bf16.msra.mxu1 %v6096_v21 }
 0x30b   :  { %5794 = vmatprep.subr.bf16.mxu1 %v6097_v25 }
 0x30c   :  { %5768 = vmatprep.mubr.msk.bf16.mxu1 %vm1402_vm3, %v1380_v1 }
 0x30d   :  { %5769 = vmatmul.mubr.msk.bf16.gmra.mrb[40].mxu1 %vm1402_vm3, %v1381_v63 }
 0x30e   :  { %5795 = vmatpush3.bf16.msra.mxu1 %v6097_v25 }
 0x30f   :  { %v6246_v2 = vpop.eup %6245 }
 0x310   :  { %v6248_v4 = vpop.eup %6247 }
 0x311   :  { %v6250_v5 = vpop.eup %6249 }
 0x312   :  { %v6252_v6 = vpop.eup %6251  ;;  %v1383_v9 = vpack.c.bf16 %v6250_v5, %v6246_v2 }
 0x313   :  { %v1382_v10 = vpack.c.bf16 %v6252_v6, %v6248_v4 }
 0x315   :  { %5772 = vmatprep.mubr.msk.bf16.mxu1 %vm1402_vm3, %v1382_v10 }
 0x316   :  { %5773 = vmatmul.mubr.msk.bf16.gmra.mrb[44].mxu1 %vm1402_vm3, %v1383_v9 }
 0x3d8   :  { %v5766_v29 = vpop.f32.mrb[36].mxu1 }
 0x3d9   :  { %v1464_v30 = vadd.f32 %v5766_v29, %v5143_v27  ;;  %v1455_v35 = vpop.f32.mrb[37].mxu1 }
 0x3da   :  { %v1456_v38 = vadd.f32 %v5143_v27, %v1455_v35  ;;  %v5767_v39 = vpop.f32.mrb[38].mxu1 }
 0x3db   :  { %v5154_v42 = vmul.f32 -1.442695, %v1464_v30  ;;  %v1467_v44 = vadd.f32 %v5767_v39, %v5143_v27  ;;  %v1458_v18 = vpop.f32.mrb[39].mxu1 }
 0x3dc   :  { %v5152_v46 = vmul.f32 -1.442695, %v1456_v38  ;;  %v1459_v58 = vadd.f32 %v5143_v27, %v1458_v18 }
 0x3dd   :  { %6253 = vpow2.f32 %v5154_v42  ;;  %v5155_v47 = vmul.f32 -1.442695, %v1467_v44 }
 0x3de   :  { %6255 = vpow2.f32 %v5152_v46  ;;  %v5153_v48 = vmul.f32 -1.442695, %v1459_v58 }
 0x3df   :  { %6257 = vpow2.f32 %v5155_v47 }
 0x3e0   :  { %6259 = vpow2.f32 %v5153_v48  ;;  %v5770_v36 = vpop.f32.mrb[40].mxu1 }
 0x3e1   :  { %v1480_v41 = vadd.f32 %v5770_v36, %v5143_v27  ;;  %v1471_v24 = vpop.f32.mrb[41].mxu1 }
 0x3e2   :  { %v1472_v40 = vadd.f32 %v5143_v27, %v1471_v24  ;;  %v5771_v50 = vpop.f32.mrb[42].mxu1 }
 0x3e3   :  { %v5158_v51 = vmul.f32 -1.442695, %v1480_v41  ;;  %v1483_v53 = vadd.f32 %v5771_v50, %v5143_v27  ;;  %v1474_v54 = vpop.f32.mrb[43].mxu1 }
 0x3e4   :  { %v5156_v56 = vmul.f32 -1.442695, %v1472_v40  ;;  %v1475_v57 = vadd.f32 %v5143_v27, %v1474_v54 }
 0x3e5   :  { %6261 = vpow2.f32 %v5158_v51  ;;  %v5159_v60 = vmul.f32 -1.442695, %v1483_v53 }
 0x3e6   :  { %6263 = vpow2.f32 %v5156_v56  ;;  %v5157_v61 = vmul.f32 -1.442695, %v1475_v57 }
 0x3e7   :  { %v6254_v62 = vpop.eup %6253  ;;  %6265 = vpow2.f32 %v5159_v60 }
 0x3e8   :  { %v6256_v63 = vpop.eup %6255  ;;  %v1540_v1 = vadd.f32 1.0, %v6254_v62  ;;  %6267 = vpow2.f32 %v5157_v61 }
 0x3e9   :  { %v6258_v2 = vpop.eup %6257  ;;  %v1538_v4 = vadd.f32 1.0, %v6256_v63  ;;  %v5774_v5 = vpop.f32.mrb[44].mxu1 }
 0x3ea   :  { %v6260_v6 = vpop.eup %6259  ;;  %6269 = vrcp.f32 %v1540_v1  ;;  %v1541_v9 = vadd.f32 1.0, %v6258_v2  ;;  %v1496_v10 = vadd.f32 %v5774_v5, %v5143_v27  ;;  %v1487_v13 = vpop.f32.mrb[45].mxu1 }
 0x3eb   :  { %6271 = vrcp.f32 %v1538_v4  ;;  %v1539_v15 = vadd.f32 1.0, %v6260_v6  ;;  %v1488_v16 = vadd.f32 %v5143_v27, %v1487_v13  ;;  %v5775_v21 = vpop.f32.mrb[46].mxu1 }
 0x3ec   :  { %6273 = vrcp.f32 %v1541_v9  ;;  %v5162_v25 = vmul.f32 -1.442695, %v1496_v10  ;;  %v1499_v29 = vadd.f32 %v5775_v21, %v5143_v27  ;;  %v1490_v30 = vpop.f32.mrb[47].mxu1 }
 0x3ed   :  { %6275 = vrcp.f32 %v1539_v15  ;;  %v5160_v35 = vmul.f32 -1.442695, %v1488_v16  ;;  %v1491_v38 = vadd.f32 %v5143_v27, %v1490_v30  ;;  %v6098_v30 = vld [vmem:[%s6826_s19 + $0x18] sm:$0xff]   ;;  %s6537_s19 = smov 21  }
 0x3ee   :  { %6277 = vpow2.f32 %v5162_v25  ;;  %v5163_v39 = vmul.f32 -1.442695, %v1499_v29  ;;  %5796 = vmatprep.subr.bf16.mxu1 %v6098_v30  ;;  %s7180_s22 = sld [smem:[%s8178_s0 + %s6537_s19]]   ;;  %s6552_s19 = smov 29  }
 0x3ef   :  { %v6262_v42 = vpop.eup %6261  ;;  %6279 = vpow2.f32 %v5160_v35  ;;  %v5161_v44 = vmul.f32 -1.442695, %v1491_v38  ;;  %5797 = vmatpush3.bf16.msra.mxu1 %v6098_v30  ;;  %v6099_v35 = vld [vmem:[%s6845_s27] ss:$16 sps:$4 sm:$0xff]   ;;  %v6101_v38 = vld [vmem:[%s6845_s27 + $0x4] ss:$16 sps:$4 sm:$0xff]  }
 0x3f0   :  { %v6264_v18 = vpop.eup %6263  ;;  %v1544_v46 = vadd.f32 1.0, %v6262_v42  ;;  %6281 = vpow2.f32 %v5163_v39  ;;  %v6104_v39 = vld [vmem:[%s6845_s27 + $0xc] ss:$16 sps:$4 sm:$0xff]   ;;  %1948 = vmatprep.subr.bf16.mxu0 %v6101_v38  ;;  %v6107_v42 = vld [vmem:[%s6845_s27 + $0x24] ss:$16 sps:$4 sm:$0xff]  }
 0x3f1   :  { %v6266_v58 = vpop.eup %6265  ;;  %v1542_v47 = vadd.f32 1.0, %v6264_v18  ;;  %6283 = vpow2.f32 %v5161_v44  ;;  %2041 = vmatprep.subr.bf16.mxu1 %v6104_v39  ;;  %v6105_v44 = vld [vmem:[%s6845_s27 + $0x20] ss:$16 sps:$4 sm:$0xff]   ;;  %v6116_v38 = vld [vmem:[%s6845_s27 + $0x4c] ss:$16 sps:$4 sm:$0xff]  }
 0x3f2   :  { %v6268_v48 = vpop.eup %6267  ;;  %6285 = vrcp.f32 %v1544_v46  ;;  %v1545_v36 = vadd.f32 1.0, %v6266_v58  ;;  %v5122_v18 = vld [vmem:[%s5043_s1] ss:$0 sm:$0xff]  ;;  %s6540_s1 = smov 20  }
 0x3f3   :  { %6287 = vrcp.f32 %v1542_v47  ;;  %v1543_v41 = vadd.f32 1.0, %v6268_v48  ;;  %v1268_v46 = vadd.f32 %v6733_v8, %v5122_v18  ;;  %v1260_v58 = vadd.f32 %v5122_v18, %v6737_v11  ;;  %v6102_v11 = vld [vmem:[%s6845_s27 + $0x8] ss:$16 sps:$4 sm:$0xff]   ;;  %v6111_v39 = vld [vmem:[%s6845_s27 + $0x40] ss:$16 sps:$4 sm:$0xff]   ;;  %s5054_s4 = sld [smem:[%s8178_s0 + %s6540_s1]]  }
 0x3f4   :  { %v6270_v24 = vpop.eup %6269  ;;  %6289 = vrcp.f32 %v1545_v36  ;;  %v1271_v48 = vadd.f32 %v6739_v12, %v5122_v18  ;;  %v1284_v12 = vadd.f32 %v6747_v19, %v5122_v18 }
 0x3f5   :  { %v6272_v40 = vpop.eup %6271  ;;  %6291 = vrcp.f32 %v1543_v41 }
 0x3f6   :  { %v6274_v27 = vpop.eup %6273 }
 0x3f7   :  { %v6276_v50 = vpop.eup %6275  ;;  %v1575_v51 = vpack.c.bf16 %v6274_v27, %v6270_v24  ;;  %v1263_v24 = vadd.f32 %v5122_v18, %v6741_v14  ;;  %v6110_v14 = vld [vmem:[%s6845_s27 + $0x2c] ss:$16 sps:$4 sm:$0xff]  }
 0x3f8   :  { %v6278_v53 = vpop.eup %6277  ;;  %v1574_v54 = vpack.c.bf16 %v6276_v50, %v6272_v40 }
 0x3f9   :  { %v6280_v56 = vpop.eup %6279  ;;  %v1548_v57 = vadd.f32 1.0, %v6278_v53 }
 0x3fa   :  { %v6282_v60 = vpop.eup %6281  ;;  %v1546_v61 = vadd.f32 1.0, %v6280_v56  ;;  %5778 = vmatprep.mubr.msk.bf16.mxu0 %vm1580_vm5, %v1574_v54  ;;  %v1276_v56 = vadd.f32 %v5122_v18, %v6751_v22 }
 0x3fb   :  { %v6284_v62 = vpop.eup %6283  ;;  %6293 = vrcp.f32 %v1548_v57  ;;  %v1549_v63 = vadd.f32 1.0, %v6282_v60  ;;  %5779 = vmatmul.mubr.msk.bf16.vlgmr.msra.gmra.mrb[36].mxu0 %vm1580_vm5, %v1575_v51  ;;  %v1287_v60 = vadd.f32 %v6753_v23, %v5122_v18 }
 0x3fc   :  { %v6286_v1 = vpop.eup %6285  ;;  %6295 = vrcp.f32 %v1546_v61  ;;  %v1547_v2 = vadd.f32 1.0, %v6284_v62  ;;  %1949 = vmatpush1.bf16.msra.mxu0 %v6099_v35 }
 0x3fd   :  { %v6288_v4 = vpop.eup %6287  ;;  %6297 = vrcp.f32 %v1549_v63  ;;  %1950 = vmatprep.subr.bf16.mxu0 %v6107_v42  ;;  %v1279_v63 = vadd.f32 %v5122_v18, %v6755_v26  ;;  %v1300_v26 = vadd.f32 %v6761_v31, %v5122_v18  ;;  %v6114_v42 = vld [vmem:[%s6845_s27 + $0x48] ss:$16 sps:$4 sm:$0xff]  }
 0x3fe   :  { %v6290_v5 = vpop.eup %6289  ;;  %6299 = vrcp.f32 %v1547_v2  ;;  %v6108_v2 = vld [vmem:[%s6845_s27 + $0x28] ss:$16 sps:$4 sm:$0xff]  }
 0x3ff   :  { %v6292_v6 = vpop.eup %6291  ;;  %v1577_v9 = vpack.c.bf16 %v6290_v5, %v6286_v1 }
 0x400   :  { %v1576_v10 = vpack.c.bf16 %v6292_v6, %v6288_v4  ;;  %1951 = vmatpush1.bf16.msra.mxu0 %v6105_v44  ;;  %v6119_v44 = vld [vmem:[%s6845_s27 + $0x64] ss:$16 sps:$4 sm:$0xff]  }
 0x402   :  { %5782 = vmatprep.mubr.msk.bf16.mxu0 %vm1580_vm5, %v1576_v10 }
 0x403   :  { %5783 = vmatmul.mubr.msk.bf16.gmra.mrb[40].mxu0 %vm1580_vm5, %v1577_v9  ;;  %v1292_v9 = vadd.f32 %v5122_v18, %v6763_v33 }
 0x405   :  { %v6294_v13 = vpop.eup %6293 }
 0x406   :  { %v6296_v15 = vpop.eup %6295 }
 0x407   :  { %v6298_v16 = vpop.eup %6297 }
 0x408   :  { %v6300_v21 = vpop.eup %6299  ;;  %v1579_v25 = vpack.c.bf16 %v6298_v16, %v6294_v13  ;;  %v1303_v13 = vadd.f32 %v6765_v34, %v5122_v18 }
 0x409   :  { %v1578_v29 = vpack.c.bf16 %v6300_v21, %v6296_v15  ;;  %v1295_v21 = vadd.f32 %v5122_v18, %v6767_v37  ;;  %v6113_v37 = vld [vmem:[%s6845_s27 + $0x44] ss:$16 sps:$4 sm:$0xff]   ;;  %v6122_v18 = vld [vmem:[%s6845_s27 + $0x6c] ss:$16 sps:$4 sm:$0xff]  }
 0x40a   :  { %1952 = vmatprep.subr.bf16.mxu0 %v6113_v37  ;;  %v6135_v37 = vld [vmem:[%s6924_s5 + $0x40] ss:$16 sps:$4 sm:$0xff]  }
 0x40b   :  { %5786 = vmatprep.mubr.msk.bf16.mxu0 %vm1580_vm5, %v1578_v29  ;;  %1953 = vmatpush1.bf16.msra.mxu0 %v6111_v39  ;;  %v6143_v39 = vld [vmem:[%s6924_s5 + $0x64] ss:$16 sps:$4 sm:$0xff]  }
 0x40c   :  { %5787 = vmatmul.mubr.msk.bf16.gmra.mrb[44].mxu0 %vm1580_vm5, %v1579_v25  ;;  %1954 = vmatprep.subr.bf16.mxu0 %v6119_v44  ;;  %v6146_v44 = vld [vmem:[%s6924_s5 + $0x6c] ss:$16 sps:$4 sm:$0xff]  }
 0x40d   :  { %1980 = vmatprep.mubr.bf16.mxu0 %v6518_v0 }
 0x4ce   :  { %v5780_v47 = vpop.f32.mrb[36].mxu0 }
 0x4cf   :  { %v6858_v36 = vmul.f32 %v5780_v47, %v1268_v46  ;;  %v1637_v41 = vpop.f32.mrb[37].mxu0  ;;  %v6117_v46 = vld [vmem:[%s6845_s27 + $0x60] ss:$16 sps:$4 sm:$0xff]   ;;  %v6125_v47 = vld [vmem:[%s6924_s5 + $0x4] ss:$16 sps:$4 sm:$0xff]  }
 0x4d0   :  { %v6861_v40 = vmul.f32 %v1637_v41, %v1260_v58  ;;  %v5781_v27 = vpop.f32.mrb[38].mxu0  ;;  %v6120_v58 = vld [vmem:[%s6845_s27 + $0x68] ss:$16 sps:$4 sm:$0xff]   ;;  %1955 = vmatpush1.bf16.msra.mxu0 %v6117_v46  ;;  %s6539_s27 = smov 22  }
 0x4d1   :  { %8215 = vst [vmem:[#allocation14_spill] sm:$0xff] %v6858_v36  ;;  %v6863_v50 = vmul.f32 %v5781_v27, %v1271_v48  ;;  %v1640_v51 = vpop.f32.mrb[39].mxu0  ;;  %v6128_v48 = vld [vmem:[%s6924_s5 + $0xc] ss:$16 sps:$4 sm:$0xff]   ;;  %2250 = vmatprep.subr.bf16.mxu0 %v6125_v47  ;;  %v6144_v47 = vld [vmem:[%s6924_s5 + $0x68] ss:$16 sps:$4 sm:$0xff]   ;;  %s7434_s30 = sld [smem:[%s8178_s0 + %s6539_s27]]  }
 0x4d2   :  { %8216 = vst [vmem:[#allocation15_spill] sm:$0xff] %v6861_v40  ;;  %v6865_v53 = vmul.f32 %v1640_v51, %v1263_v24  ;;  %v6931_v24 = vld [vmem:[%s5048_s9] ss:$0 sm:$0xff]  ;;  %s6542_s9 = smov 27   ;;  %s6554_s27 = smov 36  }
 0x4d3   :  { %8217 = vst [vmem:[#allocation16_spill] sm:$0xff] %v6863_v50  ;;  %v1709_v54 = vpack.c.bf16 %v6863_v50, %v6858_v36  ;;  %v6179_v50 = vld [vmem:[%s7115_s18] sm:$0xff]   ;;  %s7665_s12 = sld [smem:[%s8178_s0 + %s6542_s9]]  }
 0x4d4   :  { %8218 = vst [vmem:[#allocation17_spill] sm:$0xff] %v6865_v53  ;;  %v1708_v8 = vpack.c.bf16 %v6865_v53, %v6861_v40 }
 0x4d6   :  { %v5784_v57 = vpop.f32.mrb[40].mxu0  ;;  %5798 = vmatprep.mubr.msk.bf16.mxu1 %vm1744_vm6, %v1708_v8 }
 0x4d7   :  { %v6877_v61 = vmul.f32 %v5784_v57, %v1284_v12  ;;  %v1653_v62 = vpop.f32.mrb[41].mxu0  ;;  %5799 = vmatmul.mubr.msk.bf16.vlgmr.msra.gmra.mrb[48].mxu1 %vm1744_vm6, %v1709_v54 }
 0x4d8   :  { %v6881_v1 = vmul.f32 %v1653_v62, %v1276_v56  ;;  %v5785_v19 = vpop.f32.mrb[42].mxu0  ;;  %2042 = vmatpush1.bf16.msra.mxu1 %v6102_v11  ;;  %v6126_v62 = vld [vmem:[%s6924_s5 + $0x8] ss:$16 sps:$4 sm:$0xff]  }
 0x4d9   :  { %8219 = vst [vmem:[#allocation18_spill] sm:$0xff] %v6877_v61  ;;  %v6884_v4 = vmul.f32 %v5785_v19, %v1287_v60  ;;  %v1656_v22 = vpop.f32.mrb[43].mxu0  ;;  %2043 = vmatprep.subr.bf16.mxu1 %v6110_v14  ;;  %v6123_v60 = vld [vmem:[%s6924_s5] ss:$16 sps:$4 sm:$0xff]  }
 0x4da   :  { %8220 = vst [vmem:[#allocation19_spill] sm:$0xff] %v6881_v1  ;;  %v6886_v5 = vmul.f32 %v1656_v22, %v1279_v63  ;;  %v6131_v63 = vld [vmem:[%s6924_s5 + $0x24] ss:$16 sps:$4 sm:$0xff]  }
 0x4db   :  { %8221 = vst [vmem:[#allocation20_spill] sm:$0xff] %v6884_v4  ;;  %v1711_v6 = vpack.c.bf16 %v6884_v4, %v6877_v61 }
 0x4dc   :  { %8222 = vst [vmem:[#allocation21_spill] sm:$0xff] %v6886_v5  ;;  %v1710_v23 = vpack.c.bf16 %v6886_v5, %v6881_v1  ;;  %2044 = vmatpush1.bf16.msra.mxu1 %v6108_v2  ;;  %v6134_v2 = vld [vmem:[%s6924_s5 + $0x2c] ss:$16 sps:$4 sm:$0xff]  }
 0x4dd   :  { %2045 = vmatprep.subr.bf16.mxu1 %v6116_v38  ;;  %v6138_v38 = vld [vmem:[%s6924_s5 + $0x48] ss:$16 sps:$4 sm:$0xff]  }
 0x4de   :  { %5802 = vmatprep.mubr.msk.bf16.mxu1 %vm1744_vm6, %v1710_v23 }
 0x4df   :  { %v5788_v10 = vpop.f32.mrb[44].mxu0  ;;  %5803 = vmatmul.mubr.msk.bf16.gmra.mrb[52].mxu1 %vm1744_vm6, %v1711_v6  ;;  %v6129_v6 = vld [vmem:[%s6924_s5 + $0x20] ss:$16 sps:$4 sm:$0xff]  }
 0x4e0   :  { %v6897_v15 = vmul.f32 %v5788_v10, %v1300_v26  ;;  %v1669_v16 = vpop.f32.mrb[45].mxu0  ;;  %2046 = vmatpush1.bf16.msra.mxu1 %v6114_v42 }
 0x4e1   :  { %v6900_v25 = vmul.f32 %v1669_v16, %v1292_v9  ;;  %v5789_v31 = vpop.f32.mrb[46].mxu0  ;;  %2047 = vmatprep.subr.bf16.mxu1 %v6122_v18  ;;  %v6137_v16 = vld [vmem:[%s6924_s5 + $0x44] ss:$16 sps:$4 sm:$0xff]  }
 0x4e2   :  { %8223 = vst [vmem:[#allocation22_spill] sm:$0xff] %v6897_v15  ;;  %v6902_v29 = vmul.f32 %v5789_v31, %v1303_v13  ;;  %v1672_v33 = vpop.f32.mrb[47].mxu0  ;;  %v6132_v13 = vld [vmem:[%s6924_s5 + $0x28] ss:$16 sps:$4 sm:$0xff]  }
 0x4e3   :  { %8224 = vst [vmem:[#allocation23_spill] sm:$0xff] %v6900_v25  ;;  %v6904_v30 = vmul.f32 %v1672_v33, %v1295_v21 }
 0x4e4   :  { %8225 = vst [vmem:[#allocation24_spill] sm:$0xff] %v6902_v29  ;;  %v1713_v35 = vpack.c.bf16 %v6902_v29, %v6897_v15  ;;  %2048 = vmatpush1.bf16.msra.mxu1 %v6120_v58  ;;  %v6141_v58 = vld [vmem:[%s6924_s5 + $0x60] ss:$16 sps:$4 sm:$0xff]  }
 0x4e5   :  { %8226 = vst [vmem:[#allocation25_spill] sm:$0xff] %v6904_v30  ;;  %v1712_v34 = vpack.c.bf16 %v6904_v30, %v6900_v25  ;;  %2343 = vmatprep.subr.bf16.mxu1 %v6128_v48 }
 0x4e7   :  { %5806 = vmatprep.mubr.msk.bf16.mxu1 %vm1744_vm6, %v1712_v34 }
 0x4e8   :  { %5807 = vmatmul.mubr.msk.bf16.gmra.mrb[56].mxu1 %vm1744_vm6, %v1713_v35  ;;  %v6140_v35 = vld [vmem:[%s6924_s5 + $0x4c] ss:$16 sps:$4 sm:$0xff]   ;;  %s6541_s5 = smov 23  }
 0x4e9   :  { %2073 = vmatprep.mubr.bf16.mxu1 %v6518_v0  ;;  %s5057_s8 = sld [smem:[%s8178_s0 + %s6541_s5]]  }
 0x5aa   :  { %v5800_v41 = vpop.f32.mrb[48].mxu1 }
 0x5ab   :  { %v1797_v27 = vpop.f32.mrb[49].mxu1  ;;  %v1806_v8 = vadd.f32 %v5800_v41, %v6931_v24 }
 0x5ac   :  { %v5801_v51 = vpop.f32.mrb[50].mxu1  ;;  %v1798_v54 = vadd.f32 %v6931_v24, %v1797_v27 }
 0x5ad   :  { %v1809_v11 = vadd.f32 %v5801_v51, %v6931_v24  ;;  %v1800_v12 = vpop.f32.mrb[51].mxu1 }
 0x5ae   :  { %v1801_v14 = vadd.f32 %v6931_v24, %v1800_v12 }
 0x5af   :  { %v1845_v56 = vpack.c.bf16 %v1809_v11, %v1806_v8 }
 0x5b0   :  { %v1844_v57 = vpack.c.bf16 %v1801_v14, %v1798_v54 }
 0x5b2   :  { %v5804_v19 = vpop.f32.mrb[52].mxu1  ;;  %2140 = vrot.lane.b32.xlu0 %v1844_v57, %s6534_s10  ;;  %5197 = vmatmul.mubr.msk.bf16.vlgmr.msra.gmra.mrb[48].mxu0 %vm1744_vm6, %v1844_v57 }
 0x5b3   :  { %5203 = vmatmul.mubr.msk.bf16.vlgmr.msra.gmra.mrb[60].mxu1 %vm1744_vm6, %v1844_v57  ;;  %v1813_v22 = vpop.f32.mrb[53].mxu1  ;;  %1990 = vmatprep.mubr.bf16.mxu0 %v6518_v0  ;;  %v1822_v26 = vadd.f32 %v5804_v19, %v6931_v24  ;;  %v6148_v57 = vld [vmem:[%s7000_s14 + $0xc0] sm:$0xff]   ;;  %v6151_v19 = vld [vmem:[%s7000_s14 + $0x48] sm:$0xff]  }
 0x5b4   :  { %v5805_v23 = vpop.f32.mrb[54].mxu1  ;;  %2083 = vmatprep.mubr.bf16.mxu1 %v6518_v0  ;;  %2251 = vmatpush1.bf16.msra.mxu0 %v6123_v60  ;;  %v1814_v21 = vadd.f32 %v6931_v24, %v1813_v22  ;;  %v6149_v60 = vld [vmem:[%s7000_s14] sm:$0xff]   ;;  %v6153_v22 = vld [vmem:[%s7000_s14 + $0x8] sm:$0xff]  }
 0x5b5   :  { %v1825_v9 = vadd.f32 %v5805_v23, %v6931_v24  ;;  %v1816_v10 = vpop.f32.mrb[55].mxu1  ;;  %2344 = vmatpush1.bf16.msra.mxu1 %v6126_v62  ;;  %2252 = vmatprep.subr.bf16.mxu0 %v6131_v63  ;;  %v6150_v62 = vld [vmem:[%s7000_s14 + $0x80] sm:$0xff]   ;;  %v6154_v23 = vld [vmem:[%s7000_s14 + $0x88] sm:$0xff]  }
 0x5b6   :  { %v1817_v31 = vadd.f32 %v6931_v24, %v1816_v10  ;;  %2142 = vrot.lane.b32.xlu0 %v1845_v56, %s6534_s10  ;;  %2345 = vmatprep.subr.bf16.mxu1 %v6134_v2  ;;  %v6152_v2 = vld [vmem:[%s7000_s14 + $0xc8] sm:$0xff]   ;;  %v6158_v10 = vld [vmem:[%s7000_s14 + $0x90] sm:$0xff]  }
 0x5b7   :  { %v1847_v33 = vpack.c.bf16 %v1825_v9, %v1822_v26  ;;  %v6156_v26 = vld [vmem:[%s7000_s14 + $0xd0] sm:$0xff]  }
 0x5b8   :  { %v1846_v34 = vpack.c.bf16 %v1817_v31, %v1814_v21  ;;  %2253 = vmatpush1.bf16.msra.mxu0 %v6129_v6  ;;  %v6155_v6 = vld [vmem:[%s7000_s14 + $0x50] sm:$0xff]   ;;  %v6160_v21 = vld [vmem:[%s7000_s14 + $0xd8] sm:$0xff]  }
 0x5b9   :  { %2346 = vmatpush1.bf16.msra.mxu1 %v6132_v13  ;;  %2254 = vmatprep.subr.bf16.mxu0 %v6137_v16  ;;  %v6157_v9 = vld [vmem:[%s7000_s14 + $0x10] sm:$0xff]   ;;  %v6159_v16 = vld [vmem:[%s7000_s14 + $0x58] sm:$0xff]  }
 0x5ba   :  { %2144 = vrot.lane.b32.xlu1 %v1846_v34, %s6534_s10  ;;  %5198 = vmatmul.mubr.msk.bf16.gmra.mrb[52].mxu0 %vm1744_vm6, %v1845_v56  ;;  %v6161_v31 = vld [vmem:[%s7000_s14 + $0x18] sm:$0xff]  }
 0x5bb   :  { %v5808_v42 = vpop.f32.mrb[56].mxu1  ;;  %5204 = vmatmul.mubr.msk.bf16.gmra.mrb[64].mxu1 %vm1744_vm6, %v1845_v56  ;;  %2000 = vmatprep.mubr.bf16.mxu0 %v6518_v0  ;;  %v6147_v56 = vld [vmem:[%s7000_s14 + $0x40] sm:$0xff]  }
 0x5bc   :  { %v1829_v18 = vpop.f32.mrb[57].mxu1  ;;  %2093 = vmatprep.mubr.bf16.mxu1 %v6518_v0  ;;  %2347 = vmatprep.subr.bf16.mxu1 %v6140_v35  ;;  %v1838_v48 = vadd.f32 %v5808_v42, %v6931_v24  ;;  %v6164_v35 = vld [vmem:[%s7000_s14 + $0xe0] sm:$0xff]   ;;  %v6168_v42 = vld [vmem:[%s7000_s14 + $0xe8] sm:$0xff]  }
 0x5bd   :  { %v5809_v46 = vpop.f32.mrb[58].mxu1  ;;  %2255 = vmatpush1.bf16.msra.mxu0 %v6135_v37  ;;  %2348 = vmatpush1.bf16.msra.mxu1 %v6138_v38  ;;  %v1830_v51 = vadd.f32 %v6931_v24, %v1829_v18  ;;  %v6165_v37 = vld [vmem:[%s7000_s14 + $0x20] sm:$0xff]   ;;  %v6170_v18 = vld [vmem:[%s7000_s14 + $0xa8] sm:$0xff]  }
 0x5be   :  { %v1841_v41 = vadd.f32 %v5809_v46, %v6931_v24  ;;  %v1832_v27 = vpop.f32.mrb[59].mxu1  ;;  %2146 = vrot.lane.b32.xlu1 %v1847_v33, %s6534_s10  ;;  %2256 = vmatprep.subr.bf16.mxu0 %v6143_v39  ;;  %v6166_v38 = vld [vmem:[%s7000_s14 + $0xa0] sm:$0xff]   ;;  %v6171_v46 = vld [vmem:[%s7000_s14 + $0x70] sm:$0xff]  }
 0x5bf   :  { %v1833_v8 = vadd.f32 %v6931_v24, %v1832_v27  ;;  %2349 = vmatprep.subr.bf16.mxu1 %v6146_v44  ;;  %v6169_v44 = vld [vmem:[%s7000_s14 + $0x28] sm:$0xff]   ;;  %v6176_v27 = vld [vmem:[%s7000_s14 + $0xf8] sm:$0xff]  }
 0x5c0   :  { %v1849_v11 = vpack.c.bf16 %v1841_v41, %v1838_v48  ;;  %v6174_v48 = vld [vmem:[%s7000_s14 + $0xb0] sm:$0xff]   ;;  %v6175_v41 = vld [vmem:[%s7000_s14 + $0x78] sm:$0xff]  }
 0x5c1   :  { %v1848_v12 = vpack.c.bf16 %v1833_v8, %v1830_v51  ;;  %2257 = vmatpush1.bf16.msra.mxu0 %v6141_v58  ;;  %2350 = vmatpush1.bf16.msra.mxu1 %v6144_v47  ;;  %v6172_v58 = vld [vmem:[%s7000_s14 + $0xf0] sm:$0xff]   ;;  %v6177_v51 = vld [vmem:[%s7000_s14 + $0x38] sm:$0xff]  }
 0x5c2   :  { %5199 = vmatmul.mubr.msk.bf16.gmra.mrb[56].mxu0 %vm1744_vm6, %v1846_v34  ;;  %2150 = vrot.lane.b32.xlu1 %v1849_v11, %s6534_s10  ;;  %v6173_v47 = vld [vmem:[%s7000_s14 + $0x30] sm:$0xff]   ;;  %v6178_v8 = vld [vmem:[%s7000_s14 + $0xb8] sm:$0xff]  }
 0x5c3   :  { %5205 = vmatmul.mubr.msk.bf16.gmra.mrb[68].mxu1 %vm1744_vm6, %v1846_v34  ;;  %2148 = vrot.lane.b32.xlu0 %v1848_v12, %s6534_s10  ;;  %v6163_v34 = vld [vmem:[%s7000_s14 + $0x60] sm:$0xff]   ;;  %s5059_s10 = sld [smem:[%s8178_s0 + %s6549_s7]]  }
 0x5c4   :  { %2010 = vmatprep.mubr.bf16.mxu0 %v6518_v0  ;;  %2103 = vmatprep.mubr.bf16.mxu1 %v6518_v0 }
 0x5c5   :  { %5454 = vmatprep.subr.bf16.mxu0 %v6147_v56  ;;  %5506 = vmatprep.subr.bf16.mxu1 %v6148_v57 }
 0x5ca   :  { %5200 = vmatmul.mubr.msk.bf16.gmra.mrb[60].mxu0 %vm1744_vm6, %v1847_v33 }
 0x5cb   :  { %5206 = vmatmul.mubr.msk.bf16.gmra.mrb[72].mxu1 %vm1744_vm6, %v1847_v33  ;;  %2020 = vmatprep.mubr.bf16.mxu0 %v6518_v0  ;;  %v6162_v33 = vld [vmem:[%s7000_s14 + $0x98] sm:$0xff]  }
 0x5cc   :  { %2113 = vmatprep.mubr.bf16.mxu1 %v6518_v0 }
 0x5d2   :  { %5201 = vmatmul.mubr.msk.bf16.gmra.mrb[64].mxu0 %vm1744_vm6, %v1848_v12 }
 0x5d3   :  { %5207 = vmatmul.mubr.msk.bf16.gmra.mrb[76].mxu1 %vm1744_vm6, %v1848_v12  ;;  %2030 = vmatprep.mubr.bf16.mxu0 %v6518_v0 }
 0x5d4   :  { %2123 = vmatprep.mubr.bf16.mxu1 %v6518_v0 }
 0x5da   :  { %5202 = vmatmul.mubr.msk.bf16.gmra.mrb[68].mxu0 %vm1744_vm6, %v1849_v11 }
 0x5db   :  { %5208 = vmatmul.mubr.msk.bf16.gmra.mrb[80].mxu1 %vm1744_vm6, %v1849_v11  ;;  %2282 = vmatprep.mubr.bf16.mxu0 %v6518_v0 }
 0x5dc   :  { %2375 = vmatprep.mubr.bf16.mxu1 %v6518_v0 }
 0x624   :  { %v2141_v24 = vpop.permute.xlu0 %2140 }
 0x625   :  { %5225 = vmatmul.mubr.msk.bf16.vlgmr.msra.gmra.mrb[72].mxu0 %vm1744_vm6, %v2141_v24  ;;  %5231 = vmatmul.mubr.msk.bf16.vlgmr.msra.gmra.mrb[84].mxu1 %vm1744_vm6, %v2141_v24 }
 0x626   :  { %2292 = vmatprep.mubr.bf16.mxu0 %v6518_v0  ;;  %2385 = vmatprep.mubr.bf16.mxu1 %v6518_v0 }
 0x627   :  { %5455 = vmatpush3.bf16.msra.mxu0 %v6149_v60  ;;  %5507 = vmatpush3.bf16.msra.mxu1 %v6150_v62 }
 0x628   :  { %v2143_v54 = vpop.permute.xlu0 %2142  ;;  %5456 = vmatprep.subr.bf16.mxu0 %v6151_v19  ;;  %5508 = vmatprep.subr.bf16.mxu1 %v6152_v2 }
 0x62b   :  { %5457 = vmatpush3.bf16.msra.mxu0 %v6153_v22  ;;  %5509 = vmatpush3.bf16.msra.mxu1 %v6154_v23 }
 0x62c   :  { %v2145_v14 = vpop.permute.xlu1 %2144  ;;  %5458 = vmatprep.subr.bf16.mxu0 %v6155_v6  ;;  %5510 = vmatprep.subr.bf16.mxu1 %v6156_v26 }
 0x62d   :  { %5226 = vmatmul.mubr.msk.bf16.gmra.mrb[76].mxu0 %vm1744_vm6, %v2143_v54  ;;  %5232 = vmatmul.mubr.msk.bf16.gmra.mrb[88].mxu1 %vm1744_vm6, %v2143_v54 }
 0x62e   :  { %2302 = vmatprep.mubr.bf16.mxu0 %v6518_v0  ;;  %2395 = vmatprep.mubr.bf16.mxu1 %v6518_v0 }
 0x62f   :  { %5459 = vmatpush3.bf16.msra.mxu0 %v6157_v9  ;;  %5511 = vmatpush3.bf16.msra.mxu1 %v6158_v10 }
 0x630   :  { %v2147_v63 = vpop.permute.xlu1 %2146  ;;  %5460 = vmatprep.subr.bf16.mxu0 %v6159_v16  ;;  %5512 = vmatprep.subr.bf16.mxu1 %v6160_v21 }
 0x633   :  { %5461 = vmatpush3.bf16.msra.mxu0 %v6161_v31  ;;  %5513 = vmatpush3.bf16.msra.mxu1 %v6162_v33 }
 0x634   :  { %5462 = vmatprep.subr.bf16.mxu0 %v6163_v34  ;;  %v2151_v39 = vpop.permute.xlu1 %2150  ;;  %5514 = vmatprep.subr.bf16.mxu1 %v6164_v35 }
 0x635   :  { %5227 = vmatmul.mubr.msk.bf16.gmra.mrb[80].mxu0 %vm1744_vm6, %v2145_v14  ;;  %5233 = vmatmul.mubr.msk.bf16.gmra.mrb[92].mxu1 %vm1744_vm6, %v2145_v14  ;;  %v2149_v13 = vpop.permute.xlu0 %2148 }
 0x636   :  { %2312 = vmatprep.mubr.bf16.mxu0 %v6518_v0  ;;  %2405 = vmatprep.mubr.bf16.mxu1 %v6518_v0 }
 0x637   :  { %5463 = vmatpush3.bf16.msra.mxu0 %v6165_v37  ;;  %5515 = vmatpush3.bf16.msra.mxu1 %v6166_v38 }
 0x638   :  { %5516 = vmatprep.subr.bf16.mxu1 %v6168_v42 }
 0x63b   :  { %5517 = vmatpush3.bf16.msra.mxu1 %v6170_v18 }
 0x63c   :  { %5518 = vmatprep.subr.bf16.mxu1 %v6172_v58 }
 0x63d   :  { %5228 = vmatmul.mubr.msk.bf16.gmra.mrb[84].mxu0 %vm1744_vm6, %v2147_v63  ;;  %5234 = vmatmul.mubr.msk.bf16.gmra.mrb[96].mxu1 %vm1744_vm6, %v2147_v63 }
 0x63e   :  { %2322 = vmatprep.mubr.bf16.mxu0 %v6518_v0  ;;  %2415 = vmatprep.mubr.bf16.mxu1 %v6518_v0 }
 0x63f   :  { %5519 = vmatpush3.bf16.msra.mxu1 %v6174_v48 }
 0x640   :  { %5520 = vmatprep.subr.bf16.mxu1 %v6176_v27 }
 0x643   :  { %5521 = vmatpush3.bf16.msra.mxu1 %v6178_v8 }
 0x645   :  { %5229 = vmatmul.mubr.msk.bf16.gmra.mrb[88].mxu0 %vm1744_vm6, %v2149_v13  ;;  %5235 = vmatmul.mubr.msk.bf16.gmra.mrb[100].mxu1 %vm1744_vm6, %v2149_v13 }
 0x646   :  { %2332 = vmatprep.mubr.bf16.mxu0 %v6518_v0  ;;  %2425 = vmatprep.mubr.bf16.mxu1 %v6518_v0  ;;  %v6167_v0 = vld [vmem:[%s7000_s14 + $0x68] sm:$0xff]   ;;  %s7861_s14 = sld [smem:[%s8178_s0 + %s6550_s11]]  }
 0x647   :  { %5464 = vmatprep.subr.bf16.mxu0 %v6167_v0 }
 0x648   :  { %5465 = vmatpush3.bf16.msra.mxu0 %v6169_v44 }
 0x649   :  { %5466 = vmatprep.subr.bf16.mxu0 %v6171_v46 }
 0x64c   :  { %5467 = vmatpush3.bf16.msra.mxu0 %v6173_v47 }
 0x64d   :  { %5230 = vmatmul.mubr.msk.bf16.gmra.mrb[92].mxu0 %vm1744_vm6, %v2151_v39  ;;  %5236 = vmatmul.mubr.msk.bf16.gmra.mrb[104].mxu1 %vm1744_vm6, %v2151_v39 }
 0x64e   :  { %5468 = vmatprep.subr.bf16.mxu0 %v6175_v41 }
 0x650   :  { %5469 = vmatpush3.bf16.msra.mxu0 %v6177_v51 }
 0x651   :  { %5810 = vmatprep.subr.bf16.mxu0 %v6179_v50 }
 0x685   :  { %v1982_v11 = vpop.f32.mrb[48].mxu0 }
 0x686   :  { %v2075_v12 = vpop.f32.mrb[60].mxu1  ;;  %v1984_v24 = vpop.f32.mrb[49].mxu0 }
 0x687   :  { %v2077_v54 = vpop.f32.mrb[61].mxu1  ;;  %v1986_v14 = vpop.f32.mrb[50].mxu0 }
 0x688   :  { %v2079_v56 = vpop.f32.mrb[62].mxu1  ;;  %v1988_v57 = vpop.f32.mrb[51].mxu0 }
 0x689   :  { %v2081_v60 = vpop.f32.mrb[63].mxu1 }
 0x68d   :  { %v7048_v62 = vpop.f32.mrb[52].mxu0 }
 0x68e   :  { %v7050_v63 = vpop.f32.mrb[64].mxu1  ;;  %v7052_v19 = vpop.f32.mrb[53].mxu0 }
 0x68f   :  { %v7054_v2 = vpop.f32.mrb[65].mxu1  ;;  %v7056_v22 = vpop.f32.mrb[54].mxu0 }
 0x690   :  { %v7058_v23 = vpop.f32.mrb[66].mxu1  ;;  %v7060_v6 = vpop.f32.mrb[55].mxu0 }
 0x691   :  { %v7062_v26 = vpop.f32.mrb[67].mxu1 }
 0x695   :  { %v7064_v9 = vpop.f32.mrb[56].mxu0 }
 0x696   :  { %v7066_v10 = vpop.f32.mrb[68].mxu1  ;;  %v7068_v13 = vpop.f32.mrb[57].mxu0 }
 0x697   :  { %v7070_v16 = vpop.f32.mrb[69].mxu1  ;;  %v7072_v21 = vpop.f32.mrb[58].mxu0 }
 0x698   :  { %v7074_v31 = vpop.f32.mrb[70].mxu1  ;;  %v7076_v33 = vpop.f32.mrb[59].mxu0 }
 0x699   :  { %v7078_v34 = vpop.f32.mrb[71].mxu1 }
 0x69d   :  { %v7080_v35 = vpop.f32.mrb[60].mxu0 }
 0x69e   :  { %v7082_v37 = vpop.f32.mrb[72].mxu1  ;;  %v7084_v38 = vpop.f32.mrb[61].mxu0 }
 0x69f   :  { %v7086_v39 = vpop.f32.mrb[73].mxu1  ;;  %v7088_v0 = vpop.f32.mrb[62].mxu0 }
 0x6a0   :  { %v7090_v42 = vpop.f32.mrb[74].mxu1  ;;  %v7092_v44 = vpop.f32.mrb[63].mxu0 }
 0x6a1   :  { %v7094_v18 = vpop.f32.mrb[75].mxu1 }
 0x6a5   :  { %v7096_v46 = vpop.f32.mrb[64].mxu0 }
 0x6a6   :  { %v7098_v58 = vpop.f32.mrb[76].mxu1  ;;  %v7100_v47 = vpop.f32.mrb[65].mxu0 }
 0x6a7   :  { %v7102_v48 = vpop.f32.mrb[77].mxu1  ;;  %v7104_v41 = vpop.f32.mrb[66].mxu0 }
 0x6a8   :  { %v7106_v27 = vpop.f32.mrb[78].mxu1  ;;  %v7108_v51 = vpop.f32.mrb[67].mxu0 }
 0x6a9   :  { %v7110_v8 = vpop.f32.mrb[79].mxu1 }
 0x6ad   :  { %v7117_v29 = vpop.f32.mrb[68].mxu0 }
 0x6ae   :  { %v7119_v15 = vpop.f32.mrb[80].mxu1  ;;  %v7121_v30 = vpop.f32.mrb[69].mxu0 }
 0x6af   :  { %8227 = vst [vmem:[#allocation26_spill] sm:$0xff] %v7121_v30  ;;  %v7123_v25 = vpop.f32.mrb[81].mxu1  ;;  %v7125_v4 = vpop.f32.mrb[70].mxu0  ;;  %v6180_v30 = vld [vmem:[%s7115_s18 + $0x8] sm:$0xff]  }
 0x6b0   :  { %8228 = vst [vmem:[#allocation27_spill] sm:$0xff] %v7123_v25  ;;  %8229 = vst [vmem:[#allocation28_spill] sm:$0xff] %v7125_v4  ;;  %v7127_v61 = vpop.f32.mrb[82].mxu1  ;;  %v7129_v5 = vpop.f32.mrb[71].mxu0 }
 0x6b1   :  { %8230 = vst [vmem:[#allocation29_spill] sm:$0xff] %v7127_v61  ;;  %8231 = vst [vmem:[#allocation30_spill] sm:$0xff] %v7129_v5  ;;  %v7131_v1 = vpop.f32.mrb[83].mxu1 }
 0x6b2   :  { %8232 = vst [vmem:[#allocation31_spill] sm:$0xff] %v7131_v1 }
 0x6f8   :  { %v2284_v36 = vpop.f32.mrb[72].mxu0  ;;  %v2377_v53 = vpop.f32.mrb[84].mxu1 }
 0x6f9   :  { %v2436_v40 = vmul.f32 %v2284_v36, %v1982_v11  ;;  %v2438_v17 = vmul.f32 %v2377_v53, %v2075_v12  ;;  %v2286_v3 = vpop.f32.mrb[73].mxu0  ;;  %v2379_v20 = vpop.f32.mrb[85].mxu1 }
 0x6fa   :  { %v2437_v7 = vmul.f32 %v2286_v3, %v1984_v24  ;;  %v2439_v52 = vmul.f32 %v2379_v20, %v2077_v54  ;;  %v2288_v32 = vpop.f32.mrb[74].mxu0  ;;  %v2381_v55 = vpop.f32.mrb[86].mxu1 }
 0x6fb   :  { %v2440_v49 = vmul.f32 %v2288_v32, %v1986_v14  ;;  %v2442_v59 = vmul.f32 %v2381_v55, %v2079_v56  ;;  %v2290_v43 = vpop.f32.mrb[75].mxu0  ;;  %v2383_v28 = vpop.f32.mrb[87].mxu1 }
 0x6fc   :  { %v2441_v45 = vmul.f32 %v2290_v43, %v1988_v57  ;;  %v2443_v5 = vmul.f32 %v2383_v28, %v2081_v60 }
 0x6fd   :  { %v2484_v1 = vpack.c.bf16 %v2440_v49, %v2436_v40  ;;  %v2486_v61 = vpack.c.bf16 %v2442_v59, %v2438_v17 }
 0x6fe   :  { %v2485_v4 = vpack.c.bf16 %v2441_v45, %v2437_v7  ;;  %v2487_v25 = vpack.c.bf16 %v2443_v5, %v2439_v52 }
 0x700   :  { %v2294_v36 = vpop.f32.mrb[76].mxu0  ;;  %v2387_v53 = vpop.f32.mrb[88].mxu1  ;;  %2732 = vmatprep.mubr.bf16.mxu0 %v2485_v4  ;;  %2813 = vmatprep.mubr.bf16.mxu1 %v2487_v25 }
 0x701   :  { %v2444_v3 = vmul.f32 %v2294_v36, %v7048_v62  ;;  %v2446_v20 = vmul.f32 %v2387_v53, %v7050_v63  ;;  %v2296_v11 = vpop.f32.mrb[77].mxu0  ;;  %v2389_v32 = vpop.f32.mrb[89].mxu1  ;;  %2733 = vmatmul.mubr.bf16.vlgmr.msra.gmra.mrb[96].mxu0 %v2484_v1  ;;  %2814 = vmatmul.mubr.bf16.vlgmr.msra.gmra.mrb[108].mxu1 %v2486_v61 }
 0x702   :  { %v2445_v43 = vmul.f32 %v2296_v11, %v7052_v19  ;;  %v2447_v28 = vmul.f32 %v2389_v32, %v7054_v2  ;;  %v2298_v59 = vpop.f32.mrb[78].mxu0  ;;  %v2391_v45 = vpop.f32.mrb[90].mxu1  ;;  %5811 = vmatpush3.bf16.msra.mxu0 %v6179_v50 }
 0x703   :  { %v2448_v49 = vmul.f32 %v2298_v59, %v7056_v22  ;;  %v2450_v52 = vmul.f32 %v2391_v45, %v7058_v23  ;;  %v2300_v55 = vpop.f32.mrb[79].mxu0  ;;  %v2393_v7 = vpop.f32.mrb[91].mxu1  ;;  %5812 = vmatprep.subr.bf16.mxu0 %v6180_v30 }
 0x704   :  { %v2449_v17 = vmul.f32 %v2300_v55, %v7060_v6  ;;  %v2451_v40 = vmul.f32 %v2393_v7, %v7062_v26 }
 0x705   :  { %v2488_v1 = vpack.c.bf16 %v2448_v49, %v2444_v3  ;;  %v2490_v61 = vpack.c.bf16 %v2450_v52, %v2446_v20 }
 0x706   :  { %v2489_v4 = vpack.c.bf16 %v2449_v17, %v2445_v43  ;;  %v2491_v5 = vpack.c.bf16 %v2451_v40, %v2447_v28  ;;  %5813 = vmatpush3.bf16.msra.mxu0 %v6180_v30 }
 0x708   :  { %v2304_v25 = vpop.f32.mrb[80].mxu0  ;;  %v2397_v12 = vpop.f32.mrb[92].mxu1  ;;  %2740 = vmatprep.mubr.bf16.mxu0 %v2489_v4  ;;  %2821 = vmatprep.mubr.bf16.mxu1 %v2491_v5 }
 0x709   :  { %v2452_v50 = vmul.f32 %v2304_v25, %v7064_v9  ;;  %v2454_v24 = vmul.f32 %v2397_v12, %v7066_v10  ;;  %v2306_v54 = vpop.f32.mrb[81].mxu0  ;;  %v2399_v14 = vpop.f32.mrb[93].mxu1  ;;  %2741 = vmatmul.mubr.bf16.gmra.mrb[100].mxu0 %v2488_v1  ;;  %2822 = vmatmul.mubr.bf16.gmra.mrb[112].mxu1 %v2490_v61 }
 0x70a   :  { %v2453_v56 = vmul.f32 %v2306_v54, %v7068_v13  ;;  %v2455_v57 = vmul.f32 %v2399_v14, %v7070_v16  ;;  %v2308_v60 = vpop.f32.mrb[82].mxu0  ;;  %v2401_v62 = vpop.f32.mrb[94].mxu1 }
 0x70b   :  { %v2456_v30 = vmul.f32 %v2308_v60, %v7072_v21  ;;  %v2458_v63 = vmul.f32 %v2401_v62, %v7074_v31  ;;  %v2310_v19 = vpop.f32.mrb[83].mxu0  ;;  %v2403_v2 = vpop.f32.mrb[95].mxu1 }
 0x70c   :  { %v2457_v22 = vmul.f32 %v2310_v19, %v7076_v33  ;;  %v2459_v23 = vmul.f32 %v2403_v2, %v7078_v34  ;;  %v8236_v19 = vld [vmem:[#allocation29_spill] sm:$0xff] }
 0x70d   :  { %v2492_v6 = vpack.c.bf16 %v2456_v30, %v2452_v50  ;;  %v2494_v26 = vpack.c.bf16 %v2458_v63, %v2454_v24  ;;  %v8235_v30 = vld [vmem:[#allocation28_spill] sm:$0xff] }
 0x70e   :  { %v2493_v9 = vpack.c.bf16 %v2457_v22, %v2453_v56  ;;  %v2495_v10 = vpack.c.bf16 %v2459_v23, %v2455_v57  ;;  %v8233_v56 = vld [vmem:[#allocation26_spill] sm:$0xff]  ;;  %v8234_v57 = vld [vmem:[#allocation27_spill] sm:$0xff] }
 0x70f   :  { %v8237_v23 = vld [vmem:[#allocation30_spill] sm:$0xff] }
 0x710   :  { %v2314_v36 = vpop.f32.mrb[84].mxu0  ;;  %v2407_v13 = vpop.f32.mrb[96].mxu1  ;;  %2748 = vmatprep.mubr.bf16.mxu0 %v2493_v9  ;;  %2829 = vmatprep.mubr.bf16.mxu1 %v2495_v10 }
 0x711   :  { %v2460_v16 = vmul.f32 %v2314_v36, %v7080_v35  ;;  %v2462_v21 = vmul.f32 %v2407_v13, %v7082_v37  ;;  %v2316_v53 = vpop.f32.mrb[85].mxu0  ;;  %v2409_v31 = vpop.f32.mrb[97].mxu1  ;;  %2749 = vmatmul.mubr.bf16.gmra.mrb[104].mxu0 %v2492_v6  ;;  %2830 = vmatmul.mubr.bf16.gmra.mrb[116].mxu1 %v2494_v26  ;;  %v8238_v6 = vld [vmem:[#allocation31_spill] sm:$0xff] }
 0x712   :  { %v2461_v33 = vmul.f32 %v2316_v53, %v7084_v38  ;;  %v2463_v34 = vmul.f32 %v2409_v31, %v7086_v39  ;;  %v2318_v3 = vpop.f32.mrb[86].mxu0  ;;  %v2411_v20 = vpop.f32.mrb[98].mxu1  ;;  %v6183_v53 = vld [vmem:[%s7180_s22] sm:$0xff]   ;;  %v6184_v31 = vld [vmem:[%s7180_s22 + $0x8] sm:$0xff]  }
 0x713   :  { %v2464_v11 = vmul.f32 %v2318_v3, %v7088_v0  ;;  %v2466_v32 = vmul.f32 %v2411_v20, %v7090_v42  ;;  %v2320_v43 = vpop.f32.mrb[87].mxu0  ;;  %v2413_v28 = vpop.f32.mrb[99].mxu1  ;;  %5830 = vmatprep.subr.bf16.mxu1 %v6183_v53 }
 0x714   :  { %v2465_v35 = vmul.f32 %v2320_v43, %v7092_v44  ;;  %v2467_v37 = vmul.f32 %v2413_v28, %v7094_v18  ;;  %5831 = vmatpush3.bf16.msra.mxu1 %v6183_v53 }
 0x715   :  { %v2496_v59 = vpack.c.bf16 %v2464_v11, %v2460_v16  ;;  %v2498_v45 = vpack.c.bf16 %v2466_v32, %v2462_v21  ;;  %v6181_v16 = vld [vmem:[%s7115_s18 + $0x10] sm:$0xff]   ;;  %v6182_v21 = vld [vmem:[%s7115_s18 + $0x18] sm:$0xff]   ;;  %5832 = vmatprep.subr.bf16.mxu1 %v6184_v31  ;;  %s5062_s18 = sld [smem:[%s8178_s0 + %s6551_s15]]  }
 0x716   :  { %v2497_v49 = vpack.c.bf16 %v2465_v35, %v2461_v33  ;;  %v2499_v52 = vpack.c.bf16 %v2467_v37, %v2463_v34  ;;  %5814 = vmatprep.subr.bf16.mxu0 %v6181_v16 }
 0x717   :  { %5815 = vmatpush3.bf16.msra.mxu0 %v6181_v16 }
 0x718   :  { %v2324_v55 = vpop.f32.mrb[88].mxu0  ;;  %v2417_v38 = vpop.f32.mrb[100].mxu1  ;;  %2756 = vmatprep.mubr.bf16.mxu0 %v2497_v49  ;;  %2837 = vmatprep.mubr.bf16.mxu1 %v2499_v52 }
 0x719   :  { %v2468_v39 = vmul.f32 %v2324_v55, %v7096_v46  ;;  %v2470_v0 = vmul.f32 %v2417_v38, %v7098_v58  ;;  %v2326_v7 = vpop.f32.mrb[89].mxu0  ;;  %v2419_v42 = vpop.f32.mrb[101].mxu1  ;;  %2757 = vmatmul.mubr.bf16.gmra.mrb[108].mxu0 %v2496_v59  ;;  %2838 = vmatmul.mubr.bf16.gmra.mrb[120].mxu1 %v2498_v45 }
 0x71a   :  { %v2469_v44 = vmul.f32 %v2326_v7, %v7100_v47  ;;  %v2471_v18 = vmul.f32 %v2419_v42, %v7102_v48  ;;  %v2328_v17 = vpop.f32.mrb[90].mxu0  ;;  %v2421_v40 = vpop.f32.mrb[102].mxu1  ;;  %5816 = vmatprep.subr.bf16.mxu0 %v6182_v21  ;;  %5833 = vmatpush3.bf16.msra.mxu1 %v6184_v31 }
 0x71b   :  { %v2472_v1 = vmul.f32 %v2328_v17, %v7104_v41  ;;  %v2474_v61 = vmul.f32 %v2421_v40, %v7106_v27  ;;  %v2330_v4 = vpop.f32.mrb[91].mxu0  ;;  %v2423_v5 = vpop.f32.mrb[103].mxu1  ;;  %5817 = vmatpush3.bf16.msra.mxu0 %v6182_v21 }
 0x71c   :  { %v2473_v46 = vmul.f32 %v2330_v4, %v7108_v51  ;;  %v2475_v58 = vmul.f32 %v2423_v5, %v7110_v8 }
 0x71d   :  { %v2500_v25 = vpack.c.bf16 %v2472_v1, %v2468_v39  ;;  %v2502_v12 = vpack.c.bf16 %v2474_v61, %v2470_v0 }
 0x71e   :  { %v2501_v50 = vpack.c.bf16 %v2473_v46, %v2469_v44  ;;  %v2503_v24 = vpack.c.bf16 %v2475_v58, %v2471_v18 }
 0x720   :  { %v2334_v54 = vpop.f32.mrb[92].mxu0  ;;  %v2427_v47 = vpop.f32.mrb[104].mxu1  ;;  %2764 = vmatprep.mubr.bf16.mxu0 %v2501_v50  ;;  %2845 = vmatprep.mubr.bf16.mxu1 %v2503_v24 }
 0x721   :  { %v2476_v48 = vmul.f32 %v2334_v54, %v7117_v29  ;;  %v2478_v41 = vmul.f32 %v2427_v47, %v7119_v15  ;;  %v2336_v14 = vpop.f32.mrb[93].mxu0  ;;  %v2429_v27 = vpop.f32.mrb[105].mxu1  ;;  %2765 = vmatmul.mubr.bf16.gmra.mrb[112].mxu0 %v2500_v25  ;;  %2846 = vmatmul.mubr.bf16.gmra.mrb[124].mxu1 %v2502_v12 }
 0x722   :  { %v2477_v51 = vmul.f32 %v2336_v14, %v8233_v56  ;;  %v2479_v8 = vmul.f32 %v2429_v27, %v8234_v57  ;;  %v2338_v60 = vpop.f32.mrb[94].mxu0  ;;  %v2431_v62 = vpop.f32.mrb[106].mxu1 }
 0x723   :  { %v2480_v63 = vmul.f32 %v2338_v60, %v8235_v30  ;;  %v2482_v2 = vmul.f32 %v2431_v62, %v8236_v19  ;;  %v2340_v22 = vpop.f32.mrb[95].mxu0  ;;  %v2433_v29 = vpop.f32.mrb[107].mxu1 }
 0x724   :  { %v2481_v15 = vmul.f32 %v2340_v22, %v8237_v23  ;;  %v2483_v26 = vmul.f32 %v2433_v29, %v8238_v6 }
 0x725   :  { %v2504_v9 = vpack.c.bf16 %v2480_v63, %v2476_v48  ;;  %v2506_v10 = vpack.c.bf16 %v2482_v2, %v2478_v41 }
 0x726   :  { %v2505_v36 = vpack.c.bf16 %v2481_v15, %v2477_v51  ;;  %v2507_v13 = vpack.c.bf16 %v2483_v26, %v2479_v8 }
 0x728   :  { %2772 = vmatprep.mubr.bf16.mxu0 %v2505_v36  ;;  %2853 = vmatprep.mubr.bf16.mxu1 %v2507_v13 }
 0x729   :  { %2773 = vmatmul.mubr.bf16.gmra.mrb[116].mxu0 %v2504_v9  ;;  %2854 = vmatmul.mubr.bf16.gmra.mrb[128].mxu1 %v2506_v10 }
 0x7d4   :  { %v5470_v33 = vpop.f32.mrb[96].mxu0  ;;  %v5522_v34 = vpop.f32.mrb[108].mxu1 }
 0x7d5   :  { %v5471_v3 = vpop.f32.mrb[97].mxu0  ;;  %v5523_v20 = vpop.f32.mrb[109].mxu1 }
 0x7d6   :  { %v5472_v11 = vadd.f32 %v5471_v3, %v5470_v33  ;;  %v5524_v32 = vadd.f32 %v5523_v20, %v5522_v34  ;;  %v5473_v43 = vpop.f32.mrb[98].mxu0  ;;  %v5525_v28 = vpop.f32.mrb[110].mxu1 }
 0x7d7   :  { %v5474_v35 = vpop.f32.mrb[99].mxu0  ;;  %v5526_v37 = vpop.f32.mrb[111].mxu1 }
 0x7d8   :  { %v2816_v59 = vadd.f32 %v5524_v32, %v5472_v11  ;;  %v5475_v45 = vadd.f32 %v5474_v35, %v5473_v43  ;;  %v5527_v49 = vadd.f32 %v5526_v37, %v5525_v28 }
 0x7da   :  { %v2819_v52 = vadd.f32 %v5527_v49, %v5475_v45 }
 0x7dc   :  { %v2862_v55 = vpack.c.bf16 %v2819_v52, %v2816_v59  ;;  %v5476_v38 = vpop.f32.mrb[100].mxu0  ;;  %v5528_v39 = vpop.f32.mrb[112].mxu1 }
 0x7dd   :  { %v5477_v0 = vpop.f32.mrb[101].mxu0  ;;  %v5529_v7 = vpop.f32.mrb[113].mxu1 }
 0x7de   :  { %v5478_v42 = vadd.f32 %v5477_v0, %v5476_v38  ;;  %v5530_v44 = vadd.f32 %v5529_v7, %v5528_v39  ;;  %v5479_v18 = vpop.f32.mrb[102].mxu0  ;;  %v5531_v17 = vpop.f32.mrb[114].mxu1  ;;  %5818 = vmatprep.mubr.msk.bf16.mxu0 %vm1744_vm6, %v2862_v55 }
 0x7df   :  { %v5480_v40 = vpop.f32.mrb[103].mxu0  ;;  %v5532_v1 = vpop.f32.mrb[115].mxu1 }
 0x7e0   :  { %v2824_v61 = vadd.f32 %v5530_v44, %v5478_v42  ;;  %v5481_v4 = vadd.f32 %v5480_v40, %v5479_v18  ;;  %v5533_v5 = vadd.f32 %v5532_v1, %v5531_v17 }
 0x7e2   :  { %v2827_v46 = vadd.f32 %v5533_v5, %v5481_v4  ;;  %v6185_v4 = vld [vmem:[%s7180_s22 + $0x10] sm:$0xff]   ;;  %v6186_v5 = vld [vmem:[%s7180_s22 + $0x18] sm:$0xff]   ;;  %s5063_s22 = sld [smem:[%s8178_s0 + %s6552_s19]]  }
 0x7e3   :  { %5834 = vmatprep.subr.bf16.mxu1 %v6185_v4 }
 0x7e4   :  { %v2863_v58 = vpack.c.bf16 %v2827_v46, %v2824_v61  ;;  %v5482_v25 = vpop.f32.mrb[104].mxu0  ;;  %v5534_v12 = vpop.f32.mrb[116].mxu1  ;;  %5835 = vmatpush3.bf16.msra.mxu1 %v6185_v4  ;;  %v5269_v46 = vld [vmem:[%s5053_s26] ss:$0 sm:$0xff]  ;;  %s5067_s26 = sld [smem:[%s8178_s0 + %s6553_s23]]  }
 0x7e5   :  { %v5483_v50 = vpop.f32.mrb[105].mxu0  ;;  %v5535_v24 = vpop.f32.mrb[117].mxu1  ;;  %5836 = vmatprep.subr.bf16.mxu1 %v6186_v5 }
 0x7e6   :  { %v5484_v54 = vadd.f32 %v5483_v50, %v5482_v25  ;;  %v5536_v47 = vadd.f32 %v5535_v24, %v5534_v12  ;;  %v5485_v48 = vpop.f32.mrb[106].mxu0  ;;  %v5537_v41 = vpop.f32.mrb[118].mxu1  ;;  %5819 = vmatmul.mubr.msk.bf16.vlgmr.msra.gmra.mrb[120].mxu0 %vm1744_vm6, %v2863_v58 }
 0x7e7   :  { %v5486_v14 = vpop.f32.mrb[107].mxu0  ;;  %v5538_v27 = vpop.f32.mrb[119].mxu1 }
 0x7e8   :  { %v2832_v56 = vadd.f32 %v5536_v47, %v5484_v54  ;;  %v5487_v51 = vadd.f32 %v5486_v14, %v5485_v48  ;;  %v5539_v57 = vadd.f32 %v5538_v27, %v5537_v41  ;;  %5837 = vmatpush3.bf16.msra.mxu1 %v6186_v5 }
 0x7ea   :  { %v2835_v8 = vadd.f32 %v5539_v57, %v5487_v51 }
 0x7ec   :  { %v2864_v60 = vpack.c.bf16 %v2835_v8, %v2832_v56  ;;  %v5488_v62 = vpop.f32.mrb[108].mxu0  ;;  %v5540_v30 = vpop.f32.mrb[120].mxu1 }
 0x7ed   :  { %v5489_v63 = vpop.f32.mrb[109].mxu0  ;;  %v5541_v19 = vpop.f32.mrb[121].mxu1 }
 0x7ee   :  { %v5490_v2 = vadd.f32 %v5489_v63, %v5488_v62  ;;  %v5542_v22 = vadd.f32 %v5541_v19, %v5540_v30  ;;  %v5491_v29 = vpop.f32.mrb[110].mxu0  ;;  %v5543_v23 = vpop.f32.mrb[122].mxu1  ;;  %5822 = vmatprep.mubr.msk.bf16.mxu0 %vm1744_vm6, %v2864_v60 }
 0x7ef   :  { %v5492_v15 = vpop.f32.mrb[111].mxu0  ;;  %v5544_v6 = vpop.f32.mrb[123].mxu1 }
 0x7f0   :  { %v2840_v26 = vadd.f32 %v5542_v22, %v5490_v2  ;;  %v5493_v9 = vadd.f32 %v5492_v15, %v5491_v29  ;;  %v5545_v10 = vadd.f32 %v5544_v6, %v5543_v23 }
 0x7f2   :  { %v2843_v36 = vadd.f32 %v5545_v10, %v5493_v9 }
 0x7f4   :  { %v2865_v13 = vpack.c.bf16 %v2843_v36, %v2840_v26  ;;  %v5494_v16 = vpop.f32.mrb[112].mxu0  ;;  %v5546_v21 = vpop.f32.mrb[124].mxu1 }
 0x7f5   :  { %v5495_v53 = vpop.f32.mrb[113].mxu0  ;;  %v5547_v31 = vpop.f32.mrb[125].mxu1 }
 0x7f6   :  { %v5496_v33 = vadd.f32 %v5495_v53, %v5494_v16  ;;  %v5548_v34 = vadd.f32 %v5547_v31, %v5546_v21  ;;  %v5497_v3 = vpop.f32.mrb[114].mxu0  ;;  %v5549_v20 = vpop.f32.mrb[126].mxu1  ;;  %5823 = vmatmul.mubr.msk.bf16.gmra.mrb[124].mxu0 %vm1744_vm6, %v2865_v13 }
 0x7f7   :  { %v5498_v11 = vpop.f32.mrb[115].mxu0  ;;  %v5550_v32 = vpop.f32.mrb[127].mxu1 }
 0x7f8   :  { %v2848_v43 = vadd.f32 %v5548_v34, %v5496_v33  ;;  %v5499_v28 = vadd.f32 %v5498_v11, %v5497_v3  ;;  %v5551_v35 = vadd.f32 %v5550_v32, %v5549_v20 }
 0x7fa   :  { %v2851_v37 = vadd.f32 %v5551_v35, %v5499_v28 }
 0x7fc   :  { %v2866_v59 = vpack.c.bf16 %v2851_v37, %v2848_v43  ;;  %v5500_v45 = vpop.f32.mrb[116].mxu0  ;;  %v5552_v49 = vpop.f32.mrb[128].mxu1 }
 0x7fd   :  { %v5501_v52 = vpop.f32.mrb[117].mxu0  ;;  %v5553_v55 = vpop.f32.mrb[129].mxu1 }
 0x7fe   :  { %v5502_v38 = vadd.f32 %v5501_v52, %v5500_v45  ;;  %v5554_v39 = vadd.f32 %v5553_v55, %v5552_v49  ;;  %v5503_v0 = vpop.f32.mrb[118].mxu0  ;;  %v5555_v7 = vpop.f32.mrb[130].mxu1  ;;  %5826 = vmatprep.mubr.msk.bf16.mxu0 %vm1744_vm6, %v2866_v59 }
 0x7ff   :  { %v5504_v42 = vpop.f32.mrb[119].mxu0  ;;  %v5556_v44 = vpop.f32.mrb[131].mxu1 }
 0x800   :  { %v2856_v18 = vadd.f32 %v5554_v39, %v5502_v38  ;;  %v5505_v17 = vadd.f32 %v5504_v42, %v5503_v0  ;;  %v5557_v40 = vadd.f32 %v5556_v44, %v5555_v7 }
 0x802   :  { %v2859_v1 = vadd.f32 %v5557_v40, %v5505_v17 }
 0x804   :  { %v2867_v61 = vpack.c.bf16 %v2859_v1, %v2856_v18 }
 0x806   :  { %5827 = vmatmul.mubr.msk.bf16.gmra.mrb[128].mxu0 %vm1744_vm6, %v2867_v61 }
 0x8b9   :  { %v5820_v58 = vpop.f32.mrb[120].mxu0 }
 0x8ba   :  { %v2950_v25 = vpop.f32.mrb[121].mxu0  ;;  %v7197_v24 = vadd.f32 %v5820_v58, %v5269_v46 }
 0x8bb   :  { %v7195_v12 = vadd.f32 %v5269_v46, %v2950_v25  ;;  %v5821_v50 = vpop.f32.mrb[122].mxu0 }
 0x8bc   :  { %v7199_v54 = vadd.f32 %v5821_v50, %v5269_v46  ;;  %v2953_v47 = vpop.f32.mrb[123].mxu0  ;;  %v2999_v56 = vmul.f32 %v7197_v24, %v7197_v24 }
 0x8bd   :  { %v7201_v48 = vadd.f32 %v5269_v46, %v2953_v47  ;;  %v2997_v14 = vmul.f32 %v7195_v12, %v7195_v12 }
 0x8be   :  { %v3000_v41 = vmul.f32 %v7199_v54, %v7199_v54 }
 0x8bf   :  { %v2998_v27 = vmul.f32 %v7201_v48, %v7201_v48 }
 0x8c0   :  { %v3010_v57 = vpack.c.bf16 %v3000_v41, %v2999_v56 }
 0x8c1   :  { %v3009_v51 = vpack.c.bf16 %v2998_v27, %v2997_v14 }
 0x8c3   :  { %5838 = vmatprep.mubr.msk.bf16.mxu1 %vm1744_vm6, %v3009_v51 }
 0x8c4   :  { %5839 = vmatmul.mubr.msk.bf16.vlgmr.msra.gmra.mrb[132].mxu1 %vm1744_vm6, %v3010_v57 }
 0x8c9   :  { %v5824_v8 = vpop.f32.mrb[124].mxu0 }
 0x8ca   :  { %v2966_v60 = vpop.f32.mrb[125].mxu0  ;;  %v7215_v63 = vadd.f32 %v5824_v8, %v5269_v46 }
 0x8cb   :  { %v7213_v62 = vadd.f32 %v5269_v46, %v2966_v60  ;;  %v5825_v30 = vpop.f32.mrb[126].mxu0 }
 0x8cc   :  { %v7217_v19 = vadd.f32 %v5825_v30, %v5269_v46  ;;  %v2969_v2 = vpop.f32.mrb[127].mxu0  ;;  %v3003_v6 = vmul.f32 %v7215_v63, %v7215_v63 }
 0x8cd   :  { %v7219_v22 = vadd.f32 %v5269_v46, %v2969_v2  ;;  %v3001_v23 = vmul.f32 %v7213_v62, %v7213_v62 }
 0x8ce   :  { %v3004_v29 = vmul.f32 %v7217_v19, %v7217_v19 }
 0x8cf   :  { %v3002_v15 = vmul.f32 %v7219_v22, %v7219_v22 }
 0x8d0   :  { %v3012_v9 = vpack.c.bf16 %v3004_v29, %v3003_v6 }
 0x8d1   :  { %v3011_v26 = vpack.c.bf16 %v3002_v15, %v3001_v23 }
 0x8d3   :  { %5842 = vmatprep.mubr.msk.bf16.mxu1 %vm1744_vm6, %v3011_v26 }
 0x8d4   :  { %5843 = vmatmul.mubr.msk.bf16.gmra.mrb[136].mxu1 %vm1744_vm6, %v3012_v9 }
 0x8d9   :  { %v5828_v10 = vpop.f32.mrb[128].mxu0 }
 0x8da   :  { %v2982_v36 = vpop.f32.mrb[129].mxu0  ;;  %v7233_v21 = vadd.f32 %v5828_v10, %v5269_v46 }
 0x8db   :  { %v7231_v13 = vadd.f32 %v5269_v46, %v2982_v36  ;;  %v5829_v16 = vpop.f32.mrb[130].mxu0 }
 0x8dc   :  { %v7235_v53 = vadd.f32 %v5829_v16, %v5269_v46  ;;  %v2985_v31 = vpop.f32.mrb[131].mxu0  ;;  %v3007_v11 = vmul.f32 %v7233_v21, %v7233_v21 }
 0x8dd   :  { %v7237_v33 = vadd.f32 %v5269_v46, %v2985_v31  ;;  %v3005_v3 = vmul.f32 %v7231_v13, %v7231_v13 }
 0x8de   :  { %v3008_v34 = vmul.f32 %v7235_v53, %v7235_v53 }
 0x8df   :  { %v3006_v20 = vmul.f32 %v7237_v33, %v7237_v33 }
 0x8e0   :  { %v3014_v43 = vpack.c.bf16 %v3008_v34, %v3007_v11 }
 0x8e1   :  { %v3013_v32 = vpack.c.bf16 %v3006_v20, %v3005_v3 }
 0x8e3   :  { %5846 = vmatprep.mubr.msk.bf16.mxu1 %vm1744_vm6, %v3013_v32 }
 0x8e4   :  { %5847 = vmatmul.mubr.msk.bf16.gmra.mrb[140].mxu1 %vm1744_vm6, %v3014_v43 }
 0x997   :  { %v5840_v28 = vpop.f32.mrb[132].mxu1 }
 0x998   :  { %v3140_v35 = vmul.f32 %v5840_v28, %v5840_v28  ;;  %v3091_v37 = vpop.f32.mrb[133].mxu1 }
 0x999   :  { %v3138_v59 = vmul.f32 %v3091_v37, %v3091_v37  ;;  %v5841_v45 = vpop.f32.mrb[134].mxu1 }
 0x99a   :  { %v3152_v49 = vadd.f32 1e-16, %v3140_v35  ;;  %v3141_v52 = vmul.f32 %v5841_v45, %v5841_v45  ;;  %v3094_v55 = vpop.f32.mrb[135].mxu1 }
 0x99b   :  { %v3150_v38 = vadd.f32 1e-16, %v3138_v59  ;;  %v3139_v39 = vmul.f32 %v3094_v55, %v3094_v55 }
 0x99c   :  { %6301 = vrsqrt.f32 %v3152_v49  ;;  %v3153_v0 = vadd.f32 1e-16, %v3141_v52  ;;  %vm3178_vm8 = vcmp.eq.f32.partialorder %v3152_v49, inf  ;;  %v3181_v50 = vand.u32 2147483648, %v3152_v49 }
 0x99d   :  { %6303 = vrsqrt.f32 %v3150_v38  ;;  %v3151_v7 = vadd.f32 1e-16, %v3139_v39  ;;  %vm3164_vm7 = vcmp.eq.f32.partialorder %v3150_v38, inf  ;;  %vm3166_vm9 = vcmp.eq.f32.partialorder %v3150_v38, 0.0 }
 0x99e   :  { %6305 = vrsqrt.f32 %v3153_v0  ;;  %v3167_v25 = vand.u32 2147483648, %v3150_v38  ;;  %vm3180_vm12 = vcmp.eq.f32.partialorder %v3152_v49, 0.0  ;;  %vm3185_vm13 = vcmp.eq.f32.partialorder %v3153_v0, inf }
 0x99f   :  { %6307 = vrsqrt.f32 %v3151_v7  ;;  %vm3171_vm10 = vcmp.eq.f32.partialorder %v3151_v7, inf  ;;  %vm3173_vm11 = vcmp.eq.f32.partialorder %v3151_v7, 0.0  ;;  %v3174_v8 = vand.u32 2147483648, %v3151_v7 }
 0x9a0   :  { %v3188_v9 = vand.u32 2147483648, %v3153_v0  ;;  %vm3187_vm14 = vcmp.eq.f32.partialorder %v3153_v0, 0.0 }
 0x9a6   :  { %v6302_v42 = vpop.eup %6301 }
 0x9a7   :  { %v6304_v44 = vpop.eup %6303  ;;  %v5844_v18 = vpop.f32.mrb[136].mxu1  ;;  %v3177_v40 = vmul.f32 %v6302_v42, %v3152_v49 }
 0x9a8   :  { %v6306_v17 = vpop.eup %6305  ;;  %v3163_v1 = vmul.f32 %v6304_v44, %v3150_v38  ;;  %v3144_v61 = vmul.f32 %v5844_v18, %v5844_v18  ;;  %v3107_v4 = vpop.f32.mrb[137].mxu1 }
 0x9a9   :  { %v6308_v5 = vpop.eup %6307  ;;  %v3142_v46 = vmul.f32 %v3107_v4, %v3107_v4  ;;  %v5845_v58 = vpop.f32.mrb[138].mxu1  ;;  %v3184_v60 = vmul.f32 %v6306_v17, %v3153_v0  ;;  %v3179_v2 = vsel %vm3178_vm8, %v3152_v49, %v3177_v40 }
 0x9aa   :  { %v3170_v47 = vmul.f32 %v6308_v5, %v3151_v7  ;;  %v7249_v41 = vadd.f32 1e-16, %v3144_v61  ;;  %v3145_v14 = vmul.f32 %v5845_v58, %v5845_v58  ;;  %v3110_v27 = vpop.f32.mrb[139].mxu1  ;;  %v3165_v56 = vsel %vm3164_vm7, %v3150_v38, %v3163_v1 }
 0x9ab   :  { %v7252_v51 = vadd.f32 1e-16, %v3142_v46  ;;  %v3143_v57 = vmul.f32 %v3110_v27, %v3110_v27  ;;  %v7262_v23 = vsel %vm3166_vm9, %v3167_v25, %v3165_v56  ;;  %v7269_v26 = vsel %vm3180_vm12, %v3181_v50, %v3179_v2 }
 0x9ac   :  { %6309 = vrsqrt.f32 %v7249_v41  ;;  %v7255_v30 = vadd.f32 1e-16, %v3145_v14  ;;  %v3172_v15 = vsel %vm3171_vm10, %v3151_v7, %v3170_v47  ;;  %v3186_v10 = vsel %vm3185_vm13, %v3153_v0, %v3184_v60 }
 0x9ad   :  { %6311 = vrsqrt.f32 %v7252_v51  ;;  %v7259_v29 = vadd.f32 1e-16, %v3143_v57  ;;  %v7266_v6 = vsel %vm3173_vm11, %v3174_v8, %v3172_v15  ;;  %v7273_v36 = vsel %vm3187_vm14, %v3188_v9, %v3186_v10 }
 0x9ae   :  { %6313 = vrsqrt.f32 %v7255_v30  ;;  %vm3248_vm15 = vcmp.eq.f32.partialorder %v7262_v23, inf  ;;  %vm3250_vm0 = vcmp.eq.f32.partialorder %v7262_v23, 0.0  ;;  %v3251_v16 = vand.u32 2147483648, %v7262_v23 }
 0x9af   :  { %6315 = vrsqrt.f32 %v7259_v29  ;;  %vm3255_vm1 = vcmp.eq.f32.partialorder %v7266_v6, inf  ;;  %vm3257_vm2 = vcmp.eq.f32.partialorder %v7266_v6, 0.0  ;;  %v3258_v34 = vand.u32 2147483648, %v7266_v6 }
 0x9b0   :  { %6317 = vrsqrt.f32 %v7262_v23  ;;  %vm3262_vm7 = vcmp.eq.f32.partialorder %v7269_v26, inf  ;;  %v3265_v3 = vand.u32 2147483648, %v7269_v26  ;;  %vm3264_vm8 = vcmp.eq.f32.partialorder %v7269_v26, 0.0 }
 0x9b1   :  { %6319 = vrsqrt.f32 %v7266_v6  ;;  %vm3192_vm9 = vcmp.eq.f32.partialorder %v7252_v51, inf  ;;  %vm3194_vm10 = vcmp.eq.f32.partialorder %v7252_v51, 0.0  ;;  %v3195_v43 = vand.u32 2147483648, %v7252_v51 }
 0x9b2   :  { %6321 = vrsqrt.f32 %v7269_v26  ;;  %vm3269_vm11 = vcmp.eq.f32.partialorder %v7273_v36, inf  ;;  %v3272_v45 = vand.u32 2147483648, %v7273_v36  ;;  %vm3199_vm12 = vcmp.eq.f32.partialorder %v7259_v29, inf }
 0x9b3   :  { %6323 = vrsqrt.f32 %v7273_v36  ;;  %vm3206_vm13 = vcmp.eq.f32.partialorder %v7249_v41, inf  ;;  %vm3271_vm14 = vcmp.eq.f32.partialorder %v7273_v36, 0.0  ;;  %v3209_v9 = vand.u32 2147483648, %v7249_v41 }
 0x9b4   :  { %v3202_v10 = vand.u32 2147483648, %v7259_v29 }
 0x9b6   :  { %v6310_v31 = vpop.eup %6309 }
 0x9b7   :  { %v6312_v20 = vpop.eup %6311  ;;  %v3205_v11 = vmul.f32 %v6310_v31, %v7249_v41  ;;  %v5848_v32 = vpop.f32.mrb[140].mxu1 }
 0x9b8   :  { %v6314_v28 = vpop.eup %6313  ;;  %v3191_v35 = vmul.f32 %v6312_v20, %v7252_v51  ;;  %v3148_v37 = vmul.f32 %v5848_v32, %v5848_v32  ;;  %v3123_v59 = vpop.f32.mrb[141].mxu1 }
 0x9b9   :  { %v6316_v49 = vpop.eup %6315  ;;  %v3212_v52 = vmul.f32 %v6314_v28, %v7255_v30  ;;  %v3146_v55 = vmul.f32 %v3123_v59, %v3123_v59  ;;  %v5849_v38 = vpop.f32.mrb[142].mxu1  ;;  %v3207_v18 = vsel %vm3206_vm13, %v7249_v41, %v3205_v11 }
 0x9ba   :  { %v6318_v39 = vpop.eup %6317  ;;  %v7296_v0 = vadd.f32 1e-16, %v3148_v37  ;;  %v3149_v7 = vmul.f32 %v5849_v38, %v5849_v38  ;;  %v3126_v42 = vpop.f32.mrb[143].mxu1  ;;  %v3193_v44 = vsel %vm3192_vm9, %v7252_v51, %v3191_v35  ;;  %v3198_v40 = vmul.f32 %v6316_v49, %v7259_v29 }
 0x9bb   :  { %v6320_v17 = vpop.eup %6319  ;;  %v7303_v1 = vadd.f32 1e-16, %v3146_v55  ;;  %v3147_v61 = vmul.f32 %v3126_v42, %v3126_v42  ;;  %v3247_v4 = vmul.f32 %v6318_v39, %v7262_v23  ;;  %v7313_v25 = vsel %vm3194_vm10, %v3195_v43, %v3193_v44 }
 0x9bc   :  { %v6322_v5 = vpop.eup %6321  ;;  %6325 = vrsqrt.f32 %v7296_v0  ;;  %v7308_v46 = vadd.f32 1e-16, %v3149_v7  ;;  %v3254_v58 = vmul.f32 %v6320_v17, %v7266_v6  ;;  %vm3234_vm13 = vcmp.eq.f32.partialorder %v7296_v0, inf }
 0x9bd   :  { %v6324_v50 = vpop.eup %6323  ;;  %6327 = vrsqrt.f32 %v7303_v1  ;;  %v7316_v47 = vadd.f32 1e-16, %v3147_v61  ;;  %v3249_v14 = vsel %vm3248_vm15, %v7262_v23, %v3247_v4  ;;  %v3261_v27 = vmul.f32 %v6322_v5, %v7269_v26 }
 0x9be   :  { %6329 = vrsqrt.f32 %v7308_v46  ;;  %v3252_v56 = vsel %vm3250_vm0, %v3251_v16, %v3249_v14  ;;  %v3256_v51 = vsel %vm3255_vm1, %v7266_v6, %v3254_v58  ;;  %v3268_v57 = vmul.f32 %v6324_v50, %v7273_v36 }
 0x9bf   :  { %6331 = vrsqrt.f32 %v7316_v47  ;;  %v3330_v8 = vsel %vm1580_vm5, %v3252_v56, 0.0  ;;  %v3259_v60 = vsel %vm3257_vm2, %v3258_v34, %v3256_v51  ;;  %v3263_v2 = vsel %vm3262_vm7, %v7269_v26, %v3261_v27 }
 0x9c0   :  { %3331 = vadd.xlane.f32.xlu0 %v3330_v8  ;;  %v3333_v23 = vsel %vm1580_vm5, %v3259_v60, 0.0  ;;  %v3266_v15 = vsel %vm3264_vm8, %v3265_v3, %v3263_v2  ;;  %6333 = vrsqrt.f32 %v7313_v25  ;;  %v3270_v6 = vsel %vm3269_vm11, %v7273_v36, %v3268_v57 }
 0x9c1   :  { %3334 = vadd.xlane.f32.xlu1 %v3333_v23  ;;  %vm3208_vm15 = vcmp.eq.f32.partialorder %v7249_v41, 0.0  ;;  %vm3213_vm0 = vcmp.eq.f32.partialorder %v7255_v30, inf  ;;  %v3200_v26 = vsel %vm3199_vm12, %v7259_v29, %v3198_v40  ;;  %vm3201_vm1 = vcmp.eq.f32.partialorder %v7259_v29, 0.0 }
 0x9c2   :  { %v7351_v16 = vsel %vm3208_vm15, %v3209_v9, %v3207_v18  ;;  %v3214_v31 = vsel %vm3213_vm0, %v7255_v30, %v3212_v52  ;;  %v3336_v34 = vsel %vm1580_vm5, %v3266_v15, 0.0  ;;  %v7355_v3 = vsel %vm3201_vm1, %v3202_v10, %v3200_v26 }
 0x9c3   :  { %6335 = vrsqrt.f32 %v7351_v16  ;;  %v3216_v41 = vand.u32 2147483648, %v7255_v30  ;;  %v3273_v20 = vsel %vm3271_vm14, %v3272_v45, %v3270_v6  ;;  %vm3215_vm2 = vcmp.eq.f32.partialorder %v7255_v30, 0.0 }
 0x9c4   :  { %3337 = vadd.xlane.f32.xlu0 %v3336_v34  ;;  %6337 = vrsqrt.f32 %v7355_v3  ;;  %vm3276_vm7 = vcmp.eq.f32.partialorder %v7313_v25, inf  ;;  %vm3278_vm8 = vcmp.eq.f32.partialorder %v7313_v25, 0.0  ;;  %v3339_v28 = vsel %vm1580_vm5, %v3273_v20, 0.0 }
 0x9c5   :  { %v7363_v29 = vsel %vm3215_vm2, %v3216_v41, %v3214_v31  ;;  %v3279_v36 = vand.u32 2147483648, %v7313_v25  ;;  %vm3290_vm9 = vcmp.eq.f32.partialorder %v7351_v16, inf  ;;  %vm3283_vm10 = vcmp.eq.f32.partialorder %v7355_v3, inf }
 0x9c6   :  { %v6326_v11 = vpop.eup %6325  ;;  %6339 = vrsqrt.f32 %v7363_v29  ;;  %vm3292_vm11 = vcmp.eq.f32.partialorder %v7351_v16, 0.0  ;;  %vm3220_vm12 = vcmp.eq.f32.partialorder %v7303_v1, inf  ;;  %vm3222_vm14 = vcmp.eq.f32.partialorder %v7303_v1, 0.0 }
 0x9c7   :  { %v6328_v32 = vpop.eup %6327  ;;  %v3233_v43 = vmul.f32 %v6326_v11, %v7296_v0  ;;  %v3223_v59 = vand.u32 2147483648, %v7303_v1  ;;  %v3237_v49 = vand.u32 2147483648, %v7296_v0  ;;  %vm3236_vm15 = vcmp.eq.f32.partialorder %v7296_v0, 0.0 }
 0x9c8   :  { %v6330_v35 = vpop.eup %6329  ;;  %v3219_v30 = vmul.f32 %v6328_v32, %v7303_v1  ;;  %3340 = vadd.xlane.f32.xlu0 %v3339_v28  ;;  %v3293_v42 = vand.u32 2147483648, %v7351_v16  ;;  %vm3227_vm0 = vcmp.eq.f32.partialorder %v7316_v47, inf  ;;  %vm3229_vm1 = vcmp.eq.f32.partialorder %v7316_v47, 0.0 }
 0x9c9   :  { %v6332_v37 = vpop.eup %6331  ;;  %v3235_v45 = vsel %vm3234_vm13, %v7296_v0, %v3233_v43  ;;  %v3240_v55 = vmul.f32 %v6330_v35, %v7308_v46  ;;  %v3230_v17 = vand.u32 2147483648, %v7316_v47  ;;  %vm3241_vm2 = vcmp.eq.f32.partialorder %v7308_v46, inf }
 0x9ca   :  { %v6334_v52 = vpop.eup %6333  ;;  %v3226_v38 = vmul.f32 %v6332_v37, %v7316_v47  ;;  %v3221_v39 = vsel %vm3220_vm12, %v7303_v1, %v3219_v30  ;;  %v7387_v18 = vsel %vm3236_vm15, %v3237_v49, %v3235_v45  ;;  %v3286_v51 = vand.u32 2147483648, %v7355_v3 }
 0x9cb   :  { %v3275_v7 = vmul.f32 %v6334_v52, %v7313_v25  ;;  %v3224_v44 = vsel %vm3222_vm14, %v3223_v59, %v3221_v39  ;;  %v3242_v50 = vsel %vm3241_vm2, %v7308_v46, %v3240_v55  ;;  %vm3297_vm12 = vcmp.eq.f32.partialorder %v7363_v29, inf }
 0x9cc   :  { %6341 = vrsqrt.f32 %v3224_v44  ;;  %v3228_v0 = vsel %vm3227_vm0, %v7316_v47, %v3226_v38  ;;  %v3244_v47 = vand.u32 2147483648, %v7308_v46  ;;  %v3300_v15 = vand.u32 2147483648, %v7363_v29  ;;  %v8239_v38 = vld [vmem:[#allocation3_spill] sm:$0xff] }
 0x9cd   :  { %v6336_v40 = vpop.eup %6335  ;;  %v3277_v1 = vsel %vm3276_vm7, %v7313_v25, %v3275_v7  ;;  %6343 = vrsqrt.f32 %v7387_v18  ;;  %v3231_v58 = vsel %vm3229_vm1, %v3230_v17, %v3228_v0  ;;  %vm3285_vm7 = vcmp.eq.f32.partialorder %v7355_v3, 0.0 }
 0x9ce   :  { %v6338_v61 = vpop.eup %6337  ;;  %v3280_v4 = vsel %vm3278_vm8, %v3279_v36, %v3277_v1  ;;  %v3289_v5 = vmul.f32 %v6336_v40, %v7351_v16  ;;  %6345 = vrsqrt.f32 %v3231_v58  ;;  %vm3243_vm8 = vcmp.eq.f32.partialorder %v7308_v46, 0.0  ;;  %v8241_v1 = vld [vmem:[#allocation2_spill] sm:$0xff] }
 0x9cf   :  { %v3342_v14 = vsel %vm1580_vm5, %v3280_v4, 0.0  ;;  %v3282_v27 = vmul.f32 %v6338_v61, %v7355_v3  ;;  %v3245_v2 = vsel %vm3243_vm8, %v3244_v47, %v3242_v50  ;;  %vm3318_vm13 = vcmp.eq.f32.partialorder %v7387_v18, inf  ;;  %v8242_v61 = vld [vmem:[#allocation4_spill] sm:$0xff]  ;;  %v6187_v50 = vld [vmem:[%s7434_s30] sm:$0xff]  }
 0x9d0   :  { %v6340_v56 = vpop.eup %6339  ;;  %3343 = vadd.xlane.f32.xlu1 %v3342_v14  ;;  %v3291_v25 = vsel %vm3290_vm9, %v7351_v16, %v3289_v5  ;;  %6347 = vrsqrt.f32 %v3245_v2  ;;  %vm3299_vm9 = vcmp.eq.f32.partialorder %v7363_v29, 0.0  ;;  %v3321_v28 = vand.u32 2147483648, %v7387_v18  ;;  %5850 = vmatprep.subr.bf16.mxu0 %v6187_v50  ;;  %v8243_v14 = vld [vmem:[#allocation7_spill] sm:$0xff] }
 0x9d1   :  { %v3284_v57 = vsel %vm3283_vm10, %v7355_v3, %v3282_v27  ;;  %v3294_v8 = vsel %vm3292_vm11, %v3293_v42, %v3291_v25  ;;  %v3296_v60 = vmul.f32 %v6340_v56, %v7363_v29  ;;  %vm3304_vm10 = vcmp.eq.f32.partialorder %v3224_v44, inf  ;;  %5851 = vmatpush3.bf16.msra.mxu0 %v6187_v50  ;;  %v6188_v56 = vld [vmem:[%s7434_s30 + $0x8] sm:$0xff]  }
 0x9d2   :  { %v3287_v23 = vsel %vm3285_vm7, %v3286_v51, %v3284_v57  ;;  %v3348_v46 = vsel %vm1580_vm5, %v3294_v8, 0.0  ;;  %v3307_v3 = vand.u32 2147483648, %v3224_v44  ;;  %vm3306_vm11 = vcmp.eq.f32.partialorder %v3224_v44, 0.0  ;;  %v8244_v51 = vld [vmem:[#allocation9_spill] sm:$0xff]  ;;  %5852 = vmatprep.subr.bf16.mxu0 %v6188_v56  ;;  %v8245_v8 = vld [vmem:[#allocation6_spill] sm:$0xff] }
 0x9d3   :  { %v3345_v9 = vsel %vm1580_vm5, %v3287_v23, 0.0  ;;  %v3298_v6 = vsel %vm3297_vm12, %v7363_v29, %v3296_v60  ;;  %vm3311_vm14 = vcmp.eq.f32.partialorder %v3231_v58, inf  ;;  %v3314_v35 = vand.u32 2147483648, %v3231_v58  ;;  %v6189_v23 = vld [vmem:[%s7434_s30 + $0x10] sm:$0xff]  }
 0x9d4   :  { %3346 = vadd.xlane.f32.xlu0 %v3345_v9  ;;  %3349 = vadd.xlane.f32.xlu1 %v3348_v46  ;;  %v3301_v10 = vsel %vm3299_vm9, %v3300_v15, %v3298_v6  ;;  %vm3320_vm15 = vcmp.eq.f32.partialorder %v7387_v18, 0.0  ;;  %vm3313_vm0 = vcmp.eq.f32.partialorder %v3231_v58, 0.0  ;;  %vm3325_vm1 = vcmp.eq.f32.partialorder %v3245_v2, inf  ;;  %v8246_v15 = vld [vmem:[#allocation8_spill] sm:$0xff]  ;;  %v8247_v6 = vld [vmem:[#allocation11_spill] sm:$0xff] }
 0x9d5   :  { %v3351_v31 = vsel %vm1580_vm5, %v3301_v10, 0.0  ;;  %v3328_v55 = vand.u32 2147483648, %v3245_v2  ;;  %v7437_v39 = vmax.f32 %v8239_v38, 0.0  ;;  %vm3327_vm2 = vcmp.eq.f32.partialorder %v3245_v2, 0.0  ;;  %5853 = vmatpush3.bf16.msra.mxu0 %v6188_v56 }
 0x9d6   :  { %v6342_v26 = vpop.eup %6341  ;;  %v7445_v0 = vmax.f32 %v8241_v1, 0.0  ;;  %v7448_v4 = vmax.f32 %v8242_v61, 0.0  ;;  %v7456_v27 = vmax.f32 %v8243_v14, 0.0  ;;  %v7462_v25 = vmax.f32 %v8244_v51, 0.0  ;;  %5854 = vmatprep.subr.bf16.mxu0 %v6189_v23 }
 0x9d7   :  { %v6344_v16 = vpop.eup %6343  ;;  %v3303_v34 = vmul.f32 %v6342_v26, %v3224_v44  ;;  %v4375_v5 = vsel %vm1402_vm3, %v7437_v39, 0.0  ;;  %v7467_v60 = vmax.f32 %v8245_v8, 0.0  ;;  %v7473_v9 = vmax.f32 %v8246_v15, 0.0 }
 0x9d8   :  { %3352 = vadd.xlane.f32.xlu0 %v3351_v31  ;;  %v3317_v41 = vmul.f32 %v6344_v16, %v7387_v18  ;;  %v6346_v20 = vpop.eup %6345  ;;  %v4381_v47 = vsel %vm1402_vm3, %v7445_v0, 0.0  ;;  %v4384_v57 = vsel %vm1402_vm3, %v7448_v4, 0.0  ;;  %v4390_v46 = vsel %vm1402_vm3, %v7462_v25, 0.0  ;;  %v6190_v16 = vld [vmem:[%s7434_s30 + $0x18] sm:$0xff]   ;;  %s8126_s30 = sld [smem:[%s8178_s0 + %s6554_s27]]  }
 0x9d9   :  { %v3305_v11 = vsel %vm3304_vm10, %v3224_v44, %v3303_v34  ;;  %v3310_v29 = vmul.f32 %v6346_v20, %v3231_v58  ;;  %v8240_v44 = vld [vmem:[#allocation5_spill] sm:$0xff]  ;;  %v7478_v10 = vmax.f32 %v8247_v6, 0.0  ;;  %v4393_v26 = vsel %vm1402_vm3, %v7467_v60, 0.0  ;;  %5855 = vmatpush3.bf16.msra.mxu0 %v6189_v23  ;;  %v8251_v23 = vld [vmem:[#allocation15_spill] sm:$0xff] }
 0x9da   :  { %v3308_v32 = vsel %vm3306_vm11, %v3307_v3, %v3305_v11  ;;  %v3319_v43 = vsel %vm3318_vm13, %v7387_v18, %v3317_v41  ;;  %v6348_v30 = vpop.eup %6347  ;;  %v7441_v18 = vmax.f32 %v8240_v44, 0.0  ;;  %v8248_v31 = vld [vmem:[#allocation13_spill] sm:$0xff]  ;;  %v4396_v3 = vsel %vm1402_vm3, %v7473_v9, 0.0  ;;  %5856 = vmatprep.subr.bf16.mxu0 %v6190_v16  ;;  %v8249_v41 = vld [vmem:[#allocation10_spill] sm:$0xff] }
 0x9db   :  { %v3354_v36 = vsel %vm1580_vm5, %v3308_v32, 0.0  ;;  %v3312_v37 = vsel %vm3311_vm14, %v3231_v58, %v3310_v29  ;;  %v3322_v59 = vsel %vm3320_vm15, %v3321_v28, %v3319_v43  ;;  %v3324_v49 = vmul.f32 %v6348_v30, %v3245_v2  ;;  %v8250_v32 = vld [vmem:[#allocation12_spill] sm:$0xff] }
 0x9dc   :  { %3355 = vadd.xlane.f32.xlu1 %v3354_v36  ;;  %v3315_v45 = vsel %vm3313_vm0, %v3314_v35, %v3312_v37  ;;  %v3360_v7 = vsel %vm1580_vm5, %v3322_v59, 0.0  ;;  %v4378_v58 = vsel %vm1402_vm3, %v7441_v18, 0.0  ;;  %v7484_v34 = vmax.f32 %v8248_v31, 0.0 }
 0x9dd   :  { %v3357_v52 = vsel %vm1580_vm5, %v3315_v45, 0.0  ;;  %v3326_v42 = vsel %vm3325_vm1, %v3245_v2, %v3324_v49  ;;  %v4387_v2 = vsel %vm1402_vm3, %v7456_v27, 0.0  ;;  %v7489_v20 = vmax.f32 %v8249_v41, 0.0  ;;  %5857 = vmatpush3.bf16.msra.mxu0 %v6190_v16 }
 0x9de   :  { %3358 = vadd.xlane.f32.xlu0 %v3357_v52  ;;  %v3329_v17 = vsel %vm3327_vm2, %v3328_v55, %v3326_v42  ;;  %v4399_v11 = vsel %vm1402_vm3, %v7478_v10, 0.0  ;;  %v7494_v29 = vmax.f32 %v8250_v32, 0.0  ;;  %v4402_v43 = vsel %vm1402_vm3, %v7484_v34, 0.0 }
 0x9df   :  { %v3363_v40 = vsel %vm1580_vm5, %v3329_v17, 0.0  ;;  %v4405_v28 = vsel %vm1402_vm3, %v7489_v20, 0.0  ;;  %v7505_v17 = vld [vmem:[%s5054_s4] ss:$0 sm:$0xff] }
 0x9e0   :  { %3361 = vadd.xlane.f32.xlu1 %v3360_v7  ;;  %v4408_v36 = vsel %vm1402_vm3, %v7494_v29, 0.0 }
 0x9e2   :  { %3364 = vadd.xlane.f32.xlu0 %v3363_v40 }
 0x9e4   :  { %4376 = vadd.xlane.f32.xlu1 %v4375_v5 }
 0x9e6   :  { %4379 = vadd.xlane.f32.xlu0 %v4378_v58 }
 0x9e8   :  { %4382 = vadd.xlane.f32.xlu1 %v4381_v47 }
 0x9ea   :  { %4385 = vadd.xlane.f32.xlu0 %v4384_v57 }
 0x9ec   :  { %4388 = vadd.xlane.f32.xlu1 %v4387_v2 }
 0x9ee   :  { %4391 = vadd.xlane.f32.xlu0 %v4390_v46 }
 0x9f0   :  { %4394 = vadd.xlane.f32.xlu1 %v4393_v26  ;;  %v8252_v26 = vld [vmem:[#allocation17_spill] sm:$0xff] }
 0x9f2   :  { %4397 = vadd.xlane.f32.xlu0 %v4396_v3 }
 0x9f4   :  { %4400 = vadd.xlane.f32.xlu1 %v4399_v11 }
 0x9f6   :  { %4403 = vadd.xlane.f32.xlu0 %v4402_v43 }
 0x9f8   :  { %4406 = vadd.xlane.f32.xlu1 %v4405_v28 }
 0x9fa   :  { %4409 = vadd.xlane.f32.xlu0 %v4408_v36 }
 0xa4d   :  { %v3332_v35 = vpop.xlane.xlu0 %3331 }
 0xa4e   :  { %v3367_v30 = vmul.f32 0.125, %v3332_v35  ;;  %v3335_v37 = vpop.xlane.xlu1 %3334  ;;  %v8253_v35 = vld [vmem:[#allocation14_spill] sm:$0xff] }
 0xa4f   :  { %v3368_v59 = vmul.f32 0.125, %v3335_v37  ;;  %v8254_v37 = vld [vmem:[#allocation16_spill] sm:$0xff] }
 0xa50   :  { %v3379_v45 = vadd.f32 1e-06, %v3367_v30 }
 0xa51   :  { %v3380_v49 = vadd.f32 1e-06, %v3368_v59  ;;  %v3338_v52 = vpop.xlane.xlu0 %3337 }
 0xa52   :  { %6349 = vrcp.f32 %v3379_v45  ;;  %v3369_v55 = vmul.f32 0.125, %v3338_v52 }
 0xa53   :  { %6351 = vrcp.f32 %v3380_v49 }
 0xa54   :  { %v3381_v38 = vadd.f32 1e-06, %v3369_v55 }
 0xa55   :  { %v3341_v7 = vpop.xlane.xlu0 %3340 }
 0xa56   :  { %6353 = vrcp.f32 %v3381_v38  ;;  %v3370_v42 = vmul.f32 0.125, %v3341_v7 }
 0xa58   :  { %v3382_v44 = vadd.f32 1e-06, %v3370_v42 }
 0xa5a   :  { %6355 = vrcp.f32 %v3382_v44 }
 0xa5c   :  { %v6350_v40 = vpop.eup %6349 }
 0xa5d   :  { %v6352_v1 = vpop.eup %6351  ;;  %v3398_v61 = vmul.f32 %v6350_v40, %v7505_v17  ;;  %v3344_v5 = vpop.xlane.xlu1 %3343 }
 0xa5e   :  { %v3400_v58 = vmul.f32 %v6352_v1, %v7505_v17  ;;  %v3371_v50 = vmul.f32 0.125, %v3344_v5 }
 0xa5f   :  { %v3421_v14 = vmul.f32 %v3398_v61, %v7195_v12 }
 0xa60   :  { %v6354_v47 = vpop.eup %6353  ;;  %v3383_v56 = vadd.f32 1e-06, %v3371_v50  ;;  %v3422_v51 = vmul.f32 %v3400_v58, %v7201_v48 }
 0xa61   :  { %v3402_v57 = vmul.f32 %v6354_v47, %v7505_v17  ;;  %v3347_v8 = vpop.xlane.xlu0 %3346  ;;  %v3350_v2 = vpop.xlane.xlu1 %3349  ;;  %v7513_v15 = vadd.f32 %v3421_v14, %v8251_v23 }
 0xa62   :  { %6357 = vrcp.f32 %v3383_v56  ;;  %v3372_v46 = vmul.f32 0.125, %v3347_v8  ;;  %v3373_v6 = vmul.f32 0.125, %v3350_v2  ;;  %v7516_v16 = vadd.f32 %v3422_v51, %v8252_v26 }
 0xa63   :  { %v3423_v48 = vmul.f32 %v3402_v57, %v7197_v24 }
 0xa64   :  { %v6356_v31 = vpop.eup %6355  ;;  %v3384_v3 = vadd.f32 1e-06, %v3372_v46  ;;  %v3385_v12 = vadd.f32 1e-06, %v3373_v6  ;;  %v3445_v41 = vpack.c.bf16 %v7516_v16, %v7513_v15  ;;  %v8255_v6 = vld [vmem:[#allocation19_spill] sm:$0xff] }
 0xa65   :  { %v3404_v11 = vmul.f32 %v6356_v31, %v7505_v17  ;;  %v3353_v32 = vpop.xlane.xlu0 %3352  ;;  %v7525_v30 = vadd.f32 %v3423_v48, %v8253_v35 }
 0xa66   :  { %6359 = vrcp.f32 %v3384_v3  ;;  %v3374_v43 = vmul.f32 0.125, %v3353_v32  ;;  %5858 = vmatprep.mubr.msk.bf16.mxu0 %vm1744_vm6, %v3445_v41 }
 0xa67   :  { %v3424_v28 = vmul.f32 %v3404_v11, %v7199_v54  ;;  %6361 = vrcp.f32 %v3385_v12  ;;  %v8256_v12 = vld [vmem:[#allocation21_spill] sm:$0xff] }
 0xa68   :  { %v3386_v36 = vadd.f32 1e-06, %v3374_v43 }
 0xa69   :  { %v7528_v59 = vadd.f32 %v3424_v28, %v8254_v37  ;;  %v3356_v45 = vpop.xlane.xlu1 %3355  ;;  %v8257_v37 = vld [vmem:[#allocation18_spill] sm:$0xff] }
 0xa6a   :  { %6363 = vrcp.f32 %v3386_v36  ;;  %v3375_v24 = vmul.f32 0.125, %v3356_v45 }
 0xa6b   :  { %v3446_v49 = vpack.c.bf16 %v7528_v59, %v7525_v30  ;;  %v3359_v38 = vpop.xlane.xlu0 %3358 }
 0xa6c   :  { %v6358_v52 = vpop.eup %6357  ;;  %v3387_v55 = vadd.f32 1e-06, %v3375_v24  ;;  %v3376_v54 = vmul.f32 0.125, %v3359_v38 }
 0xa6d   :  { %v3406_v7 = vmul.f32 %v6358_v52, %v7505_v17  ;;  %5859 = vmatmul.mubr.msk.bf16.vlgmr.msra.gmra.mrb[132].mxu0 %vm1744_vm6, %v3446_v49  ;;  %v3362_v42 = vpop.xlane.xlu1 %3361 }
 0xa6e   :  { %6365 = vrcp.f32 %v3387_v55  ;;  %v3377_v44 = vmul.f32 0.125, %v3362_v42  ;;  %v3388_v40 = vadd.f32 1e-06, %v3376_v54  ;;  %v8258_v55 = vld [vmem:[#allocation20_spill] sm:$0xff] }
 0xa6f   :  { %v3365_v5 = vpop.xlane.xlu0 %3364  ;;  %v3425_v58 = vmul.f32 %v3406_v7, %v7213_v62 }
 0xa70   :  { %v6360_v1 = vpop.eup %6359  ;;  %v3389_v61 = vadd.f32 1e-06, %v3377_v44  ;;  %6367 = vrcp.f32 %v3388_v40  ;;  %v3378_v47 = vmul.f32 0.125, %v3365_v5 }
 0xa71   :  { %v6362_v50 = vpop.eup %6361  ;;  %v3408_v14 = vmul.f32 %v6360_v1, %v7505_v17  ;;  %v4377_v56 = vpop.xlane.xlu1 %4376  ;;  %v7542_v26 = vadd.f32 %v3425_v58, %v8255_v6 }
 0xa72   :  { %v3410_v51 = vmul.f32 %v6362_v50, %v7505_v17  ;;  %6369 = vrcp.f32 %v3389_v61  ;;  %v4412_v57 = vmul.f32 0.03125, %v4377_v56  ;;  %v3390_v8 = vadd.f32 1e-06, %v3378_v47 }
 0xa73   :  { %v3426_v2 = vmul.f32 %v3408_v14, %v7219_v22  ;;  %v4380_v62 = vpop.xlane.xlu0 %4379 }
 0xa74   :  { %v6364_v23 = vpop.eup %6363  ;;  %v7539_v46 = vsub.f32 %v7437_v39, %v4412_v57  ;;  %v3427_v31 = vmul.f32 %v3410_v51, %v7215_v63  ;;  %6371 = vrcp.f32 %v3390_v8  ;;  %v4413_v48 = vmul.f32 0.03125, %v4380_v62 }
 0xa75   :  { %v3412_v3 = vmul.f32 %v6364_v23, %v7505_v17  ;;  %v7547_v41 = vadd.f32 %v3426_v2, %v8256_v12  ;;  %v4383_v11 = vpop.xlane.xlu1 %4382 }
 0xa76   :  { %v4414_v32 = vmul.f32 0.03125, %v4383_v11  ;;  %v4436_v22 = vmul.f32 %v7539_v46, %v7539_v46  ;;  %v7554_v28 = vsub.f32 %v7441_v18, %v4413_v48  ;;  %v7561_v45 = vadd.f32 %v3427_v31, %v8257_v37  ;;  %v8259_v48 = vld [vmem:[#allocation23_spill] sm:$0xff] }
 0xa77   :  { %v3447_v43 = vpack.c.bf16 %v7547_v41, %v7542_v26  ;;  %v3428_v63 = vmul.f32 %v3412_v3, %v7217_v19  ;;  %v4386_v24 = vpop.xlane.xlu0 %4385 }
 0xa78   :  { %v6366_v36 = vpop.eup %6365  ;;  %v7558_v35 = vsub.f32 %v7445_v0, %v4414_v32  ;;  %v4448_v49 = vsel %vm1402_vm3, %v4436_v22, 0.0  ;;  %v4415_v7 = vmul.f32 0.03125, %v4386_v24  ;;  %v4437_v54 = vmul.f32 %v7554_v28, %v7554_v28 }
 0xa79   :  { %v3414_v52 = vmul.f32 %v6366_v36, %v7505_v17  ;;  %5862 = vmatprep.mubr.msk.bf16.mxu0 %vm1744_vm6, %v3447_v43  ;;  %v7567_v38 = vadd.f32 %v3428_v63, %v8258_v55  ;;  %4449 = vadd.xlane.f32.xlu1 %v4448_v49  ;;  %v4389_v19 = vpop.xlane.xlu1 %4388  ;;  %v8260_v36 = vld [vmem:[#allocation25_spill] sm:$0xff] }
 0xa7a   :  { %v4416_v42 = vmul.f32 0.03125, %v4389_v19  ;;  %v4438_v44 = vmul.f32 %v7558_v35, %v7558_v35  ;;  %v6368_v40 = vpop.eup %6367  ;;  %v7576_v61 = vsub.f32 %v7448_v4, %v4415_v7  ;;  %v4451_v5 = vsel %vm1402_vm3, %v4437_v54, 0.0 }
 0xa7b   :  { %v3448_v1 = vpack.c.bf16 %v7567_v38, %v7561_v45  ;;  %v3429_v58 = vmul.f32 %v3414_v52, %v7231_v13  ;;  %v3416_v14 = vmul.f32 %v6368_v40, %v7505_v17  ;;  %4452 = vadd.xlane.f32.xlu0 %v4451_v5  ;;  %v4392_v56 = vpop.xlane.xlu0 %4391 }
 0xa7c   :  { %v6370_v50 = vpop.eup %6369  ;;  %v7582_v47 = vsub.f32 %v7456_v27, %v4416_v42  ;;  %v4454_v51 = vsel %vm1402_vm3, %v4438_v44, 0.0  ;;  %v4417_v8 = vmul.f32 0.03125, %v4392_v56  ;;  %v4439_v13 = vmul.f32 %v7576_v61, %v7576_v61 }
 0xa7d   :  { %v3418_v57 = vmul.f32 %v6370_v50, %v7505_v17  ;;  %5863 = vmatmul.mubr.msk.bf16.gmra.mrb[136].mxu0 %vm1744_vm6, %v3448_v1  ;;  %4455 = vadd.xlane.f32.xlu1 %v4454_v51  ;;  %v4395_v2 = vpop.xlane.xlu1 %4394  ;;  %v3430_v62 = vmul.f32 %v3416_v14, %v7237_v33  ;;  %v7597_v11 = vadd.f32 %v3429_v58, %v8259_v48  ;;  %v8261_v1 = vld [vmem:[#allocation22_spill] sm:$0xff]  ;;  %v8262_v58 = vld [vmem:[#allocation24_spill] sm:$0xff] }
 0xa7e   :  { %v4418_v23 = vmul.f32 0.03125, %v4395_v2  ;;  %v4440_v6 = vmul.f32 %v7582_v47, %v7582_v47  ;;  %v6372_v31 = vpop.eup %6371  ;;  %v7593_v3 = vsub.f32 %v7462_v25, %v4417_v8  ;;  %v4457_v12 = vsel %vm1402_vm3, %v4439_v13, 0.0 }
 0xa7f   :  { %v3431_v32 = vmul.f32 %v3418_v57, %v7233_v21  ;;  %v3420_v22 = vmul.f32 %v6372_v31, %v7505_v17  ;;  %4458 = vadd.xlane.f32.xlu0 %v4457_v12  ;;  %v4398_v63 = vpop.xlane.xlu0 %4397  ;;  %v7606_v37 = vadd.f32 %v3430_v62, %v8260_v36 }
 0xa80   :  { %v7602_v43 = vsub.f32 %v7467_v60, %v4418_v23  ;;  %v4460_v33 = vsel %vm1402_vm3, %v4440_v6, 0.0  ;;  %v4419_v24 = vmul.f32 0.03125, %v4398_v63  ;;  %v4441_v52 = vmul.f32 %v7593_v3, %v7593_v3 }
 0xa81   :  { %4461 = vadd.xlane.f32.xlu1 %v4460_v33  ;;  %v4401_v49 = vpop.xlane.xlu1 %4400  ;;  %v3449_v21 = vpack.c.bf16 %v7606_v37, %v7597_v11  ;;  %v3432_v7 = vmul.f32 %v3420_v22, %v7235_v53  ;;  %v7625_v5 = vadd.f32 %v3431_v32, %v8261_v1 }
 0xa82   :  { %v4420_v55 = vmul.f32 0.03125, %v4401_v49  ;;  %v4442_v17 = vmul.f32 %v7602_v43, %v7602_v43  ;;  %v7616_v19 = vsub.f32 %v7473_v9, %v4419_v24  ;;  %v4463_v54 = vsel %vm1402_vm3, %v4441_v52, 0.0  ;;  %v365_v24 = vld [vmem:[%s5057_s8] sm:$0xf] }
 0xa83   :  { %5866 = vmatprep.mubr.msk.bf16.mxu0 %vm1744_vm6, %v3449_v21  ;;  %4464 = vadd.xlane.f32.xlu0 %v4463_v54  ;;  %v4404_v44 = vpop.xlane.xlu0 %4403  ;;  %v7628_v50 = vadd.f32 %v3432_v7, %v8262_v58  ;;  %v3743_v49 = vsel %vm1599_vm4, %v365_v24, 0 }
 0xa84   :  { %v7620_v42 = vsub.f32 %v7478_v10, %v4420_v55  ;;  %v4466_v40 = vsel %vm1402_vm3, %v4442_v17, 0.0  ;;  %v4421_v53 = vmul.f32 0.03125, %v4404_v44  ;;  %v4443_v56 = vmul.f32 %v7616_v19, %v7616_v19  ;;  %5999 = vmatprep.subr.msk.bf16.mxu1 %vm1599_vm4, %v365_v24 }
 0xa85   :  { %4467 = vadd.xlane.f32.xlu1 %v4466_v40  ;;  %v4407_v14 = vpop.xlane.xlu1 %4406  ;;  %v3450_v57 = vpack.c.bf16 %v7628_v50, %v7625_v5  ;;  %5871 = vmatpush3.bf16.msra.mxu1 %v3743_v49 }
 0xa86   :  { %v4422_v51 = vmul.f32 0.03125, %v4407_v14  ;;  %v4444_v8 = vmul.f32 %v7620_v42, %v7620_v42  ;;  %v7637_v2 = vsub.f32 %v7484_v34, %v4421_v53  ;;  %v4469_v13 = vsel %vm1402_vm3, %v4443_v56, 0.0 }
 0xa87   :  { %5867 = vmatmul.mubr.msk.bf16.gmra.mrb[140].mxu0 %vm1744_vm6, %v3450_v57  ;;  %4470 = vadd.xlane.f32.xlu0 %v4469_v13  ;;  %v4410_v6 = vpop.xlane.xlu0 %4409 }
 0xa88   :  { %v7641_v23 = vsub.f32 %v7489_v20, %v4422_v51  ;;  %v4472_v62 = vsel %vm1402_vm3, %v4444_v8, 0.0  ;;  %v4423_v31 = vmul.f32 0.03125, %v4410_v6  ;;  %v4445_v12 = vmul.f32 %v7637_v2, %v7637_v2 }
 0xa89   :  { %4473 = vadd.xlane.f32.xlu1 %v4472_v62  ;;  %v7674_v62 = vld [vmem:[%s7665_s12] sm:$0xff]  }
 0xa8a   :  { %v4446_v48 = vmul.f32 %v7641_v23, %v7641_v23  ;;  %v7650_v32 = vsub.f32 %v7494_v29, %v4423_v31  ;;  %v4475_v22 = vsel %vm1402_vm3, %v4445_v12, 0.0  ;;  %5904 = vmatprep.subr.bf16.mxu1 %v7674_v62 }
 0xa8b   :  { %4476 = vadd.xlane.f32.xlu0 %v4475_v22  ;;  %v7682_v22 = vld [vmem:[%s5065_s16] ss:$0 sm:$0xff] }
 0xa8c   :  { %v4478_v63 = vsel %vm1402_vm3, %v4446_v48, 0.0  ;;  %v4447_v33 = vmul.f32 %v7650_v32, %v7650_v32 }
 0xa8d   :  { %4479 = vadd.xlane.f32.xlu1 %v4478_v63 }
 0xa8e   :  { %v4481_v36 = vsel %vm1402_vm3, %v4447_v33, 0.0 }
 0xa8f   :  { %4482 = vadd.xlane.f32.xlu0 %v4481_v36 }
 0xb06   :  { %v4450_v52 = vpop.xlane.xlu1 %4449 }
 0xb07   :  { %v4484_v55 = vmul.f32 0.03125, %v4450_v52  ;;  %v7685_v52 = vld [vmem:[%s5066_s20] ss:$0 sm:$0xff] }
 0xb08   :  { %v4453_v17 = vpop.xlane.xlu0 %4452 }
 0xb09   :  { %v4496_v21 = vadd.f32 1e-05, %v4484_v55  ;;  %v4485_v7 = vmul.f32 0.03125, %v4453_v17 }
 0xb0a   :  { %v4456_v54 = vpop.xlane.xlu1 %4455 }
 0xb0b   :  { %6373 = vrsqrt.f32 %v4496_v21  ;;  %v4486_v44 = vmul.f32 0.03125, %v4456_v54  ;;  %v4497_v40 = vadd.f32 1e-05, %v4485_v7 }
 0xb0c   :  { %v4459_v58 = vpop.xlane.xlu0 %4458 }
 0xb0d   :  { %v4498_v1 = vadd.f32 1e-05, %v4486_v44  ;;  %6375 = vrsqrt.f32 %v4497_v40  ;;  %v4487_v53 = vmul.f32 0.03125, %v4459_v58 }
 0xb0e   :  { %v4462_v14 = vpop.xlane.xlu1 %4461 }
 0xb0f   :  { %6377 = vrsqrt.f32 %v4498_v1  ;;  %v4488_v56 = vmul.f32 0.03125, %v4462_v14  ;;  %v4499_v51 = vadd.f32 1e-05, %v4487_v53 }
 0xb10   :  { %v4465_v8 = vpop.xlane.xlu0 %4464 }
 0xb11   :  { %v4500_v57 = vadd.f32 1e-05, %v4488_v56  ;;  %6379 = vrsqrt.f32 %v4499_v51  ;;  %v4489_v13 = vmul.f32 0.03125, %v4465_v8 }
 0xb12   :  { %v4468_v6 = vpop.xlane.xlu1 %4467 }
 0xb13   :  { %6381 = vrsqrt.f32 %v4500_v57  ;;  %v4490_v31 = vmul.f32 0.03125, %v4468_v6  ;;  %v4501_v12 = vadd.f32 1e-05, %v4489_v13 }
 0xb14   :  { %v4471_v33 = vpop.xlane.xlu0 %4470 }
 0xb15   :  { %v6374_v48 = vpop.eup %6373  ;;  %v4502_v63 = vadd.f32 1e-05, %v4490_v31  ;;  %6383 = vrsqrt.f32 %v4501_v12  ;;  %v4491_v24 = vmul.f32 0.03125, %v4471_v33 }
 0xb16   :  { %v4520_v36 = vmul.f32 %v6374_v48, %v7539_v46  ;;  %v4474_v49 = vpop.xlane.xlu1 %4473 }
 0xb17   :  { %6385 = vrsqrt.f32 %v4502_v63  ;;  %v4492_v55 = vmul.f32 0.03125, %v4474_v49  ;;  %v6376_v21 = vpop.eup %6375  ;;  %v4503_v7 = vadd.f32 1e-05, %v4491_v24 }
 0xb18   :  { %v4538_v17 = vmul.f32 %v7682_v22, %v4520_v36  ;;  %v4521_v44 = vmul.f32 %v6376_v21, %v7554_v28  ;;  %v4477_v1 = vpop.xlane.xlu0 %4476 }
 0xb19   :  { %v6378_v54 = vpop.eup %6377  ;;  %v4504_v40 = vadd.f32 1e-05, %v4492_v55  ;;  %6387 = vrsqrt.f32 %v4503_v7  ;;  %v4493_v53 = vmul.f32 0.03125, %v4477_v1 }
 0xb1a   :  { %v4556_v58 = vadd.f32 %v7685_v52, %v4538_v17  ;;  %v4522_v46 = vmul.f32 %v6378_v54, %v7558_v35  ;;  %v4480_v14 = vpop.xlane.xlu1 %4479  ;;  %v4539_v56 = vmul.f32 %v7682_v22, %v4521_v44 }
 0xb1b   :  { %6389 = vrsqrt.f32 %v4504_v40  ;;  %v4494_v51 = vmul.f32 0.03125, %v4480_v14  ;;  %v6380_v57 = vpop.eup %6379  ;;  %v4505_v8 = vadd.f32 1e-05, %v4493_v53 }
 0xb1c   :  { %5003 = vst.msk [vmem:[%s7679_s24] sm:$0xff] %vm1402_vm3, %v4556_v58  ;;  %v4540_v28 = vmul.f32 %v7682_v22, %v4522_v46  ;;  %v4557_v6 = vadd.f32 %v7685_v52, %v4539_v56  ;;  %v4523_v35 = vmul.f32 %v6380_v57, %v7576_v61  ;;  %v4483_v12 = vpop.xlane.xlu0 %4482 }
 0xb1d   :  { %v6382_v13 = vpop.eup %6381  ;;  %v4506_v31 = vadd.f32 1e-05, %v4494_v51  ;;  %6391 = vrsqrt.f32 %v4505_v8  ;;  %v4495_v33 = vmul.f32 0.03125, %v4483_v12 }
 0xb1e   :  { %v4558_v48 = vadd.f32 %v7685_v52, %v4540_v28  ;;  %v4524_v63 = vmul.f32 %v6382_v13, %v7582_v47  ;;  %5004 = vst.msk [vmem:[%s7679_s24 + $0x8] sm:$0xff] %vm1402_vm3, %v4557_v6  ;;  %v4541_v36 = vmul.f32 %v7682_v22, %v4523_v35 }
 0xb1f   :  { %6393 = vrsqrt.f32 %v4506_v31  ;;  %v6384_v24 = vpop.eup %6383  ;;  %v4507_v49 = vadd.f32 1e-05, %v4495_v33 }
 0xb20   :  { %5005 = vst.msk [vmem:[%s7679_s24 + $0x10] sm:$0xff] %vm1402_vm3, %v4558_v48  ;;  %v4542_v61 = vmul.f32 %v7682_v22, %v4524_v63  ;;  %v4559_v21 = vadd.f32 %v7685_v52, %v4541_v36  ;;  %v4525_v47 = vmul.f32 %v6384_v24, %v7593_v3  ;;  %v6194_v48 = vld [vmem:[%s7725_s28 + $0x8] sm:$0xff]  }
 0xb21   :  { %v6386_v55 = vpop.eup %6385  ;;  %6395 = vrsqrt.f32 %v4507_v49 }
 0xb22   :  { %v4560_v17 = vadd.f32 %v7685_v52, %v4542_v61  ;;  %v4526_v7 = vmul.f32 %v6386_v55, %v7602_v43  ;;  %5006 = vst.msk [vmem:[%s7679_s24 + $0x18] sm:$0xff] %vm1402_vm3, %v4559_v21  ;;  %v4543_v54 = vmul.f32 %v7682_v22, %v4525_v47 }
 0xb23   :  { %v6388_v44 = vpop.eup %6387 }
 0xb24   :  { %5007 = vst.msk [vmem:[%s7679_s24 + $0x20] sm:$0xff] %vm1402_vm3, %v4560_v17  ;;  %v4544_v40 = vmul.f32 %v7682_v22, %v4526_v7  ;;  %v4561_v58 = vadd.f32 %v7685_v52, %v4543_v54  ;;  %v4527_v3 = vmul.f32 %v6388_v44, %v7616_v19 }
 0xb25   :  { %v6390_v1 = vpop.eup %6389 }
 0xb26   :  { %v4562_v46 = vadd.f32 %v7685_v52, %v4544_v40  ;;  %v4528_v43 = vmul.f32 %v6390_v1, %v7620_v42  ;;  %5008 = vst.msk [vmem:[%s7679_s24 + $0x28] sm:$0xff] %vm1402_vm3, %v4561_v58  ;;  %v4545_v53 = vmul.f32 %v7682_v22, %v4527_v3 }
 0xb27   :  { %v6392_v14 = vpop.eup %6391 }
 0xb28   :  { %5009 = vst.msk [vmem:[%s7679_s24 + $0x30] sm:$0xff] %vm1402_vm3, %v4562_v46  ;;  %v4546_v19 = vmul.f32 %v7682_v22, %v4528_v43  ;;  %v4563_v56 = vadd.f32 %v7685_v52, %v4545_v53  ;;  %v4529_v51 = vmul.f32 %v6392_v14, %v7637_v2  ;;  %v6193_v2 = vld [vmem:[%s7725_s28] sm:$0xff]  }
 0xb29   :  { %v6394_v42 = vpop.eup %6393  ;;  %5884 = vmatprep.subr.bf16.mxu0 %v6193_v2 }
 0xb2a   :  { %v4564_v57 = vadd.f32 %v7685_v52, %v4546_v19  ;;  %v4530_v28 = vmul.f32 %v6394_v42, %v7641_v23  ;;  %5010 = vst.msk [vmem:[%s7679_s24 + $0x38] sm:$0xff] %vm1402_vm3, %v4563_v56  ;;  %v4547_v8 = vmul.f32 %v7682_v22, %v4529_v51  ;;  %5885 = vmatpush3.bf16.msra.mxu0 %v6193_v2 }
 0xb2b   :  { %v6396_v13 = vpop.eup %6395  ;;  %5886 = vmatprep.subr.bf16.mxu0 %v6194_v48 }
 0xb2c   :  { %5011 = vst.msk [vmem:[%s7679_s24 + $0x40] sm:$0xff] %vm1402_vm3, %v4564_v57  ;;  %v4548_v6 = vmul.f32 %v7682_v22, %v4530_v28  ;;  %v4565_v35 = vadd.f32 %v7685_v52, %v4547_v8  ;;  %v4531_v31 = vmul.f32 %v6396_v13, %v7650_v32 }
 0xb2e   :  { %v4566_v12 = vadd.f32 %v7685_v52, %v4548_v6  ;;  %5012 = vst.msk [vmem:[%s7679_s24 + $0x48] sm:$0xff] %vm1402_vm3, %v4565_v35  ;;  %v4549_v23 = vmul.f32 %v7682_v22, %v4531_v31  ;;  %5887 = vmatpush3.bf16.msra.mxu0 %v6194_v48 }
 0xb30   :  { %5013 = vst.msk [vmem:[%s7679_s24 + $0x50] sm:$0xff] %vm1402_vm3, %v4566_v12  ;;  %v4567_v63 = vadd.f32 %v7685_v52, %v4549_v23 }
 0xb32   :  { %5014 = vst.msk [vmem:[%s7679_s24 + $0x58] sm:$0xff] %vm1402_vm3, %v4567_v63 }
 0xb40   :  { %v5860_v33 = vpop.f32.mrb[132].mxu0 }
 0xb41   :  { %v3576_v32 = vmul.f32 0.044715, %v5860_v33  ;;  %v3527_v36 = vpop.f32.mrb[133].mxu0 }
 0xb42   :  { %v3574_v24 = vmul.f32 0.044715, %v3527_v36  ;;  %v5861_v61 = vpop.f32.mrb[134].mxu0 }
 0xb43   :  { %v3588_v49 = vmul.f32 %v5860_v33, %v3576_v32  ;;  %v3577_v55 = vmul.f32 0.044715, %v5861_v61  ;;  %v3530_v21 = vpop.f32.mrb[135].mxu0 }
 0xb44   :  { %v3586_v47 = vmul.f32 %v3574_v24, %v3527_v36  ;;  %v3575_v22 = vmul.f32 0.044715, %v3530_v21 }
 0xb45   :  { %v3600_v17 = vmul.f32 %v5860_v33, %v3588_v49  ;;  %v3589_v7 = vmul.f32 %v5861_v61, %v3577_v55 }
 0xb46   :  { %v3598_v54 = vmul.f32 %v3586_v47, %v3527_v36  ;;  %v3587_v44 = vmul.f32 %v3575_v22, %v3530_v21 }
 0xb47   :  { %v3612_v40 = vadd.f32 %v5860_v33, %v3600_v17  ;;  %v3601_v52 = vmul.f32 %v5861_v61, %v3589_v7 }
 0xb48   :  { %v3610_v1 = vadd.f32 %v3598_v54, %v3527_v36  ;;  %v3599_v58 = vmul.f32 %v3587_v44, %v3530_v21 }
 0xb49   :  { %v3624_v3 = vmul.f32 2.0, %v3612_v40  ;;  %v3613_v46 = vadd.f32 %v5861_v61, %v3601_v52 }
 0xb4a   :  { %v3622_v43 = vmul.f32 2.0, %v3610_v1  ;;  %v3611_v53 = vadd.f32 %v3599_v58, %v3530_v21 }
 0xb4b   :  { %v5303_v14 = vmul.f32 -0.7978846, %v3624_v3  ;;  %v3625_v19 = vmul.f32 2.0, %v3613_v46 }
 0xb4c   :  { %v5301_v42 = vmul.f32 -0.7978846, %v3622_v43  ;;  %v3623_v56 = vmul.f32 2.0, %v3611_v53 }
 0xb4d   :  { %v3662_v51 = vmul.f32 1.442695, %v5303_v14  ;;  %v5304_v57 = vmul.f32 -0.7978846, %v3625_v19 }
 0xb4e   :  { %v3658_v28 = vmul.f32 1.442695, %v5301_v42  ;;  %v5302_v8 = vmul.f32 -0.7978846, %v3623_v56 }
 0xb4f   :  { %6397 = vpow2.f32 %v3662_v51  ;;  %v3664_v13 = vmul.f32 1.442695, %v5304_v57 }
 0xb50   :  { %6399 = vpow2.f32 %v3658_v28  ;;  %v3660_v6 = vmul.f32 1.442695, %v5302_v8  ;;  %v5864_v35 = vpop.f32.mrb[136].mxu0 }
 0xb51   :  { %6401 = vpow2.f32 %v3664_v13  ;;  %v3580_v31 = vmul.f32 0.044715, %v5864_v35  ;;  %v3543_v2 = vpop.f32.mrb[137].mxu0 }
 0xb52   :  { %6403 = vpow2.f32 %v3660_v6  ;;  %v3578_v12 = vmul.f32 0.044715, %v3543_v2  ;;  %v5865_v48 = vpop.f32.mrb[138].mxu0 }
 0xb53   :  { %v3592_v23 = vmul.f32 %v5864_v35, %v3580_v31  ;;  %v3581_v63 = vmul.f32 0.044715, %v5865_v48  ;;  %v3546_v33 = vpop.f32.mrb[139].mxu0 }
 0xb54   :  { %v3590_v32 = vmul.f32 %v3578_v12, %v3543_v2  ;;  %v3579_v36 = vmul.f32 0.044715, %v3546_v33 }
 0xb55   :  { %v3604_v24 = vmul.f32 %v5864_v35, %v3592_v23  ;;  %v3593_v61 = vmul.f32 %v5865_v48, %v3581_v63 }
 0xb56   :  { %v3602_v49 = vmul.f32 %v3590_v32, %v3543_v2  ;;  %v3591_v55 = vmul.f32 %v3579_v36, %v3546_v33 }
 0xb57   :  { %v3616_v21 = vadd.f32 %v5864_v35, %v3604_v24  ;;  %v3605_v47 = vmul.f32 %v5865_v48, %v3593_v61 }
 0xb58   :  { %v3614_v22 = vadd.f32 %v3602_v49, %v3543_v2  ;;  %v3603_v17 = vmul.f32 %v3591_v55, %v3546_v33 }
 0xb59   :  { %v6398_v7 = vpop.eup %6397  ;;  %v3628_v54 = vmul.f32 2.0, %v3616_v21  ;;  %v3617_v44 = vadd.f32 %v5865_v48, %v3605_v47 }
 0xb5a   :  { %v6400_v40 = vpop.eup %6399  ;;  %v3684_v52 = vadd.f32 1.0, %v6398_v7  ;;  %v3626_v1 = vmul.f32 2.0, %v3614_v22  ;;  %v3615_v58 = vadd.f32 %v3603_v17, %v3546_v33  ;;  %v5868_v14 = vpop.f32.mrb[140].mxu0 }
 0xb5b   :  { %v6402_v3 = vpop.eup %6401  ;;  %v3682_v46 = vadd.f32 1.0, %v6400_v40  ;;  %v5307_v43 = vmul.f32 -0.7978846, %v3628_v54  ;;  %v3629_v53 = vmul.f32 2.0, %v3617_v44  ;;  %v3559_v57 = vpop.f32.mrb[141].mxu0 }
 0xb5c   :  { %v6404_v19 = vpop.eup %6403  ;;  %6405 = vrcp.f32 %v3684_v52  ;;  %v3685_v42 = vadd.f32 1.0, %v6402_v3  ;;  %v5305_v56 = vmul.f32 -0.7978846, %v3626_v1  ;;  %v3627_v51 = vmul.f32 2.0, %v3615_v58  ;;  %v5869_v6 = vpop.f32.mrb[142].mxu0 }
 0xb5d   :  { %6407 = vrcp.f32 %v3682_v46  ;;  %v3683_v28 = vadd.f32 1.0, %v6404_v19  ;;  %v3670_v8 = vmul.f32 1.442695, %v5307_v43  ;;  %v5308_v13 = vmul.f32 -0.7978846, %v3629_v53  ;;  %v3562_v32 = vpop.f32.mrb[143].mxu0 }
 0xb5e   :  { %6409 = vrcp.f32 %v3685_v42  ;;  %v3666_v35 = vmul.f32 1.442695, %v5305_v56  ;;  %v5306_v31 = vmul.f32 -0.7978846, %v3627_v51  ;;  %v3584_v2 = vmul.f32 0.044715, %v5868_v14 }
 0xb5f   :  { %6411 = vrcp.f32 %v3683_v28  ;;  %v3672_v12 = vmul.f32 1.442695, %v5308_v13  ;;  %v3582_v48 = vmul.f32 0.044715, %v3559_v57  ;;  %v3585_v23 = vmul.f32 0.044715, %v5869_v6 }
 0xb60   :  { %6413 = vpow2.f32 %v3670_v8  ;;  %v3668_v63 = vmul.f32 1.442695, %v5306_v31  ;;  %v3596_v33 = vmul.f32 %v5868_v14, %v3584_v2  ;;  %v3583_v61 = vmul.f32 0.044715, %v3562_v32 }
 0xb61   :  { %6415 = vpow2.f32 %v3666_v35  ;;  %v3594_v36 = vmul.f32 %v3582_v48, %v3559_v57  ;;  %v3597_v24 = vmul.f32 %v5869_v6, %v3585_v23 }
 0xb62   :  { %6417 = vpow2.f32 %v3672_v12  ;;  %v3608_v49 = vmul.f32 %v5868_v14, %v3596_v33  ;;  %v3595_v47 = vmul.f32 %v3583_v61, %v3562_v32 }
 0xb63   :  { %6419 = vpow2.f32 %v3668_v63  ;;  %v3606_v55 = vmul.f32 %v3594_v36, %v3559_v57  ;;  %v3609_v21 = vmul.f32 %v5869_v6, %v3597_v24 }
 0xb64   :  { %v3620_v22 = vadd.f32 %v5868_v14, %v3608_v49  ;;  %v3607_v54 = vmul.f32 %v3595_v47, %v3562_v32 }
 0xb65   :  { %v3618_v17 = vadd.f32 %v3606_v55, %v3559_v57  ;;  %v3621_v7 = vadd.f32 %v5869_v6, %v3609_v21  ;;  %v6192_v6 = vld [vmem:[%s7665_s12 + $0x8] sm:$0xff]  }
 0xb66   :  { %v6406_v44 = vpop.eup %6405  ;;  %v3632_v40 = vmul.f32 2.0, %v3620_v22  ;;  %v3619_v3 = vadd.f32 %v3607_v54, %v3562_v32 }
 0xb67   :  { %v6408_v52 = vpop.eup %6407  ;;  %v3630_v1 = vmul.f32 2.0, %v3618_v17  ;;  %v3633_v58 = vmul.f32 2.0, %v3621_v7 }
 0xb68   :  { %v6410_v46 = vpop.eup %6409  ;;  %v5311_v43 = vmul.f32 -0.7978846, %v3632_v40  ;;  %v3631_v42 = vmul.f32 2.0, %v3619_v3 }
 0xb69   :  { %v6412_v53 = vpop.eup %6411  ;;  %v5309_v19 = vmul.f32 -0.7978846, %v3630_v1  ;;  %v3719_v56 = vpack.c.bf16 %v6410_v46, %v6406_v44  ;;  %v5312_v8 = vmul.f32 -0.7978846, %v3633_v58 }
 0xb6a   :  { %v6414_v51 = vpop.eup %6413  ;;  %v3678_v28 = vmul.f32 1.442695, %v5311_v43  ;;  %v3718_v14 = vpack.c.bf16 %v6412_v53, %v6408_v52  ;;  %v5310_v2 = vmul.f32 -0.7978846, %v3631_v42  ;;  %v3979_v53 = vpack.c.bf16 %v7441_v18, %v7437_v39 }
 0xb6b   :  { %v6416_v57 = vpop.eup %6415  ;;  %v3688_v13 = vadd.f32 1.0, %v6414_v51  ;;  %v3674_v23 = vmul.f32 1.442695, %v5309_v19  ;;  %v3680_v33 = vmul.f32 1.442695, %v5312_v8  ;;  %v3980_v19 = vpack.c.bf16 %v7448_v4, %v7445_v0  ;;  %v6195_v4 = vld [vmem:[%s7725_s28 + $0x10] sm:$0xff]  }
 0xb6c   :  { %v6418_v35 = vpop.eup %6417  ;;  %v3686_v31 = vadd.f32 1.0, %v6416_v57  ;;  %6421 = vpow2.f32 %v3678_v28  ;;  %5872 = vmatprep.mubr.msk.bf16.mxu1 %vm1580_vm5, %v3718_v14  ;;  %v3676_v32 = vmul.f32 1.442695, %v5310_v2  ;;  %v3981_v42 = vpack.c.bf16 %v7462_v25, %v7456_v27  ;;  %5888 = vmatprep.subr.bf16.mxu0 %v6195_v4  ;;  %v6196_v27 = vld [vmem:[%s7725_s28 + $0x18] sm:$0xff]   ;;  %v6197_v25 = vld [vmem:[%s7784_s2] sm:$0xff]  }
 0xb6d   :  { %v6420_v12 = vpop.eup %6419  ;;  %6423 = vrcp.f32 %v3688_v13  ;;  %v3689_v48 = vadd.f32 1.0, %v6418_v35  ;;  %5873 = vmatmul.mubr.msk.bf16.vlgmr.msra.gmra.mrb[144].mxu1 %vm1580_vm5, %v3719_v56  ;;  %v3982_v39 = vpack.c.bf16 %v7473_v9, %v7467_v60  ;;  %v3983_v18 = vpack.c.bf16 %v7484_v34, %v7478_v10  ;;  %5889 = vmatpush3.bf16.msra.mxu0 %v6195_v4  ;;  %v6198_v60 = vld [vmem:[%s7784_s2 + $0x8] sm:$0xff]  }
 0xb6e   :  { %6425 = vrcp.f32 %v3686_v31  ;;  %v3687_v63 = vadd.f32 1.0, %v6420_v12  ;;  %5905 = vmatpush3.bf16.msra.mxu1 %v7674_v62  ;;  %v3984_v0 = vpack.c.bf16 %v7494_v29, %v7489_v20  ;;  %5890 = vmatprep.subr.bf16.mxu0 %v6196_v27 }
 0xb6f   :  { %6427 = vrcp.f32 %v3689_v48  ;;  %5906 = vmatprep.subr.bf16.mxu1 %v6192_v6 }
 0xb70   :  { %6429 = vrcp.f32 %v3687_v63 }
 0xb71   :  { %6431 = vpow2.f32 %v3674_v23  ;;  %5891 = vmatpush3.bf16.msra.mxu0 %v6196_v27 }
 0xb72   :  { %6433 = vpow2.f32 %v3680_v33  ;;  %5907 = vmatpush3.bf16.msra.mxu1 %v6192_v6 }
 0xb73   :  { %6435 = vpow2.f32 %v3676_v32  ;;  %5920 = vmatprep.subr.bf16.mxu1 %v6197_v25 }
 0xb76   :  { %v6422_v36 = vpop.eup %6421 }
 0xb77   :  { %v6424_v24 = vpop.eup %6423  ;;  %v3692_v55 = vadd.f32 1.0, %v6422_v36  ;;  %v6199_v36 = vld [vmem:[%s7784_s2 + $0x10] sm:$0xff]  }
 0xb78   :  { %v6426_v61 = vpop.eup %6425 }
 0xb79   :  { %v6428_v49 = vpop.eup %6427  ;;  %6437 = vrcp.f32 %v3692_v55 }
 0xb7a   :  { %v6430_v21 = vpop.eup %6429  ;;  %v3721_v47 = vpack.c.bf16 %v6428_v49, %v6424_v24  ;;  %v6200_v24 = vld [vmem:[%s7784_s2 + $0x18] sm:$0xff]  }
 0xb7b   :  { %v6432_v22 = vpop.eup %6431  ;;  %v3720_v17 = vpack.c.bf16 %v6430_v21, %v6426_v61 }
 0xb7c   :  { %v6434_v7 = vpop.eup %6433  ;;  %v3690_v54 = vadd.f32 1.0, %v6432_v22 }
 0xb7d   :  { %v6436_v62 = vpop.eup %6435  ;;  %v3693_v44 = vadd.f32 1.0, %v6434_v7  ;;  %5876 = vmatprep.mubr.msk.bf16.mxu1 %vm1580_vm5, %v3720_v17 }
 0xb7e   :  { %6439 = vrcp.f32 %v3690_v54  ;;  %v3691_v40 = vadd.f32 1.0, %v6436_v62  ;;  %5877 = vmatmul.mubr.msk.bf16.gmra.mrb[148].mxu1 %vm1580_vm5, %v3721_v47 }
 0xb7f   :  { %6441 = vrcp.f32 %v3693_v44 }
 0xb80   :  { %6443 = vrcp.f32 %v3691_v40 }
 0xb83   :  { %v6438_v52 = vpop.eup %6437 }
 0xb88   :  { %v6440_v1 = vpop.eup %6439 }
 0xb89   :  { %v6442_v58 = vpop.eup %6441 }
 0xb8a   :  { %v6444_v3 = vpop.eup %6443  ;;  %v3723_v46 = vpack.c.bf16 %v6442_v58, %v6438_v52 }
 0xb8b   :  { %v3722_v43 = vpack.c.bf16 %v6444_v3, %v6440_v1 }
 0xb8d   :  { %5880 = vmatprep.mubr.msk.bf16.mxu1 %vm1580_vm5, %v3722_v43 }
 0xb8e   :  { %5881 = vmatmul.mubr.msk.bf16.gmra.mrb[152].mxu1 %vm1580_vm5, %v3723_v46 }
 0xb8f   :  { %5908 = vmatprep.mubr.msk.bf16.mxu1 %vm1402_vm3, %v3979_v53 }
 0xb96   :  { %5909 = vmatmul.mubr.msk.bf16.vlgmr.msra.gmra.mrb[156].mxu1 %vm1402_vm3, %v3980_v19 }
 0xb97   :  { %5912 = vmatprep.mubr.msk.bf16.mxu1 %vm1402_vm3, %v3981_v42  ;;  %5921 = vmatpush3.bf16.msra.mxu1 %v6197_v25 }
 0xb98   :  { %5922 = vmatprep.subr.bf16.mxu1 %v6198_v60 }
 0xb9b   :  { %5923 = vmatpush3.bf16.msra.mxu1 %v6198_v60 }
 0xb9c   :  { %5924 = vmatprep.subr.bf16.mxu1 %v6199_v36 }
 0xb9e   :  { %5913 = vmatmul.mubr.msk.bf16.gmra.mrb[160].mxu1 %vm1402_vm3, %v3982_v39 }
 0xb9f   :  { %5916 = vmatprep.mubr.msk.bf16.mxu1 %vm1402_vm3, %v3983_v18  ;;  %5925 = vmatpush3.bf16.msra.mxu1 %v6199_v36 }
 0xba0   :  { %5926 = vmatprep.subr.bf16.mxu1 %v6200_v24 }
 0xba3   :  { %5927 = vmatpush3.bf16.msra.mxu1 %v6200_v24 }
 0xba6   :  { %5917 = vmatmul.mubr.msk.bf16.gmra.mrb[164].mxu1 %vm1402_vm3, %v3984_v0 }
 0xc40   :  { %v5874_v9 = vpop.f32.mrb[144].mxu1 }
 0xc41   :  { %v3779_v10 = vpop.f32.mrb[145].mxu1  ;;  %v3828_v20 = vmul.f32 %v5874_v9, %v7525_v30 }
 0xc42   :  { %v5875_v34 = vpop.f32.mrb[146].mxu1  ;;  %v3826_v51 = vmul.f32 %v3779_v10, %v7513_v15  ;;  %v6201_v10 = vld [vmem:[%s7861_s14] sm:$0xff]  }
 0xc43   :  { %v3829_v29 = vmul.f32 %v5875_v34, %v7528_v59  ;;  %v3782_v56 = vpop.f32.mrb[147].mxu1  ;;  %v5348_v34 = vld [vmem:[%s5062_s18] ss:$0 sm:$0xff] }
 0xc44   :  { %v3827_v28 = vmul.f32 %v3782_v56, %v7516_v16 }
 0xc45   :  { %v3839_v8 = vpack.c.bf16 %v3829_v29, %v3828_v20 }
 0xc46   :  { %v3838_v14 = vpack.c.bf16 %v3827_v28, %v3826_v51 }
 0xc48   :  { %5892 = vmatprep.mubr.msk.bf16.mxu0 %vm1744_vm6, %v3838_v14 }
 0xc49   :  { %5893 = vmatmul.mubr.msk.bf16.vlgmr.msra.gmra.mrb[144].mxu0 %vm1744_vm6, %v3839_v8 }
 0xc51   :  { %v5878_v57 = vpop.f32.mrb[148].mxu1 }
 0xc52   :  { %v3795_v13 = vpop.f32.mrb[149].mxu1  ;;  %v3832_v35 = vmul.f32 %v5878_v57, %v7561_v45 }
 0xc53   :  { %v5879_v6 = vpop.f32.mrb[150].mxu1  ;;  %v3830_v59 = vmul.f32 %v3795_v13, %v7542_v26 }
 0xc54   :  { %v3833_v30 = vmul.f32 %v5879_v6, %v7567_v38  ;;  %v3798_v31 = vpop.f32.mrb[151].mxu1 }
 0xc55   :  { %v3831_v15 = vmul.f32 %v3798_v31, %v7547_v41 }
 0xc56   :  { %v3841_v2 = vpack.c.bf16 %v3833_v30, %v3832_v35  ;;  %v6202_v35 = vld [vmem:[%s7861_s14 + $0x8] sm:$0xff]  }
 0xc57   :  { %v3840_v16 = vpack.c.bf16 %v3831_v15, %v3830_v59 }
 0xc59   :  { %5896 = vmatprep.mubr.msk.bf16.mxu0 %vm1744_vm6, %v3840_v16 }
 0xc5a   :  { %5897 = vmatmul.mubr.msk.bf16.gmra.mrb[148].mxu0 %vm1744_vm6, %v3841_v2 }
 0xc61   :  { %v5882_v12 = vpop.f32.mrb[152].mxu1 }
 0xc62   :  { %v3811_v48 = vpop.f32.mrb[153].mxu1  ;;  %v3836_v45 = vmul.f32 %v5882_v12, %v7625_v5 }
 0xc63   :  { %v5883_v23 = vpop.f32.mrb[154].mxu1  ;;  %v3834_v26 = vmul.f32 %v3811_v48, %v7597_v11  ;;  %v389_v11 = vld [vmem:[%s5064_s6] sm:$0xf] }
 0xc64   :  { %v3837_v38 = vmul.f32 %v5883_v23, %v7628_v50  ;;  %v3814_v63 = vpop.f32.mrb[155].mxu1  ;;  %6000 = vmatprep.subr.msk.bf16.mxu0 %vm1599_vm4, %v389_v11  ;;  %v5319_v50 = vld [vmem:[%s5059_s10] ss:$0 sm:$0xff] }
 0xc65   :  { %v3835_v41 = vmul.f32 %v3814_v63, %v7606_v37  ;;  %v4280_v37 = vsel %vm1599_vm4, %v389_v11, 0 }
 0xc66   :  { %v3843_v33 = vpack.c.bf16 %v3837_v38, %v3836_v45  ;;  %5941 = vmatpush3.bf16.msra.mxu0 %v4280_v37 }
 0xc67   :  { %v3842_v32 = vpack.c.bf16 %v3835_v41, %v3834_v26  ;;  %5954 = vmatprep.subr.bf16.mxu0 %v6201_v10 }
 0xc69   :  { %5900 = vmatprep.mubr.msk.bf16.mxu0 %vm1744_vm6, %v3842_v32 }
 0xc6a   :  { %5901 = vmatmul.mubr.msk.bf16.gmra.mrb[152].mxu0 %vm1744_vm6, %v3843_v33 }
 0xd1c   :  { %v5894_v5 = vpop.f32.mrb[144].mxu0 }
 0xd1d   :  { %v3926_v61 = vpop.f32.mrb[145].mxu0  ;;  %v7816_v55 = vadd.f32 %v5894_v5, %v5319_v50  ;;  %v6203_v5 = vld [vmem:[%s7861_s14 + $0x10] sm:$0xff]  }
 0xd1e   :  { %v5895_v49 = vpop.f32.mrb[146].mxu0  ;;  %v7820_v22 = vadd.f32 %v5319_v50, %v3926_v61  ;;  %v5349_v61 = vld [vmem:[%s5063_s22] ss:$0 sm:$0xff] }
 0xd1f   :  { %v7818_v21 = vadd.f32 %v5895_v49, %v5319_v50  ;;  %v3929_v47 = vpop.f32.mrb[147].mxu0  ;;  %v4245_v49 = vmul.f32 %v5349_v61, %v7816_v55 }
 0xd20   :  { %v7822_v17 = vadd.f32 %v5319_v50, %v3929_v47 }
 0xd21   :  { %v3974_v7 = vpack.c.bf16 %v7818_v21, %v7816_v55 }
 0xd22   :  { %v3973_v54 = vpack.c.bf16 %v7822_v17, %v7820_v22 }
 0xd24   :  { %5928 = vmatprep.mubr.msk.bf16.mxu1 %vm1744_vm6, %v3973_v54 }
 0xd25   :  { %5929 = vmatmul.mubr.msk.bf16.vlgmr.msra.gmra.mrb[156].mxu1 %vm1744_vm6, %v3974_v7  ;;  %v4243_v7 = vmul.f32 %v5349_v61, %v7820_v22 }
 0xd2d   :  { %v5898_v62 = vpop.f32.mrb[148].mxu0 }
 0xd2e   :  { %v3942_v44 = vpop.f32.mrb[149].mxu0  ;;  %v7830_v52 = vadd.f32 %v5898_v62, %v5319_v50 }
 0xd2f   :  { %v5899_v40 = vpop.f32.mrb[150].mxu0  ;;  %v7834_v3 = vadd.f32 %v5319_v50, %v3942_v44  ;;  %v4246_v44 = vmul.f32 %v5349_v61, %v7818_v21 }
 0xd30   :  { %v7832_v1 = vadd.f32 %v5899_v40, %v5319_v50  ;;  %v3945_v58 = vpop.f32.mrb[151].mxu0 }
 0xd31   :  { %v7836_v46 = vadd.f32 %v5319_v50, %v3945_v58 }
 0xd32   :  { %v3976_v43 = vpack.c.bf16 %v7832_v1, %v7830_v52 }
 0xd33   :  { %v3975_v53 = vpack.c.bf16 %v7836_v46, %v7834_v3 }
 0xd35   :  { %5932 = vmatprep.mubr.msk.bf16.mxu1 %vm1744_vm6, %v3975_v53 }
 0xd36   :  { %5933 = vmatmul.mubr.msk.bf16.gmra.mrb[160].mxu1 %vm1744_vm6, %v3976_v43  ;;  %v4244_v43 = vmul.f32 %v5349_v61, %v7822_v17  ;;  %v4249_v17 = vmul.f32 %v5349_v61, %v7830_v52 }
 0xd3d   :  { %v5902_v19 = vpop.f32.mrb[152].mxu0 }
 0xd3e   :  { %v3958_v42 = vpop.f32.mrb[153].mxu0  ;;  %v7844_v18 = vadd.f32 %v5902_v19, %v5319_v50 }
 0xd3f   :  { %v5903_v39 = vpop.f32.mrb[154].mxu0  ;;  %v7848_v27 = vadd.f32 %v5319_v50, %v3958_v42 }
 0xd40   :  { %v7846_v0 = vadd.f32 %v5903_v39, %v5319_v50  ;;  %v3961_v4 = vpop.f32.mrb[155].mxu0 }
 0xd41   :  { %v7850_v25 = vadd.f32 %v5319_v50, %v3961_v4  ;;  %v6204_v50 = vld [vmem:[%s7861_s14 + $0x18] sm:$0xff]  }
 0xd42   :  { %v3978_v60 = vpack.c.bf16 %v7846_v0, %v7844_v18 }
 0xd43   :  { %v3977_v9 = vpack.c.bf16 %v7850_v25, %v7848_v27 }
 0xd45   :  { %5936 = vmatprep.mubr.msk.bf16.mxu1 %vm1744_vm6, %v3977_v9 }
 0xd46   :  { %5937 = vmatmul.mubr.msk.bf16.gmra.mrb[164].mxu1 %vm1744_vm6, %v3978_v60 }
 0xdf8   :  { %v5930_v20 = vpop.f32.mrb[156].mxu1 }
 0xdf9   :  { %v4172_v29 = vpop.f32.mrb[157].mxu1  ;;  %v4227_v51 = vadd.f32 %v5930_v20, %v5348_v34 }
 0xdfa   :  { %v5931_v56 = vpop.f32.mrb[158].mxu1  ;;  %v4225_v14 = vadd.f32 %v5348_v34, %v4172_v29  ;;  %v4250_v29 = vmul.f32 %v5349_v61, %v7832_v1 }
 0xdfb   :  { %v4228_v28 = vadd.f32 %v5931_v56, %v5348_v34  ;;  %v4175_v8 = vpop.f32.mrb[159].mxu1 }
 0xdfc   :  { %v4226_v57 = vadd.f32 %v5348_v34, %v4175_v8 }
 0xdfd   :  { %v4256_v13 = vpack.c.bf16 %v4228_v28, %v4227_v51  ;;  %v4248_v28 = vmul.f32 %v5349_v61, %v7836_v46  ;;  %v4253_v46 = vmul.f32 %v5349_v61, %v7844_v18 }
 0xdfe   :  { %v4255_v6 = vpack.c.bf16 %v4226_v57, %v4225_v14 }
 0xe00   :  { %5942 = vmatprep.mubr.msk.bf16.mxu0 %vm1580_vm5, %v4255_v6 }
 0xe01   :  { %5943 = vmatmul.mubr.msk.bf16.vlgmr.msra.gmra.mrb[156].mxu0 %vm1580_vm5, %v4256_v13 }
 0xe02   :  { %5955 = vmatpush3.bf16.msra.mxu0 %v6201_v10  ;;  %v4247_v10 = vmul.f32 %v5349_v61, %v7834_v3 }
 0xe03   :  { %5956 = vmatprep.subr.bf16.mxu0 %v6202_v35 }
 0xe06   :  { %5957 = vmatpush3.bf16.msra.mxu0 %v6202_v35 }
 0xe07   :  { %5958 = vmatprep.subr.bf16.mxu0 %v6203_v5 }
 0xe09   :  { %v5934_v30 = vpop.f32.mrb[160].mxu1 }
 0xe0a   :  { %v4188_v31 = vpop.f32.mrb[161].mxu1  ;;  %v4231_v15 = vadd.f32 %v5934_v30, %v5348_v34  ;;  %5959 = vmatpush3.bf16.msra.mxu0 %v6203_v5 }
 0xe0b   :  { %v5935_v59 = vpop.f32.mrb[162].mxu1  ;;  %v4229_v12 = vadd.f32 %v5348_v34, %v4188_v31  ;;  %5960 = vmatprep.subr.bf16.mxu0 %v6204_v50  ;;  %v4251_v31 = vmul.f32 %v5349_v61, %v7848_v27 }
 0xe0c   :  { %v4232_v2 = vadd.f32 %v5935_v59, %v5348_v34  ;;  %v4191_v16 = vpop.f32.mrb[163].mxu1 }
 0xe0d   :  { %v4230_v48 = vadd.f32 %v5348_v34, %v4191_v16 }
 0xe0e   :  { %v4258_v23 = vpack.c.bf16 %v4232_v2, %v4231_v15  ;;  %5961 = vmatpush3.bf16.msra.mxu0 %v6204_v50  ;;  %v4254_v2 = vmul.f32 %v5349_v61, %v7846_v0 }
 0xe0f   :  { %v4257_v45 = vpack.c.bf16 %v4230_v48, %v4229_v12  ;;  %v4252_v48 = vmul.f32 %v5349_v61, %v7850_v25 }
 0xe11   :  { %5946 = vmatprep.mubr.msk.bf16.mxu0 %vm1580_vm5, %v4257_v45 }
 0xe12   :  { %5947 = vmatmul.mubr.msk.bf16.gmra.mrb[160].mxu0 %vm1580_vm5, %v4258_v23 }
 0xe19   :  { %v5938_v38 = vpop.f32.mrb[164].mxu1 }
 0xe1a   :  { %v4204_v63 = vpop.f32.mrb[165].mxu1  ;;  %v4235_v41 = vadd.f32 %v5938_v38, %v5348_v34 }
 0xe1b   :  { %v5939_v26 = vpop.f32.mrb[166].mxu1  ;;  %v4233_v36 = vadd.f32 %v5348_v34, %v4204_v63 }
 0xe1c   :  { %v4236_v33 = vadd.f32 %v5939_v26, %v5348_v34  ;;  %v4207_v32 = vpop.f32.mrb[167].mxu1 }
 0xe1d   :  { %v4234_v24 = vadd.f32 %v5348_v34, %v4207_v32 }
 0xe1e   :  { %v4260_v11 = vpack.c.bf16 %v4236_v33, %v4235_v41 }
 0xe1f   :  { %v4259_v37 = vpack.c.bf16 %v4234_v24, %v4233_v36 }
 0xe21   :  { %5950 = vmatprep.mubr.msk.bf16.mxu0 %vm1580_vm5, %v4259_v37 }
 0xe22   :  { %5951 = vmatmul.mubr.msk.bf16.gmra.mrb[164].mxu0 %vm1580_vm5, %v4260_v11 }
 0xed4   :  { %v5944_v47 = vpop.f32.mrb[156].mxu0 }
 0xed5   :  { %v7881_v54 = vadd.f32 %v5944_v47, %v4245_v49  ;;  %v4316_v62 = vpop.f32.mrb[157].mxu0 }
 0xed6   :  { %v7884_v40 = vadd.f32 %v4316_v62, %v4243_v7  ;;  %v5945_v58 = vpop.f32.mrb[158].mxu0 }
 0xed7   :  { %v7887_v53 = vadd.f32 %v5945_v58, %v4246_v44  ;;  %v4319_v19 = vpop.f32.mrb[159].mxu0  ;;  %v4570_v21 = vmul.f32 %v7881_v54, %v7881_v54 }
 0xed8   :  { %v7889_v42 = vadd.f32 %v4319_v19, %v4244_v43  ;;  %v4568_v22 = vmul.f32 %v7884_v40, %v7884_v40 }
 0xed9   :  { %v4571_v55 = vmul.f32 %v7887_v53, %v7887_v53 }
 0xeda   :  { %v4569_v39 = vmul.f32 %v7889_v42, %v7889_v42 }
 0xedb   :  { %v4581_v60 = vpack.c.bf16 %v4571_v55, %v4570_v21 }
 0xedc   :  { %v4580_v4 = vpack.c.bf16 %v4569_v39, %v4568_v22 }
 0xede   :  { %5962 = vmatprep.mubr.msk.bf16.mxu0 %vm1744_vm6, %v4580_v4 }
 0xedf   :  { %5963 = vmatmul.mubr.msk.bf16.vlgmr.msra.gmra.mrb[168].mxu0 %vm1744_vm6, %v4581_v60 }
 0xee5   :  { %v5948_v9 = vpop.f32.mrb[160].mxu0 }
 0xee6   :  { %v7903_v34 = vadd.f32 %v5948_v9, %v4249_v17  ;;  %v4332_v20 = vpop.f32.mrb[161].mxu0 }
 0xee7   :  { %v7906_v56 = vadd.f32 %v4332_v20, %v4247_v10  ;;  %v5949_v51 = vpop.f32.mrb[162].mxu0 }
 0xee8   :  { %v7909_v8 = vadd.f32 %v5949_v51, %v4250_v29  ;;  %v4335_v14 = vpop.f32.mrb[163].mxu0  ;;  %v4574_v1 = vmul.f32 %v7903_v34, %v7903_v34 }
 0xee9   :  { %v7911_v57 = vadd.f32 %v4335_v14, %v4248_v28  ;;  %v4572_v3 = vmul.f32 %v7906_v56, %v7906_v56 }
 0xeea   :  { %v4575_v52 = vmul.f32 %v7909_v8, %v7909_v8 }
 0xeeb   :  { %v4573_v13 = vmul.f32 %v7911_v57, %v7911_v57 }
 0xeec   :  { %v4583_v35 = vpack.c.bf16 %v4575_v52, %v4574_v1 }
 0xeed   :  { %v4582_v6 = vpack.c.bf16 %v4573_v13, %v4572_v3 }
 0xeef   :  { %5966 = vmatprep.mubr.msk.bf16.mxu0 %vm1744_vm6, %v4582_v6 }
 0xef0   :  { %5967 = vmatmul.mubr.msk.bf16.gmra.mrb[172].mxu0 %vm1744_vm6, %v4583_v35 }
 0xef5   :  { %v5952_v30 = vpop.f32.mrb[164].mxu0 }
 0xef6   :  { %v7925_v59 = vadd.f32 %v5952_v30, %v4253_v46  ;;  %v4348_v15 = vpop.f32.mrb[165].mxu0 }
 0xef7   :  { %v7928_v16 = vadd.f32 %v4348_v15, %v4251_v31  ;;  %v5953_v12 = vpop.f32.mrb[166].mxu0 }
 0xef8   :  { %v7931_v23 = vadd.f32 %v5953_v12, %v4254_v2  ;;  %v4351_v45 = vpop.f32.mrb[167].mxu0  ;;  %v4578_v0 = vmul.f32 %v7925_v59, %v7925_v59 }
 0xef9   :  { %v7933_v38 = vadd.f32 %v4351_v45, %v4252_v48  ;;  %v4576_v27 = vmul.f32 %v7928_v16, %v7928_v16 }
 0xefa   :  { %v4579_v18 = vmul.f32 %v7931_v23, %v7931_v23 }
 0xefb   :  { %v4577_v63 = vmul.f32 %v7933_v38, %v7933_v38 }
 0xefc   :  { %v4585_v41 = vpack.c.bf16 %v4579_v18, %v4578_v0 }
 0xefd   :  { %v4584_v26 = vpack.c.bf16 %v4577_v63, %v4576_v27 }
 0xeff   :  { %5970 = vmatprep.mubr.msk.bf16.mxu0 %vm1744_vm6, %v4584_v26 }
 0xf00   :  { %5971 = vmatmul.mubr.msk.bf16.gmra.mrb[176].mxu0 %vm1744_vm6, %v4585_v41 }
 0xfb2   :  { %v5964_v25 = vpop.f32.mrb[168].mxu0 }
 0xfb3   :  { %v4711_v33 = vmul.f32 %v5964_v25, %v5964_v25  ;;  %v4662_v32 = vpop.f32.mrb[169].mxu0 }
 0xfb4   :  { %v4709_v36 = vmul.f32 %v4662_v32, %v4662_v32  ;;  %v5965_v24 = vpop.f32.mrb[170].mxu0 }
 0xfb5   :  { %v4723_v11 = vadd.f32 1e-16, %v4711_v33  ;;  %v4712_v37 = vmul.f32 %v5965_v24, %v5965_v24  ;;  %v4665_v5 = vpop.f32.mrb[171].mxu0 }
 0xfb6   :  { %v4721_v50 = vadd.f32 1e-16, %v4709_v36  ;;  %v4710_v61 = vmul.f32 %v4665_v5, %v4665_v5 }
 0xfb7   :  { %6445 = vrsqrt.f32 %v4723_v11  ;;  %v4724_v49 = vadd.f32 1e-16, %v4712_v37  ;;  %vm4749_vm3 = vcmp.eq.f32.partialorder %v4723_v11, inf  ;;  %vm4751_vm4 = vcmp.eq.f32.partialorder %v4723_v11, 0.0 }
 0xfb8   :  { %6447 = vrsqrt.f32 %v4721_v50  ;;  %v4722_v47 = vadd.f32 1e-16, %v4710_v61  ;;  %v4752_v55 = vand.u32 2147483648, %v4723_v11  ;;  %vm4735_vm7 = vcmp.eq.f32.partialorder %v4721_v50, inf }
 0xfb9   :  { %6449 = vrsqrt.f32 %v4724_v49  ;;  %vm4756_vm8 = vcmp.eq.f32.partialorder %v4724_v49, inf  ;;  %vm4758_vm12 = vcmp.eq.f32.partialorder %v4724_v49, 0.0  ;;  %v4759_v28 = vand.u32 2147483648, %v4724_v49 }
 0xfba   :  { %6451 = vrsqrt.f32 %v4722_v47  ;;  %v4738_v35 = vand.u32 2147483648, %v4721_v50  ;;  %vm4737_vm9 = vcmp.eq.f32.partialorder %v4721_v50, 0.0  ;;  %vm4742_vm10 = vcmp.eq.f32.partialorder %v4722_v47, inf }
 0xfbb   :  { %v4745_v15 = vand.u32 2147483648, %v4722_v47  ;;  %vm4744_vm11 = vcmp.eq.f32.partialorder %v4722_v47, 0.0 }
 0xfc1   :  { %v6446_v7 = vpop.eup %6445 }
 0xfc2   :  { %v6448_v62 = vpop.eup %6447  ;;  %v4748_v44 = vmul.f32 %v6446_v7, %v4723_v11 }
 0xfc3   :  { %v6450_v58 = vpop.eup %6449  ;;  %v4734_v43 = vmul.f32 %v6448_v62, %v4721_v50  ;;  %v5968_v19 = vpop.f32.mrb[172].mxu0 }
 0xfc4   :  { %v6452_v22 = vpop.eup %6451  ;;  %v4755_v39 = vmul.f32 %v6450_v58, %v4724_v49  ;;  %v4715_v21 = vmul.f32 %v5968_v19, %v5968_v19  ;;  %v4678_v4 = vpop.f32.mrb[173].mxu0  ;;  %v4750_v60 = vsel %vm4749_vm3, %v4723_v11, %v4748_v44 }
 0xfc5   :  { %v4713_v17 = vmul.f32 %v4678_v4, %v4678_v4  ;;  %v5969_v9 = vpop.f32.mrb[174].mxu0  ;;  %v4753_v10 = vsel %vm4751_vm4, %v4752_v55, %v4750_v60  ;;  %v4741_v14 = vmul.f32 %v6452_v22, %v4722_v47  ;;  %v4736_v13 = vsel %vm4735_vm7, %v4721_v50, %v4734_v43 }
 0xfc6   :  { %v7945_v20 = vadd.f32 1e-16, %v4715_v21  ;;  %v4716_v29 = vmul.f32 %v5969_v9, %v5969_v9  ;;  %v4681_v51 = vpop.f32.mrb[175].mxu0  ;;  %6453 = vrsqrt.f32 %v4753_v10  ;;  %v4757_v6 = vsel %vm4756_vm8, %v4724_v49, %v4755_v39 }
 0xfc7   :  { %v7947_v52 = vadd.f32 1e-16, %v4713_v17  ;;  %v4714_v3 = vmul.f32 %v4681_v51, %v4681_v51  ;;  %v7956_v30 = vsel %vm4758_vm12, %v4759_v28, %v4757_v6  ;;  %v7959_v31 = vsel %vm4737_vm9, %v4738_v35, %v4736_v13 }
 0xfc8   :  { %6455 = vrsqrt.f32 %v7945_v20  ;;  %v7950_v1 = vadd.f32 1e-16, %v4716_v29  ;;  %v4743_v2 = vsel %vm4742_vm10, %v4722_v47, %v4741_v14  ;;  %vm4833_vm13 = vcmp.eq.f32.partialorder %v4753_v10, inf }
 0xfc9   :  { %6457 = vrsqrt.f32 %v7947_v52  ;;  %v7953_v46 = vadd.f32 1e-16, %v4714_v3  ;;  %v7963_v12 = vsel %vm4744_vm11, %v4745_v15, %v4743_v2  ;;  %vm4835_vm14 = vcmp.eq.f32.partialorder %v4753_v10, 0.0 }
 0xfca   :  { %6459 = vrsqrt.f32 %v7950_v1  ;;  %v4836_v45 = vand.u32 2147483648, %v4753_v10  ;;  %vm4840_vm15 = vcmp.eq.f32.partialorder %v7956_v30, inf  ;;  %vm4842_vm0 = vcmp.eq.f32.partialorder %v7956_v30, 0.0 }
 0xfcb   :  { %6461 = vrsqrt.f32 %v7953_v46  ;;  %v4843_v27 = vand.u32 2147483648, %v7956_v30  ;;  %vm4819_vm1 = vcmp.eq.f32.partialorder %v7959_v31, inf  ;;  %v4822_v63 = vand.u32 2147483648, %v7959_v31 }
 0xfcc   :  { %6463 = vrsqrt.f32 %v7956_v30  ;;  %vm4821_vm2 = vcmp.eq.f32.partialorder %v7959_v31, 0.0  ;;  %vm4826_vm3 = vcmp.eq.f32.partialorder %v7963_v12, inf  ;;  %v4829_v26 = vand.u32 2147483648, %v7963_v12 }
 0xfcd   :  { %6465 = vrsqrt.f32 %v7959_v31  ;;  %vm4777_vm4 = vcmp.eq.f32.partialorder %v7945_v20, inf  ;;  %vm4779_vm7 = vcmp.eq.f32.partialorder %v7945_v20, 0.0  ;;  %vm4828_vm8 = vcmp.eq.f32.partialorder %v7963_v12, 0.0 }
 0xfce   :  { %6467 = vrsqrt.f32 %v7963_v12  ;;  %v4780_v36 = vand.u32 2147483648, %v7945_v20  ;;  %vm4784_vm12 = vcmp.eq.f32.partialorder %v7950_v1, inf  ;;  %vm4786_vm9 = vcmp.eq.f32.partialorder %v7950_v1, 0.0 }
 0xfcf   :  { %v4787_v50 = vand.u32 2147483648, %v7950_v1  ;;  %vm4763_vm10 = vcmp.eq.f32.partialorder %v7947_v52, inf  ;;  %v4766_v6 = vand.u32 2147483648, %v7947_v52  ;;  %vm4770_vm11 = vcmp.eq.f32.partialorder %v7953_v46, inf }
 0xfd0   :  { %v6454_v48 = vpop.eup %6453 }
 0xfd1   :  { %v4832_v18 = vmul.f32 %v6454_v48, %v4753_v10 }
 0xfd2   :  { %v6456_v0 = vpop.eup %6455 }
 0xfd3   :  { %v6458_v41 = vpop.eup %6457  ;;  %v4776_v25 = vmul.f32 %v6456_v0, %v7945_v20  ;;  %v5972_v33 = vpop.f32.mrb[176].mxu0  ;;  %v4834_v32 = vsel %vm4833_vm13, %v4753_v10, %v4832_v18  ;;  %vm4765_vm13 = vcmp.eq.f32.partialorder %v7947_v52, 0.0 }
 0xfd4   :  { %v6460_v24 = vpop.eup %6459  ;;  %v4719_v11 = vmul.f32 %v5972_v33, %v5972_v33  ;;  %v4694_v37 = vpop.f32.mrb[177].mxu0  ;;  %v4837_v5 = vsel %vm4835_vm14, %v4836_v45, %v4834_v32  ;;  %v4762_v49 = vmul.f32 %v6458_v41, %v7947_v52  ;;  %vm4772_vm14 = vcmp.eq.f32.partialorder %v7953_v46, 0.0 }
 0xfd5   :  { %v6462_v61 = vpop.eup %6461  ;;  %v4717_v47 = vmul.f32 %v4694_v37, %v4694_v37  ;;  %v5973_v7 = vpop.f32.mrb[178].mxu0  ;;  %v4907_v62 = vsel %vm1580_vm5, %v4837_v5, 0.0  ;;  %v4778_v44 = vsel %vm4777_vm4, %v7945_v20, %v4776_v25  ;;  %v4783_v43 = vmul.f32 %v6460_v24, %v7950_v1 }
 0xfd6   :  { %v6464_v58 = vpop.eup %6463  ;;  %v7992_v19 = vadd.f32 1e-16, %v4719_v11  ;;  %v4720_v55 = vmul.f32 %v5973_v7, %v5973_v7  ;;  %v4697_v22 = vpop.f32.mrb[179].mxu0  ;;  %4908 = vadd.xlane.f32.xlu1 %v4907_v62  ;;  %v7996_v39 = vsel %vm4779_vm7, %v4780_v36, %v4778_v44  ;;  %v4769_v10 = vmul.f32 %v6462_v61, %v7953_v46 }
 0xfd7   :  { %v6466_v21 = vpop.eup %6465  ;;  %v7998_v4 = vadd.f32 1e-16, %v4717_v47  ;;  %v4718_v60 = vmul.f32 %v4697_v22, %v4697_v22  ;;  %v4839_v17 = vmul.f32 %v6464_v58, %v7956_v30  ;;  %6469 = vrsqrt.f32 %v7996_v39 }
 0xfd8   :  { %v6468_v9 = vpop.eup %6467  ;;  %6471 = vrsqrt.f32 %v7992_v19  ;;  %v8004_v29 = vadd.f32 1e-16, %v4720_v55  ;;  %v4818_v51 = vmul.f32 %v6466_v21, %v7959_v31  ;;  %v4785_v45 = vsel %vm4784_vm12, %v7950_v1, %v4783_v43 }
 0xfd9   :  { %6473 = vrsqrt.f32 %v7998_v4  ;;  %v8008_v20 = vadd.f32 1e-16, %v4718_v60  ;;  %v4841_v28 = vsel %vm4840_vm15, %v7956_v30, %v4839_v17  ;;  %v4825_v14 = vmul.f32 %v6468_v9, %v7963_v12 }
 0xfda   :  { %6475 = vrsqrt.f32 %v8004_v29  ;;  %v4844_v3 = vsel %vm4842_vm0, %v4843_v27, %v4841_v28  ;;  %v4820_v13 = vsel %vm4819_vm1, %v7959_v31, %v4818_v51  ;;  %v8037_v31 = vsel %vm4786_vm9, %v4787_v50, %v4785_v45 }
 0xfdb   :  { %6477 = vrsqrt.f32 %v8008_v20  ;;  %v4910_v35 = vsel %vm1580_vm5, %v4844_v3, 0.0  ;;  %v4823_v15 = vsel %vm4821_vm2, %v4822_v63, %v4820_v13  ;;  %v4827_v2 = vsel %vm4826_vm3, %v7963_v12, %v4825_v14 }
 0xfdc   :  { %4911 = vadd.xlane.f32.xlu0 %v4910_v35  ;;  %v4901_v30 = vsel %vm1580_vm5, %v4823_v15, 0.0  ;;  %v4830_v48 = vsel %vm4828_vm8, %v4829_v26, %v4827_v2  ;;  %v4764_v18 = vsel %vm4763_vm10, %v7947_v52, %v4762_v49  ;;  %v4771_v27 = vsel %vm4770_vm11, %v7953_v46, %v4769_v10 }
 0xfdd   :  { %4902 = vadd.xlane.f32.xlu1 %v4901_v30  ;;  %v4773_v12 = vand.u32 2147483648, %v7953_v46  ;;  %6479 = vrsqrt.f32 %v8037_v31  ;;  %v4904_v63 = vsel %vm1580_vm5, %v4830_v48, 0.0  ;;  %v8048_v0 = vsel %vm4765_vm13, %v4766_v6, %v4764_v18 }
 0xfde   :  { %6481 = vrsqrt.f32 %v8048_v0  ;;  %vm4861_vm15 = vcmp.eq.f32.partialorder %v7996_v39, inf  ;;  %vm4863_vm0 = vcmp.eq.f32.partialorder %v7996_v39, 0.0  ;;  %v4864_v52 = vand.u32 2147483648, %v7996_v39 }
 0xfdf   :  { %v8050_v1 = vsel %vm4772_vm14, %v4773_v12, %v4771_v27  ;;  %vm4868_vm1 = vcmp.eq.f32.partialorder %v8037_v31, inf  ;;  %vm4791_vm2 = vcmp.eq.f32.partialorder %v7998_v4, inf  ;;  %vm4793_vm3 = vcmp.eq.f32.partialorder %v7998_v4, 0.0 }
 0xfe0   :  { %4905 = vadd.xlane.f32.xlu0 %v4904_v63  ;;  %6483 = vrsqrt.f32 %v8050_v1  ;;  %v4794_v32 = vand.u32 2147483648, %v7998_v4  ;;  %vm4805_vm4 = vcmp.eq.f32.partialorder %v7992_v19, inf  ;;  %v4808_v37 = vand.u32 2147483648, %v7992_v19 }
 0xfe1   :  { %v6470_v26 = vpop.eup %6469  ;;  %vm4807_vm7 = vcmp.eq.f32.partialorder %v7992_v19, 0.0  ;;  %vm4870_vm8 = vcmp.eq.f32.partialorder %v8037_v31, 0.0  ;;  %v4871_v58 = vand.u32 2147483648, %v8037_v31  ;;  %vm4847_vm12 = vcmp.eq.f32.partialorder %v8048_v0, inf }
 0xfe2   :  { %v6472_v41 = vpop.eup %6471  ;;  %v4860_v25 = vmul.f32 %v6470_v26, %v7996_v39  ;;  %vm4798_vm9 = vcmp.eq.f32.partialorder %v8008_v20, inf  ;;  %vm4800_vm10 = vcmp.eq.f32.partialorder %v8008_v20, 0.0  ;;  %vm4812_vm11 = vcmp.eq.f32.partialorder %v8004_v29, inf }
 0xfe3   :  { %v6474_v46 = vpop.eup %6473  ;;  %v4804_v33 = vmul.f32 %v6472_v41, %v7992_v19  ;;  %vm4849_vm13 = vcmp.eq.f32.partialorder %v8048_v0, 0.0  ;;  %vm4854_vm14 = vcmp.eq.f32.partialorder %v8050_v1, inf  ;;  %v4857_v6 = vand.u32 2147483648, %v8050_v1 }
 0xfe4   :  { %v6476_v36 = vpop.eup %6475  ;;  %v4790_v24 = vmul.f32 %v6474_v46, %v7998_v4  ;;  %v4862_v11 = vsel %vm4861_vm15, %v7996_v39, %v4860_v25  ;;  %vm4814_vm15 = vcmp.eq.f32.partialorder %v8004_v29, 0.0 }
 0xfe5   :  { %v6478_v5 = vpop.eup %6477  ;;  %v4811_v50 = vmul.f32 %v6476_v36, %v8004_v29  ;;  %v4865_v61 = vsel %vm4863_vm0, %v4864_v52, %v4862_v11  ;;  %v4806_v49 = vsel %vm4805_vm4, %v7992_v19, %v4804_v33  ;;  %v4801_v19 = vand.u32 2147483648, %v8008_v20 }
 0xfe6   :  { %v4797_v47 = vmul.f32 %v6478_v5, %v8008_v20  ;;  %v4919_v7 = vsel %vm1580_vm5, %v4865_v61, 0.0  ;;  %v4792_v62 = vsel %vm4791_vm2, %v7998_v4, %v4790_v24  ;;  %v8073_v44 = vsel %vm4807_vm7, %v4808_v37, %v4806_v49 }
 0xfe7   :  { %4920 = vadd.xlane.f32.xlu1 %v4919_v7  ;;  %v4795_v43 = vsel %vm4793_vm3, %v4794_v32, %v4792_v62  ;;  %6485 = vrsqrt.f32 %v8073_v44  ;;  %v6480_v55 = vpop.eup %6479  ;;  %v4850_v4 = vand.u32 2147483648, %v8048_v0  ;;  %v4813_v17 = vsel %vm4812_vm11, %v8004_v29, %v4811_v50 }
 0xfe8   :  { %6487 = vrsqrt.f32 %v4795_v43  ;;  %v4867_v22 = vmul.f32 %v6480_v55, %v8037_v31  ;;  %v4799_v39 = vsel %vm4798_vm9, %v8008_v20, %v4797_v47  ;;  %v6482_v21 = vpop.eup %6481  ;;  %v4815_v20 = vand.u32 2147483648, %v8004_v29 }
 0xfe9   :  { %v4802_v60 = vsel %vm4800_vm10, %v4801_v19, %v4799_v39  ;;  %v4846_v51 = vmul.f32 %v6482_v21, %v8048_v0  ;;  %vm4856_vm0 = vcmp.eq.f32.partialorder %v8050_v1, 0.0  ;;  %v4878_v12 = vand.u32 2147483648, %v4795_v43 }
 0xfea   :  { %v6484_v9 = vpop.eup %6483  ;;  %v4869_v10 = vsel %vm4868_vm1, %v8037_v31, %v4867_v22  ;;  %6489 = vrsqrt.f32 %v4802_v60  ;;  %v4816_v35 = vsel %vm4814_vm15, %v4815_v20, %v4813_v17  ;;  %vm4875_vm1 = vcmp.eq.f32.partialorder %v4795_v43, inf }
 0xfeb   :  { %v4872_v28 = vsel %vm4870_vm8, %v4871_v58, %v4869_v10  ;;  %v4853_v14 = vmul.f32 %v6484_v9, %v8050_v1  ;;  %v4848_v13 = vsel %vm4847_vm12, %v8048_v0, %v4846_v51  ;;  %6491 = vrsqrt.f32 %v4816_v35 }
 0xfec   :  { %v4922_v3 = vsel %vm1580_vm5, %v4872_v28, 0.0  ;;  %v4851_v15 = vsel %vm4849_vm13, %v4850_v4, %v4848_v13  ;;  %vm4889_vm2 = vcmp.eq.f32.partialorder %v8073_v44, inf  ;;  %vm4877_vm3 = vcmp.eq.f32.partialorder %v4795_v43, 0.0 }
 0xfed   :  { %4923 = vadd.xlane.f32.xlu0 %v4922_v3  ;;  %v4855_v2 = vsel %vm4854_vm14, %v8050_v1, %v4853_v14  ;;  %v4913_v29 = vsel %vm1580_vm5, %v4851_v15, 0.0  ;;  %v4892_v25 = vand.u32 2147483648, %v8073_v44  ;;  %vm4882_vm4 = vcmp.eq.f32.partialorder %v4802_v60, inf }
 0xfee   :  { %v4858_v30 = vsel %vm4856_vm0, %v4857_v6, %v4855_v2  ;;  %4914 = vadd.xlane.f32.xlu1 %v4913_v29  ;;  %v4885_v46 = vand.u32 2147483648, %v4802_v60  ;;  %vm4891_vm7 = vcmp.eq.f32.partialorder %v8073_v44, 0.0  ;;  %vm4884_vm8 = vcmp.eq.f32.partialorder %v4802_v60, 0.0 }
 0xfef   :  { %v4916_v45 = vsel %vm1580_vm5, %v4858_v30, 0.0  ;;  %vm4896_vm12 = vcmp.eq.f32.partialorder %v4816_v35, inf  ;;  %v4899_v5 = vand.u32 2147483648, %v4816_v35  ;;  %vm4898_vm9 = vcmp.eq.f32.partialorder %v4816_v35, 0.0 }
 0xff1   :  { %v6486_v48 = vpop.eup %6485  ;;  %4917 = vadd.xlane.f32.xlu0 %v4916_v45 }
 0xff2   :  { %v6488_v31 = vpop.eup %6487  ;;  %v4888_v18 = vmul.f32 %v6486_v48, %v8073_v44 }
 0xff3   :  { %v4874_v27 = vmul.f32 %v6488_v31, %v4795_v43 }
 0xff4   :  { %v6490_v63 = vpop.eup %6489  ;;  %v4890_v1 = vsel %vm4889_vm2, %v8073_v44, %v4888_v18 }
 0xff5   :  { %v4876_v0 = vsel %vm4875_vm1, %v4795_v43, %v4874_v27  ;;  %v4881_v41 = vmul.f32 %v6490_v63, %v4802_v60  ;;  %v6492_v33 = vpop.eup %6491  ;;  %v4893_v36 = vsel %vm4891_vm7, %v4892_v25, %v4890_v1 }
 0xff6   :  { %v4879_v26 = vsel %vm4877_vm3, %v4878_v12, %v4876_v0  ;;  %v4895_v11 = vmul.f32 %v6492_v33, %v4816_v35  ;;  %v4931_v50 = vsel %vm1580_vm5, %v4893_v36, 0.0 }
 0xff7   :  { %v4925_v52 = vsel %vm1580_vm5, %v4879_v26, 0.0  ;;  %v4883_v32 = vsel %vm4882_vm4, %v4802_v60, %v4881_v41  ;;  %v8128_v60 = vld [vmem:[%s5067_s26] ss:$0 sm:$0xff] }
 0xff8   :  { %4926 = vadd.xlane.f32.xlu1 %v4925_v52  ;;  %v4886_v24 = vsel %vm4884_vm8, %v4885_v46, %v4883_v32  ;;  %v4897_v61 = vsel %vm4896_vm12, %v4816_v35, %v4895_v11 }
 0xff9   :  { %v4928_v37 = vsel %vm1580_vm5, %v4886_v24, 0.0  ;;  %v4900_v49 = vsel %vm4898_vm9, %v4899_v5, %v4897_v61 }
 0xffa   :  { %4929 = vadd.xlane.f32.xlu0 %v4928_v37  ;;  %v4934_v47 = vsel %vm1580_vm5, %v4900_v49, 0.0 }
 0xffc   :  { %4932 = vadd.xlane.f32.xlu1 %v4931_v50 }
 0xffe   :  { %4935 = vadd.xlane.f32.xlu0 %v4934_v47 }
0x1063   :  { %v4909_v7 = vpop.xlane.xlu1 %4908 }
0x1064   :  { %v4939_v62 = vmul.f32 0.125, %v4909_v7 }
0x1066   :  { %v4951_v44 = vadd.f32 1e-06, %v4939_v62 }
0x1068   :  { %6493 = vrcp.f32 %v4951_v44 }
0x1069   :  { %v4912_v58 = vpop.xlane.xlu0 %4911 }
0x106a   :  { %v4940_v43 = vmul.f32 0.125, %v4912_v58  ;;  %v4903_v55 = vpop.xlane.xlu1 %4902 }
0x106b   :  { %v4937_v19 = vmul.f32 0.125, %v4903_v55 }
0x106c   :  { %v4952_v22 = vadd.f32 1e-06, %v4940_v43 }
0x106d   :  { %v4949_v39 = vadd.f32 1e-06, %v4937_v19  ;;  %v4906_v21 = vpop.xlane.xlu0 %4905 }
0x106e   :  { %6495 = vrcp.f32 %v4952_v22  ;;  %v4938_v4 = vmul.f32 0.125, %v4906_v21 }
0x106f   :  { %6497 = vrcp.f32 %v4949_v39 }
0x1070   :  { %v4950_v17 = vadd.f32 1e-06, %v4938_v4 }
0x1072   :  { %v6494_v9 = vpop.eup %6493  ;;  %6499 = vrcp.f32 %v4950_v17 }
0x1073   :  { %v4972_v10 = vmul.f32 %v6494_v9, %v8128_v60 }
0x1074   :  { %v4921_v51 = vpop.xlane.xlu1 %4920 }
0x1075   :  { %v4993_v20 = vmul.f32 %v4972_v10, %v7881_v54  ;;  %v4943_v28 = vmul.f32 0.125, %v4921_v51 }
0x1077   :  { %5017 = vst.msk [vmem:[%s8126_s30 + $0x10] sm:$0xff] %vm1744_vm6, %v4993_v20  ;;  %v4955_v14 = vadd.f32 1e-06, %v4943_v28 }
0x1078   :  { %v6496_v3 = vpop.eup %6495 }
0x1079   :  { %v6498_v13 = vpop.eup %6497  ;;  %v4974_v6 = vmul.f32 %v6496_v3, %v8128_v60  ;;  %6501 = vrcp.f32 %v4955_v14 }
0x107a   :  { %v4968_v35 = vmul.f32 %v6498_v13, %v8128_v60  ;;  %v4924_v2 = vpop.xlane.xlu0 %4923 }
0x107b   :  { %v4994_v15 = vmul.f32 %v4974_v6, %v7887_v53  ;;  %v4944_v54 = vmul.f32 0.125, %v4924_v2  ;;  %v4915_v45 = vpop.xlane.xlu1 %4914 }
0x107c   :  { %v6500_v29 = vpop.eup %6499  ;;  %v4991_v30 = vmul.f32 %v4968_v35, %v7884_v40  ;;  %v4941_v18 = vmul.f32 0.125, %v4915_v45 }
0x107d   :  { %5018 = vst.msk [vmem:[%s8126_s30 + $0x18] sm:$0xff] %vm1744_vm6, %v4994_v15  ;;  %v4970_v48 = vmul.f32 %v6500_v29, %v8128_v60  ;;  %v4956_v31 = vadd.f32 1e-06, %v4944_v54 }
0x107e   :  { %5015 = vst.msk [vmem:[%s8126_s30] sm:$0xff] %vm1744_vm6, %v4991_v30  ;;  %v4918_v12 = vpop.xlane.xlu0 %4917  ;;  %v4953_v53 = vadd.f32 1e-06, %v4941_v18 }
0x107f   :  { %v4992_v27 = vmul.f32 %v4970_v48, %v7889_v42  ;;  %6503 = vrcp.f32 %v4956_v31  ;;  %v4942_v63 = vmul.f32 0.125, %v4918_v12 }
0x1080   :  { %6505 = vrcp.f32 %v4953_v53 }
0x1081   :  { %5016 = vst.msk [vmem:[%s8126_s30 + $0x8] sm:$0xff] %vm1744_vm6, %v4992_v27  ;;  %v4954_v40 = vadd.f32 1e-06, %v4942_v63 }
0x1083   :  { %v6502_v0 = vpop.eup %6501  ;;  %6507 = vrcp.f32 %v4954_v40 }
0x1084   :  { %v4980_v1 = vmul.f32 %v6502_v0, %v8128_v60 }
0x1085   :  { %v4927_v26 = vpop.xlane.xlu1 %4926 }
0x1086   :  { %v4997_v41 = vmul.f32 %v4980_v1, %v7903_v34  ;;  %v4945_v25 = vmul.f32 0.125, %v4927_v26 }
0x1087   :  { %v4930_v42 = vpop.xlane.xlu0 %4929 }
0x1088   :  { %5021 = vst.msk [vmem:[%s8126_s30 + $0x30] sm:$0xff] %vm1744_vm6, %v4997_v41  ;;  %v4957_v52 = vadd.f32 1e-06, %v4945_v25  ;;  %v4946_v46 = vmul.f32 0.125, %v4930_v42 }
0x1089   :  { %v4933_v33 = vpop.xlane.xlu1 %4932  ;;  %v6504_v32 = vpop.eup %6503 }
0x108a   :  { %6509 = vrcp.f32 %v4957_v52  ;;  %v4947_v36 = vmul.f32 0.125, %v4933_v33  ;;  %v4982_v24 = vmul.f32 %v6504_v32, %v8128_v60  ;;  %v4958_v11 = vadd.f32 1e-06, %v4946_v46  ;;  %v6506_v37 = vpop.eup %6505 }
0x108b   :  { %v4936_v50 = vpop.xlane.xlu0 %4935  ;;  %v4976_v61 = vmul.f32 %v6506_v37, %v8128_v60 }
0x108c   :  { %v4959_v5 = vadd.f32 1e-06, %v4947_v36  ;;  %v4998_v34 = vmul.f32 %v4982_v24, %v7909_v8  ;;  %6511 = vrcp.f32 %v4958_v11  ;;  %v4948_v49 = vmul.f32 0.125, %v4936_v50 }
0x108d   :  { %v6508_v47 = vpop.eup %6507  ;;  %v4995_v7 = vmul.f32 %v4976_v61, %v7906_v56 }
0x108e   :  { %6513 = vrcp.f32 %v4959_v5  ;;  %5022 = vst.msk [vmem:[%s8126_s30 + $0x38] sm:$0xff] %vm1744_vm6, %v4998_v34  ;;  %v4978_v62 = vmul.f32 %v6508_v47, %v8128_v60  ;;  %v4960_v44 = vadd.f32 1e-06, %v4948_v49 }
0x108f   :  { %5019 = vst.msk [vmem:[%s8126_s30 + $0x20] sm:$0xff] %vm1744_vm6, %v4995_v7 }
0x1090   :  { %v4996_v58 = vmul.f32 %v4978_v62, %v7911_v57  ;;  %6515 = vrcp.f32 %v4960_v44 }
0x1092   :  { %5020 = vst.msk [vmem:[%s8126_s30 + $0x28] sm:$0xff] %vm1744_vm6, %v4996_v58 }
0x1094   :  { %v6510_v8 = vpop.eup %6509 }
0x1095   :  { %v4984_v43 = vmul.f32 %v6510_v8, %v8128_v60 }
0x1096   :  { %v6512_v55 = vpop.eup %6511 }
0x1097   :  { %v4999_v19 = vmul.f32 %v4984_v43, %v7928_v16  ;;  %v4986_v22 = vmul.f32 %v6512_v55, %v8128_v60 }
0x1098   :  { %v6514_v56 = vpop.eup %6513 }
0x1099   :  { %5023 = vst.msk [vmem:[%s8126_s30 + $0x40] sm:$0xff] %vm1744_vm6, %v4999_v19  ;;  %v4988_v39 = vmul.f32 %v6514_v56, %v8128_v60  ;;  %v5000_v57 = vmul.f32 %v4986_v22, %v7933_v38 }
0x109a   :  { %v6516_v21 = vpop.eup %6515 }
0x109b   :  { %v5001_v4 = vmul.f32 %v4988_v39, %v7925_v59  ;;  %5024 = vst.msk [vmem:[%s8126_s30 + $0x48] sm:$0xff] %vm1744_vm6, %v5000_v57  ;;  %v4990_v17 = vmul.f32 %v6516_v21, %v8128_v60 }
0x109d   :  { %5025 = vst.msk [vmem:[%s8126_s30 + $0x50] sm:$0xff] %vm1744_vm6, %v5001_v4  ;;  %v5002_v16 = vmul.f32 %v4990_v17, %v7931_v23 }
0x109f   :  { %5026 = vst.msk [vmem:[%s8126_s30 + $0x58] sm:$0xff] %vm1744_vm6, %v5002_v16 }

// kernel: _lambda_.8
= control target key start
LH: loop header
LB: loop body
LE: loop exit
PB: predicated region body
PF: predicated region fallthrough
CT: control target
= control target key end

     0   :  { %s3809_s3 = smov 2   ;;  %v3810_v0 = vmov 0   ;;  %s3811_s7 = smov 1   ;;  %v409_v39 = vlaneseq  ;;  %vm762_vm0 = vcmask 130048   ;;  %vm841_vm1 = vcmask 523264   ;;  %s4307_s0 = inlined_call_operand.smem [shape: u32[37], index: -1, kind: input, shape index: {}] }
   0x1   :  { %s3855_s6 = sld [smem:[%s4307_s0 + %s3809_s3]]   ;;  %584 = vmatprep.mubr.bf16.mxu0 %v3810_v0  ;;  %s3812_s11 = smov 4   ;;  %vm1047_vm2 = vcmask 261120   ;;  %vm1129_vm3 = vcmask 1043456   ;;  %vm1122_vm4 = vcmask 64512  }
   0x2   :  { %s3864_s10 = sld [smem:[%s4307_s0 + %s3811_s7]]   ;;  %s3813_s15 = smov 6   ;;  %v410_v40 = vshrl.u32 %v409_v39, 7 }
   0x3   :  { %s3871_s14 = sld [smem:[%s4307_s0 + %s3812_s11]]   ;;  %s3814_s19 = smov 3  }
   0x4   :  { %s2946_s18 = sld [smem:[%s4307_s0 + %s3813_s15]]   ;;  %v411_v41 = vsub.s32 0, %v410_v40  ;;  %v415_v43 = vsub.s32 1, %v410_v40  ;;  %s3815_s23 = smov 5  }
   0x5   :  { %s2943_s22 = sld [smem:[%s4307_s0 + %s3814_s19]]   ;;  %s3816_s27 = smov 8  }
   0x6   :  { %s3913_s26 = sld [smem:[%s4307_s0 + %s3815_s23]]   ;;  %s3817_s4 = smov 10  }
   0x7   :  { %v3566_v1 = vld [vmem:[%s3855_s6 + $0x4] ss:$12 sps:$4 sm:$0xff]   ;;  %v3568_v2 = vld [vmem:[%s3855_s6] ss:$12 sps:$4 sm:$0xff]   ;;  %v3569_v3 = vld [vmem:[%s3855_s6 + $0x1c] ss:$12 sps:$4 sm:$0xff]   ;;  %s3919_s30 = sld [smem:[%s4307_s0 + %s3816_s27]]  }
   0x8   :  { %552 = vmatprep.subr.bf16.mxu0 %v3566_v1  ;;  %v3571_v4 = vld [vmem:[%s3855_s6 + $0x18] ss:$12 sps:$4 sm:$0xff]   ;;  %v3572_v5 = vld [vmem:[%s3855_s6 + $0x34] ss:$12 sps:$4 sm:$0xff]   ;;  %v3574_v6 = vld [vmem:[%s3855_s6 + $0x30] ss:$12 sps:$4 sm:$0xff]   ;;  %s1_s3 = sld [smem:[%s4307_s0]]  }
   0x9   :  { %553 = vmatpush1.bf16.msra.mxu0 %v3568_v2  ;;  %v3575_v7 = vld [vmem:[%s3855_s6 + $0x4c] ss:$12 sps:$4 sm:$0xff]   ;;  %v403_v8 = vld [vmem:[%s3864_s10] sm:$0xff]  ;;  %v3577_v9 = vld [vmem:[%s3855_s6 + $0x48] ss:$12 sps:$4 sm:$0xff]   ;;  %s2950_s7 = sld [smem:[%s4307_s0 + %s3817_s4]]   ;;  %s3818_s8 = smov 7  }
   0xa   :  { %554 = vmatprep.subr.bf16.mxu0 %v3569_v3  ;;  %v404_v10 = vld [vmem:[%s3864_s10 + $0x8] sm:$0xff]  ;;  %v3578_v11 = vld [vmem:[%s3855_s6 + $0x64] ss:$12 sps:$4 sm:$0xff]   ;;  %v3584_v16 = vld [vmem:[%s3855_s6 + $0x94] ss:$12 sps:$4 sm:$0xff]   ;;  %v419_v3 = vsub.s32 2, %v410_v40  ;;  %s2947_s11 = sld [smem:[%s4307_s0 + %s3818_s8]]  }
   0xb   :  { %v406_v12 = vpack.c.bf16 %v404_v10, %v403_v8  ;;  %v3580_v13 = vld [vmem:[%s3855_s6 + $0x60] ss:$12 sps:$4 sm:$0xff]   ;;  %v3581_v14 = vld [vmem:[%s3855_s6 + $0x7c] ss:$12 sps:$4 sm:$0xff]   ;;  %v3583_v15 = vld [vmem:[%s3855_s6 + $0x78] ss:$12 sps:$4 sm:$0xff]  }
   0xc   :  { %v3586_v17 = vld [vmem:[%s3855_s6 + $0x90] ss:$12 sps:$4 sm:$0xff]   ;;  %v3587_v18 = vld [vmem:[%s3855_s6 + $0xac] ss:$12 sps:$4 sm:$0xff]   ;;  %v3589_v19 = vld [vmem:[%s3855_s6 + $0xa8] ss:$12 sps:$4 sm:$0xff]  }
   0xd   :  { %555 = vmatpush1.bf16.msra.mxu0 %v3571_v4  ;;  %3345 = vmatprep.mubr.bf16.mxu1 %v406_v12  ;;  %v3590_v20 = vld [vmem:[%s3871_s14] sm:$0xff]   ;;  %v3591_v21 = vld [vmem:[%s3871_s14 + $0x8] sm:$0xff]   ;;  %v405_v22 = vld [vmem:[%s3864_s10 + $0x10] sm:$0xff]  ;;  %s3819_s12 = smov 12   ;;  %s3820_s16 = smov 13  }
   0xe   :  { %556 = vmatprep.subr.bf16.mxu0 %v3572_v5  ;;  %v3592_v23 = vld [vmem:[%s3871_s14 + $0x10] sm:$0xff]   ;;  %v407_v24 = vpack.c.bf16 %v405_v22, %v405_v22  ;;  %v3593_v25 = vld [vmem:[%s3871_s14 + $0x18] sm:$0xff]   ;;  %v3594_v26 = vld [vmem:[%s3871_s14 + $0x20] sm:$0xff]   ;;  %s2952_s15 = sld [smem:[%s4307_s0 + %s3819_s12]]   ;;  %s3821_s20 = smov 11  }
   0xf   :  { %v3595_v27 = vld [vmem:[%s3871_s14 + $0x28] sm:$0xff]   ;;  %v3596_v28 = vld [vmem:[%s3871_s14 + $0x30] sm:$0xff]   ;;  %v3597_v29 = vld [vmem:[%s3871_s14 + $0x38] sm:$0xff]   ;;  %s3969_s19 = sld [smem:[%s4307_s0 + %s3820_s16]]   ;;  %s3822_s24 = smov 15  }
  0x10   :  { %v3598_v30 = vld [vmem:[%s3855_s6 + $0x8] ss:$12 sps:$4 sm:$0xff]   ;;  %v3599_v31 = vld [vmem:[%s3855_s6 + $0x20] ss:$12 sps:$4 sm:$0xff]   ;;  %v3600_v32 = vld [vmem:[%s3855_s6 + $0x38] ss:$12 sps:$4 sm:$0xff]   ;;  %s2951_s23 = sld [smem:[%s4307_s0 + %s3821_s20]]  }
  0x11   :  { %557 = vmatpush1.bf16.msra.mxu0 %v3574_v6  ;;  %3329 = vmatprep.subr.bf16.mxu1 %v3598_v30  ;;  %v3601_v33 = vld [vmem:[%s3855_s6 + $0x50] ss:$12 sps:$4 sm:$0xff]   ;;  %v3602_v34 = vld [vmem:[%s3855_s6 + $0x68] ss:$12 sps:$4 sm:$0xff]   ;;  %v3603_v35 = vld [vmem:[%s3855_s6 + $0x80] ss:$12 sps:$4 sm:$0xff]   ;;  %s3983_s27 = sld [smem:[%s4307_s0 + %s3822_s24]]  }
  0x12   :  { %558 = vmatprep.subr.bf16.mxu0 %v3575_v7  ;;  %3330 = vmatpush3.bf16.msra.mxu1 %v3598_v30  ;;  %v3604_v36 = vld [vmem:[%s3855_s6 + $0x98] ss:$12 sps:$4 sm:$0xff]   ;;  %v3605_v37 = vld [vmem:[%s3855_s6 + $0xb0] ss:$12 sps:$4 sm:$0xff]   ;;  %v182_v42 = vld [vmem:[%s2943_s22] sm:$0x7] }
  0x13   :  { %3331 = vmatprep.subr.bf16.mxu1 %v3599_v31  ;;  %v3606_v38 = vld [vmem:[%s2946_s18] sm:$0xff]   ;;  %v412_v44 = vrot.slane %v182_v42, %v411_v41  ;;  %v416_v45 = vrot.slane %v182_v42, %v415_v43  ;;  %v420_v6 = vrot.slane %v182_v42, %v419_v3  ;;  %v3609_v22 = vld [vmem:[%s3913_s26 + $0x10] sm:$0xff]   ;;  %s3823_s28 = smov 9   ;;  %s3824_s2 = smov 16  }
  0x14   :  { %v3607_v2 = vld [vmem:[%s3913_s26] sm:$0xff]   ;;  %s2949_s1 = sld [smem:[%s4307_s0 + %s3823_s28]]   ;;  %s3825_s6 = smov 14  }
  0x15   :  { %559 = vmatpush1.bf16.msra.mxu0 %v3577_v9  ;;  %v3615_v30 = vld [vmem:[%s3919_s30 + $0x20] sm:$0xff]   ;;  %s4023_s5 = sld [smem:[%s4307_s0 + %s3824_s2]]   ;;  %s3826_s10 = smov 64  }
  0x16   :  { %560 = vmatprep.subr.bf16.mxu0 %v3578_v11  ;;  %3332 = vmatpush3.bf16.msra.mxu1 %v3599_v31  ;;  %v3616_v31 = vld [vmem:[%s3919_s30 + $0x28] sm:$0xff]   ;;  %v3018_v42 = vld [vmem:[%s2947_s11] ss:$0 sm:$0xff]  ;;  %s2954_s9 = sld [smem:[%s4307_s0 + %s3825_s6]]   ;;  %s3827_s11 = smov 17  }
  0x17   :  { %3333 = vmatprep.subr.bf16.mxu1 %v3600_v32  ;;  %s4055_s14 = sld [smem:[%s4307_s0 + %s3827_s11]]   ;;  %s3835_s13 = smov 24  }
  0x18   :  { %s4213_s16 = sld [smem:[%s4307_s0 + %s3835_s13]]   ;;  %s3836_s17 = smov 31  }
  0x19   :  { %561 = vmatpush1.bf16.msra.mxu0 %v3580_v13  ;;  %s2971_s20 = sld [smem:[%s4307_s0 + %s3836_s17]]   ;;  %s3837_s21 = smov 32  }
  0x1a   :  { %562 = vmatprep.subr.bf16.mxu0 %v3581_v14  ;;  %3334 = vmatpush3.bf16.msra.mxu1 %v3600_v32  ;;  %v400_v14 = vld [vmem:[%s1_s3] sm:$0xff]  ;;  %v3617_v32 = vld [vmem:[%s3919_s30 + $0x30] sm:$0xff]   ;;  %s2972_s24 = sld [smem:[%s4307_s0 + %s3837_s21]]   ;;  %s3838_s25 = smov 35  }
  0x1b   :  { %3335 = vmatprep.subr.bf16.mxu1 %v3601_v33  ;;  %s2975_s28 = sld [smem:[%s4307_s0 + %s3838_s25]]   ;;  %s3839_s29 = smov 26  }
  0x1c   :  { %s2966_s2 = sld [smem:[%s4307_s0 + %s3839_s29]]   ;;  %s3842_s11 = smov 34  }
  0x1d   :  { %563 = vmatpush1.bf16.msra.mxu0 %v3583_v15  ;;  %v401_v15 = vld [vmem:[%s1_s3 + $0x8] sm:$0xff] }
  0x1e   :  { %564 = vmatprep.subr.bf16.mxu0 %v3584_v16  ;;  %3336 = vmatpush3.bf16.msra.mxu1 %v3601_v33  ;;  %v3618_v33 = vld [vmem:[%s3919_s30 + $0x38] sm:$0xff]  }
  0x1f   :  { %3337 = vmatprep.subr.bf16.mxu1 %v3602_v34 }
  0x21   :  { %565 = vmatpush1.bf16.msra.mxu0 %v3586_v17 }
  0x22   :  { %566 = vmatprep.subr.bf16.mxu0 %v3587_v18  ;;  %3338 = vmatpush3.bf16.msra.mxu1 %v3602_v34 }
  0x23   :  { %3339 = vmatprep.subr.bf16.mxu1 %v3603_v35 }
  0x25   :  { %567 = vmatpush1.bf16.msra.mxu0 %v3589_v19  ;;  %v752_v19 = vpack.c.bf16 %v401_v15, %v400_v14 }
  0x26   :  { %3349 = vmatprep.subr.bf16.mxu0 %v3590_v20  ;;  %3340 = vmatpush3.bf16.msra.mxu1 %v3603_v35 }
  0x27   :  { %3341 = vmatprep.subr.bf16.mxu1 %v3604_v36 }
  0x28   :  { %585 = vmatmul.mubr.bf16.vlgmr.msra.gmra.mrb[0].mxu0 %v406_v12 }
  0x29   :  { %594 = vmatprep.mubr.bf16.mxu0 %v3810_v0  ;;  %3350 = vmatpush3.bf16.msra.mxu0 %v3590_v20 }
  0x2a   :  { %3351 = vmatprep.subr.bf16.mxu0 %v3591_v21  ;;  %3342 = vmatpush3.bf16.msra.mxu1 %v3604_v36  ;;  %v3619_v36 = vld [vmem:[%s2950_s7] sm:$0xff]  }
  0x2b   :  { %3343 = vmatprep.subr.bf16.mxu1 %v3605_v37 }
  0x2d   :  { %3352 = vmatpush3.bf16.msra.mxu0 %v3591_v21  ;;  %v3608_v21 = vld [vmem:[%s3913_s26 + $0x8] sm:$0xff]  }
  0x2e   :  { %3353 = vmatprep.subr.bf16.mxu0 %v3592_v23  ;;  %3344 = vmatpush3.bf16.msra.mxu1 %v3605_v37  ;;  %v3620_v37 = vld [vmem:[%s2950_s7 + $0x8] sm:$0xff]   ;;  %s3841_s7 = smov 30  }
  0x2f   :  { %3369 = vmatprep.subr.bf16.mxu1 %v3606_v38 }
  0x30   :  { %595 = vmatmul.mubr.bf16.gmra.mrb[4].mxu0 %v407_v24 }
  0x31   :  { %3354 = vmatpush3.bf16.msra.mxu0 %v3592_v23  ;;  %3346 = vmatmul.mubr.bf16.vlgmr.msra.gmra.mrb[0].mxu1 %v407_v24  ;;  %v3610_v23 = vld [vmem:[%s3913_s26 + $0x18] sm:$0xff]   ;;  %v402_v24 = vld [vmem:[%s1_s3 + $0x10] sm:$0xff]  ;;  %s3840_s3 = smov 25  }
  0x32   :  { %3355 = vmatprep.subr.bf16.mxu0 %v3593_v25  ;;  %3370 = vmatpush3.bf16.msra.mxu1 %v3606_v38  ;;  %s2965_s6 = sld [smem:[%s4307_s0 + %s3840_s3]]  }
  0x33   :  { %3375 = vmatprep.subr.bf16.mxu1 %v3607_v2 }
  0x35   :  { %3356 = vmatpush3.bf16.msra.mxu0 %v3593_v25  ;;  %v3611_v25 = vld [vmem:[%s3919_s30] sm:$0xff]  }
  0x36   :  { %3357 = vmatprep.subr.bf16.mxu0 %v3594_v26 }
  0x39   :  { %3358 = vmatpush3.bf16.msra.mxu0 %v3594_v26  ;;  %v753_v26 = vpack.c.bf16 %v402_v24, %v402_v24 }
  0x3a   :  { %3359 = vmatprep.subr.bf16.mxu0 %v3595_v27 }
  0x3d   :  { %3360 = vmatpush3.bf16.msra.mxu0 %v3595_v27  ;;  %v3612_v27 = vld [vmem:[%s3919_s30 + $0x8] sm:$0xff]  }
  0x3e   :  { %3361 = vmatprep.subr.bf16.mxu0 %v3596_v28 }
  0x41   :  { %3362 = vmatpush3.bf16.msra.mxu0 %v3596_v28  ;;  %v3613_v28 = vld [vmem:[%s3919_s30 + $0x10] sm:$0xff]  }
  0x42   :  { %3363 = vmatprep.subr.bf16.mxu0 %v3597_v29 }
  0x45   :  { %3364 = vmatpush3.bf16.msra.mxu0 %v3597_v29  ;;  %v3614_v29 = vld [vmem:[%s3919_s30 + $0x18] sm:$0xff]  }
  0xfb   :  { %v586_v46 = vpop.f32.mrb[0].mxu0 }
  0xfc   :  { %v587_v47 = vadd.f32 %v586_v46, %v412_v44  ;;  %v588_v48 = vpop.f32.mrb[1].mxu0 }
  0xfd   :  { %v589_v49 = vadd.f32 %v588_v48, %v416_v45  ;;  %v590_v50 = vpop.f32.mrb[2].mxu0 }
  0xfe   :  { %v591_v51 = vadd.f32 %v590_v50, %v412_v44  ;;  %v592_v52 = vpop.f32.mrb[3].mxu0 }
  0xff   :  { %v651_v53 = vmul.f32 %v589_v49, %v587_v47  ;;  %v593_v54 = vadd.f32 %v592_v52, %v416_v45 }
 0x101   :  { %v652_v55 = vmul.f32 %v593_v54, %v591_v51 }
 0x103   :  { %v596_v56 = vpop.f32.mrb[4].mxu0  ;;  %v654_v57 = vpack.c.bf16 %v652_v55, %v651_v53 }
 0x104   :  { %v597_v58 = vadd.f32 %v596_v56, %v412_v44  ;;  %v598_v59 = vpop.f32.mrb[5].mxu0  ;;  %v3347_v4 = vpop.f32.mrb[0].mxu1 }
 0x105   :  { %v599_v60 = vadd.f32 %v598_v59, %v416_v45  ;;  %v600_v61 = vpop.f32.mrb[6].mxu0  ;;  %3365 = vmatprep.mubr.bf16.mxu0 %v654_v57  ;;  %v637_v5 = vpop.f32.mrb[1].mxu1  ;;  %v646_v34 = vadd.f32 %v3347_v4, %v420_v6 }
 0x106   :  { %v601_v62 = vpop.f32.mrb[7].mxu0  ;;  %v3348_v7 = vpop.f32.mrb[2].mxu1  ;;  %v638_v8 = vadd.f32 %v637_v5, %v420_v6 }
 0x107   :  { %v653_v63 = vmul.f32 %v599_v60, %v597_v58  ;;  %v640_v9 = vpop.f32.mrb[3].mxu1  ;;  %v906_v35 = vpack.c.bf16 %v646_v34, %v646_v34  ;;  %v3623_v34 = vld [vmem:[%s3969_s19 + $0x10] sm:$0xff]  }
 0x108   :  { %v641_v10 = vadd.f32 %v640_v9, %v420_v6 }
 0x109   :  { %v655_v1 = vpack.c.bf16 %v653_v63, %v653_v63 }
 0x10a   :  { %v905_v11 = vpack.c.bf16 %v641_v10, %v638_v8  ;;  %v232_v8 = vld [vmem:[%s2952_s15] sm:$0xf]  ;;  %s3828_s15 = smov 18  }
 0x10b   :  { %3366 = vmatmul.mubr.bf16.vlgmr.msra.gmra.mrb[8].mxu0 %v655_v1  ;;  %3525 = vmatprep.subr.msk.bf16.mxu0 %vm1129_vm3, %v232_v8  ;;  %v1131_v9 = vsel %vm1129_vm3, %v232_v8, 0  ;;  %v3621_v10 = vld [vmem:[%s3969_s19] sm:$0xff]   ;;  %s4098_s18 = sld [smem:[%s4307_s0 + %s3828_s15]]   ;;  %s3843_s15 = smov 28  }
 0x10c   :  { %3416 = vmatpush3.bf16.msra.mxu0 %v1131_v9  ;;  %v3041_v8 = vld [vmem:[%s2954_s9] ss:$0 sm:$0xff]  ;;  %s3834_s9 = smov 23  }
 0x10d   :  { %3421 = vmatprep.subr.bf16.mxu0 %v3621_v10  ;;  %s2963_s12 = sld [smem:[%s4307_s0 + %s3834_s9]]  }
 0x1de   :  { %v3367_v12 = vpop.f32.mrb[8].mxu0 }
 0x1df   :  { %v738_v13 = vpop.f32.mrb[9].mxu0  ;;  %v755_v20 = vpack.c.bf16 %v3367_v12, %v3367_v12 }
 0x1e0   :  { %v3368_v16 = vpop.f32.mrb[10].mxu0 }
 0x1e1   :  { %v741_v17 = vpop.f32.mrb[11].mxu0 }
 0x1e2   :  { %v754_v18 = vpack.c.bf16 %v741_v17, %v738_v13 }
 0x1e4   :  { %3371 = vmatprep.mubr.msk.bf16.mxu1 %vm762_vm0, %v754_v18 }
 0x1e5   :  { %3372 = vmatmul.mubr.msk.bf16.vlgmr.msra.gmra.mrb[4].mxu1 %vm762_vm0, %v755_v20 }
 0x1e6   :  { %3376 = vmatpush3.bf16.msra.mxu1 %v3607_v2  ;;  %3383 = vmatprep.mubr.msk.bf16.mxu1 %vm841_vm1, %v752_v19 }
 0x1e7   :  { %3377 = vmatprep.subr.bf16.mxu1 %v3608_v21 }
 0x1ea   :  { %3378 = vmatpush3.bf16.msra.mxu1 %v3608_v21 }
 0x1eb   :  { %3379 = vmatprep.subr.bf16.mxu1 %v3609_v22 }
 0x1ee   :  { %3380 = vmatpush3.bf16.msra.mxu1 %v3609_v22 }
 0x1ef   :  { %3381 = vmatprep.subr.bf16.mxu1 %v3610_v23 }
 0x1f2   :  { %3382 = vmatpush3.bf16.msra.mxu1 %v3610_v23 }
 0x1f3   :  { %3387 = vmatprep.subr.bf16.mxu1 %v3611_v25 }
 0x1f5   :  { %3384 = vmatmul.mubr.msk.bf16.vlgmr.msra.gmra.mrb[8].mxu1 %vm841_vm1, %v753_v26 }
 0x1f6   :  { %3388 = vmatpush3.bf16.msra.mxu1 %v3611_v25  ;;  %3403 = vmatprep.mubr.bf16.mxu1 %v905_v11  ;;  %v3031_v11 = vld [vmem:[%s2951_s23] ss:$0 sm:$0xff]  ;;  %s3830_s23 = smov 19  }
 0x1f7   :  { %3389 = vmatprep.subr.bf16.mxu1 %v3612_v27  ;;  %s2959_s26 = sld [smem:[%s4307_s0 + %s3830_s23]]   ;;  %s3845_s23 = smov 33  }
 0x1fa   :  { %3390 = vmatpush3.bf16.msra.mxu1 %v3612_v27 }
 0x1fb   :  { %3391 = vmatprep.subr.bf16.mxu1 %v3613_v28 }
 0x1fe   :  { %3392 = vmatpush3.bf16.msra.mxu1 %v3613_v28 }
 0x1ff   :  { %3393 = vmatprep.subr.bf16.mxu1 %v3614_v29 }
 0x202   :  { %3394 = vmatpush3.bf16.msra.mxu1 %v3614_v29 }
 0x203   :  { %3395 = vmatprep.subr.bf16.mxu1 %v3615_v30 }
 0x206   :  { %3396 = vmatpush3.bf16.msra.mxu1 %v3615_v30 }
 0x207   :  { %3397 = vmatprep.subr.bf16.mxu1 %v3616_v31 }
 0x20a   :  { %3398 = vmatpush3.bf16.msra.mxu1 %v3616_v31 }
 0x20b   :  { %3399 = vmatprep.subr.bf16.mxu1 %v3617_v32 }
 0x20e   :  { %3400 = vmatpush3.bf16.msra.mxu1 %v3617_v32 }
 0x20f   :  { %3401 = vmatprep.subr.bf16.mxu1 %v3618_v33 }
 0x212   :  { %3402 = vmatpush3.bf16.msra.mxu1 %v3618_v33  ;;  %v3622_v33 = vld [vmem:[%s3969_s19 + $0x8] sm:$0xff]  }
 0x213   :  { %3407 = vmatprep.subr.bf16.mxu1 %v3619_v36 }
 0x215   :  { %3404 = vmatmul.mubr.bf16.vlgmr.msra.gmra.mrb[12].mxu1 %v906_v35  ;;  %v3624_v35 = vld [vmem:[%s3969_s19 + $0x18] sm:$0xff]   ;;  %s3829_s19 = smov 21  }
 0x216   :  { %3408 = vmatpush3.bf16.msra.mxu1 %v3619_v36  ;;  %v3625_v36 = vld [vmem:[%s3983_s27] ss:$16 sps:$4 sm:$0xff]   ;;  %s4107_s22 = sld [smem:[%s4307_s0 + %s3829_s19]]   ;;  %s3844_s19 = smov 29  }
 0x217   :  { %3409 = vmatprep.subr.bf16.mxu1 %v3620_v37 }
 0x21a   :  { %3410 = vmatpush3.bf16.msra.mxu1 %v3620_v37  ;;  %v3627_v37 = vld [vmem:[%s3983_s27 + $0x4] ss:$16 sps:$4 sm:$0xff]  }
 0x21b   :  { %1361 = vmatprep.subr.bf16.mxu1 %v3627_v37  ;;  %v3678_v37 = vld [vmem:[%s4055_s14 + $0xc8] sm:$0xff]  }
 0x2b8   :  { %v3373_v38 = vpop.f32.mrb[4].mxu1 }
 0x2b9   :  { %v803_v39 = vpop.f32.mrb[5].mxu1 }
 0x2ba   :  { %v3374_v40 = vpop.f32.mrb[6].mxu1 }
 0x2bb   :  { %v806_v41 = vpop.f32.mrb[7].mxu1  ;;  %v3631_v40 = vld [vmem:[%s3983_s27 + $0x20] ss:$16 sps:$4 sm:$0xff]  }
 0x2c8   :  { %v3385_v43 = vpop.f32.mrb[8].mxu1 }
 0x2c9   :  { %v891_v44 = vadd.f32 %v3385_v43, %v3373_v38  ;;  %v882_v45 = vpop.f32.mrb[9].mxu1  ;;  %v3630_v38 = vld [vmem:[%s3983_s27 + $0xc] ss:$16 sps:$4 sm:$0xff]  }
 0x2ca   :  { %v883_v46 = vadd.f32 %v882_v45, %v803_v39  ;;  %v3386_v47 = vpop.f32.mrb[10].mxu1  ;;  %v3633_v39 = vld [vmem:[%s3983_s27 + $0x24] ss:$16 sps:$4 sm:$0xff]  }
 0x2cb   :  { %v3943_v48 = vadd.f32 %v3018_v42, %v891_v44  ;;  %v885_v49 = vpop.f32.mrb[11].mxu1 }
 0x2cc   :  { %v3945_v50 = vadd.f32 %v3018_v42, %v883_v46  ;;  %v886_v51 = vadd.f32 %v885_v49, %v806_v41  ;;  %v3019_v41 = vld [vmem:[%s2949_s1] ss:$0 sm:$0xff]  ;;  %s3832_s1 = smov 27  }
 0x2cd   :  { %v3030_v52 = vmul.f32 -1.442695, %v3943_v48  ;;  %s4156_s4 = sld [smem:[%s4307_s0 + %s3832_s1]]  }
 0x2ce   :  { %v3028_v53 = vmul.f32 -1.442695, %v3945_v50  ;;  %v3949_v54 = vadd.f32 %v3018_v42, %v886_v51 }
 0x2cf   :  { %3731 = vpow2.f32 %v3030_v52 }
 0x2d0   :  { %3733 = vpow2.f32 %v3028_v53  ;;  %v3029_v55 = vmul.f32 -1.442695, %v3949_v54 }
 0x2d2   :  { %3735 = vpow2.f32 %v3029_v55 }
 0x2d9   :  { %v3732_v56 = vpop.eup %3731 }
 0x2da   :  { %v3734_v57 = vpop.eup %3733  ;;  %v1020_v58 = vadd.f32 1.0, %v3732_v56  ;;  %v3628_v56 = vld [vmem:[%s3983_s27 + $0x8] ss:$16 sps:$4 sm:$0xff]  }
 0x2db   :  { %v1018_v59 = vadd.f32 1.0, %v3734_v57 }
 0x2dc   :  { %v3736_v60 = vpop.eup %3735  ;;  %3737 = vrcp.f32 %v1020_v58  ;;  %v3636_v58 = vld [vmem:[%s3983_s27 + $0x2c] ss:$16 sps:$4 sm:$0xff]  }
 0x2dd   :  { %v1019_v61 = vadd.f32 1.0, %v3736_v60  ;;  %3739 = vrcp.f32 %v1018_v59  ;;  %v3634_v59 = vld [vmem:[%s3983_s27 + $0x28] ss:$16 sps:$4 sm:$0xff]   ;;  %v3639_v60 = vld [vmem:[%s3983_s27 + $0x44] ss:$16 sps:$4 sm:$0xff]  }
 0x2df   :  { %3741 = vrcp.f32 %v1019_v61  ;;  %v3642_v61 = vld [vmem:[%s3983_s27 + $0x4c] ss:$16 sps:$4 sm:$0xff]  }
 0x2e6   :  { %v3738_v62 = vpop.eup %3737 }
 0x2e7   :  { %v3740_v63 = vpop.eup %3739  ;;  %v1028_v6 = vpack.c.bf16 %v3738_v62, %v3738_v62  ;;  %v3637_v62 = vld [vmem:[%s3983_s27 + $0x40] ss:$16 sps:$4 sm:$0xff]  }
 0x2e8   :  { %v3952_v1 = vpop.f32.mrb[12].mxu1 }
 0x2e9   :  { %v3742_v2 = vpop.eup %3741  ;;  %v3954_v3 = vpop.f32.mrb[13].mxu1  ;;  %v1004_v42 = vadd.f32 %v3952_v1, %v3019_v41  ;;  %v3645_v1 = vld [vmem:[%s3983_s27 + $0x64] ss:$16 sps:$4 sm:$0xff]  }
 0x2ea   :  { %v1027_v4 = vpack.c.bf16 %v3742_v2, %v3740_v63  ;;  %v3406_v5 = vpop.f32.mrb[14].mxu1  ;;  %v996_v43 = vadd.f32 %v3019_v41, %v3954_v3  ;;  %v3640_v63 = vld [vmem:[%s3983_s27 + $0x48] ss:$16 sps:$4 sm:$0xff]   ;;  %v3648_v2 = vld [vmem:[%s3983_s27 + $0x6c] ss:$16 sps:$4 sm:$0xff]  }
 0x2eb   :  { %v3956_v7 = vpop.f32.mrb[15].mxu1  ;;  %v3643_v3 = vld [vmem:[%s3983_s27 + $0x60] ss:$16 sps:$4 sm:$0xff]   ;;  %v3651_v5 = vld [vmem:[%s4023_s5 + $0x4] ss:$16 sps:$4 sm:$0xff]  }
 0x2ec   :  { %3411 = vmatprep.mubr.msk.bf16.mxu1 %vm1047_vm2, %v1027_v4  ;;  %v999_v47 = vadd.f32 %v3019_v41, %v3956_v7  ;;  %v3646_v4 = vld [vmem:[%s3983_s27 + $0x68] ss:$16 sps:$4 sm:$0xff]   ;;  %v3682_v41 = vld [vmem:[%s4055_s14 + $0xd0] sm:$0xff]   ;;  %s3831_s27 = smov 22  }
 0x2ed   :  { %3412 = vmatmul.mubr.msk.bf16.vlgmr.msra.gmra.mrb[16].mxu1 %vm1047_vm2, %v1028_v6  ;;  %v3654_v6 = vld [vmem:[%s4023_s5 + $0xc] ss:$16 sps:$4 sm:$0xff]   ;;  %s2962_s30 = sld [smem:[%s4307_s0 + %s3831_s27]]   ;;  %s3846_s27 = smov 36  }
 0x2ee   :  { %1393 = vmatprep.mubr.bf16.mxu1 %v3810_v0  ;;  %1362 = vmatpush1.bf16.msra.mxu1 %v3625_v36 }
 0x2ef   :  { %1363 = vmatprep.subr.bf16.mxu1 %v3633_v39  ;;  %v3680_v39 = vld [vmem:[%s4055_s14 + $0x88] sm:$0xff]  }
 0x2f2   :  { %1364 = vmatpush1.bf16.msra.mxu1 %v3631_v40  ;;  %v3681_v40 = vld [vmem:[%s4055_s14 + $0x50] sm:$0xff]  }
 0x2f3   :  { %1365 = vmatprep.subr.bf16.mxu1 %v3639_v60  ;;  %v3695_v60 = vld [vmem:[%s4055_s14 + $0x28] sm:$0xff]  }
 0x2f6   :  { %1366 = vmatpush1.bf16.msra.mxu1 %v3637_v62  ;;  %v3697_v62 = vld [vmem:[%s4055_s14 + $0x70] sm:$0xff]  }
 0x2f7   :  { %1367 = vmatprep.subr.bf16.mxu1 %v3645_v1  ;;  %v3699_v1 = vld [vmem:[%s4055_s14 + $0x30] sm:$0xff]  }
 0x2fa   :  { %1368 = vmatpush1.bf16.msra.mxu1 %v3643_v3  ;;  %v3701_v3 = vld [vmem:[%s4055_s14 + $0x78] sm:$0xff]  }
 0x2fb   :  { %1555 = vmatprep.subr.bf16.mxu1 %v3651_v5  ;;  %v3703_v5 = vld [vmem:[%s4055_s14 + $0x38] sm:$0xff]  }
 0x3c0   :  { %v3413_v12 = vpop.f32.mrb[16].mxu1 }
 0x3c1   :  { %v1097_v13 = vadd.f32 %v3413_v12, %v3031_v11  ;;  %v1088_v14 = vpop.f32.mrb[17].mxu1 }
 0x3c2   :  { %v1089_v15 = vadd.f32 %v3031_v11, %v1088_v14  ;;  %v3414_v16 = vpop.f32.mrb[18].mxu1 }
 0x3c3   :  { %v3038_v17 = vmul.f32 -1.442695, %v1097_v13  ;;  %v1091_v18 = vpop.f32.mrb[19].mxu1  ;;  %v3649_v16 = vld [vmem:[%s4023_s5] ss:$16 sps:$4 sm:$0xff]  }
 0x3c4   :  { %v3036_v19 = vmul.f32 -1.442695, %v1089_v15  ;;  %v1092_v20 = vadd.f32 %v3031_v11, %v1091_v18  ;;  %v3657_v18 = vld [vmem:[%s4023_s5 + $0x24] ss:$16 sps:$4 sm:$0xff]  }
 0x3c5   :  { %3743 = vpow2.f32 %v3038_v17  ;;  %v3652_v17 = vld [vmem:[%s4023_s5 + $0x8] ss:$16 sps:$4 sm:$0xff]  }
 0x3c6   :  { %3745 = vpow2.f32 %v3036_v19  ;;  %v3037_v21 = vmul.f32 -1.442695, %v1092_v20  ;;  %v3660_v19 = vld [vmem:[%s4023_s5 + $0x2c] ss:$16 sps:$4 sm:$0xff]  }
 0x3c8   :  { %3747 = vpow2.f32 %v3037_v21  ;;  %v3655_v21 = vld [vmem:[%s4023_s5 + $0x20] ss:$16 sps:$4 sm:$0xff]  }
 0x3cf   :  { %v3744_v22 = vpop.eup %3743 }
 0x3d0   :  { %v3746_v23 = vpop.eup %3745  ;;  %v1113_v24 = vadd.f32 1.0, %v3744_v22  ;;  %v3658_v22 = vld [vmem:[%s4023_s5 + $0x28] ss:$16 sps:$4 sm:$0xff]  }
 0x3d1   :  { %v1111_v25 = vadd.f32 1.0, %v3746_v23  ;;  %v3663_v23 = vld [vmem:[%s4023_s5 + $0x44] ss:$16 sps:$4 sm:$0xff]  }
 0x3d2   :  { %v3748_v26 = vpop.eup %3747  ;;  %3749 = vrcp.f32 %v1113_v24  ;;  %v3666_v24 = vld [vmem:[%s4023_s5 + $0x4c] ss:$16 sps:$4 sm:$0xff]  }
 0x3d3   :  { %v1112_v27 = vadd.f32 1.0, %v3748_v26  ;;  %3751 = vrcp.f32 %v1111_v25  ;;  %v3661_v25 = vld [vmem:[%s4023_s5 + $0x40] ss:$16 sps:$4 sm:$0xff]   ;;  %v3664_v26 = vld [vmem:[%s4023_s5 + $0x48] ss:$16 sps:$4 sm:$0xff]  }
 0x3d5   :  { %3753 = vrcp.f32 %v1112_v27  ;;  %v3669_v27 = vld [vmem:[%s4023_s5 + $0x64] ss:$16 sps:$4 sm:$0xff]  }
 0x3dc   :  { %v3750_v28 = vpop.eup %3749 }
 0x3dd   :  { %v3752_v29 = vpop.eup %3751  ;;  %v1121_v32 = vpack.c.bf16 %v3750_v28, %v3750_v28  ;;  %v3672_v28 = vld [vmem:[%s4023_s5 + $0x6c] ss:$16 sps:$4 sm:$0xff]  }
 0x3df   :  { %v3754_v30 = vpop.eup %3753 }
 0x3e0   :  { %v1120_v31 = vpack.c.bf16 %v3754_v30, %v3752_v29  ;;  %v3667_v29 = vld [vmem:[%s4023_s5 + $0x60] ss:$16 sps:$4 sm:$0xff]   ;;  %v3670_v30 = vld [vmem:[%s4023_s5 + $0x68] ss:$16 sps:$4 sm:$0xff]   ;;  %s3833_s5 = smov 20  }
 0x3e1   :  { %s2960_s8 = sld [smem:[%s4307_s0 + %s3833_s5]]  }
 0x3e2   :  { %3417 = vmatprep.mubr.msk.bf16.mxu0 %vm1122_vm4, %v1120_v31  ;;  %v3673_v31 = vld [vmem:[%s4055_s14 + $0x40] sm:$0xff]  }
 0x3e3   :  { %3418 = vmatmul.mubr.msk.bf16.vlgmr.msra.gmra.mrb[12].mxu0 %vm1122_vm4, %v1121_v32  ;;  %v3674_v32 = vld [vmem:[%s4055_s14 + $0xc0] sm:$0xff]  }
 0x3e4   :  { %3422 = vmatpush3.bf16.msra.mxu0 %v3621_v10 }
 0x3e5   :  { %3423 = vmatprep.subr.bf16.mxu0 %v3622_v33 }
 0x3e8   :  { %3424 = vmatpush3.bf16.msra.mxu0 %v3622_v33  ;;  %v3675_v33 = vld [vmem:[%s4055_s14] sm:$0xff]  }
 0x3e9   :  { %3425 = vmatprep.subr.bf16.mxu0 %v3623_v34 }
 0x3ec   :  { %3426 = vmatpush3.bf16.msra.mxu0 %v3623_v34  ;;  %v3676_v34 = vld [vmem:[%s4055_s14 + $0x80] sm:$0xff]  }
 0x3ed   :  { %3427 = vmatprep.subr.bf16.mxu0 %v3624_v35 }
 0x3f0   :  { %3428 = vmatpush3.bf16.msra.mxu0 %v3624_v35  ;;  %v3677_v35 = vld [vmem:[%s4055_s14 + $0x48] sm:$0xff]  }
 0x3f1   :  { %1412 = vmatprep.subr.bf16.mxu0 %v3630_v38  ;;  %v3679_v38 = vld [vmem:[%s4055_s14 + $0x8] sm:$0xff]  }
 0x4b6   :  { %v3419_v44 = vpop.f32.mrb[12].mxu0 }
 0x4b7   :  { %v3995_v45 = vmul.f32 %v3419_v44, %v1004_v42  ;;  %v1167_v46 = vpop.f32.mrb[13].mxu0  ;;  %v3683_v42 = vld [vmem:[%s4055_s14 + $0x10] sm:$0xff]   ;;  %v3685_v44 = vld [vmem:[%s4055_s14 + $0x58] sm:$0xff]  }
 0x4b8   :  { %v3998_v49 = vmul.f32 %v1167_v46, %v996_v43  ;;  %v3420_v51 = vpop.f32.mrb[14].mxu0  ;;  %v3684_v43 = vld [vmem:[%s4055_s14 + $0x90] sm:$0xff]   ;;  %v3686_v46 = vld [vmem:[%s4055_s14 + $0xd8] sm:$0xff]  }
 0x4b9   :  { %v1170_v52 = vpop.f32.mrb[15].mxu0  ;;  %v1188_v57 = vpack.c.bf16 %v3995_v45, %v3995_v45  ;;  %v3688_v51 = vld [vmem:[%s4055_s14 + $0x98] sm:$0xff]  }
 0x4ba   :  { %v4000_v53 = vmul.f32 %v1170_v52, %v999_v47  ;;  %v3687_v47 = vld [vmem:[%s4055_s14 + $0x18] sm:$0xff]   ;;  %v3689_v52 = vld [vmem:[%s4055_s14 + $0x60] sm:$0xff]  }
 0x4bc   :  { %v1187_v55 = vpack.c.bf16 %v4000_v53, %v3998_v49 }
 0x4be   :  { %3429 = vmatprep.mubr.msk.bf16.mxu0 %vm841_vm1, %v1187_v55  ;;  %v3690_v55 = vld [vmem:[%s4055_s14 + $0xe0] sm:$0xff]  }
 0x4bf   :  { %3430 = vmatmul.mubr.msk.bf16.vlgmr.msra.gmra.mrb[16].mxu0 %vm841_vm1, %v1188_v57  ;;  %v3692_v57 = vld [vmem:[%s4055_s14 + $0xa0] sm:$0xff]  }
 0x4c0   :  { %1413 = vmatpush1.bf16.msra.mxu0 %v3628_v56  ;;  %1444 = vmatprep.mubr.bf16.mxu0 %v3810_v0  ;;  %v3691_v56 = vld [vmem:[%s4055_s14 + $0x20] sm:$0xff]  }
 0x4c1   :  { %1414 = vmatprep.subr.bf16.mxu0 %v3636_v58  ;;  %v3693_v58 = vld [vmem:[%s4055_s14 + $0x68] sm:$0xff]  }
 0x4c4   :  { %1415 = vmatpush1.bf16.msra.mxu0 %v3634_v59  ;;  %v3694_v59 = vld [vmem:[%s4055_s14 + $0xe8] sm:$0xff]  }
 0x4c5   :  { %1416 = vmatprep.subr.bf16.mxu0 %v3642_v61  ;;  %v3696_v61 = vld [vmem:[%s4055_s14 + $0xa8] sm:$0xff]  }
 0x4c8   :  { %1417 = vmatpush1.bf16.msra.mxu0 %v3640_v63  ;;  %v3698_v63 = vld [vmem:[%s4055_s14 + $0xf0] sm:$0xff]  }
 0x4c9   :  { %1418 = vmatprep.subr.bf16.mxu0 %v3648_v2  ;;  %v3700_v2 = vld [vmem:[%s4055_s14 + $0xb0] sm:$0xff]  }
 0x4cc   :  { %1419 = vmatpush1.bf16.msra.mxu0 %v3646_v4  ;;  %v3702_v4 = vld [vmem:[%s4055_s14 + $0xf8] sm:$0xff]  }
 0x4cd   :  { %1606 = vmatprep.subr.bf16.mxu0 %v3654_v6  ;;  %v3704_v6 = vld [vmem:[%s4055_s14 + $0xb8] sm:$0xff]   ;;  %s2974_s14 = sld [smem:[%s4307_s0 + %s3842_s11]]  }
 0x592   :  { %v3431_v7 = vpop.f32.mrb[16].mxu0 }
 0x593   :  { %v1259_v9 = vpop.f32.mrb[17].mxu0  ;;  %v1268_v14 = vadd.f32 %v3431_v7, %v3041_v8 }
 0x594   :  { %v3432_v10 = vpop.f32.mrb[18].mxu0  ;;  %v1260_v12 = vadd.f32 %v3041_v8, %v1259_v9 }
 0x595   :  { %v1262_v11 = vpop.f32.mrb[19].mxu0  ;;  %v1274_v20 = vpack.c.bf16 %v1268_v14, %v1268_v14 }
 0x596   :  { %v1263_v13 = vadd.f32 %v3041_v8, %v1262_v11 }
 0x598   :  { %v1273_v15 = vpack.c.bf16 %v1263_v13, %v1260_v12 }
 0x59a   :  { %1465 = vrot.lane.b32.xlu0 %v1273_v15, %s3826_s10  ;;  %3064 = vmatmul.mubr.msk.bf16.vlgmr.msra.gmra.mrb[20].mxu1 %vm841_vm1, %v1273_v15 }
 0x59b   :  { %3066 = vmatmul.mubr.msk.bf16.vlgmr.msra.gmra.mrb[20].mxu0 %vm841_vm1, %v1273_v15  ;;  %1403 = vmatprep.mubr.bf16.mxu1 %v3810_v0 }
 0x59c   :  { %1454 = vmatprep.mubr.bf16.mxu0 %v3810_v0  ;;  %1556 = vmatpush1.bf16.msra.mxu1 %v3649_v16 }
 0x59d   :  { %1607 = vmatpush1.bf16.msra.mxu0 %v3652_v17  ;;  %1557 = vmatprep.subr.bf16.mxu1 %v3657_v18 }
 0x59e   :  { %1467 = vrot.lane.b32.xlu0 %v1274_v20, %s3826_s10  ;;  %1608 = vmatprep.subr.bf16.mxu0 %v3660_v19  ;;  %s2970_s10 = sld [smem:[%s4307_s0 + %s3841_s7]]  }
 0x5a0   :  { %1558 = vmatpush1.bf16.msra.mxu1 %v3655_v21 }
 0x5a1   :  { %1609 = vmatpush1.bf16.msra.mxu0 %v3658_v22  ;;  %1559 = vmatprep.subr.bf16.mxu1 %v3663_v23  ;;  %v3705_v23 = vld [vmem:[%s4098_s18] sm:$0xff]  }
 0x5a2   :  { %3065 = vmatmul.mubr.msk.bf16.gmra.mrb[24].mxu1 %vm841_vm1, %v1274_v20  ;;  %1610 = vmatprep.subr.bf16.mxu0 %v3666_v24 }
 0x5a3   :  { %3067 = vmatmul.mubr.msk.bf16.gmra.mrb[24].mxu0 %vm841_vm1, %v1274_v20  ;;  %1587 = vmatprep.mubr.bf16.mxu1 %v3810_v0 }
 0x5a4   :  { %1560 = vmatpush1.bf16.msra.mxu1 %v3661_v25  ;;  %1638 = vmatprep.mubr.bf16.mxu0 %v3810_v0 }
 0x5a5   :  { %1611 = vmatpush1.bf16.msra.mxu0 %v3664_v26  ;;  %1561 = vmatprep.subr.bf16.mxu1 %v3669_v27 }
 0x5a6   :  { %1612 = vmatprep.subr.bf16.mxu0 %v3672_v28 }
 0x5a8   :  { %1562 = vmatpush1.bf16.msra.mxu1 %v3667_v29 }
 0x5a9   :  { %1613 = vmatpush1.bf16.msra.mxu0 %v3670_v30  ;;  %3227 = vmatprep.subr.bf16.mxu1 %v3673_v31 }
 0x5aa   :  { %3255 = vmatprep.subr.bf16.mxu0 %v3674_v32 }
 0x60c   :  { %v1466_v36 = vpop.permute.xlu0 %1465 }
 0x60d   :  { %3084 = vmatmul.mubr.msk.bf16.vlgmr.msra.gmra.mrb[28].mxu1 %vm841_vm1, %v1466_v36  ;;  %3086 = vmatmul.mubr.msk.bf16.vlgmr.msra.gmra.mrb[28].mxu0 %vm841_vm1, %v1466_v36 }
 0x60e   :  { %1597 = vmatprep.mubr.bf16.mxu1 %v3810_v0  ;;  %1648 = vmatprep.mubr.bf16.mxu0 %v3810_v0 }
 0x60f   :  { %3228 = vmatpush3.bf16.msra.mxu1 %v3675_v33  ;;  %3256 = vmatpush3.bf16.msra.mxu0 %v3676_v34 }
 0x610   :  { %3229 = vmatprep.subr.bf16.mxu1 %v3677_v35  ;;  %3257 = vmatprep.subr.bf16.mxu0 %v3678_v37  ;;  %v1468_v0 = vpop.permute.xlu0 %1467 }
 0x613   :  { %3230 = vmatpush3.bf16.msra.mxu1 %v3679_v38  ;;  %3258 = vmatpush3.bf16.msra.mxu0 %v3680_v39 }
 0x614   :  { %3231 = vmatprep.subr.bf16.mxu1 %v3681_v40  ;;  %3259 = vmatprep.subr.bf16.mxu0 %v3682_v41 }
 0x615   :  { %3085 = vmatmul.mubr.msk.bf16.gmra.mrb[32].mxu1 %vm841_vm1, %v1468_v0  ;;  %3087 = vmatmul.mubr.msk.bf16.gmra.mrb[32].mxu0 %vm841_vm1, %v1468_v0 }
 0x617   :  { %3232 = vmatpush3.bf16.msra.mxu1 %v3683_v42  ;;  %3260 = vmatpush3.bf16.msra.mxu0 %v3684_v43 }
 0x618   :  { %3233 = vmatprep.subr.bf16.mxu1 %v3685_v44  ;;  %3261 = vmatprep.subr.bf16.mxu0 %v3686_v46 }
 0x61b   :  { %3234 = vmatpush3.bf16.msra.mxu1 %v3687_v47  ;;  %3262 = vmatpush3.bf16.msra.mxu0 %v3688_v51 }
 0x61c   :  { %3235 = vmatprep.subr.bf16.mxu1 %v3689_v52  ;;  %3263 = vmatprep.subr.bf16.mxu0 %v3690_v55 }
 0x61f   :  { %3236 = vmatpush3.bf16.msra.mxu1 %v3691_v56  ;;  %3264 = vmatpush3.bf16.msra.mxu0 %v3692_v57 }
 0x620   :  { %3237 = vmatprep.subr.bf16.mxu1 %v3693_v58  ;;  %3265 = vmatprep.subr.bf16.mxu0 %v3694_v59 }
 0x623   :  { %3238 = vmatpush3.bf16.msra.mxu1 %v3695_v60  ;;  %3266 = vmatpush3.bf16.msra.mxu0 %v3696_v61 }
 0x624   :  { %3239 = vmatprep.subr.bf16.mxu1 %v3697_v62  ;;  %3267 = vmatprep.subr.bf16.mxu0 %v3698_v63 }
 0x627   :  { %3240 = vmatpush3.bf16.msra.mxu1 %v3699_v1  ;;  %3268 = vmatpush3.bf16.msra.mxu0 %v3700_v2  ;;  %v3706_v2 = vld [vmem:[%s4098_s18 + $0x8] sm:$0xff]  }
 0x628   :  { %3241 = vmatprep.subr.bf16.mxu1 %v3701_v3  ;;  %3269 = vmatprep.subr.bf16.mxu0 %v3702_v4  ;;  %v3707_v3 = vld [vmem:[%s4098_s18 + $0x10] sm:$0xff]   ;;  %v3708_v4 = vld [vmem:[%s4098_s18 + $0x18] sm:$0xff]   ;;  %s2968_s18 = sld [smem:[%s4307_s0 + %s3843_s15]]  }
 0x62b   :  { %3242 = vmatpush3.bf16.msra.mxu1 %v3703_v5  ;;  %3270 = vmatpush3.bf16.msra.mxu0 %v3704_v6  ;;  %v3709_v5 = vld [vmem:[%s4107_s22] sm:$0xff]   ;;  %v3710_v6 = vld [vmem:[%s4107_s22 + $0x8] sm:$0xff]  }
 0x62c   :  { %3433 = vmatprep.subr.bf16.mxu1 %v3705_v23  ;;  %3445 = vmatprep.subr.bf16.mxu0 %v3709_v5 }
 0x66d   :  { %v1395_v7 = vpop.f32.mrb[20].mxu1 }
 0x66e   :  { %v1446_v8 = vpop.f32.mrb[20].mxu0  ;;  %v1397_v9 = vpop.f32.mrb[21].mxu1 }
 0x66f   :  { %v1448_v10 = vpop.f32.mrb[21].mxu0  ;;  %v1399_v11 = vpop.f32.mrb[22].mxu1 }
 0x670   :  { %v1450_v12 = vpop.f32.mrb[22].mxu0  ;;  %v1401_v13 = vpop.f32.mrb[23].mxu1 }
 0x671   :  { %v1452_v14 = vpop.f32.mrb[23].mxu0 }
 0x675   :  { %v1405_v15 = vpop.f32.mrb[24].mxu1 }
 0x676   :  { %v1456_v16 = vpop.f32.mrb[24].mxu0  ;;  %v1407_v17 = vpop.f32.mrb[25].mxu1 }
 0x677   :  { %v1458_v18 = vpop.f32.mrb[25].mxu0  ;;  %v1409_v19 = vpop.f32.mrb[26].mxu1 }
 0x678   :  { %v1460_v20 = vpop.f32.mrb[26].mxu0  ;;  %v1410_v21 = vpop.f32.mrb[27].mxu1 }
 0x679   :  { %v1461_v22 = vpop.f32.mrb[27].mxu0 }
 0x6e0   :  { %v1589_v24 = vpop.f32.mrb[28].mxu1  ;;  %v1640_v25 = vpop.f32.mrb[28].mxu0 }
 0x6e1   :  { %v1657_v26 = vmul.f32 %v1589_v24, %v1395_v7  ;;  %v1659_v27 = vmul.f32 %v1640_v25, %v1446_v8  ;;  %v1591_v28 = vpop.f32.mrb[29].mxu1  ;;  %v1642_v29 = vpop.f32.mrb[29].mxu0 }
 0x6e2   :  { %v1658_v30 = vmul.f32 %v1591_v28, %v1397_v9  ;;  %v1660_v31 = vmul.f32 %v1642_v29, %v1448_v10  ;;  %v1593_v32 = vpop.f32.mrb[30].mxu1  ;;  %v1644_v33 = vpop.f32.mrb[30].mxu0 }
 0x6e3   :  { %v1661_v34 = vmul.f32 %v1593_v32, %v1399_v11  ;;  %v1663_v35 = vmul.f32 %v1644_v33, %v1450_v12  ;;  %v1595_v36 = vpop.f32.mrb[31].mxu1  ;;  %v1646_v37 = vpop.f32.mrb[31].mxu0 }
 0x6e4   :  { %v1662_v38 = vmul.f32 %v1595_v36, %v1401_v13  ;;  %v1664_v39 = vmul.f32 %v1646_v37, %v1452_v14  ;;  %v3120_v36 = vld [vmem:[%s2959_s26] ss:$0 sm:$0xff]  ;;  %s2973_s26 = sld [smem:[%s4307_s0 + %s3845_s23]]  }
 0x6e5   :  { %v1669_v40 = vpack.c.bf16 %v1661_v34, %v1657_v26  ;;  %v1671_v41 = vpack.c.bf16 %v1663_v35, %v1659_v27  ;;  %v3711_v34 = vld [vmem:[%s4107_s22 + $0x10] sm:$0xff]   ;;  %v3712_v35 = vld [vmem:[%s4107_s22 + $0x18] sm:$0xff]   ;;  %s2969_s22 = sld [smem:[%s4307_s0 + %s3844_s19]]  }
 0x6e6   :  { %v1670_v42 = vpack.c.bf16 %v1662_v38, %v1658_v30  ;;  %v1672_v43 = vpack.c.bf16 %v1664_v39, %v1660_v31 }
 0x6e8   :  { %v1599_v44 = vpop.f32.mrb[32].mxu1  ;;  %v1650_v0 = vpop.f32.mrb[32].mxu0  ;;  %1901 = vmatprep.mubr.bf16.mxu1 %v1670_v42  ;;  %1949 = vmatprep.mubr.bf16.mxu0 %v1672_v43 }
 0x6e9   :  { %v1665_v46 = vmul.f32 %v1599_v44, %v1405_v15  ;;  %v1667_v47 = vmul.f32 %v1650_v0, %v1456_v16  ;;  %v1601_v51 = vpop.f32.mrb[33].mxu1  ;;  %v1652_v52 = vpop.f32.mrb[33].mxu0  ;;  %1902 = vmatmul.mubr.bf16.vlgmr.msra.gmra.mrb[36].mxu1 %v1669_v40  ;;  %1950 = vmatmul.mubr.bf16.vlgmr.msra.gmra.mrb[36].mxu0 %v1671_v41 }
 0x6ea   :  { %v1666_v55 = vmul.f32 %v1601_v51, %v1407_v17  ;;  %v1668_v56 = vmul.f32 %v1652_v52, %v1458_v18  ;;  %v1603_v57 = vpop.f32.mrb[34].mxu1  ;;  %v1654_v58 = vpop.f32.mrb[34].mxu0  ;;  %3434 = vmatpush3.bf16.msra.mxu1 %v3705_v23  ;;  %3446 = vmatpush3.bf16.msra.mxu0 %v3709_v5 }
 0x6eb   :  { %v1604_v59 = vpop.f32.mrb[35].mxu1  ;;  %v1655_v60 = vpop.f32.mrb[35].mxu0  ;;  %v1673_v63 = vpack.c.bf16 %v1665_v46, %v1665_v46  ;;  %v1675_v1 = vpack.c.bf16 %v1667_v47, %v1667_v47  ;;  %3435 = vmatprep.subr.bf16.mxu1 %v3706_v2  ;;  %3447 = vmatprep.subr.bf16.mxu0 %v3710_v6 }
 0x6ec   :  { %v1674_v61 = vpack.c.bf16 %v1666_v55, %v1666_v55  ;;  %v1676_v62 = vpack.c.bf16 %v1668_v56, %v1668_v56 }
 0x6ee   :  { %1909 = vmatprep.mubr.bf16.mxu1 %v1674_v61  ;;  %1957 = vmatprep.mubr.bf16.mxu0 %v1676_v62 }
 0x6ef   :  { %3436 = vmatpush3.bf16.msra.mxu1 %v3706_v2  ;;  %3448 = vmatpush3.bf16.msra.mxu0 %v3710_v6 }
 0x6f0   :  { %3437 = vmatprep.subr.bf16.mxu1 %v3707_v3  ;;  %3449 = vmatprep.subr.bf16.mxu0 %v3711_v34 }
 0x6f1   :  { %1910 = vmatmul.mubr.bf16.gmra.mrb[40].mxu1 %v1673_v63  ;;  %1958 = vmatmul.mubr.bf16.gmra.mrb[40].mxu0 %v1675_v1 }
 0x6f3   :  { %3438 = vmatpush3.bf16.msra.mxu1 %v3707_v3  ;;  %3450 = vmatpush3.bf16.msra.mxu0 %v3711_v34 }
 0x6f4   :  { %3439 = vmatprep.subr.bf16.mxu1 %v3708_v4  ;;  %3451 = vmatprep.subr.bf16.mxu0 %v3712_v35 }
 0x6f7   :  { %3440 = vmatpush3.bf16.msra.mxu1 %v3708_v4  ;;  %3452 = vmatpush3.bf16.msra.mxu0 %v3712_v35  ;;  %v4139_v35 = vmax.f32 %v3949_v54, 0.0  ;;  %v3713_v54 = vld [vmem:[%s2962_s30] sm:$0xff]  }
 0x6f8   :  { %3457 = vmatprep.subr.bf16.mxu1 %v3713_v54 }
 0x7bc   :  { %v3243_v7 = vpop.f32.mrb[36].mxu1  ;;  %v3271_v8 = vpop.f32.mrb[36].mxu0 }
 0x7bd   :  { %v3244_v9 = vpop.f32.mrb[37].mxu1  ;;  %v3272_v10 = vpop.f32.mrb[37].mxu0 }
 0x7be   :  { %v3245_v11 = vadd.f32 %v3244_v9, %v3243_v7  ;;  %v3273_v12 = vadd.f32 %v3272_v10, %v3271_v8  ;;  %v3246_v13 = vpop.f32.mrb[38].mxu1  ;;  %v3274_v14 = vpop.f32.mrb[38].mxu0 }
 0x7bf   :  { %v3247_v15 = vpop.f32.mrb[39].mxu1  ;;  %v3275_v16 = vpop.f32.mrb[39].mxu0 }
 0x7c0   :  { %v1952_v17 = vadd.f32 %v3273_v12, %v3245_v11  ;;  %v3248_v18 = vadd.f32 %v3247_v15, %v3246_v13  ;;  %v3276_v19 = vadd.f32 %v3275_v16, %v3274_v14 }
 0x7c2   :  { %v1955_v20 = vadd.f32 %v3276_v19, %v3248_v18 }
 0x7c4   :  { %v1965_v21 = vpack.c.bf16 %v1955_v20, %v1952_v17  ;;  %v3249_v22 = vpop.f32.mrb[40].mxu1  ;;  %v3277_v23 = vpop.f32.mrb[40].mxu0 }
 0x7c5   :  { %v3250_v24 = vpop.f32.mrb[41].mxu1  ;;  %v3278_v25 = vpop.f32.mrb[41].mxu0 }
 0x7c6   :  { %v3251_v26 = vadd.f32 %v3250_v24, %v3249_v22  ;;  %v3279_v27 = vadd.f32 %v3278_v25, %v3277_v23  ;;  %v3252_v28 = vpop.f32.mrb[42].mxu1  ;;  %v3280_v29 = vpop.f32.mrb[42].mxu0  ;;  %3441 = vmatprep.mubr.msk.bf16.mxu1 %vm841_vm1, %v1965_v21 }
 0x7c7   :  { %v3253_v30 = vpop.f32.mrb[43].mxu1  ;;  %v3281_v31 = vpop.f32.mrb[43].mxu0 }
 0x7c8   :  { %v1960_v32 = vadd.f32 %v3279_v27, %v3251_v26 }
 0x7ca   :  { %v1966_v33 = vpack.c.bf16 %v1960_v32, %v1960_v32 }
 0x7cc   :  { %3442 = vmatmul.mubr.msk.bf16.vlgmr.msra.gmra.mrb[44].mxu1 %vm841_vm1, %v1966_v33  ;;  %v4135_v33 = vmax.f32 %v3945_v50, 0.0 }
 0x7cd   :  { %3458 = vmatpush3.bf16.msra.mxu1 %v3713_v54 }
 0x89f   :  { %v3443_v37 = vpop.f32.mrb[44].mxu1 }
 0x8a0   :  { %v4118_v38 = vadd.f32 %v3443_v37, %v3120_v36  ;;  %v2037_v39 = vpop.f32.mrb[45].mxu1  ;;  %v4144_v37 = vmax.f32 %v3943_v48, 0.0  ;;  %v3715_v48 = vld [vmem:[%s2962_s30 + $0x10] sm:$0xff]  }
 0x8a1   :  { %v4120_v40 = vadd.f32 %v3120_v36, %v2037_v39  ;;  %v3444_v41 = vpop.f32.mrb[46].mxu1  ;;  %v2711_v39 = vsel %vm1047_vm2, %v4139_v35, 0.0 }
 0x8a2   :  { %v2040_v42 = vpop.f32.mrb[47].mxu1  ;;  %v2053_v44 = vmul.f32 %v4118_v38, %v4118_v38  ;;  %v2714_v50 = vsel %vm1047_vm2, %v4144_v37, 0.0  ;;  %v3714_v41 = vld [vmem:[%s2962_s30 + $0x8] sm:$0xff]  }
 0x8a3   :  { %v4122_v43 = vadd.f32 %v3120_v36, %v2040_v42  ;;  %v2051_v0 = vmul.f32 %v4120_v40, %v4120_v40  ;;  %v2708_v36 = vsel %vm1047_vm2, %v4135_v33, 0.0  ;;  %3459 = vmatprep.subr.bf16.mxu1 %v3714_v41  ;;  %v3716_v42 = vld [vmem:[%s2962_s30 + $0x18] sm:$0xff]   ;;  %s2976_s30 = sld [smem:[%s4307_s0 + %s3846_s27]]  }
 0x8a4   :  { %v2055_v51 = vpack.c.bf16 %v2053_v44, %v2053_v44  ;;  %3460 = vmatpush3.bf16.msra.mxu1 %v3714_v41  ;;  %v3717_v44 = vld [vmem:[%s4156_s4] sm:$0xff]  }
 0x8a5   :  { %v2052_v46 = vmul.f32 %v4122_v43, %v4122_v43  ;;  %3461 = vmatprep.subr.bf16.mxu1 %v3715_v48 }
 0x8a7   :  { %v2054_v47 = vpack.c.bf16 %v2052_v46, %v2051_v0 }
 0x8a8   :  { %3462 = vmatpush3.bf16.msra.mxu1 %v3715_v48 }
 0x8a9   :  { %3453 = vmatprep.mubr.msk.bf16.mxu0 %vm841_vm1, %v2054_v47  ;;  %3463 = vmatprep.subr.bf16.mxu1 %v3716_v42 }
 0x8aa   :  { %3454 = vmatmul.mubr.msk.bf16.vlgmr.msra.gmra.mrb[44].mxu0 %vm841_vm1, %v2055_v51 }
 0x8ac   :  { %3464 = vmatpush3.bf16.msra.mxu1 %v3716_v42 }
 0x8ad   :  { %3487 = vmatprep.subr.bf16.mxu1 %v3717_v44 }
 0x97d   :  { %v3455_v52 = vpop.f32.mrb[44].mxu0 }
 0x97e   :  { %v2136_v55 = vmul.f32 %v3455_v52, %v3455_v52  ;;  %v2120_v56 = vpop.f32.mrb[45].mxu0 }
 0x97f   :  { %v2134_v57 = vmul.f32 %v2120_v56, %v2120_v56  ;;  %v3456_v58 = vpop.f32.mrb[46].mxu0 }
 0x980   :  { %v2139_v59 = vadd.f32 1e-16, %v2136_v55  ;;  %v2123_v60 = vpop.f32.mrb[47].mxu0 }
 0x981   :  { %v2137_v61 = vadd.f32 1e-16, %v2134_v57  ;;  %v2135_v62 = vmul.f32 %v2123_v60, %v2123_v60 }
 0x982   :  { %3755 = vrsqrt.f32 %v2139_v59  ;;  %vm2156_vm5 = vcmp.eq.f32.partialorder %v2139_v59, inf  ;;  %v2159_v4 = vand.u32 2147483648, %v2139_v59  ;;  %vm2158_vm6 = vcmp.eq.f32.partialorder %v2139_v59, 0.0 }
 0x983   :  { %3757 = vrsqrt.f32 %v2137_v61  ;;  %v2138_v63 = vadd.f32 1e-16, %v2135_v62  ;;  %vm2142_vm7 = vcmp.eq.f32.partialorder %v2137_v61, inf  ;;  %v2145_v11 = vand.u32 2147483648, %v2137_v61  ;;  %v3133_v62 = vld [vmem:[%s2960_s8] ss:$0 sm:$0xff] }
 0x984   :  { %vm2144_vm8 = vcmp.eq.f32.partialorder %v2137_v61, 0.0 }
 0x985   :  { %3759 = vrsqrt.f32 %v2138_v63  ;;  %vm2149_vm9 = vcmp.eq.f32.partialorder %v2138_v63, inf  ;;  %v2152_v14 = vand.u32 2147483648, %v2138_v63  ;;  %vm2151_vm10 = vcmp.eq.f32.partialorder %v2138_v63, 0.0 }
 0x98c   :  { %v3756_v1 = vpop.eup %3755 }
 0x98d   :  { %v3758_v2 = vpop.eup %3757  ;;  %v2155_v3 = vmul.f32 %v3756_v1, %v2139_v59 }
 0x98e   :  { %v2141_v5 = vmul.f32 %v3758_v2, %v2137_v61 }
 0x98f   :  { %v3760_v6 = vpop.eup %3759  ;;  %v2157_v7 = vsel %vm2156_vm5, %v2139_v59, %v2155_v3 }
 0x990   :  { %v2148_v8 = vmul.f32 %v3760_v6, %v2138_v63  ;;  %v2160_v9 = vsel %vm2158_vm6, %v2159_v4, %v2157_v7  ;;  %v2143_v10 = vsel %vm2142_vm7, %v2137_v61, %v2141_v5 }
 0x991   :  { %3761 = vrsqrt.f32 %v2160_v9  ;;  %v2146_v12 = vsel %vm2144_vm8, %v2145_v11, %v2143_v10  ;;  %vm2177_vm11 = vcmp.eq.f32.partialorder %v2160_v9, inf  ;;  %v2180_v19 = vand.u32 2147483648, %v2160_v9 }
 0x992   :  { %v2150_v13 = vsel %vm2149_vm9, %v2138_v63, %v2148_v8  ;;  %3763 = vrsqrt.f32 %v2146_v12  ;;  %vm2179_vm12 = vcmp.eq.f32.partialorder %v2160_v9, 0.0  ;;  %vm2163_vm13 = vcmp.eq.f32.partialorder %v2146_v12, inf }
 0x993   :  { %v2153_v15 = vsel %vm2151_vm10, %v2152_v14, %v2150_v13  ;;  %v2166_v24 = vand.u32 2147483648, %v2146_v12  ;;  %vm2165_vm14 = vcmp.eq.f32.partialorder %v2146_v12, 0.0 }
 0x994   :  { %3765 = vrsqrt.f32 %v2153_v15  ;;  %vm2170_vm15 = vcmp.eq.f32.partialorder %v2153_v15, inf  ;;  %v2173_v29 = vand.u32 2147483648, %v2153_v15  ;;  %vm2172_vm0 = vcmp.eq.f32.partialorder %v2153_v15, 0.0 }
 0x99b   :  { %v3762_v16 = vpop.eup %3761 }
 0x99c   :  { %v2176_v17 = vmul.f32 %v3762_v16, %v2160_v9  ;;  %v3764_v18 = vpop.eup %3763 }
 0x99d   :  { %v2162_v21 = vmul.f32 %v3764_v18, %v2146_v12 }
 0x99e   :  { %v2178_v20 = vsel %vm2177_vm11, %v2160_v9, %v2176_v17  ;;  %v3766_v22 = vpop.eup %3765 }
 0x99f   :  { %v2181_v23 = vsel %vm2179_vm12, %v2180_v19, %v2178_v20  ;;  %v2164_v26 = vsel %vm2163_vm13, %v2146_v12, %v2162_v21  ;;  %v2169_v27 = vmul.f32 %v3766_v22, %v2153_v15 }
 0x9a0   :  { %v2188_v25 = vsel %vm1122_vm4, %v2181_v23, 0.0  ;;  %v2167_v28 = vsel %vm2165_vm14, %v2166_v24, %v2164_v26  ;;  %v3718_v24 = vld [vmem:[%s4156_s4 + $0x8] sm:$0xff]  }
 0x9a1   :  { %2189 = vadd.xlane.f32.xlu0 %v2188_v25  ;;  %v2182_v30 = vsel %vm1122_vm4, %v2167_v28, 0.0  ;;  %v2171_v31 = vsel %vm2170_vm15, %v2153_v15, %v2169_v27 }
 0x9a2   :  { %2183 = vadd.xlane.f32.xlu1 %v2182_v30  ;;  %v2174_v32 = vsel %vm2172_vm0, %v2173_v29, %v2171_v31 }
 0x9a3   :  { %v2185_v34 = vsel %vm1122_vm4, %v2174_v32, 0.0  ;;  %v4219_v32 = vld [vmem:[%s4213_s16] sm:$0xff]  }
 0x9a6   :  { %2186 = vadd.xlane.f32.xlu1 %v2185_v34 }
 0x9aa   :  { %2709 = vadd.xlane.f32.xlu1 %v2708_v36  ;;  %v3166_v36 = vld [vmem:[%s2971_s20] ss:$0 sm:$0xff] }
 0x9ae   :  { %2712 = vadd.xlane.f32.xlu1 %v2711_v39  ;;  %v3167_v39 = vld [vmem:[%s2972_s24] ss:$0 sm:$0xff] }
 0x9b2   :  { %2715 = vadd.xlane.f32.xlu1 %v2714_v50 }
 0xa2e   :  { %v2190_v0 = vpop.xlane.xlu0 %2189 }
 0xa2f   :  { %v2194_v46 = vmul.f32 0.125, %v2190_v0  ;;  %v2184_v47 = vpop.xlane.xlu1 %2183 }
 0xa30   :  { %v2192_v52 = vmul.f32 0.125, %v2184_v47 }
 0xa31   :  { %v2197_v51 = vadd.f32 1e-06, %v2194_v46 }
 0xa32   :  { %v2195_v55 = vadd.f32 1e-06, %v2192_v52 }
 0xa33   :  { %3767 = vrcp.f32 %v2197_v51  ;;  %v2187_v56 = vpop.xlane.xlu1 %2186 }
 0xa34   :  { %3769 = vrcp.f32 %v2195_v55  ;;  %v2193_v57 = vmul.f32 0.125, %v2187_v56 }
 0xa36   :  { %v2196_v58 = vadd.f32 1e-06, %v2193_v57 }
 0xa37   :  { %v2710_v59 = vpop.xlane.xlu1 %2709 }
 0xa38   :  { %3771 = vrcp.f32 %v2196_v58  ;;  %v2718_v60 = vmul.f32 0.03125, %v2710_v59 }
 0xa3a   :  { %v4163_v61 = vsub.f32 %v4135_v33, %v2718_v60 }
 0xa3b   :  { %v2713_v63 = vpop.xlane.xlu1 %2712 }
 0xa3c   :  { %v2719_v2 = vmul.f32 0.03125, %v2713_v63  ;;  %v2724_v3 = vmul.f32 %v4163_v61, %v4163_v61 }
 0xa3d   :  { %v3768_v1 = vpop.eup %3767 }
 0xa3e   :  { %v3770_v4 = vpop.eup %3769  ;;  %v2209_v5 = vmul.f32 %v3768_v1, %v3133_v62  ;;  %v4168_v6 = vsub.f32 %v4139_v35, %v2719_v2  ;;  %v2727_v7 = vsel %vm1047_vm2, %v2724_v3, 0.0 }
 0xa3f   :  { %v2205_v8 = vmul.f32 %v3770_v4, %v3133_v62  ;;  %2728 = vadd.xlane.f32.xlu1 %v2727_v7  ;;  %v2716_v9 = vpop.xlane.xlu1 %2715 }
 0xa40   :  { %v2720_v10 = vmul.f32 0.03125, %v2716_v9  ;;  %v2725_v11 = vmul.f32 %v4168_v6, %v4168_v6  ;;  %v2212_v13 = vmul.f32 %v2209_v5, %v4118_v38 }
 0xa41   :  { %v2210_v17 = vmul.f32 %v2205_v8, %v4120_v40 }
 0xa42   :  { %v3772_v12 = vpop.eup %3771  ;;  %v4175_v14 = vsub.f32 %v4144_v37, %v2720_v10  ;;  %v2730_v15 = vsel %vm1047_vm2, %v2725_v11, 0.0  ;;  %v4184_v21 = vadd.f32 %v2212_v13, %v3995_v45  ;;  %v2482_v45 = vpack.c.bf16 %v4139_v35, %v4135_v33 }
 0xa43   :  { %v2207_v16 = vmul.f32 %v3772_v12, %v3133_v62  ;;  %2731 = vadd.xlane.f32.xlu1 %v2730_v15  ;;  %v4187_v38 = vadd.f32 %v2210_v17, %v3998_v49  ;;  %v2483_v49 = vpack.c.bf16 %v4144_v37, %v4144_v37 }
 0xa44   :  { %v2726_v18 = vmul.f32 %v4175_v14, %v4175_v14  ;;  %v2217_v23 = vpack.c.bf16 %v4184_v21, %v4184_v21 }
 0xa45   :  { %v2211_v19 = vmul.f32 %v2207_v16, %v4122_v43 }
 0xa46   :  { %v2733_v20 = vsel %vm1047_vm2, %v2726_v18, 0.0 }
 0xa47   :  { %2734 = vadd.xlane.f32.xlu1 %v2733_v20  ;;  %v4190_v22 = vadd.f32 %v2211_v19, %v4000_v53  ;;  %v364_v53 = vld [vmem:[%s2963_s12] sm:$0xf] }
 0xa48   :  { %3526 = vmatprep.subr.msk.bf16.mxu0 %vm1129_vm3, %v364_v53  ;;  %v2341_v43 = vsel %vm1129_vm3, %v364_v53, 0 }
 0xa49   :  { %v2216_v40 = vpack.c.bf16 %v4190_v22, %v4187_v38  ;;  %3470 = vmatpush3.bf16.msra.mxu0 %v2341_v43 }
 0xa4a   :  { %3475 = vmatprep.subr.bf16.mxu0 %v4219_v32 }
 0xa4b   :  { %3465 = vmatprep.mubr.msk.bf16.mxu1 %vm841_vm1, %v2216_v40 }
 0xa4c   :  { %3466 = vmatmul.mubr.msk.bf16.vlgmr.msra.gmra.mrb[48].mxu1 %vm841_vm1, %v2217_v23 }
 0xa4d   :  { %3488 = vmatpush3.bf16.msra.mxu1 %v3717_v44  ;;  %3491 = vmatprep.mubr.msk.bf16.mxu1 %vm1047_vm2, %v2482_v45 }
 0xa4e   :  { %3489 = vmatprep.subr.bf16.mxu1 %v3718_v24 }
 0xa51   :  { %3490 = vmatpush3.bf16.msra.mxu1 %v3718_v24 }
 0xa54   :  { %3492 = vmatmul.mubr.msk.bf16.vlgmr.msra.gmra.mrb[52].mxu1 %vm1047_vm2, %v2483_v49 }
 0xacc   :  { %v2729_v25 = vpop.xlane.xlu1 %2728 }
 0xacd   :  { %v2736_v26 = vmul.f32 0.03125, %v2729_v25 }
 0xacf   :  { %v2739_v27 = vadd.f32 1e-05, %v2736_v26 }
 0xad0   :  { %v2732_v28 = vpop.xlane.xlu1 %2731 }
 0xad1   :  { %3773 = vrsqrt.f32 %v2739_v27  ;;  %v2737_v29 = vmul.f32 0.03125, %v2732_v28  ;;  %v3720_v28 = vld [vmem:[%s4213_s16 + $0x8] sm:$0xff]  }
 0xad3   :  { %v2740_v30 = vadd.f32 1e-05, %v2737_v29  ;;  %v3721_v29 = vld [vmem:[%s4213_s16 + $0x10] sm:$0xff]  }
 0xad4   :  { %v2735_v31 = vpop.xlane.xlu1 %2734 }
 0xad5   :  { %3775 = vrsqrt.f32 %v2740_v30  ;;  %v2738_v33 = vmul.f32 0.03125, %v2735_v31  ;;  %v3722_v30 = vld [vmem:[%s4213_s16 + $0x18] sm:$0xff]   ;;  %v3723_v31 = vld [vmem:[%s2966_s2] sm:$0xff]  }
 0xad6   :  { %3495 = vmatprep.subr.bf16.mxu1 %v3723_v31 }
 0xad7   :  { %v2741_v34 = vadd.f32 1e-05, %v2738_v33  ;;  %v3724_v33 = vld [vmem:[%s2966_s2 + $0x8] sm:$0xff]   ;;  %3496 = vmatpush3.bf16.msra.mxu1 %v3723_v31 }
 0xad8   :  { %3497 = vmatprep.subr.bf16.mxu1 %v3724_v33 }
 0xad9   :  { %3777 = vrsqrt.f32 %v2741_v34 }
 0xadb   :  { %v3774_v35 = vpop.eup %3773  ;;  %3498 = vmatpush3.bf16.msra.mxu1 %v3724_v33 }
 0xadc   :  { %v2745_v37 = vmul.f32 %v3774_v35, %v4163_v61 }
 0xade   :  { %v2754_v50 = vmul.f32 %v3166_v36, %v2745_v37 }
 0xadf   :  { %v3776_v54 = vpop.eup %3775 }
 0xae0   :  { %v2763_v41 = vadd.f32 %v3167_v39, %v2754_v50  ;;  %v2746_v48 = vmul.f32 %v3776_v54, %v4168_v6 }
 0xae2   :  { %2927 = vst.msk [vmem:[%s2975_s28] sm:$0xff] %vm1047_vm2, %v2763_v41  ;;  %v2755_v42 = vmul.f32 %v3166_v36, %v2746_v48  ;;  %v3725_v48 = vld [vmem:[%s2966_s2 + $0x10] sm:$0xff]  }
 0xae3   :  { %v3778_v44 = vpop.eup %3777  ;;  %3499 = vmatprep.subr.bf16.mxu1 %v3725_v48 }
 0xae4   :  { %v2764_v0 = vadd.f32 %v3167_v39, %v2755_v42  ;;  %v2747_v46 = vmul.f32 %v3778_v44, %v4175_v14  ;;  %3500 = vmatpush3.bf16.msra.mxu1 %v3725_v48  ;;  %v3726_v42 = vld [vmem:[%s2966_s2 + $0x18] sm:$0xff]  }
 0xae5   :  { %3501 = vmatprep.subr.bf16.mxu1 %v3726_v42 }
 0xae6   :  { %2928 = vst.msk [vmem:[%s2975_s28 + $0x8] sm:$0xff] %vm1047_vm2, %v2764_v0  ;;  %v2756_v47 = vmul.f32 %v3166_v36, %v2747_v46 }
 0xae8   :  { %v2765_v51 = vadd.f32 %v3167_v39, %v2756_v47  ;;  %3502 = vmatpush3.bf16.msra.mxu1 %v3726_v42 }
 0xaea   :  { %2929 = vst.msk [vmem:[%s2975_s28 + $0x10] sm:$0xff] %vm1047_vm2, %v2765_v51 }
 0xb1f   :  { %v3467_v52 = vpop.f32.mrb[48].mxu1 }
 0xb20   :  { %v2298_v55 = vmul.f32 0.044715, %v3467_v52  ;;  %v2282_v56 = vpop.f32.mrb[49].mxu1 }
 0xb21   :  { %v2296_v57 = vmul.f32 0.044715, %v2282_v56  ;;  %v3468_v58 = vpop.f32.mrb[50].mxu1 }
 0xb22   :  { %v2301_v59 = vmul.f32 %v3467_v52, %v2298_v55  ;;  %v2285_v60 = vpop.f32.mrb[51].mxu1  ;;  %v3727_v58 = vld [vmem:[%s2974_s14] sm:$0xff]  }
 0xb23   :  { %v2299_v61 = vmul.f32 %v2296_v57, %v2282_v56  ;;  %v2297_v62 = vmul.f32 0.044715, %v2285_v60 }
 0xb24   :  { %v2304_v63 = vmul.f32 %v3467_v52, %v2301_v59 }
 0xb25   :  { %v2302_v1 = vmul.f32 %v2299_v61, %v2282_v56  ;;  %v2300_v2 = vmul.f32 %v2297_v62, %v2285_v60  ;;  %v3162_v62 = vld [vmem:[%s2968_s18] ss:$0 sm:$0xff] }
 0xb26   :  { %v2307_v3 = vadd.f32 %v3467_v52, %v2304_v63 }
 0xb27   :  { %v2305_v4 = vadd.f32 %v2302_v1, %v2282_v56  ;;  %v2303_v5 = vmul.f32 %v2300_v2, %v2285_v60  ;;  %v4234_v6 = vpop.f32.mrb[52].mxu1  ;;  %v388_v56 = vld [vmem:[%s2970_s10] sm:$0xf] }
 0xb28   :  { %v2310_v7 = vmul.f32 2.0, %v2307_v3  ;;  %v4236_v8 = vpop.f32.mrb[53].mxu1  ;;  %v2655_v57 = vsel %vm1129_vm3, %v388_v56, 0 }
 0xb29   :  { %v2308_v9 = vmul.f32 2.0, %v2305_v4  ;;  %v2306_v10 = vadd.f32 %v2303_v5, %v2285_v60  ;;  %v3494_v11 = vpop.f32.mrb[54].mxu1 }
 0xb2a   :  { %v3142_v12 = vmul.f32 -0.7978846, %v2310_v7  ;;  %v4238_v13 = vpop.f32.mrb[55].mxu1  ;;  %v3728_v11 = vld [vmem:[%s2974_s14 + $0x8] sm:$0xff]  }
 0xb2b   :  { %v3140_v14 = vmul.f32 -0.7978846, %v2308_v9  ;;  %v2309_v15 = vmul.f32 2.0, %v2306_v10 }
 0xb2c   :  { %v2321_v16 = vmul.f32 1.442695, %v3142_v12  ;;  %v3163_v12 = vld [vmem:[%s2969_s22] ss:$0 sm:$0xff] }
 0xb2d   :  { %v2317_v17 = vmul.f32 1.442695, %v3140_v14  ;;  %v3141_v18 = vmul.f32 -0.7978846, %v2309_v15 }
 0xb2e   :  { %3779 = vpow2.f32 %v2321_v16 }
 0xb2f   :  { %3781 = vpow2.f32 %v2317_v17  ;;  %v2319_v19 = vmul.f32 1.442695, %v3141_v18 }
 0xb31   :  { %3783 = vpow2.f32 %v2319_v19 }
 0xb38   :  { %v3780_v20 = vpop.eup %3779 }
 0xb39   :  { %v3782_v40 = vpop.eup %3781  ;;  %v2325_v23 = vadd.f32 1.0, %v3780_v20 }
 0xb3a   :  { %v2323_v24 = vadd.f32 1.0, %v3782_v40 }
 0xb3b   :  { %v3784_v45 = vpop.eup %3783  ;;  %3785 = vrcp.f32 %v2325_v23 }
 0xb3c   :  { %v2324_v49 = vadd.f32 1.0, %v3784_v45  ;;  %3787 = vrcp.f32 %v2323_v24 }
 0xb3e   :  { %3789 = vrcp.f32 %v2324_v49 }
 0xb45   :  { %v3786_v53 = vpop.eup %3785 }
 0xb46   :  { %v3788_v43 = vpop.eup %3787  ;;  %v2333_v27 = vpack.c.bf16 %v3786_v53, %v3786_v53 }
 0xb48   :  { %v3790_v25 = vpop.eup %3789 }
 0xb49   :  { %v2332_v26 = vpack.c.bf16 %v3790_v25, %v3788_v43 }
 0xb4b   :  { %3471 = vmatprep.mubr.msk.bf16.mxu0 %vm1122_vm4, %v2332_v26 }
 0xb4c   :  { %3472 = vmatmul.mubr.msk.bf16.vlgmr.msra.gmra.mrb[48].mxu0 %vm1122_vm4, %v2333_v27 }
 0xb4d   :  { %3476 = vmatpush3.bf16.msra.mxu0 %v4219_v32 }
 0xb4e   :  { %3477 = vmatprep.subr.bf16.mxu0 %v3720_v28 }
 0xb51   :  { %3478 = vmatpush3.bf16.msra.mxu0 %v3720_v28 }
 0xb52   :  { %3479 = vmatprep.subr.bf16.mxu0 %v3721_v29 }
 0xb55   :  { %3480 = vmatpush3.bf16.msra.mxu0 %v3721_v29 }
 0xb56   :  { %3481 = vmatprep.subr.bf16.mxu0 %v3722_v30 }
 0xb59   :  { %3482 = vmatpush3.bf16.msra.mxu0 %v3722_v30 }
 0xb5a   :  { %3527 = vmatprep.subr.msk.bf16.mxu0 %vm1129_vm3, %v388_v56 }
 0xc1f   :  { %v3473_v32 = vpop.f32.mrb[48].mxu0 }
 0xc20   :  { %v2377_v34 = vpop.f32.mrb[49].mxu0  ;;  %v2393_v36 = vmul.f32 %v3473_v32, %v4184_v21 }
 0xc21   :  { %v3474_v35 = vpop.f32.mrb[50].mxu0  ;;  %v2391_v39 = vmul.f32 %v2377_v34, %v4187_v38  ;;  %v3145_v38 = vld [vmem:[%s2965_s6] ss:$0 sm:$0xff] }
 0xc22   :  { %v2380_v37 = vpop.f32.mrb[51].mxu0  ;;  %v2395_v41 = vpack.c.bf16 %v2393_v36, %v2393_v36 }
 0xc23   :  { %v2392_v50 = vmul.f32 %v2380_v37, %v4190_v22 }
 0xc25   :  { %v2394_v54 = vpack.c.bf16 %v2392_v50, %v2391_v39 }
 0xc27   :  { %3483 = vmatprep.mubr.msk.bf16.mxu0 %vm841_vm1, %v2394_v54 }
 0xc28   :  { %3484 = vmatmul.mubr.msk.bf16.vlgmr.msra.gmra.mrb[52].mxu0 %vm841_vm1, %v2395_v41 }
 0xc29   :  { %3508 = vmatpush3.bf16.msra.mxu0 %v2655_v57 }
 0xc2a   :  { %3513 = vmatprep.subr.bf16.mxu0 %v3727_v58 }
 0xcfb   :  { %v3485_v21 = vpop.f32.mrb[52].mxu0 }
 0xcfc   :  { %v2466_v22 = vpop.f32.mrb[53].mxu0  ;;  %v2475_v0 = vadd.f32 %v3485_v21, %v3145_v38 }
 0xcfd   :  { %v3486_v44 = vpop.f32.mrb[54].mxu0  ;;  %v2467_v47 = vadd.f32 %v3145_v38, %v2466_v22 }
 0xcfe   :  { %v2469_v46 = vpop.f32.mrb[55].mxu0  ;;  %v2481_v55 = vpack.c.bf16 %v2475_v0, %v2475_v0 }
 0xcff   :  { %v2470_v51 = vadd.f32 %v3145_v38, %v2469_v46  ;;  %v2643_v15 = vmul.f32 %v3163_v12, %v2467_v47 }
 0xd01   :  { %v2480_v52 = vpack.c.bf16 %v2470_v51, %v2467_v47  ;;  %v2644_v20 = vmul.f32 %v3163_v12, %v2470_v51 }
 0xd03   :  { %3503 = vmatprep.mubr.msk.bf16.mxu1 %vm841_vm1, %v2480_v52 }
 0xd04   :  { %3504 = vmatmul.mubr.msk.bf16.vlgmr.msra.gmra.mrb[56].mxu1 %vm841_vm1, %v2481_v55 }
 0xdd7   :  { %v3505_v59 = vpop.f32.mrb[56].mxu1 }
 0xdd8   :  { %v2623_v60 = vadd.f32 %v3505_v59, %v4234_v6  ;;  %v2614_v61 = vpop.f32.mrb[57].mxu1  ;;  %v3729_v6 = vld [vmem:[%s2974_s14 + $0x10] sm:$0xff]  }
 0xdd9   :  { %v2615_v63 = vadd.f32 %v2614_v61, %v4236_v8  ;;  %v3506_v1 = vpop.f32.mrb[58].mxu1  ;;  %v3730_v8 = vld [vmem:[%s2974_s14 + $0x18] sm:$0xff]  }
 0xdda   :  { %v2617_v2 = vpop.f32.mrb[59].mxu1  ;;  %v2636_v4 = vadd.f32 %v3162_v62, %v2623_v60 }
 0xddb   :  { %v2618_v3 = vadd.f32 %v2617_v2, %v4238_v13  ;;  %v2634_v5 = vadd.f32 %v3162_v62, %v2615_v63  ;;  %v2645_v13 = vmul.f32 %v3163_v12, %v2475_v0 }
 0xddc   :  { %v2647_v10 = vpack.c.bf16 %v2636_v4, %v2636_v4 }
 0xddd   :  { %v2635_v7 = vadd.f32 %v3162_v62, %v2618_v3 }
 0xddf   :  { %v2646_v9 = vpack.c.bf16 %v2635_v7, %v2634_v5 }
 0xde1   :  { %3509 = vmatprep.mubr.msk.bf16.mxu0 %vm1122_vm4, %v2646_v9 }
 0xde2   :  { %3510 = vmatmul.mubr.msk.bf16.vlgmr.msra.gmra.mrb[56].mxu0 %vm1122_vm4, %v2647_v10 }
 0xde3   :  { %3514 = vmatpush3.bf16.msra.mxu0 %v3727_v58 }
 0xde4   :  { %3515 = vmatprep.subr.bf16.mxu0 %v3728_v11 }
 0xde7   :  { %3516 = vmatpush3.bf16.msra.mxu0 %v3728_v11 }
 0xde8   :  { %3517 = vmatprep.subr.bf16.mxu0 %v3729_v6 }
 0xdeb   :  { %3518 = vmatpush3.bf16.msra.mxu0 %v3729_v6 }
 0xdec   :  { %3519 = vmatprep.subr.bf16.mxu0 %v3730_v8 }
 0xdef   :  { %3520 = vmatpush3.bf16.msra.mxu0 %v3730_v8 }
 0xeb5   :  { %v3511_v14 = vpop.f32.mrb[56].mxu0 }
 0xeb6   :  { %v4278_v16 = vadd.f32 %v3511_v14, %v2645_v13  ;;  %v2691_v17 = vpop.f32.mrb[57].mxu0 }
 0xeb7   :  { %v4280_v18 = vadd.f32 %v2691_v17, %v2643_v15  ;;  %v3512_v19 = vpop.f32.mrb[58].mxu0  ;;  %v3174_v17 = vld [vmem:[%s2973_s26] ss:$0 sm:$0xff] }
 0xeb8   :  { %v2694_v40 = vpop.f32.mrb[59].mxu0  ;;  %v2768_v24 = vmul.f32 %v4278_v16, %v4278_v16 }
 0xeb9   :  { %v4282_v23 = vadd.f32 %v2694_v40, %v2644_v20  ;;  %v2766_v45 = vmul.f32 %v4280_v18, %v4280_v18 }
 0xeba   :  { %v2770_v43 = vpack.c.bf16 %v2768_v24, %v2768_v24 }
 0xebb   :  { %v2767_v49 = vmul.f32 %v4282_v23, %v4282_v23 }
 0xebd   :  { %v2769_v53 = vpack.c.bf16 %v2767_v49, %v2766_v45 }
 0xebf   :  { %3521 = vmatprep.mubr.msk.bf16.mxu0 %vm841_vm1, %v2769_v53 }
 0xec0   :  { %3522 = vmatmul.mubr.msk.bf16.vlgmr.msra.gmra.mrb[60].mxu0 %vm841_vm1, %v2770_v43 }
 0xf93   :  { %v3523_v25 = vpop.f32.mrb[60].mxu0 }
 0xf94   :  { %v2851_v26 = vmul.f32 %v3523_v25, %v3523_v25  ;;  %v2835_v27 = vpop.f32.mrb[61].mxu0 }
 0xf95   :  { %v2849_v28 = vmul.f32 %v2835_v27, %v2835_v27  ;;  %v3524_v29 = vpop.f32.mrb[62].mxu0 }
 0xf96   :  { %v2854_v30 = vadd.f32 1e-16, %v2851_v26  ;;  %v2838_v31 = vpop.f32.mrb[63].mxu0 }
 0xf97   :  { %v2852_v33 = vadd.f32 1e-16, %v2849_v28  ;;  %v2850_v32 = vmul.f32 %v2838_v31, %v2838_v31 }
 0xf98   :  { %3791 = vrsqrt.f32 %v2854_v30  ;;  %vm2871_vm2 = vcmp.eq.f32.partialorder %v2854_v30, inf  ;;  %v2874_v50 = vand.u32 2147483648, %v2854_v30  ;;  %vm2873_vm3 = vcmp.eq.f32.partialorder %v2854_v30, 0.0 }
 0xf99   :  { %3793 = vrsqrt.f32 %v2852_v33  ;;  %v2853_v34 = vadd.f32 1e-16, %v2850_v32  ;;  %vm2857_vm5 = vcmp.eq.f32.partialorder %v2852_v33, inf  ;;  %v2860_v38 = vand.u32 2147483648, %v2852_v33 }
 0xf9a   :  { %vm2859_vm6 = vcmp.eq.f32.partialorder %v2852_v33, 0.0 }
 0xf9b   :  { %3795 = vrsqrt.f32 %v2853_v34  ;;  %vm2864_vm7 = vcmp.eq.f32.partialorder %v2853_v34, inf  ;;  %v2867_v0 = vand.u32 2147483648, %v2853_v34  ;;  %vm2866_vm8 = vcmp.eq.f32.partialorder %v2853_v34, 0.0 }
 0xfa2   :  { %v3792_v35 = vpop.eup %3791 }
 0xfa3   :  { %v3794_v36 = vpop.eup %3793  ;;  %v2870_v37 = vmul.f32 %v3792_v35, %v2854_v30 }
 0xfa4   :  { %v2856_v39 = vmul.f32 %v3794_v36, %v2852_v33 }
 0xfa5   :  { %v3796_v54 = vpop.eup %3795  ;;  %v2872_v41 = vsel %vm2871_vm2, %v2854_v30, %v2870_v37 }
 0xfa6   :  { %v2863_v48 = vmul.f32 %v3796_v54, %v2853_v34  ;;  %v2875_v42 = vsel %vm2873_vm3, %v2874_v50, %v2872_v41  ;;  %v2858_v21 = vsel %vm2857_vm5, %v2852_v33, %v2856_v39 }
 0xfa7   :  { %3797 = vrsqrt.f32 %v2875_v42  ;;  %v2861_v22 = vsel %vm2859_vm6, %v2860_v38, %v2858_v21  ;;  %vm2892_vm9 = vcmp.eq.f32.partialorder %v2875_v42, inf  ;;  %v2895_v55 = vand.u32 2147483648, %v2875_v42 }
 0xfa8   :  { %v2865_v44 = vsel %vm2864_vm7, %v2853_v34, %v2863_v48  ;;  %3799 = vrsqrt.f32 %v2861_v22  ;;  %vm2894_vm10 = vcmp.eq.f32.partialorder %v2875_v42, 0.0  ;;  %vm2878_vm11 = vcmp.eq.f32.partialorder %v2861_v22, inf }
 0xfa9   :  { %v2868_v46 = vsel %vm2866_vm8, %v2867_v0, %v2865_v44  ;;  %v2881_v60 = vand.u32 2147483648, %v2861_v22  ;;  %vm2880_vm12 = vcmp.eq.f32.partialorder %v2861_v22, 0.0 }
 0xfaa   :  { %3801 = vrsqrt.f32 %v2868_v46  ;;  %vm2885_vm13 = vcmp.eq.f32.partialorder %v2868_v46, inf  ;;  %v2888_v2 = vand.u32 2147483648, %v2868_v46  ;;  %vm2887_vm14 = vcmp.eq.f32.partialorder %v2868_v46, 0.0 }
 0xfb1   :  { %v3798_v47 = vpop.eup %3797 }
 0xfb2   :  { %v2891_v51 = vmul.f32 %v3798_v47, %v2875_v42  ;;  %v3800_v52 = vpop.eup %3799 }
 0xfb3   :  { %v2877_v57 = vmul.f32 %v3800_v52, %v2861_v22 }
 0xfb4   :  { %v2893_v56 = vsel %vm2892_vm9, %v2875_v42, %v2891_v51  ;;  %v3802_v58 = vpop.eup %3801 }
 0xfb5   :  { %v2896_v59 = vsel %vm2894_vm10, %v2895_v55, %v2893_v56  ;;  %v2879_v62 = vsel %vm2878_vm11, %v2861_v22, %v2877_v57  ;;  %v2884_v63 = vmul.f32 %v3802_v58, %v2868_v46 }
 0xfb6   :  { %v2903_v61 = vsel %vm1122_vm4, %v2896_v59, 0.0  ;;  %v2882_v1 = vsel %vm2880_vm12, %v2881_v60, %v2879_v62 }
 0xfb7   :  { %2904 = vadd.xlane.f32.xlu0 %v2903_v61  ;;  %v2897_v3 = vsel %vm1122_vm4, %v2882_v1, 0.0  ;;  %v2886_v4 = vsel %vm2885_vm13, %v2868_v46, %v2884_v63 }
 0xfb8   :  { %2898 = vadd.xlane.f32.xlu1 %v2897_v3  ;;  %v2889_v5 = vsel %vm2887_vm14, %v2888_v2, %v2886_v4 }
 0xfb9   :  { %v2900_v7 = vsel %vm1122_vm4, %v2889_v5, 0.0 }
 0xfbc   :  { %2901 = vadd.xlane.f32.xlu1 %v2900_v7 }
0x1044   :  { %v2905_v9 = vpop.xlane.xlu0 %2904 }
0x1045   :  { %v2908_v10 = vmul.f32 0.125, %v2905_v9  ;;  %v2899_v11 = vpop.xlane.xlu1 %2898 }
0x1046   :  { %v2906_v8 = vmul.f32 0.125, %v2899_v11 }
0x1047   :  { %v2911_v6 = vadd.f32 1e-06, %v2908_v10 }
0x1048   :  { %v2909_v12 = vadd.f32 1e-06, %v2906_v8 }
0x1049   :  { %3803 = vrcp.f32 %v2911_v6  ;;  %v2902_v13 = vpop.xlane.xlu1 %2901 }
0x104a   :  { %3805 = vrcp.f32 %v2909_v12  ;;  %v2907_v14 = vmul.f32 0.125, %v2902_v13 }
0x104c   :  { %v2910_v15 = vadd.f32 1e-06, %v2907_v14 }
0x104e   :  { %3807 = vrcp.f32 %v2910_v15 }
0x1053   :  { %v3804_v19 = vpop.eup %3803 }
0x1054   :  { %v2923_v20 = vmul.f32 %v3804_v19, %v3174_v17  ;;  %v3806_v40 = vpop.eup %3805 }
0x1055   :  { %v2919_v45 = vmul.f32 %v3806_v40, %v3174_v17 }
0x1056   :  { %v2926_v24 = vmul.f32 %v2923_v20, %v4278_v16 }
0x1057   :  { %v2924_v49 = vmul.f32 %v2919_v45, %v4280_v18 }
0x1058   :  { %2932 = vst.msk [vmem:[%s2976_s30 + $0x10] sm:$0xff] %vm841_vm1, %v2926_v24  ;;  %v3808_v53 = vpop.eup %3807 }
0x1059   :  { %2930 = vst.msk [vmem:[%s2976_s30] sm:$0xff] %vm841_vm1, %v2924_v49  ;;  %v2921_v43 = vmul.f32 %v3808_v53, %v3174_v17 }
0x105b   :  { %v2925_v25 = vmul.f32 %v2921_v43, %v4282_v23 }
0x105d   :  { %2931 = vst.msk [vmem:[%s2976_s30 + $0x8] sm:$0xff] %vm841_vm1, %v2925_v25 }

</bundles_post_ra>
